<compile_context>
chip_gen: v5e
topology: v5e:2x2
jax: 0.10.0
libtpu: 0.0.40
codegen_flags: <defaults>
</compile_context>

<pallas_src>
import functools

import jax
import jax.numpy as jnp
from jax.experimental import pallas as pl
from jax.experimental.pallas import tpu as pltpu

IN_DIM = 32 * 32 * 3                              # 3072
NUM_CLASSES = 10
TRUE_DIMS = [IN_DIM, 28 * 28, 128, 64, 32, NUM_CLASSES]
PAD_DIMS = [IN_DIM, 896, 128, 128, 128, 128]      # lane-aligned (x128) widths
TM_MAX = 512                                      # max batch rows per grid step


def buffer_mlp_kernel(x_ref,
                      w1_ref, b1_ref,
                      w2_ref, b2_ref,
                      w3_ref, b3_ref,
                      w4_ref, b4_ref,
                      w5_ref, b5_ref,
                      out_ref):
    def layer(h_bf16, w_ref, b_ref, relu=True):
        y = jnp.dot(h_bf16, w_ref[...], preferred_element_type=jnp.float32)
        y = y + b_ref[...]
        return jnp.maximum(y, 0.0) if relu else y

    # Cast the f32 x tile to bf16 on the VPU (cheap, hidden under the MXU) —
    # avoids a separate wrapper-side HBM pass over x.
    x_bf16 = x_ref[...].astype(jnp.bfloat16)
    # bf1 -> relu   (dominant matmul: (tm, 3072) @ (3072, 896) in bf16)
    h = layer(x_bf16, w1_ref, b1_ref)
    # sl1 -> relu
    h = layer(h.astype(jnp.bfloat16), w2_ref, b2_ref)
    # sl2 -> relu
    h = layer(h.astype(jnp.bfloat16), w3_ref, b3_ref)
    # TODO(synk): F.dropout(x, 0.5) (training-mode default) has no
    #             torch-RNG-exact Pallas equivalent; identity (eval semantics).
    # sl3 -> relu
    h = layer(h.astype(jnp.bfloat16), w4_ref, b4_ref)
    # TODO(synk): second F.dropout(x, 0.5) also identity.
    # sl4 (no relu); columns >= NUM_CLASSES have zero weights + zero bias.
    logits = layer(h.astype(jnp.bfloat16), w5_ref, b5_ref, relu=False)

    # log_softmax over the true class columns only (mask out lane padding).
    col = jax.lax.broadcasted_iota(jnp.int32, logits.shape, 1)
    valid = col < NUM_CLASSES
    masked = jnp.where(valid, logits, jnp.float32(-1e30))
    m = jnp.max(masked, axis=-1, keepdims=True)
    shifted = masked - m
    expv = jnp.where(valid, jnp.exp(shifted), 0.0)
    lse = jnp.log(jnp.sum(expv, axis=-1, keepdims=True))
    out_ref[...] = (shifted - lse).astype(out_ref.dtype)


def init_params(key):
    """torch.nn.Linear-style init (uniform +-1/sqrt(fan_in)), true shapes."""
    params = []
    for i in range(5):
        fan_in, fan_out = TRUE_DIMS[i], TRUE_DIMS[i + 1]
        key, kw, kb = jax.random.split(key, 3)
        bound = 1.0 / (fan_in ** 0.5)
        w = jax.random.uniform(kw, (fan_in, fan_out), jnp.float32, -bound, bound)
        b = jax.random.uniform(kb, (fan_out,), jnp.float32, -bound, bound)
        params.append((w, b))
    return params


def pad_params(params):
    """Zero-pad params to lane-aligned shapes; weights -> bf16, biases stay f32."""
    padded = []
    for i, (w, b) in enumerate(params):
        pin, pout = PAD_DIMS[i], PAD_DIMS[i + 1]
        wp = jnp.zeros((pin, pout), jnp.float32).at[: w.shape[0], : w.shape[1]].set(w)
        bp = jnp.zeros((1, pout), jnp.float32).at[0, : b.shape[0]].set(b)
        padded += [wp.astype(jnp.bfloat16), bp]
    return padded


def _choose_tm(batch, tm_max):
    """Balance tile sizes; aim for >= 4 grid steps when the batch allows it
    (v7x: 2 TensorCores x >= 2 steps each for megacore sharding + pipelining),
    while keeping tiles >= ~128 rows so per-step overhead stays small."""
    tiles = max(pl.cdiv(batch, tm_max), min(4, pl.cdiv(batch, 128)))
    tm = ((pl.cdiv(batch, tiles) + 7) // 8) * 8   # multiple of 8 (f32 sublane)
    # If tm >= batch, the single block spans the whole batch dim (block dim ==
    # full array dim is always a legal block shape).
    return min(tm, tm_max, batch)


@functools.partial(jax.jit, static_argnames=("tm_max",))
def buffer_mlp(x, padded_params, *, tm_max=TM_MAX):
    """x: (B, 3, 32, 32) float32 NCHW.  Returns (B, 10) log-probabilities."""
    B = x.shape[0]
    x2 = x.reshape(B, IN_DIM)            # == x.view(-1, num_features); no cast
    tm = _choose_tm(B, tm_max)
    grid = (pl.cdiv(B, tm),)             # ragged last block OK: rows independent

    x_spec = pl.BlockSpec((tm, IN_DIM), lambda i: (i, 0))
    out_spec = pl.BlockSpec((tm, PAD_DIMS[-1]), lambda i: (i, 0))
    # Constant index_maps -> weights/biases fetched once and VMEM-resident;
    # Buffered(1) drops the useless second (double-buffer) copy.
    w_specs = [
        pl.BlockSpec(p.shape, lambda i: (0, 0), pipeline_mode=pl.Buffered(1))
        for p in padded_params
    ]

    weight_bytes = sum(int(p.size) * p.dtype.itemsize for p in padded_params)
    vmem_limit = int(
        weight_bytes                       # single-buffered weights/biases
        + 2 * tm * IN_DIM * 4              # double-buffered f32 x tiles
        + 2 * tm * PAD_DIMS[-1] * 4        # double-buffered f32 out tiles
        + (20 << 20)                       # activations + compiler scratch
    )                                      # ~39 MiB at tm=512 (< v7x 64 MiB)

    out = pl.pallas_call(
        buffer_mlp_kernel,
        out_shape=jax.ShapeDtypeStruct((B, PAD_DIMS[-1]), jnp.float32),
        grid=grid,
        in_specs=[x_spec] + w_specs,
        out_specs=out_spec,
        compiler_params=pltpu.CompilerParams(
            dimension_semantics=("parallel",),
            vmem_limit_bytes=vmem_limit,
        ),
    )(x2, *padded_params)
    return out[:, :NUM_CLASSES]


def buffer_mlp_ref(x, padded_params):
    """Pure-JAX reference using the same bf16/f32 mixed precision."""
    h = x.reshape(x.shape[0], -1).astype(jnp.bfloat16)
    for i in range(4):
        w, b = padded_params[2 * i], padded_params[2 * i + 1]
        h = jnp.maximum(jnp.dot(h, w, preferred_element_type=jnp.float32) + b, 0.0)
        h = h.astype(jnp.bfloat16)
    w, b = padded_params[8], padded_params[9]
    logits = jnp.dot(h, w, preferred_element_type=jnp.float32) + b
    return jax.nn.log_softmax(logits[:, :NUM_CLASSES], axis=-1)


if __name__ == "__main__":
    key = jax.random.PRNGKey(0)
    k_x, k_p = jax.random.split(key)

    x = jax.random.normal(k_x, (2, 3, 32, 32), dtype=jnp.float32)
    params = pad_params(init_params(k_p))

    out = buffer_mlp(x, params)
    out = jax.block_until_ready(out)

    ref = buffer_mlp_ref(x, params)
    assert out.shape == (2, NUM_CLASSES), out.shape
    err = jnp.max(jnp.abs(out - ref))
    assert jnp.allclose(out, ref, atol=2e-3, rtol=2e-3), f"max abs err {err}"

    print("KERNEL_OK")
</pallas_src>

<mosaic_0001>
module attributes {stable_mosaic.version = 11 : i64} {
  func.func @buffer_mlp_kernel(%arg0: i32, %arg1: memref<2x3072xf32, #tpu.memory_space<vmem>>, %arg2: memref<3072x896xbf16, #tpu.memory_space<vmem>>, %arg3: memref<1x896xf32, #tpu.memory_space<vmem>>, %arg4: memref<896x128xbf16, #tpu.memory_space<vmem>>, %arg5: memref<1x128xf32, #tpu.memory_space<vmem>>, %arg6: memref<128x128xbf16, #tpu.memory_space<vmem>>, %arg7: memref<1x128xf32, #tpu.memory_space<vmem>>, %arg8: memref<128x128xbf16, #tpu.memory_space<vmem>>, %arg9: memref<1x128xf32, #tpu.memory_space<vmem>>, %arg10: memref<128x128xbf16, #tpu.memory_space<vmem>>, %arg11: memref<1x128xf32, #tpu.memory_space<vmem>>, %arg12: memref<2x128xf32, #tpu.memory_space<vmem>>) attributes {dimension_semantics = [#tpu.dimension_semantics<parallel>], iteration_bounds = array<i64: 1>, scalar_prefetch = 0 : i64, scratch_operands = 0 : i64, tpu.core_type = #tpu.core_type<tc>, window_params = [{transform_indices = @transform_0, window_bounds = array<i64: 2, 3072>}, {pipeline_mode = #tpu.pipeline_mode<synchronous>, transform_indices = @transform_1, window_bounds = array<i64: 3072, 896>}, {pipeline_mode = #tpu.pipeline_mode<synchronous>, transform_indices = @transform_2, window_bounds = array<i64: 1, 896>}, {pipeline_mode = #tpu.pipeline_mode<synchronous>, transform_indices = @transform_3, window_bounds = array<i64: 896, 128>}, {pipeline_mode = #tpu.pipeline_mode<synchronous>, transform_indices = @transform_4, window_bounds = array<i64: 1, 128>}, {pipeline_mode = #tpu.pipeline_mode<synchronous>, transform_indices = @transform_5, window_bounds = array<i64: 128, 128>}, {pipeline_mode = #tpu.pipeline_mode<synchronous>, transform_indices = @transform_6, window_bounds = array<i64: 1, 128>}, {pipeline_mode = #tpu.pipeline_mode<synchronous>, transform_indices = @transform_7, window_bounds = array<i64: 128, 128>}, {pipeline_mode = #tpu.pipeline_mode<synchronous>, transform_indices = @transform_8, window_bounds = array<i64: 1, 128>}, {pipeline_mode = #tpu.pipeline_mode<synchronous>, transform_indices = @transform_9, window_bounds = array<i64: 128, 128>}, {pipeline_mode = #tpu.pipeline_mode<synchronous>, transform_indices = @transform_10, window_bounds = array<i64: 1, 128>}, {transform_indices = @transform_11, window_bounds = array<i64: 2, 128>}]} {
    %c0 = arith.constant 0 : index
    %c0_0 = arith.constant 0 : index
    %0 = vector.load %arg1[%c0, %c0_0] : memref<2x3072xf32, #tpu.memory_space<vmem>>, vector<2x3072xf32>
    %1 = arith.truncf %0 : vector<2x3072xf32> to vector<2x3072xbf16>
    %c0_1 = arith.constant 0 : index
    %c0_2 = arith.constant 0 : index
    %2 = vector.load %arg2[%c0_1, %c0_2] : memref<3072x896xbf16, #tpu.memory_space<vmem>>, vector<3072x896xbf16>
    %cst = arith.constant dense<0.000000e+00> : vector<2x896xf32>
    %3 = tpu.matmul %1, %2, %cst {dimension_numbers = #tpu.dot_dimension_numbers<[1], [0], [0], [1], [0, 0, 1, 1], [], []>} : vector<2x3072xbf16>, vector<3072x896xbf16>, vector<2x896xf32> -> vector<2x896xf32>
    %c0_3 = arith.constant 0 : index
    %c0_4 = arith.constant 0 : index
    %4 = vector.load %arg3[%c0_3, %c0_4] : memref<1x896xf32, #tpu.memory_space<vmem>>, vector<1x896xf32>
    %5 = vector.broadcast %4 : vector<1x896xf32> to vector<2x896xf32>
    %6 = arith.addf %3, %5 : vector<2x896xf32>
    %cst_5 = arith.constant 0.000000e+00 : f32
    %7 = vector.broadcast %cst_5 : f32 to vector<2x896xf32>
    %8 = arith.maximumf %6, %7 : vector<2x896xf32>
    %9 = arith.truncf %8 : vector<2x896xf32> to vector<2x896xbf16>
    %c0_6 = arith.constant 0 : index
    %c0_7 = arith.constant 0 : index
    %10 = vector.load %arg4[%c0_6, %c0_7] : memref<896x128xbf16, #tpu.memory_space<vmem>>, vector<896x128xbf16>
    %cst_8 = arith.constant dense<0.000000e+00> : vector<2x128xf32>
    %11 = tpu.matmul %9, %10, %cst_8 {dimension_numbers = #tpu.dot_dimension_numbers<[1], [0], [0], [1], [0, 0, 1, 1], [], []>} : vector<2x896xbf16>, vector<896x128xbf16>, vector<2x128xf32> -> vector<2x128xf32>
    %c0_9 = arith.constant 0 : index
    %c0_10 = arith.constant 0 : index
    %12 = vector.load %arg5[%c0_9, %c0_10] : memref<1x128xf32, #tpu.memory_space<vmem>>, vector<1x128xf32>
    %13 = vector.broadcast %12 : vector<1x128xf32> to vector<2x128xf32>
    %14 = arith.addf %11, %13 : vector<2x128xf32>
    %cst_11 = arith.constant 0.000000e+00 : f32
    %15 = vector.broadcast %cst_11 : f32 to vector<2x128xf32>
    %16 = arith.maximumf %14, %15 : vector<2x128xf32>
    %17 = arith.truncf %16 : vector<2x128xf32> to vector<2x128xbf16>
    %c0_12 = arith.constant 0 : index
    %c0_13 = arith.constant 0 : index
    %18 = vector.load %arg6[%c0_12, %c0_13] : memref<128x128xbf16, #tpu.memory_space<vmem>>, vector<128x128xbf16>
    %cst_14 = arith.constant dense<0.000000e+00> : vector<2x128xf32>
    %19 = tpu.matmul %17, %18, %cst_14 {dimension_numbers = #tpu.dot_dimension_numbers<[1], [0], [0], [1], [0, 0, 1, 1], [], []>} : vector<2x128xbf16>, vector<128x128xbf16>, vector<2x128xf32> -> vector<2x128xf32>
    %c0_15 = arith.constant 0 : index
    %c0_16 = arith.constant 0 : index
    %20 = vector.load %arg7[%c0_15, %c0_16] : memref<1x128xf32, #tpu.memory_space<vmem>>, vector<1x128xf32>
    %21 = vector.broadcast %20 : vector<1x128xf32> to vector<2x128xf32>
    %22 = arith.addf %19, %21 : vector<2x128xf32>
    %cst_17 = arith.constant 0.000000e+00 : f32
    %23 = vector.broadcast %cst_17 : f32 to vector<2x128xf32>
    %24 = arith.maximumf %22, %23 : vector<2x128xf32>
    %25 = arith.truncf %24 : vector<2x128xf32> to vector<2x128xbf16>
    %c0_18 = arith.constant 0 : index
    %c0_19 = arith.constant 0 : index
    %26 = vector.load %arg8[%c0_18, %c0_19] : memref<128x128xbf16, #tpu.memory_space<vmem>>, vector<128x128xbf16>
    %cst_20 = arith.constant dense<0.000000e+00> : vector<2x128xf32>
    %27 = tpu.matmul %25, %26, %cst_20 {dimension_numbers = #tpu.dot_dimension_numbers<[1], [0], [0], [1], [0, 0, 1, 1], [], []>} : vector<2x128xbf16>, vector<128x128xbf16>, vector<2x128xf32> -> vector<2x128xf32>
    %c0_21 = arith.constant 0 : index
    %c0_22 = arith.constant 0 : index
    %28 = vector.load %arg9[%c0_21, %c0_22] : memref<1x128xf32, #tpu.memory_space<vmem>>, vector<1x128xf32>
    %29 = vector.broadcast %28 : vector<1x128xf32> to vector<2x128xf32>
    %30 = arith.addf %27, %29 : vector<2x128xf32>
    %cst_23 = arith.constant 0.000000e+00 : f32
    %31 = vector.broadcast %cst_23 : f32 to vector<2x128xf32>
    %32 = arith.maximumf %30, %31 : vector<2x128xf32>
    %33 = arith.truncf %32 : vector<2x128xf32> to vector<2x128xbf16>
    %c0_24 = arith.constant 0 : index
    %c0_25 = arith.constant 0 : index
    %34 = vector.load %arg10[%c0_24, %c0_25] : memref<128x128xbf16, #tpu.memory_space<vmem>>, vector<128x128xbf16>
    %cst_26 = arith.constant dense<0.000000e+00> : vector<2x128xf32>
    %35 = tpu.matmul %33, %34, %cst_26 {dimension_numbers = #tpu.dot_dimension_numbers<[1], [0], [0], [1], [0, 0, 1, 1], [], []>} : vector<2x128xbf16>, vector<128x128xbf16>, vector<2x128xf32> -> vector<2x128xf32>
    %c0_27 = arith.constant 0 : index
    %c0_28 = arith.constant 0 : index
    %36 = vector.load %arg11[%c0_27, %c0_28] : memref<1x128xf32, #tpu.memory_space<vmem>>, vector<1x128xf32>
    %37 = vector.broadcast %36 : vector<1x128xf32> to vector<2x128xf32>
    %38 = arith.addf %35, %37 : vector<2x128xf32>
    %39 = tpu.iota {dimensions = array<i32: 1>} : vector<2x128xi32>
    %c10_i32 = arith.constant 10 : i32
    %40 = vector.broadcast %c10_i32 : i32 to vector<2x128xi32>
    %41 = arith.cmpi slt, %39, %40 : vector<2x128xi32>
    %cst_29 = arith.constant -1.000000e+30 : f32
    %42 = vector.broadcast %cst_29 : f32 to vector<2x128xf32>
    %43 = arith.select %41, %38, %42 : vector<2x128xi1>, vector<2x128xf32>
    %cst_30 = arith.constant dense<0xFF800000> : vector<2xf32>
    %44 = vector.multi_reduction <maximumf>, %43, %cst_30 [1] : vector<2x128xf32> to vector<2xf32>
    %45 = vector.shape_cast %44 : vector<2xf32> to vector<2x1xf32>
    %46 = vector.broadcast %45 : vector<2x1xf32> to vector<2x128xf32>
    %47 = arith.subf %43, %46 : vector<2x128xf32>
    %48 = math.exp %47 : vector<2x128xf32>
    %cst_31 = arith.constant 0.000000e+00 : f32
    %49 = vector.broadcast %cst_31 : f32 to vector<2x128xf32>
    %50 = arith.select %41, %48, %49 : vector<2x128xi1>, vector<2x128xf32>
    %cst_32 = arith.constant dense<0.000000e+00> : vector<2xf32>
    %51 = vector.multi_reduction <add>, %50, %cst_32 [1] : vector<2x128xf32> to vector<2xf32>
    %52 = vector.shape_cast %51 : vector<2xf32> to vector<2x1xf32>
    %53 = math.log %52 : vector<2x1xf32>
    %54 = vector.broadcast %53 : vector<2x1xf32> to vector<2x128xf32>
    %55 = arith.subf %47, %54 : vector<2x128xf32>
    %c0_33 = arith.constant 0 : index
    %c0_34 = arith.constant 0 : index
    %56 = vector.load %arg12[%c0_33, %c0_34] : memref<2x128xf32, #tpu.memory_space<vmem>>, vector<2x128xf32>
    tpu.vector_store %arg12[%c0_33, %c0_34], %55 {strides = array<i32>} : memref<2x128xf32, #tpu.memory_space<vmem>>, vector<2x128xf32>,
    return
  }
  func.func @transform_0(%arg0: i32) -> (i32, i32) {
    %c0_i32 = arith.constant 0 : i32
    %c0_i32_0 = arith.constant 0 : i32
    return %arg0, %c0_i32 : i32, i32
  }
  func.func @transform_1(%arg0: i32) -> (i32, i32) {
    %c0_i32 = arith.constant 0 : i32
    %c0_i32_0 = arith.constant 0 : i32
    %c0_i32_1 = arith.constant 0 : i32
    return %c0_i32, %c0_i32_0 : i32, i32
  }
  func.func @transform_2(%arg0: i32) -> (i32, i32) {
    %c0_i32 = arith.constant 0 : i32
    %c0_i32_0 = arith.constant 0 : i32
    %c0_i32_1 = arith.constant 0 : i32
    return %c0_i32, %c0_i32_0 : i32, i32
  }
  func.func @transform_3(%arg0: i32) -> (i32, i32) {
    %c0_i32 = arith.constant 0 : i32
    %c0_i32_0 = arith.constant 0 : i32
    %c0_i32_1 = arith.constant 0 : i32
    return %c0_i32, %c0_i32_0 : i32, i32
  }
  func.func @transform_4(%arg0: i32) -> (i32, i32) {
    %c0_i32 = arith.constant 0 : i32
    %c0_i32_0 = arith.constant 0 : i32
    %c0_i32_1 = arith.constant 0 : i32
    return %c0_i32, %c0_i32_0 : i32, i32
  }
  func.func @transform_5(%arg0: i32) -> (i32, i32) {
    %c0_i32 = arith.constant 0 : i32
    %c0_i32_0 = arith.constant 0 : i32
    %c0_i32_1 = arith.constant 0 : i32
    return %c0_i32, %c0_i32_0 : i32, i32
  }
  func.func @transform_6(%arg0: i32) -> (i32, i32) {
    %c0_i32 = arith.constant 0 : i32
    %c0_i32_0 = arith.constant 0 : i32
    %c0_i32_1 = arith.constant 0 : i32
    return %c0_i32, %c0_i32_0 : i32, i32
  }
  func.func @transform_7(%arg0: i32) -> (i32, i32) {
    %c0_i32 = arith.constant 0 : i32
    %c0_i32_0 = arith.constant 0 : i32
    %c0_i32_1 = arith.constant 0 : i32
    return %c0_i32, %c0_i32_0 : i32, i32
  }
  func.func @transform_8(%arg0: i32) -> (i32, i32) {
    %c0_i32 = arith.constant 0 : i32
    %c0_i32_0 = arith.constant 0 : i32
    %c0_i32_1 = arith.constant 0 : i32
    return %c0_i32, %c0_i32_0 : i32, i32
  }
  func.func @transform_9(%arg0: i32) -> (i32, i32) {
    %c0_i32 = arith.constant 0 : i32
    %c0_i32_0 = arith.constant 0 : i32
    %c0_i32_1 = arith.constant 0 : i32
    return %c0_i32, %c0_i32_0 : i32, i32
  }
  func.func @transform_10(%arg0: i32) -> (i32, i32) {
    %c0_i32 = arith.constant 0 : i32
    %c0_i32_0 = arith.constant 0 : i32
    %c0_i32_1 = arith.constant 0 : i32
    return %c0_i32, %c0_i32_0 : i32, i32
  }
  func.func @transform_11(%arg0: i32) -> (i32, i32) {
    %c0_i32 = arith.constant 0 : i32
    %c0_i32_0 = arith.constant 0 : i32
    return %arg0, %c0_i32 : i32, i32
  }
}

</mosaic_0001>

<bundles_post_ra>
// kernel: buffer_mlp.1
= control target key start
LH: loop header
LB: loop body
LE: loop exit
PB: predicated region body
PF: predicated region fallthrough
CT: control target
= control target key end

     0   :  { %16 = vsyncpa [#allocation3], 0  ;;  %s19680_s0 = inlined_call_operand.vmem [shape: f32[2,3072], index: 0, kind: input, shape index: {}]   ;;  %s19681_s1 = inlined_call_operand.hbm [shape: bf16[3072,896], index: 1, kind: input, shape index: {}]   ;;  %s19682_s2 = inlined_call_operand.hbm [shape: f32[1,896], index: 2, kind: input, shape index: {}]   ;;  %s19683_s3 = inlined_call_operand.hbm [shape: bf16[896,128], index: 3, kind: input, shape index: {}]   ;;  %s19684_s4 = inlined_call_operand.hbm [shape: f32[1,128], index: 4, kind: input, shape index: {}]   ;;  %s19685_s5 = inlined_call_operand.hbm [shape: bf16[128,128], index: 5, kind: input, shape index: {}]   ;;  %s19686_s6 = inlined_call_operand.hbm [shape: f32[1,128], index: 6, kind: input, shape index: {}]   ;;  %s19687_s7 = inlined_call_operand.hbm [shape: bf16[128,128], index: 7, kind: input, shape index: {}]   ;;  %s19688_s8 = inlined_call_operand.hbm [shape: f32[1,128], index: 8, kind: input, shape index: {}]   ;;  %s19689_s9 = inlined_call_operand.hbm [shape: bf16[128,128], index: 9, kind: input, shape index: {}]   ;;  %s19690_s10 = inlined_call_operand.hbm [shape: f32[1,128], index: 10, kind: input, shape index: {}]   ;;  %s19691_s11 = inlined_call_operand.hbm [shape: f32[2,128], index: 11, kind: output, shape index: {}]  }
   0x1   :  { %17 = vsyncpa [#allocation6], 0 }
   0x2   :  { %18 = vsyncpa [#allocation9], 0 }
   0x3   :  { %19 = vsyncpa [#allocation12], 0 }
   0x4   :  { %20 = vsyncpa [#allocation15], 0 }
   0x5   :  { %21 = vsyncpa [#allocation18], 0  ;;  %s43_s19 = sshll.u32 %s19682_s2, 4  ;;  %s44_s19 = int_to_ptr.hbm [resolvable:$true] %s43_s19 }
   0x6   :  { %22 = vsyncpa [#allocation4], 0  ;;  %s19198_s20 = smov [#allocation5]   ;;  %s67_s24 = sshll.u32 %s19684_s4, 4  ;;  %s68_s24 = int_to_ptr.hbm [resolvable:$true] %s67_s24 }
   0x7   :  { %s45_s21 = sshll.u32 %s19198_s20, 4  ;;  %s19199_s25 = smov [#allocation8]   ;;  %s46_s21 = int_to_ptr.vmem [resolvable:$true] %s45_s21 }
   0x8   :  { %48 = dma.hbm_to_vmem [thread:$0]  %s44_s19, 112, %s46_s21, [#allocation6]  }
   0x9   :  { %s69_s26 = sshll.u32 %s19199_s25, 4  ;;  %s91_s29 = sshll.u32 %s19686_s6, 4  ;;  %s70_s26 = int_to_ptr.vmem [resolvable:$true] %s69_s26  ;;  %s92_s29 = int_to_ptr.hbm [resolvable:$true] %s91_s29 }
   0xa   :  { %72 = dma.hbm_to_vmem [thread:$0]  %s68_s24, 16, %s70_s26, [#allocation9]  }
   0xb   :  { %s115_s12 = sshll.u32 %s19688_s8, 4  ;;  %s19200_s13 = smov [#allocation11]   ;;  %s116_s12 = int_to_ptr.hbm [resolvable:$true] %s115_s12 }
   0xc   :  { %s93_s14 = sshll.u32 %s19200_s13, 4  ;;  %s19201_s4 = smov [#allocation14]   ;;  %s94_s14 = int_to_ptr.vmem [resolvable:$true] %s93_s14 }
   0xd   :  { %96 = dma.hbm_to_vmem [thread:$0]  %s92_s29, 16, %s94_s14, [#allocation12]  }
   0xe   :  { %s117_s15 = sshll.u32 %s19201_s4, 4  ;;  %s29_s18 = sshll.u32 %s19681_s1, 4  ;;  %s118_s15 = int_to_ptr.vmem [resolvable:$true] %s117_s15  ;;  %s30_s18 = int_to_ptr.hbm [resolvable:$true] %s29_s18 }
   0xf   :  { %120 = dma.hbm_to_vmem [thread:$0]  %s116_s12, 16, %s118_s15, [#allocation15]  }
  0x10   :  { %s19202_s6 = smov [#allocation2]   ;;  %s53_s8 = sshll.u32 %s19683_s3, 4  ;;  %s54_s8 = int_to_ptr.hbm [resolvable:$true] %s53_s8 }
  0x11   :  { %s31_s19 = sshll.u32 %s19202_s6, 4  ;;  %s19203_s22 = smov 448   ;;  %s32_s19 = int_to_ptr.vmem [resolvable:$true] %s31_s19 }
  0x12   :  { %s19204_s23 = smov 28   ;;  %s19205_s24 = smov [#allocation7]  }
  0x13   :  { %37 = dma.hbm_to_vmem [thread:$0]  %s30_s18, 172032, %s32_s19, [#allocation3], %s19203_s22, %s19203_s22, %s19204_s23  }
  0x14   :  { %s55_s25 = sshll.u32 %s19205_s24, 4  ;;  %s19206_s26 = smov 64   ;;  %s56_s25 = int_to_ptr.vmem [resolvable:$true] %s55_s25 }
  0x15   :  { %s19207_s27 = smov 4   ;;  %s77_s29 = sshll.u32 %s19685_s5, 4  ;;  %s78_s29 = int_to_ptr.hbm [resolvable:$true] %s77_s29 }
  0x16   :  { %61 = dma.hbm_to_vmem [thread:$0]  %s54_s8, 7168, %s56_s25, [#allocation6], %s19206_s26, %s19206_s26, %s19207_s27  }
  0x17   :  { %s19208_s2 = smov [#allocation10]   ;;  %s101_s13 = sshll.u32 %s19687_s7, 4  ;;  %s102_s13 = int_to_ptr.hbm [resolvable:$true] %s101_s13 }
  0x18   :  { %s79_s30 = sshll.u32 %s19208_s2, 4  ;;  %s19209_s14 = smov [#allocation13]   ;;  %s80_s30 = int_to_ptr.vmem [resolvable:$true] %s79_s30 }
  0x19   :  { %85 = dma.hbm_to_vmem [thread:$0]  %s78_s29, 1024, %s80_s30, [#allocation9], %s19206_s26, %s19206_s26, %s19207_s27  }
  0x1a   :  { %s103_s4 = sshll.u32 %s19209_s14, 4  ;;  %s125_s17 = sshll.u32 %s19689_s9, 4  ;;  %s104_s4 = int_to_ptr.vmem [resolvable:$true] %s103_s4  ;;  %s126_s17 = int_to_ptr.hbm [resolvable:$true] %s125_s17 }
  0x1b   :  { %109 = dma.hbm_to_vmem [thread:$0]  %s102_s13, 1024, %s104_s4, [#allocation12], %s19206_s26, %s19206_s26, %s19207_s27  }
  0x1c   :  { %s139_s6 = sshll.u32 %s19690_s10, 4  ;;  %s19210_s19 = smov [#allocation16]   ;;  %s140_s6 = int_to_ptr.hbm [resolvable:$true] %s139_s6 }
  0x1d   :  { %s127_s20 = sshll.u32 %s19210_s19, 4  ;;  %s19211_s7 = smov [#allocation17]   ;;  %s128_s20 = int_to_ptr.vmem [resolvable:$true] %s127_s20 }
  0x1e   :  { %133 = dma.hbm_to_vmem [thread:$0]  %s126_s17, 1024, %s128_s20, [#allocation15], %s19206_s26, %s19206_s26, %s19207_s27  }
  0x1f   :  { %s141_s21 = sshll.u32 %s19211_s7, 4  ;;  %s142_s21 = int_to_ptr.vmem [resolvable:$true] %s141_s21 }
  0x20   :  { %144 = dma.hbm_to_vmem [thread:$0]  %s140_s6, 16, %s142_s21, [#allocation18]  }
  0x21   :  { %19184 = dma.done.wait [#allocation3], 172032  }
  0x22   :  { %19185 = vsyncadd [#allocation3], 4294795264 }
  0x23   :  { %19186 = dma.done.wait [#allocation6], 7280  }
  0x24   :  { %19187 = vsyncadd [#allocation6], 4294960016 }
  0x25   :  { %19188 = dma.done.wait [#allocation9], 1040  }
  0x26   :  { %19189 = vsyncadd [#allocation9], 4294966256 }
  0x27   :  { %19190 = dma.done.wait [#allocation12], 1040  }
  0x28   :  { %19191 = vsyncadd [#allocation12], 4294966256 }
  0x29   :  { %19192 = dma.done.wait [#allocation15], 1040  }
  0x2a   :  { %19193 = vsyncadd [#allocation15], 4294966256 }
  0x2b   :  { %19194 = dma.done.wait [#allocation18], 16  }
  0x2c   :  { %19195 = vsyncadd [#allocation18], 4294967280  ;;  %v11969_v0 = vld [vmem:[#allocation2 + $0x188] sm:$0xf]  ;;  %v17519_v1 = vld [vmem:[#allocation2 + $0x1a0] sm:$0xf0] }
  0x2d   :  { %v12193_v2 = vld [vmem:[#allocation2 + $0x348] sm:$0xf]  ;;  %v11970_v3 = vor.u32 %v17519_v1, %v11969_v0  ;;  %v17575_v4 = vld [vmem:[#allocation2 + $0x360] sm:$0xf0]  ;;  %v11941_v11 = vld [vmem:[#allocation2 + $0x150] sm:$0xf] }
  0x2e   :  { %v12417_v5 = vld [vmem:[#allocation2 + $0x508] sm:$0xf]  ;;  %v17631_v6 = vld [vmem:[#allocation2 + $0x520] sm:$0xf0]  ;;  %v12194_v7 = vor.u32 %v17575_v4, %v12193_v2  ;;  %v17512_v13 = vld [vmem:[#allocation2 + $0x168] sm:$0xf0] }
  0x2f   :  { %v12418_v8 = vor.u32 %v17631_v6, %v12417_v5  ;;  %v12641_v9 = vld [vmem:[#allocation2 + $0x6c8] sm:$0xf]  ;;  %v17687_v10 = vld [vmem:[#allocation2 + $0x6e0] sm:$0xf0]  ;;  %8740 = vmatpush.bf16.msra.mxu0 %v11970_v3  ;;  %v12165_v14 = vld [vmem:[#allocation2 + $0x310] sm:$0xf]  ;;  %v11942_v16 = vor.u32 %v17512_v13, %v11941_v11 }
  0x30   :  { %v12642_v12 = vor.u32 %v17687_v10, %v12641_v9  ;;  %v17568_v15 = vld [vmem:[#allocation2 + $0x328] sm:$0xf0]  ;;  %8753 = vmatpush.bf16.msra.mxu1 %v12194_v7  ;;  %v12389_v18 = vld [vmem:[#allocation2 + $0x4d0] sm:$0xf]  ;;  %v11913_v23 = vld [vmem:[#allocation2 + $0x118] sm:$0xf] }
  0x31   :  { %8766 = vmatpush.bf16.msra.mxu2 %v12418_v8  ;;  %v12166_v17 = vor.u32 %v17568_v15, %v12165_v14  ;;  %v17624_v19 = vld [vmem:[#allocation2 + $0x4e8] sm:$0xf0]  ;;  %v12613_v20 = vld [vmem:[#allocation2 + $0x690] sm:$0xf]  ;;  %v17505_v24 = vld [vmem:[#allocation2 + $0x130] sm:$0xf0] }
  0x32   :  { %8779 = vmatpush.bf16.msra.mxu3 %v12642_v12  ;;  %v12390_v21 = vor.u32 %v17624_v19, %v12389_v18  ;;  %v17680_v22 = vld [vmem:[#allocation2 + $0x6a8] sm:$0xf0]  ;;  %v12137_v26 = vld [vmem:[#allocation2 + $0x2d8] sm:$0xf]  ;;  %v17561_v27 = vld [vmem:[#allocation2 + $0x2f0] sm:$0xf0]  ;;  %v11914_v29 = vor.u32 %v17505_v24, %v11913_v23 }
  0x33   :  { %v12614_v25 = vor.u32 %v17680_v22, %v12613_v20  ;;  %v12361_v28 = vld [vmem:[#allocation2 + $0x498] sm:$0xf]  ;;  %8741 = vmatpush.bf16.msra.mxu0 %v11942_v16  ;;  %v17617_v30 = vld [vmem:[#allocation2 + $0x4b0] sm:$0xf0]  ;;  %v12138_v33 = vor.u32 %v17561_v27, %v12137_v26  ;;  %v11885_v35 = vld [vmem:[#allocation2 + $0xe0] sm:$0xf] }
  0x34   :  { %v12585_v31 = vld [vmem:[#allocation2 + $0x658] sm:$0xf]  ;;  %v17673_v32 = vld [vmem:[#allocation2 + $0x670] sm:$0xf0]  ;;  %8754 = vmatpush.bf16.msra.mxu1 %v12166_v17  ;;  %v12362_v34 = vor.u32 %v17617_v30, %v12361_v28  ;;  %v17498_v36 = vld [vmem:[#allocation2 + $0xf8] sm:$0xf0] }
  0x35   :  { %8767 = vmatpush.bf16.msra.mxu2 %v12390_v21  ;;  %v12109_v37 = vld [vmem:[#allocation2 + $0x2a0] sm:$0xf]  ;;  %v12586_v38 = vor.u32 %v17673_v32, %v12585_v31  ;;  %v17554_v39 = vld [vmem:[#allocation2 + $0x2b8] sm:$0xf0]  ;;  %v11886_v44 = vor.u32 %v17498_v36, %v11885_v35  ;;  %v11857_v47 = vld [vmem:[#allocation2 + $0xa8] sm:$0xf] }
  0x36   :  { %8780 = vmatpush.bf16.msra.mxu3 %v12614_v25  ;;  %v12333_v40 = vld [vmem:[#allocation2 + $0x460] sm:$0xf]  ;;  %v17610_v41 = vld [vmem:[#allocation2 + $0x478] sm:$0xf0]  ;;  %v12110_v45 = vor.u32 %v17554_v39, %v12109_v37  ;;  %v17491_v48 = vld [vmem:[#allocation2 + $0xc0] sm:$0xf0] }
  0x37   :  { %v12557_v42 = vld [vmem:[#allocation2 + $0x620] sm:$0xf]  ;;  %v17666_v43 = vld [vmem:[#allocation2 + $0x638] sm:$0xf0]  ;;  %8742 = vmatpush.bf16.msra.mxu0 %v11914_v29  ;;  %v12334_v46 = vor.u32 %v17610_v41, %v12333_v40  ;;  %v12081_v49 = vld [vmem:[#allocation2 + $0x268] sm:$0xf]  ;;  %v11858_v56 = vor.u32 %v17491_v48, %v11857_v47 }
  0x38   :  { %8755 = vmatpush.bf16.msra.mxu1 %v12138_v33  ;;  %v12558_v50 = vor.u32 %v17666_v43, %v12557_v42  ;;  %v17547_v51 = vld [vmem:[#allocation2 + $0x280] sm:$0xf0]  ;;  %v12305_v52 = vld [vmem:[#allocation2 + $0x428] sm:$0xf]  ;;  %v11829_v59 = vld [vmem:[#allocation2 + $0x70] sm:$0xf] }
  0x39   :  { %8768 = vmatpush.bf16.msra.mxu2 %v12362_v34  ;;  %v17603_v53 = vld [vmem:[#allocation2 + $0x440] sm:$0xf0]  ;;  %v12529_v54 = vld [vmem:[#allocation2 + $0x5e8] sm:$0xf]  ;;  %v12082_v57 = vor.u32 %v17547_v51, %v12081_v49  ;;  %v17484_v60 = vld [vmem:[#allocation2 + $0x88] sm:$0xf0] }
  0x3a   :  { %8781 = vmatpush.bf16.msra.mxu3 %v12586_v38  ;;  %v17659_v55 = vld [vmem:[#allocation2 + $0x600] sm:$0xf0]  ;;  %v12306_v58 = vor.u32 %v17603_v53, %v12305_v52  ;;  %v12053_v61 = vld [vmem:[#allocation2 + $0x230] sm:$0xf]  ;;  %v17540_v63 = vld [vmem:[#allocation2 + $0x248] sm:$0xf0]  ;;  %v11830_v4 = vor.u32 %v17484_v60, %v11829_v59 }
  0x3b   :  { %8743 = vmatpush.bf16.msra.mxu0 %v11886_v44  ;;  %v12530_v62 = vor.u32 %v17659_v55, %v12529_v54  ;;  %v12277_v0 = vld [vmem:[#allocation2 + $0x3f0] sm:$0xf]  ;;  %v17596_v1 = vld [vmem:[#allocation2 + $0x408] sm:$0xf0]  ;;  %v12054_v5 = vor.u32 %v17540_v63, %v12053_v61  ;;  %v11801_v7 = vld [vmem:[#allocation2 + $0x38] sm:$0xf] }
  0x3c   :  { %8756 = vmatpush.bf16.msra.mxu1 %v12110_v45  ;;  %v12501_v2 = vld [vmem:[#allocation2 + $0x5b0] sm:$0xf]  ;;  %v17652_v3 = vld [vmem:[#allocation2 + $0x5c8] sm:$0xf0]  ;;  %v12278_v6 = vor.u32 %v17596_v1, %v12277_v0  ;;  %v17477_v8 = vld [vmem:[#allocation2 + $0x50] sm:$0xf0] }
  0x3d   :  { %8769 = vmatpush.bf16.msra.mxu2 %v12334_v46  ;;  %v12025_v9 = vld [vmem:[#allocation2 + $0x1f8] sm:$0xf]  ;;  %v12502_v10 = vor.u32 %v17652_v3, %v12501_v2  ;;  %v17533_v11 = vld [vmem:[#allocation2 + $0x210] sm:$0xf0]  ;;  %v11802_v16 = vor.u32 %v17477_v8, %v11801_v7  ;;  %v11773_v17 = vld [vmem:[#allocation2] sm:$0xf] }
  0x3e   :  { %8782 = vmatpush.bf16.msra.mxu3 %v12558_v50  ;;  %v12249_v12 = vld [vmem:[#allocation2 + $0x3b8] sm:$0xf]  ;;  %v17589_v13 = vld [vmem:[#allocation2 + $0x3d0] sm:$0xf0]  ;;  %v17470_v18 = vld [vmem:[#allocation2 + $0x18] sm:$0xf0]  ;;  %v12026_v19 = vor.u32 %v17533_v11, %v12025_v9 }
  0x3f   :  { %8744 = vmatpush.bf16.msra.mxu0 %v11858_v56  ;;  %v12473_v14 = vld [vmem:[#allocation2 + $0x578] sm:$0xf]  ;;  %v17645_v15 = vld [vmem:[#allocation2 + $0x590] sm:$0xf0]  ;;  %v12250_v20 = vor.u32 %v17589_v13, %v12249_v12  ;;  %v11997_v21 = vld [vmem:[#allocation2 + $0x1c0] sm:$0xf]  ;;  %v11774_v31 = vor.u32 %v17470_v18, %v11773_v17 }
  0x40   :  { %8757 = vmatpush.bf16.msra.mxu1 %v12082_v57  ;;  %v17526_v22 = vld [vmem:[#allocation2 + $0x1d8] sm:$0xf0]  ;;  %v12221_v23 = vld [vmem:[#allocation2 + $0x380] sm:$0xf]  ;;  %v12474_v24 = vor.u32 %v17645_v15, %v12473_v14  ;;  %v12865_v28 = vld [vmem:[#allocation2 + $0x888] sm:$0xf] }
  0x41   :  { %8770 = vmatpush.bf16.msra.mxu2 %v12306_v58  ;;  %v17582_v25 = vld [vmem:[#allocation2 + $0x398] sm:$0xf0]  ;;  %v12445_v26 = vld [vmem:[#allocation2 + $0x540] sm:$0xf]  ;;  %v17743_v29 = vld [vmem:[#allocation2 + $0x8a0] sm:$0xf0]  ;;  %v11998_v35 = vor.u32 %v17526_v22, %v11997_v21 }
  0x42   :  { %8783 = vmatpush.bf16.msra.mxu3 %v12530_v62  ;;  %v17638_v27 = vld [vmem:[#allocation2 + $0x558] sm:$0xf0]  ;;  %v13089_v30 = vld [vmem:[#allocation2 + $0xa48] sm:$0xf]  ;;  %v17799_v32 = vld [vmem:[#allocation2 + $0xa60] sm:$0xf0]  ;;  %v12222_v36 = vor.u32 %v17582_v25, %v12221_v23  ;;  %v12866_v40 = vor.u32 %v17743_v29, %v12865_v28 }
  0x43   :  { %8745 = vmatpush.bf16.msra.mxu0 %v11830_v4  ;;  %v13313_v33 = vld [vmem:[#allocation2 + $0xc08] sm:$0xf]  ;;  %v17855_v34 = vld [vmem:[#allocation2 + $0xc20] sm:$0xf0]  ;;  %v12446_v39 = vor.u32 %v17638_v27, %v12445_v26  ;;  %v13090_v41 = vor.u32 %v17799_v32, %v13089_v30  ;;  %v12837_v43 = vld [vmem:[#allocation2 + $0x850] sm:$0xf] }
  0x44   :  { %8758 = vmatpush.bf16.msra.mxu1 %v12054_v5  ;;  %v13537_v37 = vld [vmem:[#allocation2 + $0xdc8] sm:$0xf]  ;;  %v17911_v38 = vld [vmem:[#allocation2 + $0xde0] sm:$0xf0]  ;;  %v13314_v42 = vor.u32 %v17855_v34, %v13313_v33  ;;  %v17736_v44 = vld [vmem:[#allocation2 + $0x868] sm:$0xf0] }
  0x45   :  { %8771 = vmatpush.bf16.msra.mxu2 %v12278_v6  ;;  %v13061_v45 = vld [vmem:[#allocation2 + $0xa10] sm:$0xf]  ;;  %v13538_v46 = vor.u32 %v17911_v38, %v13537_v37  ;;  %v17792_v47 = vld [vmem:[#allocation2 + $0xa28] sm:$0xf0]  ;;  %v12838_v52 = vor.u32 %v17736_v44, %v12837_v43  ;;  %v12809_v55 = vld [vmem:[#allocation2 + $0x818] sm:$0xf] }
  0x46   :  { %8784 = vmatpush.bf16.msra.mxu3 %v12502_v10  ;;  %v13285_v48 = vld [vmem:[#allocation2 + $0xbd0] sm:$0xf]  ;;  %v17848_v49 = vld [vmem:[#allocation2 + $0xbe8] sm:$0xf0]  ;;  %v13062_v53 = vor.u32 %v17792_v47, %v13061_v45  ;;  %v17729_v56 = vld [vmem:[#allocation2 + $0x830] sm:$0xf0] }
  0x47   :  { %8746 = vmatpush.bf16.msra.mxu0 %v11802_v16  ;;  %v13509_v50 = vld [vmem:[#allocation2 + $0xd90] sm:$0xf]  ;;  %v17904_v51 = vld [vmem:[#allocation2 + $0xda8] sm:$0xf0]  ;;  %v13286_v54 = vor.u32 %v17848_v49, %v13285_v48  ;;  %v13033_v57 = vld [vmem:[#allocation2 + $0x9d8] sm:$0xf]  ;;  %v12810_v0 = vor.u32 %v17729_v56, %v12809_v55 }
  0x48   :  { %8759 = vmatpush.bf16.msra.mxu1 %v12026_v19  ;;  %v13510_v58 = vor.u32 %v17904_v51, %v13509_v50  ;;  %v17785_v59 = vld [vmem:[#allocation2 + $0x9f0] sm:$0xf0]  ;;  %v13257_v60 = vld [vmem:[#allocation2 + $0xb98] sm:$0xf]  ;;  %v12781_v1 = vld [vmem:[#allocation2 + $0x7e0] sm:$0xf] }
  0x49   :  { %8772 = vmatpush.bf16.msra.mxu2 %v12250_v20  ;;  %v17841_v61 = vld [vmem:[#allocation2 + $0xbb0] sm:$0xf0]  ;;  %v13481_v62 = vld [vmem:[#allocation2 + $0xd58] sm:$0xf]  ;;  %v13034_v3 = vor.u32 %v17785_v59, %v13033_v57  ;;  %v17722_v5 = vld [vmem:[#allocation2 + $0x7f8] sm:$0xf0] }
  0x4a   :  { %8785 = vmatpush.bf16.msra.mxu3 %v12474_v24  ;;  %v17897_v63 = vld [vmem:[#allocation2 + $0xd70] sm:$0xf0]  ;;  %v185_v2 = vld [vmem:[%s19680_s0] sm:$0xff]  ;;  %v13258_v4 = vor.u32 %v17841_v61, %v13257_v60  ;;  %v13005_v6 = vld [vmem:[#allocation2 + $0x9a0] sm:$0xf]  ;;  %v12782_v13 = vor.u32 %v17722_v5, %v12781_v1  ;;  %vm11734_vm1 = vcmask 1041408  }
  0x4b   :  { %8747 = vmatpush.bf16.msra.mxu0 %v11774_v31  ;;  %197 = vst [vmem:[#allocation1] ss:$4 sm:$0xff] %v185_v2  ;;  %v13482_v7 = vor.u32 %v17897_v63, %v13481_v62  ;;  %v17778_v8 = vld [vmem:[#allocation2 + $0x9b8] sm:$0xf0]  ;;  %v13229_v9 = vld [vmem:[#allocation2 + $0xb60] sm:$0xf] }
  0x4c   :  { %8760 = vmatpush.bf16.msra.mxu1 %v11998_v35  ;;  %v17834_v10 = vld [vmem:[#allocation2 + $0xb78] sm:$0xf0]  ;;  %v13453_v11 = vld [vmem:[#allocation2 + $0xd20] sm:$0xf]  ;;  %v12753_v14 = vld [vmem:[#allocation2 + $0x7a8] sm:$0xf]  ;;  %v13006_v16 = vor.u32 %v17778_v8, %v13005_v6 }
  0x4d   :  { %8773 = vmatpush.bf16.msra.mxu2 %v12222_v36  ;;  %v17890_v12 = vld [vmem:[#allocation2 + $0xd38] sm:$0xf0]  ;;  %v17715_v15 = vld [vmem:[#allocation2 + $0x7c0] sm:$0xf0]  ;;  %v13230_v17 = vor.u32 %v17834_v10, %v13229_v9  ;;  %v12977_v18 = vld [vmem:[#allocation2 + $0x968] sm:$0xf] }
  0x4e   :  { %8786 = vmatpush.bf16.msra.mxu3 %v12446_v39  ;;  %v17771_v19 = vld [vmem:[#allocation2 + $0x980] sm:$0xf0]  ;;  %v13201_v20 = vld [vmem:[#allocation2 + $0xb28] sm:$0xf]  ;;  %v13454_v21 = vor.u32 %v17890_v12, %v13453_v11  ;;  %v12725_v25 = vld [vmem:[#allocation2 + $0x770] sm:$0xf]  ;;  %v12754_v28 = vor.u32 %v17715_v15, %v12753_v14 }
  0x4f   :  { %8792 = vmatpush.bf16.msrb.mxu0 %v12866_v40  ;;  %v17827_v22 = vld [vmem:[#allocation2 + $0xb40] sm:$0xf0]  ;;  %v13425_v23 = vld [vmem:[#allocation2 + $0xce8] sm:$0xf]  ;;  %v17708_v26 = vld [vmem:[#allocation2 + $0x788] sm:$0xf0]  ;;  %v12978_v29 = vor.u32 %v17771_v19, %v12977_v18 }
  0x50   :  { %8805 = vmatpush.bf16.msrb.mxu1 %v13090_v41  ;;  %v17883_v24 = vld [vmem:[#allocation2 + $0xd00] sm:$0xf0]  ;;  %v187_v27 = vld [vmem:[%s19680_s0 + $0x10] sm:$0xff]  ;;  %v12949_v30 = vld [vmem:[#allocation2 + $0x930] sm:$0xf]  ;;  %v13202_v34 = vor.u32 %v17827_v22, %v13201_v20  ;;  %s11756_s3 = sshll.u32 %s19691_s11, 4  ;;  %s11757_s3 = int_to_ptr.hbm [resolvable:$true] %s11756_s3 }
  0x51   :  { %8818 = vmatpush.bf16.msrb.mxu2 %v13314_v42  ;;  %v17764_v31 = vld [vmem:[#allocation2 + $0x948] sm:$0xf0]  ;;  %v13426_v39 = vor.u32 %v17883_v24, %v13425_v23  ;;  %v13173_v40 = vld [vmem:[#allocation2 + $0xaf0] sm:$0xf]  ;;  %v12697_v47 = vld [vmem:[#allocation2 + $0x738] sm:$0xf] }
  0x52   :  { %8831 = vmatpush.bf16.msrb.mxu3 %v13538_v46  ;;  %v202_v32 = vld.sshfl [vmem:[#allocation1 + $0x10] sm:$0xff pattern:$0x73625140]  ;;  %v200_v33 = vld.sshfl [vmem:[#allocation1] sm:$0xff pattern:$0x73625140]  ;;  %v12726_v46 = vor.u32 %v17708_v26, %v12725_v25  ;;  %v12950_v49 = vor.u32 %v17764_v31, %v12949_v30 }
  0x53   :  { %8793 = vmatpush.bf16.msrb.mxu0 %v12838_v52  ;;  %v19309_v35 = vpack.c.bf16 %v202_v32, %v202_v32  ;;  %v19311_v36 = vpack.c.bf16 %v200_v33, %v200_v33  ;;  %v203_v37 = vld.sshfl [vmem:[#allocation1 + $0x18] sm:$0xff pattern:$0x73625140]  ;;  %v201_v38 = vld.sshfl [vmem:[#allocation1 + $0x8] sm:$0xff pattern:$0x73625140] }
  0x54   :  { %8806 = vmatpush.bf16.msrb.mxu1 %v13062_v53  ;;  %v17820_v41 = vld [vmem:[#allocation2 + $0xb08] sm:$0xf0]  ;;  %v19313_v42 = vpack.c.bf16 %v203_v37, %v203_v37  ;;  %208 = vst [vmem:[#allocation1] ss:$4 sm:$0xff] %v187_v27  ;;  %v19315_v43 = vpack.c.bf16 %v201_v38, %v201_v38  ;;  %v13397_v44 = vld [vmem:[#allocation2 + $0xcb0] sm:$0xf] }
  0x55   :  { %8819 = vmatpush.bf16.msrb.mxu2 %v13286_v54  ;;  %v17876_v45 = vld [vmem:[#allocation2 + $0xcc8] sm:$0xf0]  ;;  %8748 = vmatmul.bf16.vlgmr.msra.gmra.mxu0 %v19311_v36  ;;  %v17701_v48 = vld [vmem:[#allocation2 + $0x750] sm:$0xf0]  ;;  %v13174_v50 = vor.u32 %v17820_v41, %v13173_v40  ;;  %v12921_v51 = vld [vmem:[#allocation2 + $0x8f8] sm:$0xf] }
  0x56   :  { %8832 = vmatpush.bf16.msrb.mxu3 %v13510_v58  ;;  %8774 = vmatmul.bf16.vlgmr.msra.gmra.mxu2 %v19309_v35  ;;  %v17757_v52 = vld [vmem:[#allocation2 + $0x910] sm:$0xf0]  ;;  %v13145_v53 = vld [vmem:[#allocation2 + $0xab8] sm:$0xf]  ;;  %v13398_v54 = vor.u32 %v17876_v45, %v13397_v44  ;;  %v186_v57 = vld [vmem:[%s19680_s0 + $0x8] sm:$0xff]  ;;  %v12698_v60 = vor.u32 %v17701_v48, %v12697_v47 }
  0x57   :  { %8794 = vmatpush.bf16.msrb.mxu0 %v12810_v0  ;;  %8787 = vmatmul.bf16.vlgmr.msra.gmra.mxu3 %v19313_v42  ;;  %v17813_v55 = vld [vmem:[#allocation2 + $0xad0] sm:$0xf0]  ;;  %v13369_v56 = vld [vmem:[#allocation2 + $0xc78] sm:$0xf]  ;;  %v12669_v59 = vld [vmem:[#allocation2 + $0x700] sm:$0xf]  ;;  %v12922_v0 = vor.u32 %v17757_v52, %v12921_v51 }
  0x58   :  { %8807 = vmatpush.bf16.msrb.mxu1 %v13034_v3  ;;  %v17869_v58 = vld [vmem:[#allocation2 + $0xc90] sm:$0xf0]  ;;  %199 = vst [vmem:[#allocation1 + $0x20] ss:$4 sm:$0xff] %v186_v57  ;;  %v17694_v61 = vld [vmem:[#allocation2 + $0x718] sm:$0xf0]  ;;  %v13146_v1 = vor.u32 %v17813_v55, %v13145_v53 }
  0x59   :  { %8820 = vmatpush.bf16.msrb.mxu2 %v13258_v4  ;;  %8761 = vmatmul.bf16.vlgmr.msra.gmra.mxu1 %v19315_v43  ;;  %v12893_v62 = vld [vmem:[#allocation2 + $0x8c0] sm:$0xf]  ;;  %v17750_v63 = vld [vmem:[#allocation2 + $0x8d8] sm:$0xf0]  ;;  %v13370_v5 = vor.u32 %v17869_v58, %v13369_v56  ;;  %v17967_v8 = vld [vmem:[#allocation2 + $0xfa0] sm:$0xf0]  ;;  %v12670_v12 = vor.u32 %v17694_v61, %v12669_v59 }
  0x5a   :  { %8833 = vmatpush.bf16.msrb.mxu3 %v13482_v7  ;;  %v13117_v2 = vld [vmem:[#allocation2 + $0xa80] sm:$0xf]  ;;  %v17806_v3 = vld [vmem:[#allocation2 + $0xa98] sm:$0xf0]  ;;  %v13761_v7 = vld [vmem:[#allocation2 + $0xf88] sm:$0xf] }
  0x5b   :  { %8795 = vmatpush.bf16.msrb.mxu0 %v12782_v13  ;;  %v13341_v4 = vld [vmem:[#allocation2 + $0xc40] sm:$0xf]  ;;  %v17862_v6 = vld [vmem:[#allocation2 + $0xc58] sm:$0xf0]  ;;  %v13985_v9 = vld [vmem:[#allocation2 + $0x1148] sm:$0xf]  ;;  %v13762_v22 = vor.u32 %v17967_v8, %v13761_v7 }
  0x5c   :  { %8808 = vmatpush.bf16.msrb.mxu1 %v13006_v16  ;;  %v18023_v10 = vld [vmem:[#allocation2 + $0x1160] sm:$0xf0]  ;;  %v14209_v11 = vld [vmem:[#allocation2 + $0x1308] sm:$0xf]  ;;  %v12894_v16 = vor.u32 %v17750_v63, %v12893_v62  ;;  %v13733_v18 = vld [vmem:[#allocation2 + $0xf50] sm:$0xf] }
  0x5d   :  { %8821 = vmatpush.bf16.msrb.mxu2 %v13230_v17  ;;  %v18079_v13 = vld [vmem:[#allocation2 + $0x1320] sm:$0xf0]  ;;  %v14433_v14 = vld [vmem:[#allocation2 + $0x14c8] sm:$0xf]  ;;  %v13118_v17 = vor.u32 %v17806_v3, %v13117_v2  ;;  %v17960_v19 = vld [vmem:[#allocation2 + $0xf68] sm:$0xf0]  ;;  %v13986_v27 = vor.u32 %v18023_v10, %v13985_v9 }
  0x5e   :  { %8834 = vmatpush.bf16.msrb.mxu3 %v13454_v21  ;;  %v18135_v15 = vld [vmem:[#allocation2 + $0x14e0] sm:$0xf0]  ;;  %v188_v20 = vld [vmem:[%s19680_s0 + $0x18] sm:$0xff]  ;;  %v13342_v21 = vor.u32 %v17862_v6, %v13341_v4  ;;  %v18016_v24 = vld [vmem:[#allocation2 + $0x1128] sm:$0xf0]  ;;  %v13734_v41 = vor.u32 %v17960_v19, %v13733_v18 }
  0x5f   :  { %8796 = vmatpush.bf16.msrb.mxu0 %v12754_v28  ;;  %v13957_v23 = vld [vmem:[#allocation2 + $0x1110] sm:$0xf]  ;;  %v206_v25 = vld.sshfl [vmem:[#allocation1 + $0x30] sm:$0xff pattern:$0x73625140]  ;;  %v14210_v28 = vor.u32 %v18079_v13, %v14209_v11  ;;  %v14434_v31 = vor.u32 %v18135_v15, %v14433_v14 }
  0x60   :  { %8809 = vmatpush.bf16.msrb.mxu1 %v12978_v29  ;;  %v204_v26 = vld.sshfl [vmem:[#allocation1 + $0x20] sm:$0xff pattern:$0x73625140]  ;;  %v207_v29 = vld.sshfl [vmem:[#allocation1 + $0x38] sm:$0xff pattern:$0x73625140]  ;;  %v13958_v45 = vor.u32 %v18016_v24, %v13957_v23 }
  0x61   :  { %8822 = vmatpush.bf16.msrb.mxu2 %v13202_v34  ;;  %v205_v30 = vld.sshfl [vmem:[#allocation1 + $0x28] sm:$0xff pattern:$0x73625140]  ;;  %v14181_v32 = vld [vmem:[#allocation2 + $0x12d0] sm:$0xf]  ;;  %v19327_v34 = vpack.c.bf16 %v206_v25, %v206_v25  ;;  %v19331_v40 = vpack.c.bf16 %v207_v29, %v207_v29 }
  0x62   :  { %8835 = vmatpush.bf16.msrb.mxu3 %v13426_v39  ;;  %v18072_v33 = vld [vmem:[#allocation2 + $0x12e8] sm:$0xf0]  ;;  %209 = vst [vmem:[#allocation1 + $0x20] ss:$4 sm:$0xff] %v188_v20  ;;  %v14405_v37 = vld [vmem:[#allocation2 + $0x1490] sm:$0xf]  ;;  %v19329_v39 = vpack.c.bf16 %v204_v26, %v204_v26  ;;  %v19333_v44 = vpack.c.bf16 %v205_v30, %v205_v30 }
  0x63   :  { %8797 = vmatpush.bf16.msrb.mxu0 %v12726_v46  ;;  %v18128_v38 = vld [vmem:[#allocation2 + $0x14a8] sm:$0xf0]  ;;  %v14182_v46 = vor.u32 %v18072_v33, %v14181_v32  ;;  %v13705_v47 = vld [vmem:[#allocation2 + $0xf18] sm:$0xf]  ;;  %v17953_v48 = vld [vmem:[#allocation2 + $0xf30] sm:$0xf0] }
  0x64   :  { %8810 = vmatpush.bf16.msrb.mxu1 %v12950_v49  ;;  %v13929_v49 = vld [vmem:[#allocation2 + $0x10d8] sm:$0xf]  ;;  %v18009_v51 = vld [vmem:[#allocation2 + $0x10f0] sm:$0xf0]  ;;  %v13706_v56 = vor.u32 %v17953_v48, %v13705_v47  ;;  %v13677_v59 = vld [vmem:[#allocation2 + $0xee0] sm:$0xf] }
  0x65   :  { %8823 = vmatpush.bf16.msrb.mxu2 %v13174_v50  ;;  %v14406_v50 = vor.u32 %v18128_v38, %v14405_v37  ;;  %v14153_v52 = vld [vmem:[#allocation2 + $0x1298] sm:$0xf]  ;;  %v18065_v53 = vld [vmem:[#allocation2 + $0x12b0] sm:$0xf0]  ;;  %v13930_v57 = vor.u32 %v18009_v51, %v13929_v49  ;;  %v13901_v61 = vld [vmem:[#allocation2 + $0x10a0] sm:$0xf] }
  0x66   :  { %8836 = vmatpush.bf16.msrb.mxu3 %v13398_v54  ;;  %v14377_v54 = vld [vmem:[#allocation2 + $0x1458] sm:$0xf]  ;;  %v18121_v55 = vld [vmem:[#allocation2 + $0x1470] sm:$0xf0]  ;;  %v14154_v58 = vor.u32 %v18065_v53, %v14153_v52  ;;  %v18002_v63 = vld [vmem:[#allocation2 + $0x10b8] sm:$0xf0] }
  0x67   :  { %8798 = vmatpush.bf16.msrb.mxu0 %v12698_v60  ;;  %v17946_v60 = vld [vmem:[#allocation2 + $0xef8] sm:$0xf0]  ;;  %v14378_v62 = vor.u32 %v18121_v55, %v14377_v54  ;;  %v14349_v2 = vld [vmem:[#allocation2 + $0x1420] sm:$0xf]  ;;  %v17939_v6 = vld [vmem:[#allocation2 + $0xec0] sm:$0xf0]  ;;  %v13902_v8 = vor.u32 %v18002_v63, %v13901_v61 }
  0x68   :  { %8811 = vmatpush.bf16.msrb.mxu1 %v12922_v0  ;;  %v14125_v0 = vld [vmem:[#allocation2 + $0x1260] sm:$0xf]  ;;  %v18114_v3 = vld [vmem:[#allocation2 + $0x1438] sm:$0xf0]  ;;  %v13678_v4 = vor.u32 %v17946_v60, %v13677_v59  ;;  %v13873_v7 = vld [vmem:[#allocation2 + $0x1068] sm:$0xf] }
  0x69   :  { %8824 = vmatpush.bf16.msrb.mxu2 %v13146_v1  ;;  %v18058_v1 = vld [vmem:[#allocation2 + $0x1278] sm:$0xf0]  ;;  %v17995_v10 = vld [vmem:[#allocation2 + $0x1080] sm:$0xf0]  ;;  %v14097_v11 = vld [vmem:[#allocation2 + $0x1228] sm:$0xf]  ;;  %v14350_v13 = vor.u32 %v18114_v3, %v14349_v2 }
  0x6a   :  { %8837 = vmatpush.bf16.msrb.mxu3 %v13370_v5  ;;  %v13649_v5 = vld [vmem:[#allocation2 + $0xea8] sm:$0xf]  ;;  %v14126_v9 = vor.u32 %v18058_v1, %v14125_v0  ;;  %v18107_v15 = vld [vmem:[#allocation2 + $0x1400] sm:$0xf0]  ;;  %v13874_v23 = vor.u32 %v17995_v10, %v13873_v7  ;;  %v17932_v25 = vld [vmem:[#allocation2 + $0xe88] sm:$0xf0] }
  0x6b   :  { %8799 = vmatpush.bf16.msrb.mxu0 %v12670_v12  ;;  %v18051_v12 = vld [vmem:[#allocation2 + $0x1240] sm:$0xf0]  ;;  %v14321_v14 = vld [vmem:[#allocation2 + $0x13e8] sm:$0xf]  ;;  %v13650_v20 = vor.u32 %v17939_v6, %v13649_v5  ;;  %v13845_v26 = vld [vmem:[#allocation2 + $0x1030] sm:$0xf] }
  0x6c   :  { %8812 = vmatpush.bf16.msrb.mxu1 %v12894_v16  ;;  %v189_v16 = vld [vmem:[%s19680_s0 + $0x20] sm:$0xff]  ;;  %v19344_v19 = vld.sshfl [vmem:[#allocation1 + $0x10] sm:$0xff pattern:$0x73625140]  ;;  %v14098_v24 = vor.u32 %v18051_v12, %v14097_v11  ;;  %v14069_v29 = vld [vmem:[#allocation2 + $0x11f0] sm:$0xf] }
  0x6d   :  { %8825 = vmatpush.bf16.msrb.mxu2 %v13118_v17  ;;  %v13621_v17 = vld [vmem:[#allocation2 + $0xe70] sm:$0xf]  ;;  %v19342_v18 = vld.sshfl [vmem:[#allocation1] sm:$0xff pattern:$0x73625140] }
  0x6e   :  { %8838 = vmatpush.bf16.msrb.mxu3 %v13342_v21  ;;  %8800 = vmatmul.bf16.vlgmr.msrb.gmra.mxu0 %v19329_v39  ;;  %v19346_v21 = vld.sshfl [vmem:[#allocation1 + $0x8] sm:$0xff pattern:$0x73625140]  ;;  %v18044_v30 = vld [vmem:[#allocation2 + $0x1208] sm:$0xf0]  ;;  %v13622_v33 = vor.u32 %v17932_v25, %v13621_v17 }
  0x6f   :  { %8844 = vmatpush.bf16.msra.mxu0 %v13762_v22  ;;  %8813 = vmatmul.bf16.vlgmr.msrb.gmra.mxu1 %v19333_v44  ;;  %v19348_v22 = vld.sshfl [vmem:[#allocation1 + $0x18] sm:$0xff pattern:$0x73625140]  ;;  %v18100_v32 = vld [vmem:[#allocation2 + $0x13c8] sm:$0xf0]  ;;  %v14070_v38 = vor.u32 %v18044_v30, %v14069_v29  ;;  %v19360_v29 = vpack.c.bf16 %v19346_v21, %v19346_v21 }
  0x70   :  { %8857 = vmatpush.bf16.msra.mxu1 %v13986_v27  ;;  %8826 = vmatmul.bf16.vlgmr.msrb.gmra.mxu2 %v19327_v34  ;;  %218 = vst [vmem:[#allocation1] ss:$4 sm:$0xff] %v189_v16  ;;  %v14322_v27 = vor.u32 %v18107_v15, %v14321_v14  ;;  %v17981_v48 = vld [vmem:[#allocation2 + $0x1010] sm:$0xf0]  ;;  %v14041_v49 = vld [vmem:[#allocation2 + $0x11b8] sm:$0xf] }
  0x71   :  { %8870 = vmatpush.bf16.msra.mxu2 %v14210_v28  ;;  %8839 = vmatmul.bf16.vlgmr.msrb.gmra.mxu3 %v19331_v40  ;;  %v17988_v28 = vld [vmem:[#allocation2 + $0x1048] sm:$0xf0]  ;;  %v14265_v51 = vld [vmem:[#allocation2 + $0x1378] sm:$0xf]  ;;  %v18093_v52 = vld [vmem:[#allocation2 + $0x1390] sm:$0xf0] }
  0x72   :  { %8883 = vmatpush.bf16.msra.mxu3 %v14434_v31  ;;  %v14293_v31 = vld [vmem:[#allocation2 + $0x13b0] sm:$0xf]  ;;  %v13846_v37 = vor.u32 %v17988_v28, %v13845_v26  ;;  %v13565_v54 = vld [vmem:[#allocation2 + $0xe00] sm:$0xf]  ;;  %v17918_v55 = vld [vmem:[#allocation2 + $0xe18] sm:$0xf0]  ;;  %v14266_v61 = vor.u32 %v18093_v52, %v14265_v51  ;;  %v19356_v28 = vpack.c.bf16 %v19344_v19, %v19344_v19 }
  0x73   :  { %8845 = vmatpush.bf16.msra.mxu0 %v13734_v41  ;;  %v13593_v41 = vld [vmem:[#allocation2 + $0xe38] sm:$0xf]  ;;  %v14294_v47 = vor.u32 %v18100_v32, %v14293_v31  ;;  %v17974_v59 = vld [vmem:[#allocation2 + $0xfd8] sm:$0xf0]  ;;  %v14013_v60 = vld [vmem:[#allocation2 + $0x1180] sm:$0xf] }
  0x74   :  { %8858 = vmatpush.bf16.msra.mxu1 %v13958_v45  ;;  %v17925_v45 = vld [vmem:[#allocation2 + $0xe50] sm:$0xf0]  ;;  %v14237_v63 = vld [vmem:[#allocation2 + $0x1340] sm:$0xf]  ;;  %v18086_v0 = vld [vmem:[#allocation2 + $0x1358] sm:$0xf0] }
  0x75   :  { %8871 = vmatpush.bf16.msra.mxu2 %v14182_v46  ;;  %v13817_v46 = vld [vmem:[#allocation2 + $0xff8] sm:$0xf]  ;;  %v13594_v53 = vor.u32 %v17925_v45, %v13593_v41  ;;  %v14657_v1 = vld [vmem:[#allocation2 + $0x1688] sm:$0xf]  ;;  %v18191_v2 = vld [vmem:[#allocation2 + $0x16a0] sm:$0xf0]  ;;  %v14238_v12 = vor.u32 %v18086_v0, %v14237_v63 }
  0x76   :  { %8884 = vmatpush.bf16.msra.mxu3 %v14406_v50  ;;  %v18037_v50 = vld [vmem:[#allocation2 + $0x11d0] sm:$0xf0]  ;;  %v14881_v3 = vld [vmem:[#allocation2 + $0x1848] sm:$0xf]  ;;  %v18247_v5 = vld [vmem:[#allocation2 + $0x1860] sm:$0xf0] }
  0x77   :  { %8846 = vmatpush.bf16.msra.mxu0 %v13706_v56  ;;  %v13818_v56 = vor.u32 %v17981_v48, %v13817_v46  ;;  %v15105_v6 = vld [vmem:[#allocation2 + $0x1a08] sm:$0xf]  ;;  %v18303_v7 = vld [vmem:[#allocation2 + $0x1a20] sm:$0xf0]  ;;  %v14882_v14 = vor.u32 %v18247_v5, %v14881_v3  ;;  %v14629_v16 = vld [vmem:[#allocation2 + $0x1650] sm:$0xf] }
  0x78   :  { %8859 = vmatpush.bf16.msra.mxu1 %v13930_v57  ;;  %v14042_v57 = vor.u32 %v18037_v50, %v14041_v49  ;;  %v15329_v10 = vld [vmem:[#allocation2 + $0x1bc8] sm:$0xf]  ;;  %v18359_v11 = vld [vmem:[#allocation2 + $0x1be0] sm:$0xf0]  ;;  %v15106_v15 = vor.u32 %v18303_v7, %v15105_v6  ;;  %v18184_v17 = vld [vmem:[#allocation2 + $0x1668] sm:$0xf0] }
  0x79   :  { %8872 = vmatpush.bf16.msra.mxu2 %v14154_v58  ;;  %v13789_v58 = vld [vmem:[#allocation2 + $0xfc0] sm:$0xf]  ;;  %v18240_v25 = vld [vmem:[#allocation2 + $0x1828] sm:$0xf0]  ;;  %v15077_v26 = vld [vmem:[#allocation2 + $0x19d0] sm:$0xf]  ;;  %v14630_v32 = vor.u32 %v18184_v17, %v14629_v16 }
  0x7a   :  { %8885 = vmatpush.bf16.msra.mxu3 %v14378_v62  ;;  %v18030_v62 = vld [vmem:[#allocation2 + $0x1198] sm:$0xf0]  ;;  %v15301_v30 = vld [vmem:[#allocation2 + $0x1b90] sm:$0xf]  ;;  %v18352_v31 = vld [vmem:[#allocation2 + $0x1ba8] sm:$0xf0] }
  0x7b   :  { %8847 = vmatpush.bf16.msra.mxu0 %v13678_v4  ;;  %v13566_v4 = vor.u32 %v17918_v55, %v13565_v54  ;;  %v18177_v19 = vld [vmem:[#allocation2 + $0x1630] sm:$0xf0]  ;;  %v14825_v41 = vld [vmem:[#allocation2 + $0x17d8] sm:$0xf]  ;;  %v15302_v21 = vor.u32 %v18352_v31, %v15301_v30  ;;  %v14573_v49 = vld [vmem:[#allocation2 + $0x15e0] sm:$0xf] }
  0x7c   :  { %8860 = vmatpush.bf16.msra.mxu1 %v13902_v8  ;;  %v13790_v8 = vor.u32 %v17974_v59, %v13789_v58  ;;  %v18233_v45 = vld [vmem:[#allocation2 + $0x17f0] sm:$0xf0]  ;;  %v15049_v46 = vld [vmem:[#allocation2 + $0x1998] sm:$0xf]  ;;  %v18170_v50 = vld [vmem:[#allocation2 + $0x15f8] sm:$0xf0] }
  0x7d   :  { %8873 = vmatpush.bf16.msra.mxu2 %v14126_v9  ;;  %v14014_v9 = vor.u32 %v18030_v62, %v14013_v60  ;;  %v15273_v48 = vld [vmem:[#allocation2 + $0x1b58] sm:$0xf]  ;;  %v14797_v52 = vld [vmem:[#allocation2 + $0x17a0] sm:$0xf]  ;;  %v18282_v55 = vld [vmem:[#allocation2 + $0x1978] sm:$0xf0] }
  0x7e   :  { %8886 = vmatpush.bf16.msra.mxu3 %v14350_v13  ;;  %v14658_v13 = vor.u32 %v18191_v2, %v14657_v1  ;;  %v15021_v54 = vld [vmem:[#allocation2 + $0x1960] sm:$0xf]  ;;  %v19373_v59 = vld.sshfl [vmem:[#allocation1 + $0x20] sm:$0xff pattern:$0x73625140]  ;;  %v14574_v2 = vor.u32 %v18170_v50, %v14573_v49 }
  0x7f   :  { %8848 = vmatpush.bf16.msra.mxu0 %v13650_v20  ;;  %v14853_v20 = vld [vmem:[#allocation2 + $0x1810] sm:$0xf]  ;;  %v19375_v60 = vld.sshfl [vmem:[#allocation1 + $0x30] sm:$0xff pattern:$0x73625140] }
  0x80   :  { %8861 = vmatpush.bf16.msra.mxu1 %v13874_v23  ;;  %v15330_v23 = vor.u32 %v18359_v11, %v15329_v10  ;;  %v19377_v62 = vld.sshfl [vmem:[#allocation1 + $0x28] sm:$0xff pattern:$0x73625140]  ;;  %v19379_v63 = vld.sshfl [vmem:[#allocation1 + $0x38] sm:$0xff pattern:$0x73625140] }
  0x81   :  { %8874 = vmatpush.bf16.msra.mxu2 %v14098_v24  ;;  %v19352_v24 = vpack.c.bf16 %v19342_v18, %v19342_v18  ;;  %v19364_v18 = vpack.c.bf16 %v19348_v22, %v19348_v22  ;;  %v18345_v22 = vld [vmem:[#allocation2 + $0x1b70] sm:$0xf0]  ;;  %v15245_v0 = vld [vmem:[#allocation2 + $0x1b20] sm:$0xf]  ;;  %v18338_v1 = vld [vmem:[#allocation2 + $0x1b38] sm:$0xf0] }
  0x82   :  { %8887 = vmatpush.bf16.msra.mxu3 %v14322_v27  ;;  %v18296_v27 = vld [vmem:[#allocation2 + $0x19e8] sm:$0xf0]  ;;  %v14545_v5 = vld [vmem:[#allocation2 + $0x15a8] sm:$0xf]  ;;  %v18163_v6 = vld [vmem:[#allocation2 + $0x15c0] sm:$0xf0] }
  0x83   :  { %8849 = vmatpush.bf16.msra.mxu0 %v13622_v33  ;;  %v14601_v33 = vld [vmem:[#allocation2 + $0x1618] sm:$0xf]  ;;  %v14769_v7 = vld [vmem:[#allocation2 + $0x1768] sm:$0xf]  ;;  %v18275_v11 = vld [vmem:[#allocation2 + $0x1940] sm:$0xf0] }
  0x84   :  { %8862 = vmatpush.bf16.msra.mxu1 %v13846_v37  ;;  %v14854_v37 = vor.u32 %v18240_v25, %v14853_v20  ;;  %v14602_v51 = vor.u32 %v18177_v19, %v14601_v33  ;;  %v14993_v10 = vld [vmem:[#allocation2 + $0x1928] sm:$0xf]  ;;  %v14517_v17 = vld [vmem:[#allocation2 + $0x1570] sm:$0xf]  ;;  %v18156_v20 = vld [vmem:[#allocation2 + $0x1588] sm:$0xf0] }
  0x85   :  { %8875 = vmatpush.bf16.msra.mxu2 %v14070_v38  ;;  %v15078_v38 = vor.u32 %v18296_v27, %v15077_v26  ;;  %v14994_v16 = vor.u32 %v18275_v11, %v14993_v10  ;;  %v18212_v26 = vld [vmem:[#allocation2 + $0x1748] sm:$0xf0]  ;;  %v14965_v27 = vld [vmem:[#allocation2 + $0x18f0] sm:$0xf]  ;;  %v14518_v33 = vor.u32 %v18156_v20, %v14517_v17  ;;  %v18317_v49 = vld [vmem:[#allocation2 + $0x1a90] sm:$0xf0] }
  0x86   :  { %8888 = vmatpush.bf16.msra.mxu3 %v14294_v47  ;;  %v18289_v47 = vld [vmem:[#allocation2 + $0x19b0] sm:$0xf0]  ;;  %v18268_v30 = vld [vmem:[#allocation2 + $0x1908] sm:$0xf0]  ;;  %v15189_v31 = vld [vmem:[#allocation2 + $0x1ab0] sm:$0xf] }
  0x87   :  { %8850 = vmatpush.bf16.msra.mxu0 %v13594_v53  ;;  %v18226_v53 = vld [vmem:[#allocation2 + $0x17b8] sm:$0xf0]  ;;  %v15050_v58 = vor.u32 %v18289_v47, %v15049_v46  ;;  %v14966_v19 = vor.u32 %v18268_v30, %v14965_v27  ;;  %v14937_v47 = vld [vmem:[#allocation2 + $0x18b8] sm:$0xf]  ;;  %v14461_v50 = vld [vmem:[#allocation2 + $0x1500] sm:$0xf] }
  0x88   :  { %8863 = vmatpush.bf16.msra.mxu1 %v13818_v56  ;;  %v190_v56 = vld [vmem:[%s19680_s0 + $0x28] sm:$0xff]  ;;  %v14798_v3 = vor.u32 %v18226_v53, %v14797_v52  ;;  %v16225_v11 = vld [vmem:[#allocation2 + $0x22c8] sm:$0xf]  ;;  %v15525_v17 = vld [vmem:[#allocation2 + $0x1d50] sm:$0xf]  ;;  %s19212_s0 = smov [#allocation19]  }
  0x89   :  { %8876 = vmatpush.bf16.msra.mxu2 %v14042_v57  ;;  %v14826_v57 = vor.u32 %v18233_v45, %v14825_v41  ;;  %219 = vst [vmem:[#allocation1 + $0x20] ss:$4 sm:$0xff] %v190_v56  ;;  %v18149_v41 = vld [vmem:[#allocation2 + $0x1550] sm:$0xf0]  ;;  %v14713_v45 = vld [vmem:[#allocation2 + $0x16f8] sm:$0xf] }
  0x8a   :  { %8889 = vmatpush.bf16.msra.mxu3 %v14266_v61  ;;  %v15274_v61 = vor.u32 %v18345_v22, %v15273_v48  ;;  %v18261_v48 = vld [vmem:[#allocation2 + $0x18d0] sm:$0xf0]  ;;  %v15161_v22 = vld [vmem:[#allocation2 + $0x1a78] sm:$0xf]  ;;  %v14685_v53 = vld [vmem:[#allocation2 + $0x16c0] sm:$0xf] }
  0x8b   :  { %8851 = vmatpush.bf16.msra.mxu0 %v13566_v4  ;;  %v15022_v4 = vor.u32 %v18282_v55, %v15021_v54  ;;  %v18198_v54 = vld [vmem:[#allocation2 + $0x16d8] sm:$0xf0]  ;;  %v14909_v55 = vld [vmem:[#allocation2 + $0x1880] sm:$0xf]  ;;  %v18408_v20 = vld [vmem:[#allocation2 + $0x1d68] sm:$0xf0] }
  0x8c   :  { %8864 = vmatpush.bf16.msra.mxu1 %v13790_v8  ;;  %v15246_v8 = vor.u32 %v18338_v1, %v15245_v0  ;;  %v18254_v56 = vld [vmem:[#allocation2 + $0x1898] sm:$0xf0]  ;;  %v15553_v1 = vld [vmem:[#allocation2 + $0x1d88] sm:$0xf]  ;;  %v18464_v27 = vld [vmem:[#allocation2 + $0x1f28] sm:$0xf0] }
  0x8d   :  { %8877 = vmatpush.bf16.msra.mxu2 %v14014_v9  ;;  %v18219_v9 = vld [vmem:[#allocation2 + $0x1780] sm:$0xf0]  ;;  %v18310_v0 = vld [vmem:[#allocation2 + $0x1a58] sm:$0xf0]  ;;  %v14910_v10 = vor.u32 %v18254_v56, %v14909_v55  ;;  %v15973_v30 = vld [vmem:[#allocation2 + $0x20d0] sm:$0xf] }
  0x8e   :  { %8890 = vmatpush.bf16.msra.mxu3 %v14238_v12  ;;  %8852 = vmatmul.bf16.vlgmr.msra.gmra.mxu0 %v19352_v24  ;;  %v15217_v12 = vld [vmem:[#allocation2 + $0x1ae8] sm:$0xf]  ;;  %v15693_v55 = vld [vmem:[#allocation2 + $0x1ea0] sm:$0xf]  ;;  %s11754_s2 = sshll.u32 %s19212_s0, 4  ;;  %s11755_s2 = int_to_ptr.vmem [resolvable:$true] %s11754_s2 }
  0x8f   :  { %8896 = vmatpush.bf16.msrb.mxu0 %v14658_v13  ;;  %8865 = vmatmul.bf16.vlgmr.msra.gmra.mxu1 %v19360_v29  ;;  %v18331_v13 = vld [vmem:[#allocation2 + $0x1b00] sm:$0xf0] }
  0x90   :  { %8909 = vmatpush.bf16.msrb.mxu1 %v14882_v14  ;;  %8878 = vmatmul.bf16.vlgmr.msra.gmra.mxu2 %v19356_v28  ;;  %v14546_v14 = vor.u32 %v18163_v6, %v14545_v5  ;;  %v15218_v25 = vor.u32 %v18331_v13, %v15217_v12  ;;  %v18471_v5 = vld [vmem:[#allocation2 + $0x1f60] sm:$0xf0] }
  0x91   :  { %8922 = vmatpush.bf16.msrb.mxu2 %v15106_v15  ;;  %8891 = vmatmul.bf16.vlgmr.msra.gmra.mxu3 %v19364_v18  ;;  %v14770_v15 = vor.u32 %v18219_v9, %v14769_v7  ;;  %v16001_v7 = vld [vmem:[#allocation2 + $0x2108] sm:$0xf]  ;;  %v14686_v9 = vor.u32 %v18198_v54, %v14685_v53  ;;  %v18583_v12 = vld [vmem:[#allocation2 + $0x22e0] sm:$0xf0]  ;;  %v15469_v53 = vld [vmem:[#allocation2 + $0x1ce0] sm:$0xf] }
  0x92   :  { %8935 = vmatpush.bf16.msrb.mxu3 %v15330_v23  ;;  %v14741_v23 = vld [vmem:[#allocation2 + $0x1730] sm:$0xf]  ;;  %v18394_v54 = vld [vmem:[#allocation2 + $0x1cf8] sm:$0xf0] }
  0x93   :  { %8897 = vmatpush.bf16.msrb.mxu0 %v14630_v32  ;;  %v18324_v32 = vld [vmem:[#allocation2 + $0x1ac8] sm:$0xf0] }
  0x94   :  { %8910 = vmatpush.bf16.msrb.mxu1 %v14854_v37  ;;  %v14489_v37 = vld [vmem:[#allocation2 + $0x1538] sm:$0xf]  ;;  %v15190_v46 = vor.u32 %v18324_v32, %v15189_v31  ;;  %v18520_v31 = vld [vmem:[#allocation2 + $0x20e8] sm:$0xf0]  ;;  %v19387_v32 = vpack.c.bf16 %v19375_v60, %v19375_v60  ;;  %v18401_v60 = vld [vmem:[#allocation2 + $0x1d30] sm:$0xf0] }
  0x95   :  { %8923 = vmatpush.bf16.msrb.mxu2 %v15078_v38  ;;  %v14742_v38 = vor.u32 %v18212_v26, %v14741_v23  ;;  %v14490_v52 = vor.u32 %v18149_v41, %v14489_v37  ;;  %v15749_v23 = vld [vmem:[#allocation2 + $0x1f10] sm:$0xf]  ;;  %v19383_v26 = vpack.c.bf16 %v19373_v59, %v19373_v59  ;;  %v19395_v59 = vpack.c.bf16 %v19379_v63, %v19379_v63  ;;  %v16169_v63 = vld [vmem:[#allocation2 + $0x2258] sm:$0xf] }
  0x96   :  { %8936 = vmatpush.bf16.msrb.mxu3 %v15302_v21  ;;  %v18205_v21 = vld [vmem:[#allocation2 + $0x1710] sm:$0xf0]  ;;  %v16197_v37 = vld [vmem:[#allocation2 + $0x2290] sm:$0xf]  ;;  %v15750_v41 = vor.u32 %v18464_v27, %v15749_v23  ;;  %v18436_v27 = vld [vmem:[#allocation2 + $0x1e48] sm:$0xf0] }
  0x97   :  { %8898 = vmatpush.bf16.msrb.mxu0 %v14602_v51  ;;  %v18142_v51 = vld [vmem:[#allocation2 + $0x1518] sm:$0xf0]  ;;  %v15637_v23 = vld [vmem:[#allocation2 + $0x1e30] sm:$0xf] }
  0x98   :  { %8911 = vmatpush.bf16.msrb.mxu1 %v14826_v57  ;;  %v14714_v57 = vor.u32 %v18205_v21, %v14713_v45  ;;  %v14462_v6 = vor.u32 %v18142_v51, %v14461_v50  ;;  %v15974_v45 = vor.u32 %v18520_v31, %v15973_v30  ;;  %v15497_v21 = vld [vmem:[#allocation2 + $0x1d18] sm:$0xf]  ;;  %v15861_v30 = vld [vmem:[#allocation2 + $0x1ff0] sm:$0xf]  ;;  %v18492_v31 = vld [vmem:[#allocation2 + $0x2008] sm:$0xf0] }
  0x99   :  { %8924 = vmatpush.bf16.msrb.mxu2 %v15050_v58  ;;  %v14938_v58 = vor.u32 %v18261_v48, %v14937_v47  ;;  %v18457_v47 = vld [vmem:[#allocation2 + $0x1ef0] sm:$0xf0]  ;;  %v15945_v48 = vld [vmem:[#allocation2 + $0x2098] sm:$0xf]  ;;  %v15498_v50 = vor.u32 %v18401_v60, %v15497_v21 }
  0x9a   :  { %8937 = vmatpush.bf16.msrb.mxu3 %v15274_v61  ;;  %v15133_v61 = vld [vmem:[#allocation2 + $0x1a40] sm:$0xf]  ;;  %v15385_v21 = vld [vmem:[#allocation2 + $0x1c38] sm:$0xf]  ;;  %v18373_v60 = vld [vmem:[#allocation2 + $0x1c50] sm:$0xf0] }
  0x9b   :  { %8899 = vmatpush.bf16.msrb.mxu0 %v14574_v2  ;;  %v15162_v2 = vor.u32 %v18317_v49, %v15161_v22  ;;  %v15134_v13 = vor.u32 %v18310_v0, %v15133_v61  ;;  %v18513_v22 = vld [vmem:[#allocation2 + $0x20b0] sm:$0xf0]  ;;  %v18506_v61 = vld [vmem:[#allocation2 + $0x2078] sm:$0xf0]  ;;  %v16141_v0 = vld [vmem:[#allocation2 + $0x2220] sm:$0xf] }
  0x9c   :  { %8912 = vmatpush.bf16.msrb.mxu1 %v14798_v3  ;;  %v18415_v3 = vld [vmem:[#allocation2 + $0x1da0] sm:$0xf0]  ;;  %v18569_v49 = vld [vmem:[#allocation2 + $0x2270] sm:$0xf0] }
  0x9d   :  { %8925 = vmatpush.bf16.msrb.mxu2 %v15022_v4  ;;  %v15777_v4 = vld [vmem:[#allocation2 + $0x1f48] sm:$0xf]  ;;  %v16170_v56 = vor.u32 %v18569_v49, %v16169_v63  ;;  %v16057_v63 = vld [vmem:[#allocation2 + $0x2178] sm:$0xf]  ;;  %v18541_v49 = vld [vmem:[#allocation2 + $0x2190] sm:$0xf0] }
  0x9e   :  { %8938 = vmatpush.bf16.msrb.mxu3 %v15246_v8  ;;  %v18527_v8 = vld [vmem:[#allocation2 + $0x2120] sm:$0xf0] }
  0x9f   :  { %8900 = vmatpush.bf16.msrb.mxu0 %v14546_v14  ;;  %v15554_v14 = vor.u32 %v18415_v3, %v15553_v1  ;;  %v18562_v1 = vld [vmem:[#allocation2 + $0x2238] sm:$0xf0] }
  0xa0   :  { %8913 = vmatpush.bf16.msrb.mxu1 %v14770_v15  ;;  %v15778_v15 = vor.u32 %v18471_v5, %v15777_v4  ;;  %v15441_v5 = vld [vmem:[#allocation2 + $0x1ca8] sm:$0xf] }
  0xa1   :  { %8926 = vmatpush.bf16.msrb.mxu2 %v14994_v16  ;;  %v16002_v16 = vor.u32 %v18527_v8, %v16001_v7  ;;  %v15665_v7 = vld [vmem:[#allocation2 + $0x1e68] sm:$0xf]  ;;  %v16142_v8 = vor.u32 %v18562_v1, %v16141_v0  ;;  %v16058_v0 = vor.u32 %v18541_v49, %v16057_v63  ;;  %v18534_v1 = vld [vmem:[#allocation2 + $0x2158] sm:$0xf0]  ;;  %v16393_v49 = vld [vmem:[#allocation2 + $0x2418] sm:$0xf] }
  0xa2   :  { %8939 = vmatpush.bf16.msrb.mxu3 %v15218_v25  ;;  %v16226_v25 = vor.u32 %v18583_v12, %v16225_v11  ;;  %v18499_v11 = vld [vmem:[#allocation2 + $0x2040] sm:$0xf0]  ;;  %v16113_v12 = vld [vmem:[#allocation2 + $0x21e8] sm:$0xf] }
  0xa3   :  { %8901 = vmatpush.bf16.msrb.mxu0 %v14518_v33  ;;  %v19391_v33 = vpack.c.bf16 %v19377_v62, %v19377_v62 }
  0xa4   :  { %8914 = vmatpush.bf16.msrb.mxu1 %v14742_v38  ;;  %v18576_v38 = vld [vmem:[#allocation2 + $0x22a8] sm:$0xf0] }
  0xa5   :  { %8927 = vmatpush.bf16.msrb.mxu2 %v14966_v19  ;;  %v15526_v19 = vor.u32 %v18408_v20, %v15525_v17  ;;  %v16198_v62 = vor.u32 %v18576_v38, %v16197_v37  ;;  %v15413_v17 = vld [vmem:[#allocation2 + $0x1c70] sm:$0xf]  ;;  %v18380_v20 = vld [vmem:[#allocation2 + $0x1c88] sm:$0xf0] }
  0xa6   :  { %8940 = vmatpush.bf16.msrb.mxu3 %v15190_v46  ;;  %v15721_v46 = vld [vmem:[#allocation2 + $0x1ed8] sm:$0xf]  ;;  %v16085_v37 = vld [vmem:[#allocation2 + $0x21b0] sm:$0xf]  ;;  %v18548_v38 = vld [vmem:[#allocation2 + $0x21c8] sm:$0xf0] }
  0xa7   :  { %8902 = vmatpush.bf16.msrb.mxu0 %v14490_v52  ;;  %v15722_v51 = vor.u32 %v18457_v47, %v15721_v46  ;;  %v15946_v52 = vor.u32 %v18513_v22, %v15945_v48  ;;  %v15609_v46 = vld [vmem:[#allocation2 + $0x1df8] sm:$0xf]  ;;  %v18429_v47 = vld [vmem:[#allocation2 + $0x1e10] sm:$0xf0] }
  0xa8   :  { %8915 = vmatpush.bf16.msrb.mxu1 %v14714_v57  ;;  %v18450_v57 = vld [vmem:[#allocation2 + $0x1eb8] sm:$0xf0]  ;;  %v15833_v48 = vld [vmem:[#allocation2 + $0x1fb8] sm:$0xf]  ;;  %v18485_v22 = vld [vmem:[#allocation2 + $0x1fd0] sm:$0xf0] }
  0xa9   :  { %8928 = vmatpush.bf16.msrb.mxu2 %v14938_v58  ;;  %v15917_v58 = vld [vmem:[#allocation2 + $0x2060] sm:$0xf]  ;;  %v15694_v3 = vor.u32 %v18450_v57, %v15693_v55  ;;  %v15610_v55 = vor.u32 %v18429_v47, %v15609_v46  ;;  %v17093_v46 = vld [vmem:[#allocation2 + $0x2990] sm:$0xf] }
  0xaa   :  { %8941 = vmatpush.bf16.msrb.mxu3 %v15162_v2  ;;  %v15470_v2 = vor.u32 %v18394_v54, %v15469_v53  ;;  %v15918_v4 = vor.u32 %v18506_v61, %v15917_v58  ;;  %v15581_v53 = vld [vmem:[#allocation2 + $0x1dc0] sm:$0xf]  ;;  %v18422_v54 = vld [vmem:[#allocation2 + $0x1dd8] sm:$0xf0] }
  0xab   :  { %8903 = vmatpush.bf16.msrb.mxu0 %v14462_v6  ;;  %v18387_v6 = vld [vmem:[#allocation2 + $0x1cc0] sm:$0xf0]  ;;  %v15805_v57 = vld [vmem:[#allocation2 + $0x1f80] sm:$0xf]  ;;  %v18478_v58 = vld [vmem:[#allocation2 + $0x1f98] sm:$0xf0] }
  0xac   :  { %8916 = vmatpush.bf16.msrb.mxu1 %v14686_v9  ;;  %v18443_v9 = vld [vmem:[#allocation2 + $0x1e80] sm:$0xf0]  ;;  %v16029_v61 = vld [vmem:[#allocation2 + $0x2140] sm:$0xf] }
  0xad   :  { %8929 = vmatpush.bf16.msrb.mxu2 %v14910_v10  ;;  %v15889_v10 = vld [vmem:[#allocation2 + $0x2028] sm:$0xf] }
  0xae   :  { %8942 = vmatpush.bf16.msrb.mxu3 %v15134_v13  ;;  %8904 = vmatmul.bf16.vlgmr.msrb.gmra.mxu0 %v19383_v26  ;;  %v18555_v13 = vld [vmem:[#allocation2 + $0x2200] sm:$0xf0] }
  0xaf   :  { %8948 = vmatpush.bf16.msra.mxu0 %v15554_v14  ;;  %8917 = vmatmul.bf16.vlgmr.msrb.gmra.mxu1 %v19391_v33  ;;  %v15442_v14 = vor.u32 %v18387_v6, %v15441_v5  ;;  %v18695_v5 = vld [vmem:[#allocation2 + $0x2660] sm:$0xf0]  ;;  %v16897_v6 = vld [vmem:[#allocation2 + $0x2808] sm:$0xf] }
  0xb0   :  { %8961 = vmatpush.bf16.msra.mxu1 %v15778_v15  ;;  %8930 = vmatmul.bf16.vlgmr.msrb.gmra.mxu2 %v19387_v32  ;;  %v15666_v15 = vor.u32 %v18443_v9, %v15665_v7  ;;  %v17121_v9 = vld [vmem:[#allocation2 + $0x29c8] sm:$0xf] }
  0xb1   :  { %8974 = vmatpush.bf16.msra.mxu2 %v16002_v16  ;;  %8943 = vmatmul.bf16.vlgmr.msrb.gmra.mxu3 %v19395_v59  ;;  %v15890_v16 = vor.u32 %v18499_v11, %v15889_v10  ;;  %v18807_v10 = vld [vmem:[#allocation2 + $0x29e0] sm:$0xf0]  ;;  %v15582_v11 = vor.u32 %v18422_v54, %v15581_v53  ;;  %v18681_v53 = vld [vmem:[#allocation2 + $0x25f0] sm:$0xf0]  ;;  %v16841_v54 = vld [vmem:[#allocation2 + $0x2798] sm:$0xf] }
  0xb2   :  { %8987 = vmatpush.bf16.msra.mxu3 %v16226_v25  ;;  %v16114_v25 = vor.u32 %v18555_v13, %v16113_v12  ;;  %v15806_v12 = vor.u32 %v18478_v58, %v15805_v57  ;;  %v220_v13 = vld.sshfl [vmem:[#allocation1] sm:$0xff pattern:$0x73625140]  ;;  %v18793_v57 = vld [vmem:[#allocation2 + $0x2970] sm:$0xf0] }
  0xb3   :  { %8949 = vmatpush.bf16.msra.mxu0 %v15526_v19  ;;  %v15414_v19 = vor.u32 %v18380_v20, %v15413_v17  ;;  %v221_v17 = vld.sshfl [vmem:[#allocation1 + $0x8] sm:$0xff pattern:$0x73625140]  ;;  %v223_v20 = vld.sshfl [vmem:[#allocation1 + $0x18] sm:$0xff pattern:$0x73625140] }
  0xb4   :  { %8962 = vmatpush.bf16.msra.mxu1 %v15750_v41  ;;  %v15638_v41 = vor.u32 %v18436_v27, %v15637_v23  ;;  %v16421_v27 = vld [vmem:[#allocation2 + $0x2450] sm:$0xf]  ;;  %v19407_v47 = vpack.c.bf16 %v223_v20, %v223_v20  ;;  %v16785_v20 = vld [vmem:[#allocation2 + $0x2728] sm:$0xf] }
  0xb5   :  { %8975 = vmatpush.bf16.msra.mxu2 %v15974_v45  ;;  %v15862_v45 = vor.u32 %v18492_v31, %v15861_v30  ;;  %v18632_v30 = vld [vmem:[#allocation2 + $0x2468] sm:$0xf0]  ;;  %v16645_v31 = vld [vmem:[#allocation2 + $0x2610] sm:$0xf] }
  0xb6   :  { %8988 = vmatpush.bf16.msra.mxu3 %v16198_v62  ;;  %v16086_v62 = vor.u32 %v18548_v38, %v16085_v37  ;;  %v17122_v37 = vor.u32 %v18807_v10, %v17121_v9  ;;  %v19401_v38 = vpack.c.bf16 %v220_v13, %v220_v13  ;;  %v18786_v9 = vld [vmem:[#allocation2 + $0x2938] sm:$0xf0]  ;;  %v16337_v13 = vld [vmem:[#allocation2 + $0x23a8] sm:$0xf] }
  0xb7   :  { %8950 = vmatpush.bf16.msra.mxu0 %v15498_v50  ;;  %v15357_v50 = vld [vmem:[#allocation2 + $0x1c00] sm:$0xf] }
  0xb8   :  { %8963 = vmatpush.bf16.msra.mxu1 %v15722_v51  ;;  %v15386_v51 = vor.u32 %v18373_v60, %v15385_v21  ;;  %v19405_v60 = vpack.c.bf16 %v221_v17, %v221_v17  ;;  %v18667_v17 = vld [vmem:[#allocation2 + $0x2580] sm:$0xf0] }
  0xb9   :  { %8976 = vmatpush.bf16.msra.mxu2 %v15946_v52  ;;  %v18366_v52 = vld [vmem:[#allocation2 + $0x1c18] sm:$0xf0] }
  0xba   :  { %8989 = vmatpush.bf16.msra.mxu3 %v16170_v56  ;;  %v15834_v56 = vor.u32 %v18485_v22, %v15833_v48  ;;  %v15358_v7 = vor.u32 %v18366_v52, %v15357_v50  ;;  %v16422_v48 = vor.u32 %v18632_v30, %v16421_v27  ;;  %v18625_v50 = vld [vmem:[#allocation2 + $0x2430] sm:$0xf0]  ;;  %v18779_v27 = vld [vmem:[#allocation2 + $0x2900] sm:$0xf0] }
  0xbb   :  { %8951 = vmatpush.bf16.msra.mxu0 %v15470_v2  ;;  %v16449_v2 = vld [vmem:[#allocation2 + $0x2488] sm:$0xf]  ;;  %v16394_v58 = vor.u32 %v18625_v50, %v16393_v49  ;;  %v16981_v49 = vld [vmem:[#allocation2 + $0x28b0] sm:$0xf]  ;;  %v18772_v50 = vld [vmem:[#allocation2 + $0x28c8] sm:$0xf0] }
  0xbc   :  { %8964 = vmatpush.bf16.msra.mxu1 %v15694_v3  ;;  %v18639_v3 = vld [vmem:[#allocation2 + $0x24a0] sm:$0xf0] }
  0xbd   :  { %8977 = vmatpush.bf16.msra.mxu2 %v15918_v4  ;;  %v16673_v4 = vld [vmem:[#allocation2 + $0x2648] sm:$0xf] }
  0xbe   :  { %8990 = vmatpush.bf16.msra.mxu3 %v16142_v8  ;;  %v18751_v8 = vld [vmem:[#allocation2 + $0x2820] sm:$0xf0]  ;;  %v16674_v23 = vor.u32 %v18695_v5, %v16673_v4  ;;  %v18674_v5 = vld [vmem:[#allocation2 + $0x25b8] sm:$0xf0] }
  0xbf   :  { %8952 = vmatpush.bf16.msra.mxu0 %v15442_v14  ;;  %v222_v14 = vld.sshfl [vmem:[#allocation1 + $0x10] sm:$0xff pattern:$0x73625140] }
  0xc0   :  { %8965 = vmatpush.bf16.msra.mxu1 %v15666_v15  ;;  %v16030_v15 = vor.u32 %v18534_v1, %v16029_v61  ;;  %v19403_v21 = vpack.c.bf16 %v222_v14, %v222_v14  ;;  %v16365_v1 = vld [vmem:[#allocation2 + $0x23e0] sm:$0xf]  ;;  %v18611_v14 = vld [vmem:[#allocation2 + $0x23c0] sm:$0xf0] }
  0xc1   :  { %8978 = vmatpush.bf16.msra.mxu2 %v15890_v16  ;;  %v16450_v16 = vor.u32 %v18639_v3, %v16449_v2  ;;  %v18618_v2 = vld [vmem:[#allocation2 + $0x23f8] sm:$0xf0]  ;;  %v16589_v3 = vld [vmem:[#allocation2 + $0x25a0] sm:$0xf]  ;;  %v16338_v30 = vor.u32 %v18611_v14, %v16337_v13 }
  0xc2   :  { %8991 = vmatpush.bf16.msra.mxu3 %v16114_v25  ;;  %v16898_v25 = vor.u32 %v18751_v8, %v16897_v6  ;;  %v16813_v6 = vld [vmem:[#allocation2 + $0x2760] sm:$0xf]  ;;  %v16366_v10 = vor.u32 %v18618_v2, %v16365_v1  ;;  %v18709_v1 = vld [vmem:[#allocation2 + $0x26d0] sm:$0xf0]  ;;  %v16953_v2 = vld [vmem:[#allocation2 + $0x2878] sm:$0xf] }
  0xc3   :  { %8953 = vmatpush.bf16.msra.mxu0 %v15414_v19  ;;  %v18688_v19 = vld [vmem:[#allocation2 + $0x2628] sm:$0xf0]  ;;  %v17037_v8 = vld [vmem:[#allocation2 + $0x2920] sm:$0xf]  ;;  %v18702_v13 = vld [vmem:[#allocation2 + $0x2698] sm:$0xf0] }
  0xc4   :  { %8966 = vmatpush.bf16.msra.mxu1 %v15638_v41  ;;  %v16869_v41 = vld [vmem:[#allocation2 + $0x27d0] sm:$0xf]  ;;  %v16646_v22 = vor.u32 %v18688_v19, %v16645_v31  ;;  %v16925_v14 = vld [vmem:[#allocation2 + $0x2840] sm:$0xf] }
  0xc5   :  { %8979 = vmatpush.bf16.msra.mxu2 %v15862_v45  ;;  %v18744_v45 = vld [vmem:[#allocation2 + $0x27e8] sm:$0xf0]  ;;  %v16309_v31 = vld [vmem:[#allocation2 + $0x2370] sm:$0xf] }
  0xc6   :  { %8992 = vmatpush.bf16.msra.mxu3 %v16086_v62  ;;  %v18800_v62 = vld [vmem:[#allocation2 + $0x29a8] sm:$0xf0]  ;;  %v16870_v63 = vor.u32 %v18744_v45, %v16869_v41  ;;  %v16533_v45 = vld [vmem:[#allocation2 + $0x2530] sm:$0xf] }
  0xc7   :  { %8954 = vmatpush.bf16.msra.mxu0 %v15386_v51  ;;  %v16617_v51 = vld [vmem:[#allocation2 + $0x25d8] sm:$0xf]  ;;  %v17094_v52 = vor.u32 %v18800_v62, %v17093_v46  ;;  %v18604_v41 = vld [vmem:[#allocation2 + $0x2388] sm:$0xf0] }
  0xc8   :  { %8967 = vmatpush.bf16.msra.mxu1 %v15610_v55  ;;  %v18737_v55 = vld [vmem:[#allocation2 + $0x27b0] sm:$0xf0]  ;;  %v16618_v61 = vor.u32 %v18681_v53, %v16617_v51  ;;  %v18660_v46 = vld [vmem:[#allocation2 + $0x2548] sm:$0xf0]  ;;  %v16310_v51 = vor.u32 %v18604_v41, %v16309_v31 }
  0xc9   :  { %8980 = vmatpush.bf16.msra.mxu2 %v15834_v56  ;;  %v17065_v56 = vld [vmem:[#allocation2 + $0x2958] sm:$0xf]  ;;  %v16534_v53 = vor.u32 %v18660_v46, %v16533_v45  ;;  %v17684_v41 = vld [vmem:[#allocation2 + $0x6cc] sm:$0xf]  ;;  %v12643_v45 = vld [vmem:[#allocation2 + $0x6e4] sm:$0xf0] }
  0xca   :  { %8993 = vmatpush.bf16.msra.mxu3 %v16058_v0  ;;  %v16842_v0 = vor.u32 %v18737_v55, %v16841_v54  ;;  %v17066_v4 = vor.u32 %v18793_v57, %v17065_v56  ;;  %v18597_v55 = vld [vmem:[#allocation2 + $0x2350] sm:$0xf0]  ;;  %v16505_v56 = vld [vmem:[#allocation2 + $0x24f8] sm:$0xf] }
  0xcb   :  { %8955 = vmatpush.bf16.msra.mxu0 %v15358_v7  ;;  %v18730_v7 = vld [vmem:[#allocation2 + $0x2778] sm:$0xf0] }
  0xcc   :  { %8968 = vmatpush.bf16.msra.mxu1 %v15582_v11  ;;  %v16590_v11 = vor.u32 %v18674_v5, %v16589_v3  ;;  %v18765_v3 = vld [vmem:[#allocation2 + $0x2890] sm:$0xf0] }
  0xcd   :  { %8981 = vmatpush.bf16.msra.mxu2 %v15806_v12  ;;  %v16814_v12 = vor.u32 %v18730_v7, %v16813_v6  ;;  %v18590_v6 = vld [vmem:[#allocation2 + $0x2318] sm:$0xf0]  ;;  %v16477_v7 = vld [vmem:[#allocation2 + $0x24c0] sm:$0xf] }
  0xce   :  { %8994 = vmatpush.bf16.msra.mxu3 %v16030_v15  ;;  %8956 = vmatmul.bf16.vlgmr.msra.gmra.mxu0 %v19401_v38  ;;  %v16561_v15 = vld [vmem:[#allocation2 + $0x2568] sm:$0xf] }
  0xcf   :  { %9000 = vmatpush.bf16.msrb.mxu0 %v16450_v16  ;;  %8969 = vmatmul.bf16.vlgmr.msra.gmra.mxu1 %v19405_v60  ;;  %v17038_v16 = vor.u32 %v18786_v9, %v17037_v8  ;;  %v18646_v8 = vld [vmem:[#allocation2 + $0x24d8] sm:$0xf0] }
  0xd0   :  { %9013 = vmatpush.bf16.msrb.mxu1 %v16674_v23  ;;  %8982 = vmatmul.bf16.vlgmr.msra.gmra.mxu2 %v19403_v21  ;;  %v18723_v23 = vld [vmem:[#allocation2 + $0x2740] sm:$0xf0] }
  0xd1   :  { %9026 = vmatpush.bf16.msrb.mxu2 %v16898_v25  ;;  %8995 = vmatmul.bf16.vlgmr.msra.gmra.mxu3 %v19407_v47  ;;  %v17009_v25 = vld [vmem:[#allocation2 + $0x28e8] sm:$0xf]  ;;  %v16786_v19 = vor.u32 %v18723_v23, %v16785_v20  ;;  %v17516_v20 = vld [vmem:[#allocation2 + $0x18c] sm:$0xf] }
  0xd2   :  { %9039 = vmatpush.bf16.msrb.mxu3 %v17122_v37  ;;  %v16562_v37 = vor.u32 %v18667_v17, %v16561_v15  ;;  %v17010_v62 = vor.u32 %v18779_v27, %v17009_v25  ;;  %v8749_v9 = vpop.f32.mrf.mxu0  ;;  %v18758_v17 = vld [vmem:[#allocation2 + $0x2858] sm:$0xf0]  ;;  %v11971_v23 = vld [vmem:[#allocation2 + $0x1a4] sm:$0xf0]  ;;  %v17572_v25 = vld [vmem:[#allocation2 + $0x34c] sm:$0xf] }
  0xd3   :  { %9001 = vmatpush.bf16.msrb.mxu0 %v16422_v48  ;;  %v16757_v48 = vld [vmem:[#allocation2 + $0x26f0] sm:$0xf]  ;;  %v12195_v27 = vld [vmem:[#allocation2 + $0x364] sm:$0xf0] }
  0xd4   :  { %9014 = vmatpush.bf16.msrb.mxu1 %v16646_v22  ;;  %v18716_v22 = vld [vmem:[#allocation2 + $0x2708] sm:$0xf0] }
  0xd5   :  { %9027 = vmatpush.bf16.msrb.mxu2 %v16870_v63  ;;  %v1812_v63 = vld [vmem:[#allocation5] sm:$0xff]  ;;  %v16758_v54 = vor.u32 %v18716_v22, %v16757_v48  ;;  %v224_v22 = vld.sshfl [vmem:[#allocation1 + $0x20] sm:$0xff pattern:$0x73625140] }
  0xd6   :  { %9040 = vmatpush.bf16.msrb.mxu3 %v17094_v52  ;;  %v16281_v52 = vld [vmem:[#allocation2 + $0x2338] sm:$0xf]  ;;  %v1814_v57 = vperm.slane %v1812_v63, 0  ;;  %v8762_v31 = vpop.f32.mrf.mxu1  ;;  %v226_v63 = vld.sshfl [vmem:[#allocation1 + $0x30] sm:$0xff pattern:$0x73625140] }
  0xd7   :  { %9002 = vmatpush.bf16.msrb.mxu0 %v16394_v58  ;;  %v16982_v58 = vor.u32 %v18772_v50, %v16981_v49  ;;  %v16282_v5 = vor.u32 %v18597_v55, %v16281_v52  ;;  %v16926_v49 = vor.u32 %v18758_v17, %v16925_v14  ;;  %v11974_v50 = vor.u32 %v17516_v20, %v11971_v23  ;;  %v227_v52 = vld.sshfl [vmem:[#allocation1 + $0x38] sm:$0xff pattern:$0x73625140]  ;;  %v11915_v17 = vld [vmem:[#allocation2 + $0x134] sm:$0xf0] }
  0xd8   :  { %9015 = vmatpush.bf16.msrb.mxu1 %v16618_v61  ;;  %v18653_v61 = vld [vmem:[#allocation2 + $0x2510] sm:$0xf0]  ;;  %v8750_v15 = vadd.f32 %v8749_v9, %v1814_v57  ;;  %v11943_v57 = vld [vmem:[#allocation2 + $0x16c] sm:$0xf0]  ;;  %v17558_v20 = vld [vmem:[#allocation2 + $0x2dc] sm:$0xf] }
  0xd9   :  { %9028 = vmatpush.bf16.msrb.mxu2 %v16842_v0  ;;  %v16729_v0 = vld [vmem:[#allocation2 + $0x26b8] sm:$0xf]  ;;  %v17677_v9 = vld [vmem:[#allocation2 + $0x694] sm:$0xf] }
  0xda   :  { %9041 = vmatpush.bf16.msrb.mxu3 %v17066_v4  ;;  %v16253_v4 = vld [vmem:[#allocation2 + $0x2300] sm:$0xf]  ;;  %v8763_v46 = vadd.f32 %v8762_v31, %v8750_v15  ;;  %v12363_v31 = vld [vmem:[#allocation2 + $0x4b4] sm:$0xf0] }
  0xdb   :  { %9003 = vmatpush.bf16.msrb.mxu0 %v16366_v10  ;;  %v16506_v10 = vor.u32 %v18653_v61, %v16505_v56  ;;  %v17509_v56 = vld [vmem:[#allocation2 + $0x154] sm:$0xf] }
  0xdc   :  { %9016 = vmatpush.bf16.msrb.mxu1 %v16590_v11  ;;  %v16730_v11 = vor.u32 %v18709_v1, %v16729_v0  ;;  %v8788_v0 = vpop.f32.mrf.mxu3  ;;  %v12646_v1 = vor.u32 %v17684_v41, %v12643_v45 }
  0xdd   :  { %9029 = vmatpush.bf16.msrb.mxu2 %v16814_v12  ;;  %v16701_v12 = vld [vmem:[#allocation2 + $0x2680] sm:$0xf] }
  0xde   :  { %9042 = vmatpush.bf16.msrb.mxu3 %v17038_v16  ;;  %v16954_v16 = vor.u32 %v18765_v3, %v16953_v2  ;;  %v16702_v48 = vor.u32 %v18702_v13, %v16701_v12  ;;  %v19413_v2 = vpack.c.bf16 %v224_v22, %v224_v22  ;;  %v12167_v3 = vld [vmem:[#allocation2 + $0x32c] sm:$0xf0]  ;;  %v19419_v12 = vpack.c.bf16 %v227_v52, %v227_v52  ;;  %v8764_v23 = vpop.f32.mrf.mxu1  ;;  %v11887_v22 = vld [vmem:[#allocation2 + $0xfc] sm:$0xf0]  ;;  %v17607_v52 = vld [vmem:[#allocation2 + $0x464] sm:$0xf] }
  0xdf   :  { %9004 = vmatpush.bf16.msrb.mxu0 %v16338_v30  ;;  %v17628_v30 = vld [vmem:[#allocation2 + $0x50c] sm:$0xf]  ;;  %v11946_v13 = vor.u32 %v17509_v56, %v11943_v57 }
  0xe0   :  { %9017 = vmatpush.bf16.msrb.mxu1 %v16562_v37  ;;  %v16254_v37 = vor.u32 %v18590_v6, %v16253_v4  ;;  %v17621_v4 = vld [vmem:[#allocation2 + $0x4d4] sm:$0xf]  ;;  %v8751_v6 = vpop.f32.mrf.mxu0 }
  0xe1   :  { %9030 = vmatpush.bf16.msrb.mxu2 %v16786_v19  ;;  %v12419_v19 = vld [vmem:[#allocation2 + $0x524] sm:$0xf0] }
  0xe2   :  { %9043 = vmatpush.bf16.msrb.mxu3 %v17010_v62  ;;  %v16478_v62 = vor.u32 %v18646_v8, %v16477_v7  ;;  %v12422_v55 = vor.u32 %v17628_v30, %v12419_v19  ;;  %v19415_v7 = vpack.c.bf16 %v226_v63, %v226_v63  ;;  %v17614_v30 = vld [vmem:[#allocation2 + $0x49c] sm:$0xf]  ;;  %v12587_v19 = vld [vmem:[#allocation2 + $0x674] sm:$0xf0]  ;;  %v17551_v63 = vld [vmem:[#allocation2 + $0x2a4] sm:$0xf] }
  0xe3   :  { %9005 = vmatpush.bf16.msrb.mxu0 %v16310_v51  ;;  %v225_v51 = vld.sshfl [vmem:[#allocation1 + $0x28] sm:$0xff pattern:$0x73625140] }
  0xe4   :  { %9018 = vmatpush.bf16.msrb.mxu1 %v16534_v53  ;;  %v8775_v53 = vpop.f32.mrf.mxu2  ;;  %v19417_v8 = vpack.c.bf16 %v225_v51, %v225_v51  ;;  %v12111_v51 = vld [vmem:[#allocation2 + $0x2bc] sm:$0xf0] }
  0xe5   :  { %9031 = vmatpush.bf16.msrb.mxu2 %v16758_v54  ;;  %v12198_v54 = vor.u32 %v17572_v25, %v12195_v27  ;;  %v8776_v61 = vadd.f32 %v8775_v53, %v8763_v46  ;;  %v12139_v27 = vld [vmem:[#allocation2 + $0x2f4] sm:$0xf0]  ;;  %v12335_v53 = vld [vmem:[#allocation2 + $0x47c] sm:$0xf0] }
  0xe6   :  { %9044 = vmatpush.bf16.msrb.mxu3 %v16982_v58  ;;  %v17565_v58 = vld [vmem:[#allocation2 + $0x314] sm:$0xf]  ;;  %v12142_v46 = vor.u32 %v17558_v20, %v12139_v27  ;;  %v11831_v27 = vld [vmem:[#allocation2 + $0x8c] sm:$0xf0] }
  0xe7   :  { %9006 = vmatpush.bf16.msrb.mxu0 %v16282_v5  ;;  %v12391_v5 = vld [vmem:[#allocation2 + $0x4ec] sm:$0xf0]  ;;  %v12170_v14 = vor.u32 %v17565_v58, %v12167_v3  ;;  %v12114_v58 = vor.u32 %v17551_v63, %v12111_v51  ;;  %v17544_v3 = vld [vmem:[#allocation2 + $0x26c] sm:$0xf] }
  0xe8   :  { %9019 = vmatpush.bf16.msrb.mxu1 %v16506_v10  ;;  %v12615_v10 = vld [vmem:[#allocation2 + $0x6ac] sm:$0xf0]  ;;  %v12394_v15 = vor.u32 %v17621_v4, %v12391_v5 }
  0xe9   :  { %9032 = vmatpush.bf16.msrb.mxu2 %v16730_v11  ;;  %v8789_v11 = vadd.f32 %v8788_v0, %v8776_v61  ;;  %v12618_v25 = vor.u32 %v17677_v9, %v12615_v10  ;;  %v12338_v61 = vor.u32 %v17607_v52, %v12335_v53  ;;  %v17488_v0 = vld [vmem:[#allocation2 + $0xac] sm:$0xf]  ;;  %v12083_v9 = vld [vmem:[#allocation2 + $0x284] sm:$0xf0]  ;;  %v17474_v52 = vld [vmem:[#allocation2 + $0x3c] sm:$0xf] }
  0xea   :  { %9045 = vmatpush.bf16.msrb.mxu3 %v16954_v16  ;;  %v17502_v16 = vld [vmem:[#allocation2 + $0x11c] sm:$0xf]  ;;  %v17600_v10 = vld [vmem:[#allocation2 + $0x42c] sm:$0xf]  ;;  %v12086_v20 = vor.u32 %v17544_v3, %v12083_v9  ;;  %v11803_v53 = vld [vmem:[#allocation2 + $0x54] sm:$0xf0] }
  0xeb   :  { %9007 = vmatpush.bf16.msrb.mxu0 %v16254_v37  ;;  %v17670_v37 = vld [vmem:[#allocation2 + $0x65c] sm:$0xf]  ;;  %v11918_v41 = vor.u32 %v17502_v16, %v11915_v17  ;;  %v8801_v57 = vpop.f32.mrf.mxu0  ;;  %v11806_v3 = vor.u32 %v17474_v52, %v11803_v53  ;;  %v17733_v52 = vld [vmem:[#allocation2 + $0x854] sm:$0xf]  ;;  %v12839_v53 = vld [vmem:[#allocation2 + $0x86c] sm:$0xf0] }
  0xec   :  { %9020 = vmatpush.bf16.msrb.mxu1 %v16478_v62  ;;  %v8777_v45 = vpop.f32.mrf.mxu2  ;;  %v12366_v62 = vor.u32 %v17614_v30, %v12363_v31  ;;  %v8802_v4 = vadd.f32 %v8801_v57, %v8789_v11  ;;  %v8814_v5 = vpop.f32.mrf.mxu1  ;;  %v17537_v30 = vld [vmem:[#allocation2 + $0x234] sm:$0xf]  ;;  %v12027_v57 = vld [vmem:[#allocation2 + $0x214] sm:$0xf0] }
  0xed   :  { %9033 = vmatpush.bf16.msrb.mxu2 %v16702_v48  ;;  %v17495_v48 = vld [vmem:[#allocation2 + $0xe4] sm:$0xf] }
  0xee   :  { %9046 = vmatpush.bf16.msrb.mxu3 %v16926_v49  ;;  %9008 = vmatmul.bf16.vlgmr.msrb.gmra.mxu0 %v19413_v2  ;;  %v8790_v49 = vpop.f32.mrf.mxu3  ;;  %v11890_v56 = vor.u32 %v17495_v48, %v11887_v22  ;;  %v8815_v16 = vadd.f32 %v8814_v5, %v8802_v4  ;;  %v12503_v48 = vld [vmem:[#allocation2 + $0x5cc] sm:$0xf0]  ;;  %v17467_v4 = vld [vmem:[#allocation2 + $0x4] sm:$0xf]  ;;  %v11775_v5 = vld [vmem:[#allocation2 + $0x1c] sm:$0xf0] }
  0xef   :  { %9052 = vmatpush.bf16.msra.mxu0 %v11974_v50  ;;  %9021 = vmatmul.bf16.vlgmr.msrb.gmra.mxu1 %v19417_v8  ;;  %v12590_v50 = vor.u32 %v17670_v37, %v12587_v19  ;;  %v12055_v37 = vld [vmem:[#allocation2 + $0x24c] sm:$0xf0]  ;;  %v17593_v19 = vld [vmem:[#allocation2 + $0x3f4] sm:$0xf] }
  0xf0   :  { %9065 = vmatpush.bf16.msra.mxu1 %v12198_v54  ;;  %9034 = vmatmul.bf16.vlgmr.msrb.gmra.mxu2 %v19415_v7  ;;  %v17663_v54 = vld [vmem:[#allocation2 + $0x624] sm:$0xf] }
  0xf1   :  { %9078 = vmatpush.bf16.msra.mxu2 %v12422_v55  ;;  %9047 = vmatmul.bf16.vlgmr.msrb.gmra.mxu3 %v19419_v12  ;;  %v12559_v55 = vld [vmem:[#allocation2 + $0x63c] sm:$0xf0] }
  0xf2   :  { %9091 = vmatpush.bf16.msra.mxu3 %v12646_v1  ;;  %v11859_v1 = vld [vmem:[#allocation2 + $0xc4] sm:$0xf0]  ;;  %v12562_v6 = vor.u32 %v17663_v54, %v12559_v55  ;;  %v17530_v54 = vld [vmem:[#allocation2 + $0x1fc] sm:$0xf] }
  0xf3   :  { %9053 = vmatpush.bf16.msra.mxu0 %v11946_v13  ;;  %v12307_v13 = vld [vmem:[#allocation2 + $0x444] sm:$0xf0]  ;;  %v11862_v17 = vor.u32 %v17488_v0, %v11859_v1  ;;  %v8803_v49 = vpop.f32.mrf.mxu0  ;;  %v17642_v0 = vld [vmem:[#allocation2 + $0x57c] sm:$0xf]  ;;  %v12475_v1 = vld [vmem:[#allocation2 + $0x594] sm:$0xf0] }
  0xf4   :  { %9066 = vmatpush.bf16.msra.mxu1 %v12170_v14  ;;  %v17656_v14 = vld [vmem:[#allocation2 + $0x5ec] sm:$0xf]  ;;  %v12310_v23 = vor.u32 %v17600_v10, %v12307_v13  ;;  %v8827_v31 = vpop.f32.mrf.mxu2  ;;  %v8816_v55 = vpop.f32.mrf.mxu1  ;;  %v17523_v10 = vld [vmem:[#allocation2 + $0x1c4] sm:$0xf]  ;;  %v11999_v13 = vld [vmem:[#allocation2 + $0x1dc] sm:$0xf0] }
  0xf5   :  { %9079 = vmatpush.bf16.msra.mxu2 %v12394_v15  ;;  %v12531_v15 = vld [vmem:[#allocation2 + $0x604] sm:$0xf0]  ;;  %v8828_v45 = vadd.f32 %v8827_v31, %v8815_v16  ;;  %v12478_v16 = vor.u32 %v17642_v0, %v12475_v1  ;;  %v17796_v31 = vld [vmem:[#allocation2 + $0xa4c] sm:$0xf]  ;;  %v13511_v0 = vld [vmem:[#allocation2 + $0xdac] sm:$0xf0]  ;;  %v12842_v1 = vor.u32 %v17733_v52, %v12839_v53 }
  0xf6   :  { %9092 = vmatpush.bf16.msra.mxu3 %v12618_v25  ;;  %v17481_v25 = vld [vmem:[#allocation2 + $0x74] sm:$0xf]  ;;  %v12534_v11 = vor.u32 %v17656_v14, %v12531_v15  ;;  %v17579_v14 = vld [vmem:[#allocation2 + $0x384] sm:$0xf]  ;;  %v17712_v52 = vld [vmem:[#allocation2 + $0x7ac] sm:$0xf] }
  0xf7   :  { %9054 = vmatpush.bf16.msra.mxu0 %v11918_v41  ;;  %v12279_v41 = vld [vmem:[#allocation2 + $0x40c] sm:$0xf0]  ;;  %v11834_v22 = vor.u32 %v17481_v25, %v11831_v27  ;;  %v17740_v27 = vld [vmem:[#allocation2 + $0x88c] sm:$0xf]  ;;  %v12755_v53 = vld [vmem:[#allocation2 + $0x7c4] sm:$0xf0] }
  0xf8   :  { %9067 = vmatpush.bf16.msra.mxu1 %v12142_v46  ;;  %v8840_v46 = vpop.f32.mrf.mxu3  ;;  %v12282_v51 = vor.u32 %v17593_v19, %v12279_v41  ;;  %v17852_v19 = vld [vmem:[#allocation2 + $0xc0c] sm:$0xf]  ;;  %v13315_v41 = vld [vmem:[#allocation2 + $0xc24] sm:$0xf0] }
  0xf9   :  { %9080 = vmatpush.bf16.msra.mxu2 %v12366_v62  ;;  %v17649_v62 = vld [vmem:[#allocation2 + $0x5b4] sm:$0xf]  ;;  %v19425_v63 = vadd.f32 %v8840_v46, %v8828_v45  ;;  %v12002_v45 = vor.u32 %v17523_v10, %v11999_v13  ;;  %v13035_v13 = vld [vmem:[#allocation2 + $0x9f4] sm:$0xf0] }
  0xfa   :  { %9093 = vmatpush.bf16.msra.mxu3 %v12590_v50  ;;  %v12058_v50 = vor.u32 %v17537_v30, %v12055_v37  ;;  %v12867_v30 = vld [vmem:[#allocation2 + $0x8a4] sm:$0xf0] }
  0xfb   :  { %9055 = vmatpush.bf16.msra.mxu0 %v11890_v56  ;;  %v12506_v56 = vor.u32 %v17649_v62, %v12503_v48  ;;  %v13091_v37 = vld [vmem:[#allocation2 + $0xa64] sm:$0xf0]  ;;  %v17908_v62 = vld [vmem:[#allocation2 + $0xdcc] sm:$0xf]  ;;  %v12870_v49 = vor.u32 %v17740_v27, %v12867_v30  ;;  %v17719_v27 = vld [vmem:[#allocation2 + $0x7e4] sm:$0xf] }
  0xfc   :  { %9068 = vmatpush.bf16.msra.mxu1 %v12114_v58  ;;  %v17586_v58 = vld [vmem:[#allocation2 + $0x3bc] sm:$0xf]  ;;  %v8829_v15 = vpop.f32.mrf.mxu2  ;;  %v13539_v48 = vld [vmem:[#allocation2 + $0xde4] sm:$0xf0]  ;;  %v12783_v30 = vld [vmem:[#allocation2 + $0x7fc] sm:$0xf0] }
  0xfd   :  { %9081 = vmatpush.bf16.msra.mxu2 %v12338_v61  ;;  %v12251_v61 = vld [vmem:[#allocation2 + $0x3d4] sm:$0xf0]  ;;  %v13542_v55 = vor.u32 %v17908_v62, %v13539_v48  ;;  %v13455_v62 = vld [vmem:[#allocation2 + $0xd3c] sm:$0xf0] }
  0xfe   :  { %9094 = vmatpush.bf16.msra.mxu3 %v12562_v6  ;;  %v12030_v6 = vor.u32 %v17530_v54, %v12027_v57  ;;  %v12254_v9 = vor.u32 %v17586_v58, %v12251_v61  ;;  %v17789_v54 = vld [vmem:[#allocation2 + $0xa14] sm:$0xf]  ;;  %v13287_v58 = vld [vmem:[#allocation2 + $0xbec] sm:$0xf0]  ;;  %v13259_v15 = vld [vmem:[#allocation2 + $0xbb4] sm:$0xf0] }
  0xff   :  { %9056 = vmatpush.bf16.msra.mxu0 %v11862_v17  ;;  %v12223_v17 = vld [vmem:[#allocation2 + $0x39c] sm:$0xf0]  ;;  %v17845_v57 = vld [vmem:[#allocation2 + $0xbd4] sm:$0xf] }
 0x100   :  { %9069 = vmatpush.bf16.msra.mxu1 %v12086_v20  ;;  %v17635_v20 = vld [vmem:[#allocation2 + $0x544] sm:$0xf]  ;;  %v8842_v25 = vpop.f32.mrf.mxu3  ;;  %v12226_v46 = vor.u32 %v17579_v14, %v12223_v17  ;;  %v17901_v61 = vld [vmem:[#allocation2 + $0xd94] sm:$0xf]  ;;  %v17838_v14 = vld [vmem:[#allocation2 + $0xb9c] sm:$0xf] }
 0x101   :  { %9082 = vmatpush.bf16.msra.mxu2 %v12310_v23  ;;  %v12447_v23 = vld [vmem:[#allocation2 + $0x55c] sm:$0xf0]  ;;  %v13514_v10 = vor.u32 %v17901_v61, %v13511_v0  ;;  %v13483_v17 = vld [vmem:[#allocation2 + $0xd74] sm:$0xf0]  ;;  %v13262_v25 = vor.u32 %v17838_v14, %v13259_v15  ;;  %v13203_v61 = vld [vmem:[#allocation2 + $0xb44] sm:$0xf0] }
 0x102   :  { %9095 = vmatpush.bf16.msra.mxu3 %v12534_v11  ;;  %v11778_v11 = vor.u32 %v17467_v4, %v11775_v5  ;;  %v13290_v4 = vor.u32 %v17845_v57, %v13287_v58  ;;  %v17726_v5 = vld [vmem:[#allocation2 + $0x81c] sm:$0xf]  ;;  %v12979_v57 = vld [vmem:[#allocation2 + $0x984] sm:$0xf0]  ;;  %v17824_v58 = vld [vmem:[#allocation2 + $0xb2c] sm:$0xf] }
 0x103   :  { %9057 = vmatpush.bf16.msra.mxu0 %v11834_v22  ;;  %v12450_v22 = vor.u32 %v17635_v20, %v12447_v23  ;;  %v17880_v0 = vld [vmem:[#allocation2 + $0xcec] sm:$0xf]  ;;  %v12951_v14 = vld [vmem:[#allocation2 + $0x94c] sm:$0xf0]  ;;  %v17817_v15 = vld [vmem:[#allocation2 + $0xaf4] sm:$0xf] }
 0x104   :  { %9070 = vmatpush.bf16.msra.mxu1 %v12058_v50  ;;  %v13094_v50 = vor.u32 %v17796_v31, %v13091_v37  ;;  %v17775_v31 = vld [vmem:[#allocation2 + $0x9a4] sm:$0xf]  ;;  %v13007_v37 = vld [vmem:[#allocation2 + $0x9bc] sm:$0xf0] }
 0x105   :  { %9083 = vmatpush.bf16.msra.mxu2 %v12282_v51  ;;  %v13318_v51 = vor.u32 %v17852_v19, %v13315_v41  ;;  %v17831_v19 = vld [vmem:[#allocation2 + $0xb64] sm:$0xf]  ;;  %v13231_v41 = vld [vmem:[#allocation2 + $0xb7c] sm:$0xf0] }
 0x106   :  { %9096 = vmatpush.bf16.msra.mxu3 %v12506_v56  ;;  %v13063_v56 = vld [vmem:[#allocation2 + $0xa2c] sm:$0xf0] }
 0x107   :  { %9058 = vmatpush.bf16.msra.mxu0 %v11806_v3  ;;  %v13066_v3 = vor.u32 %v17789_v54, %v13063_v56  ;;  %v17768_v54 = vld [vmem:[#allocation2 + $0x96c] sm:$0xf] }
 0x108   :  { %9071 = vmatpush.bf16.msra.mxu1 %v12030_v6  ;;  %v12811_v6 = vld [vmem:[#allocation2 + $0x834] sm:$0xf0] }
 0x109   :  { %9084 = vmatpush.bf16.msra.mxu2 %v12254_v9  ;;  %v17782_v9 = vld [vmem:[#allocation2 + $0x9dc] sm:$0xf]  ;;  %v12814_v20 = vor.u32 %v17726_v5, %v12811_v6  ;;  %v17705_v5 = vld [vmem:[#allocation2 + $0x774] sm:$0xf]  ;;  %v12727_v6 = vld [vmem:[#allocation2 + $0x78c] sm:$0xf0] }
 0x10a   :  { %9097 = vmatpush.bf16.msra.mxu3 %v12478_v16  ;;  %v17894_v16 = vld [vmem:[#allocation2 + $0xd5c] sm:$0xf]  ;;  %v13038_v23 = vor.u32 %v17782_v9, %v13035_v13  ;;  %v17761_v9 = vld [vmem:[#allocation2 + $0x934] sm:$0xf] }
 0x10b   :  { %9059 = vmatpush.bf16.msra.mxu0 %v11778_v11  ;;  %v13486_v11 = vor.u32 %v17894_v16, %v13483_v17  ;;  %v13175_v16 = vld [vmem:[#allocation2 + $0xb0c] sm:$0xf0] }
 0x10c   :  { %9072 = vmatpush.bf16.msra.mxu1 %v12002_v45  ;;  %v8853_v45 = vpop.f32.mrf.mxu0 }
 0x10d   :  { %9085 = vmatpush.bf16.msra.mxu2 %v12226_v46  ;;  %v17887_v46 = vld [vmem:[#allocation2 + $0xd24] sm:$0xf]  ;;  %v8854_v48 = vadd.f32 %v8853_v45, %v19425_v63  ;;  %v12982_v63 = vor.u32 %v17768_v54, %v12979_v57  ;;  %v12699_v45 = vld [vmem:[#allocation2 + $0x754] sm:$0xf0]  ;;  %v12671_v54 = vld [vmem:[#allocation2 + $0x71c] sm:$0xf0] }
 0x10e   :  { %9098 = vmatpush.bf16.msra.mxu3 %v12450_v22  ;;  %9060 = vmatmul.bf16.vlgmr.msra.gmra.mxu0 %v19311_v36  ;;  %v12786_v22 = vor.u32 %v17719_v27, %v12783_v30  ;;  %v12730_v30 = vor.u32 %v17705_v5, %v12727_v6  ;;  %v17747_v57 = vld [vmem:[#allocation2 + $0x8c4] sm:$0xf]  ;;  %v17964_v5 = vld [vmem:[#allocation2 + $0xf8c] sm:$0xf]  ;;  %v13763_v6 = vld [vmem:[#allocation2 + $0xfa4] sm:$0xf0] }
 0x10f   :  { %9104 = vmatpush.bf16.msrb.mxu0 %v12870_v49  ;;  %9073 = vmatmul.bf16.vlgmr.msra.gmra.mxu1 %v19315_v43  ;;  %v8866_v49 = vpop.f32.mrf.mxu1 }
 0x110   :  { %9117 = vmatpush.bf16.msrb.mxu1 %v13094_v50  ;;  %9086 = vmatmul.bf16.vlgmr.msra.gmra.mxu2 %v19309_v35  ;;  %v13010_v50 = vor.u32 %v17775_v31, %v13007_v37  ;;  %v8867_v56 = vadd.f32 %v8866_v49, %v8854_v48  ;;  %v12954_v37 = vor.u32 %v17761_v9, %v12951_v14  ;;  %v12923_v48 = vld [vmem:[#allocation2 + $0x914] sm:$0xf0]  ;;  %v18020_v9 = vld [vmem:[#allocation2 + $0x114c] sm:$0xf]  ;;  %v13987_v14 = vld [vmem:[#allocation2 + $0x1164] sm:$0xf0] }
 0x111   :  { %9130 = vmatpush.bf16.msrb.mxu2 %v13318_v51  ;;  %9099 = vmatmul.bf16.vlgmr.msra.gmra.mxu3 %v19313_v42  ;;  %v13234_v51 = vor.u32 %v17831_v19, %v13231_v41  ;;  %v13178_v19 = vor.u32 %v17817_v15, %v13175_v16  ;;  %v17698_v41 = vld [vmem:[#allocation2 + $0x73c] sm:$0xf]  ;;  %v13147_v49 = vld [vmem:[#allocation2 + $0xad4] sm:$0xf0]  ;;  %v18076_v15 = vld [vmem:[#allocation2 + $0x130c] sm:$0xf] }
 0x112   :  { %9143 = vmatpush.bf16.msrb.mxu3 %v13542_v55  ;;  %v13458_v55 = vor.u32 %v17887_v46, %v13455_v62  ;;  %v17754_v46 = vld [vmem:[#allocation2 + $0x8fc] sm:$0xf]  ;;  %v14211_v16 = vld [vmem:[#allocation2 + $0x1324] sm:$0xf0] }
 0x113   :  { %9105 = vmatpush.bf16.msrb.mxu0 %v12842_v1  ;;  %v13427_v1 = vld [vmem:[#allocation2 + $0xd04] sm:$0xf0]  ;;  %v8879_v13 = vpop.f32.mrf.mxu2 }
 0x114   :  { %9118 = vmatpush.bf16.msrb.mxu1 %v13066_v3  ;;  %v12758_v3 = vor.u32 %v17712_v52, %v12755_v53  ;;  %v8880_v17 = vadd.f32 %v8879_v13, %v8867_v56  ;;  %v8855_v27 = vpop.f32.mrf.mxu0  ;;  %v12702_v52 = vor.u32 %v17698_v41, %v12699_v45  ;;  %v17691_v53 = vld [vmem:[#allocation2 + $0x704] sm:$0xf]  ;;  %v13735_v41 = vld [vmem:[#allocation2 + $0xf6c] sm:$0xf0]  ;;  %v18013_v45 = vld [vmem:[#allocation2 + $0x1114] sm:$0xf] }
 0x115   :  { %9131 = vmatpush.bf16.msrb.mxu2 %v13290_v4  ;;  %v13206_v4 = vor.u32 %v17824_v58, %v13203_v61  ;;  %v12895_v58 = vld [vmem:[#allocation2 + $0x8dc] sm:$0xf0]  ;;  %v17803_v61 = vld [vmem:[#allocation2 + $0xa84] sm:$0xf]  ;;  %v12674_v13 = vor.u32 %v17691_v53, %v12671_v54  ;;  %v17950_v54 = vld [vmem:[#allocation2 + $0xf1c] sm:$0xf] }
 0x116   :  { %9144 = vmatpush.bf16.msrb.mxu3 %v13514_v10  ;;  %v13430_v10 = vor.u32 %v17880_v0, %v13427_v1  ;;  %v13119_v1 = vld [vmem:[#allocation2 + $0xa9c] sm:$0xf0] }
 0x117   :  { %9106 = vmatpush.bf16.msrb.mxu0 %v12814_v20  ;;  %v8892_v20 = vpop.f32.mrf.mxu3  ;;  %v8868_v31 = vpop.f32.mrf.mxu1 }
 0x118   :  { %9119 = vmatpush.bf16.msrb.mxu1 %v13038_v23  ;;  %v17873_v23 = vld [vmem:[#allocation2 + $0xcb4] sm:$0xf]  ;;  %v13990_v31 = vor.u32 %v18020_v9, %v13987_v14  ;;  %v13679_v9 = vld [vmem:[#allocation2 + $0xefc] sm:$0xf0] }
 0x119   :  { %9132 = vmatpush.bf16.msrb.mxu2 %v13262_v25  ;;  %v13399_v25 = vld [vmem:[#allocation2 + $0xccc] sm:$0xf0]  ;;  %v13903_v14 = vld [vmem:[#allocation2 + $0x10bc] sm:$0xf0] }
 0x11a   :  { %9145 = vmatpush.bf16.msrb.mxu3 %v13486_v11  ;;  %v19432_v11 = vadd.f32 %v8892_v20, %v8880_v17  ;;  %v13402_v62 = vor.u32 %v17873_v23, %v13399_v25  ;;  %v12898_v17 = vor.u32 %v17747_v57, %v12895_v58  ;;  %v13122_v20 = vor.u32 %v17803_v61, %v13119_v1  ;;  %v18132_v23 = vld [vmem:[#allocation2 + $0x14cc] sm:$0xf]  ;;  %v14435_v25 = vld [vmem:[#allocation2 + $0x14e4] sm:$0xf0]  ;;  %v13931_v58 = vld [vmem:[#allocation2 + $0x10f4] sm:$0xf0] }
 0x11b   :  { %9107 = vmatpush.bf16.msrb.mxu0 %v12786_v22  ;;  %v17810_v22 = vld [vmem:[#allocation2 + $0xabc] sm:$0xf] }
 0x11c   :  { %9120 = vmatpush.bf16.msrb.mxu1 %v13010_v50  ;;  %v17866_v50 = vld [vmem:[#allocation2 + $0xc7c] sm:$0xf]  ;;  %v13150_v56 = vor.u32 %v17810_v22, %v13147_v49  ;;  %v14183_v22 = vld [vmem:[#allocation2 + $0x12ec] sm:$0xf0]  ;;  %v18125_v49 = vld [vmem:[#allocation2 + $0x1494] sm:$0xf] }
 0x11d   :  { %9133 = vmatpush.bf16.msrb.mxu2 %v13234_v51  ;;  %v13371_v51 = vld [vmem:[#allocation2 + $0xc94] sm:$0xf0]  ;;  %v18062_v61 = vld [vmem:[#allocation2 + $0x129c] sm:$0xf] }
 0x11e   :  { %9146 = vmatpush.bf16.msrb.mxu3 %v13458_v55  ;;  %v12926_v55 = vor.u32 %v17754_v46, %v12923_v48  ;;  %v13374_v0 = vor.u32 %v17866_v50, %v13371_v51  ;;  %v14438_v46 = vor.u32 %v18132_v23, %v14435_v25  ;;  %v18069_v48 = vld [vmem:[#allocation2 + $0x12d4] sm:$0xf]  ;;  %v14407_v50 = vld [vmem:[#allocation2 + $0x14ac] sm:$0xf0]  ;;  %v18118_v1 = vld [vmem:[#allocation2 + $0x145c] sm:$0xf] }
 0x11f   :  { %9108 = vmatpush.bf16.msrb.mxu0 %v12758_v3  ;;  %v17859_v3 = vld [vmem:[#allocation2 + $0xc44] sm:$0xf]  ;;  %v14186_v53 = vor.u32 %v18069_v48, %v14183_v22  ;;  %v14410_v57 = vor.u32 %v18125_v49, %v14407_v50  ;;  %v14351_v23 = vld [vmem:[#allocation2 + $0x143c] sm:$0xf0]  ;;  %v13875_v48 = vld [vmem:[#allocation2 + $0x1084] sm:$0xf0] }
 0x120   :  { %9121 = vmatpush.bf16.msrb.mxu1 %v12982_v63  ;;  %v13343_v63 = vld [vmem:[#allocation2 + $0xc5c] sm:$0xf0]  ;;  %v18048_v22 = vld [vmem:[#allocation2 + $0x122c] sm:$0xf]  ;;  %v14099_v49 = vld [vmem:[#allocation2 + $0x1244] sm:$0xf0] }
 0x121   :  { %9134 = vmatpush.bf16.msrb.mxu2 %v13206_v4  ;;  %v8881_v4 = vpop.f32.mrf.mxu2  ;;  %v13346_v27 = vor.u32 %v17859_v3, %v13343_v63  ;;  %v14379_v3 = vld [vmem:[#allocation2 + $0x1474] sm:$0xf0]  ;;  %v18104_v50 = vld [vmem:[#allocation2 + $0x13ec] sm:$0xf] }
 0x122   :  { %9147 = vmatpush.bf16.msrb.mxu3 %v13430_v10  ;;  %v8894_v10 = vpop.f32.mrf.mxu3 }
 0x123   :  { %9109 = vmatpush.bf16.msrb.mxu0 %v12730_v30  ;;  %v13766_v30 = vor.u32 %v17964_v5, %v13763_v6  ;;  %v17943_v6 = vld [vmem:[#allocation2 + $0xee4] sm:$0xf] }
 0x124   :  { %9122 = vmatpush.bf16.msrb.mxu1 %v12954_v37  ;;  %v14214_v37 = vor.u32 %v18076_v15, %v14211_v16  ;;  %v17999_v10 = vld [vmem:[#allocation2 + $0x10a4] sm:$0xf]  ;;  %v14127_v16 = vld [vmem:[#allocation2 + $0x127c] sm:$0xf0] }
 0x125   :  { %9135 = vmatpush.bf16.msrb.mxu2 %v13178_v19  ;;  %v17957_v19 = vld [vmem:[#allocation2 + $0xf54] sm:$0xf]  ;;  %v18055_v15 = vld [vmem:[#allocation2 + $0x1264] sm:$0xf] }
 0x126   :  { %9148 = vmatpush.bf16.msrb.mxu3 %v13402_v62  ;;  %v13959_v62 = vld [vmem:[#allocation2 + $0x112c] sm:$0xf0]  ;;  %v13738_v51 = vor.u32 %v17957_v19, %v13735_v41  ;;  %v17936_v19 = vld [vmem:[#allocation2 + $0xeac] sm:$0xf]  ;;  %v13651_v41 = vld [vmem:[#allocation2 + $0xec4] sm:$0xf0] }
 0x127   :  { %9110 = vmatpush.bf16.msrb.mxu0 %v12702_v52  ;;  %v13962_v52 = vor.u32 %v18013_v45, %v13959_v62  ;;  %v17992_v45 = vld [vmem:[#allocation2 + $0x106c] sm:$0xf] }
 0x128   :  { %9123 = vmatpush.bf16.msrb.mxu1 %v12926_v55  ;;  %v13707_v55 = vld [vmem:[#allocation2 + $0xf34] sm:$0xf0] }
 0x129   :  { %9136 = vmatpush.bf16.msrb.mxu2 %v13150_v56  ;;  %v18006_v56 = vld [vmem:[#allocation2 + $0x10dc] sm:$0xf]  ;;  %v13710_v63 = vor.u32 %v17950_v54, %v13707_v55  ;;  %v17929_v54 = vld [vmem:[#allocation2 + $0xe74] sm:$0xf]  ;;  %v13623_v55 = vld [vmem:[#allocation2 + $0xe8c] sm:$0xf0] }
 0x12a   :  { %9149 = vmatpush.bf16.msrb.mxu3 %v13374_v0  ;;  %v14155_v0 = vld [vmem:[#allocation2 + $0x12b4] sm:$0xf0]  ;;  %v13934_v4 = vor.u32 %v18006_v56, %v13931_v58  ;;  %v17985_v56 = vld [vmem:[#allocation2 + $0x1034] sm:$0xf] }
 0x12b   :  { %9111 = vmatpush.bf16.msrb.mxu0 %v12674_v13  ;;  %v14158_v5 = vor.u32 %v18062_v61, %v14155_v0  ;;  %v14382_v13 = vor.u32 %v18118_v1, %v14379_v3  ;;  %v13847_v61 = vld [vmem:[#allocation2 + $0x104c] sm:$0xf0]  ;;  %v18041_v0 = vld [vmem:[#allocation2 + $0x11f4] sm:$0xf] }
 0x12c   :  { %9124 = vmatpush.bf16.msrb.mxu1 %v12898_v17  ;;  %v8905_v17 = vpop.f32.mrf.mxu0  ;;  %v14071_v1 = vld [vmem:[#allocation2 + $0x120c] sm:$0xf0] }
 0x12d   :  { %9137 = vmatpush.bf16.msrb.mxu2 %v13122_v20  ;;  %v18111_v20 = vld [vmem:[#allocation2 + $0x1424] sm:$0xf]  ;;  %v8906_v25 = vadd.f32 %v8905_v17, %v19432_v11  ;;  %v13878_v11 = vor.u32 %v17992_v45, %v13875_v48  ;;  %v13595_v17 = vld [vmem:[#allocation2 + $0xe54] sm:$0xf0]  ;;  %v13567_v45 = vld [vmem:[#allocation2 + $0xe1c] sm:$0xf0] }
 0x12e   :  { %9150 = vmatpush.bf16.msrb.mxu3 %v13346_v27  ;;  %9112 = vmatmul.bf16.vlgmr.msrb.gmra.mxu0 %v19329_v39  ;;  %v13682_v27 = vor.u32 %v17943_v6, %v13679_v9  ;;  %v13626_v9 = vor.u32 %v17929_v54, %v13623_v55  ;;  %v17971_v48 = vld [vmem:[#allocation2 + $0xfc4] sm:$0xf]  ;;  %v18188_v54 = vld [vmem:[#allocation2 + $0x168c] sm:$0xf]  ;;  %v14659_v55 = vld [vmem:[#allocation2 + $0x16a4] sm:$0xf0] }
 0x12f   :  { %9156 = vmatpush.bf16.msra.mxu0 %v13766_v30  ;;  %9125 = vmatmul.bf16.vlgmr.msrb.gmra.mxu1 %v19333_v44  ;;  %v8918_v30 = vpop.f32.mrf.mxu1 }
 0x130   :  { %9169 = vmatpush.bf16.msra.mxu1 %v13990_v31  ;;  %9138 = vmatmul.bf16.vlgmr.msrb.gmra.mxu2 %v19327_v34  ;;  %v13906_v31 = vor.u32 %v17999_v10, %v13903_v14  ;;  %v8919_v62 = vadd.f32 %v8918_v30, %v8906_v25  ;;  %v13850_v14 = vor.u32 %v17985_v56, %v13847_v61  ;;  %v13819_v25 = vld [vmem:[#allocation2 + $0x1014] sm:$0xf0]  ;;  %v18244_v56 = vld [vmem:[#allocation2 + $0x184c] sm:$0xf]  ;;  %v14883_v61 = vld [vmem:[#allocation2 + $0x1864] sm:$0xf0] }
 0x131   :  { %9182 = vmatpush.bf16.msra.mxu2 %v14214_v37  ;;  %9151 = vmatmul.bf16.vlgmr.msrb.gmra.mxu3 %v19331_v40  ;;  %v14130_v37 = vor.u32 %v18055_v15, %v14127_v16  ;;  %v14074_v15 = vor.u32 %v18041_v0, %v14071_v1  ;;  %v17922_v16 = vld [vmem:[#allocation2 + $0xe3c] sm:$0xf]  ;;  %v14043_v30 = vld [vmem:[#allocation2 + $0x11d4] sm:$0xf0]  ;;  %v18300_v0 = vld [vmem:[#allocation2 + $0x1a0c] sm:$0xf] }
 0x132   :  { %9195 = vmatpush.bf16.msra.mxu3 %v14438_v46  ;;  %v14354_v46 = vor.u32 %v18111_v20, %v14351_v23  ;;  %v17978_v20 = vld [vmem:[#allocation2 + $0xffc] sm:$0xf]  ;;  %v15107_v1 = vld [vmem:[#allocation2 + $0x1a24] sm:$0xf0] }
 0x133   :  { %9157 = vmatpush.bf16.msra.mxu0 %v13738_v51  ;;  %v14323_v51 = vld [vmem:[#allocation2 + $0x1404] sm:$0xf0]  ;;  %v8931_v58 = vpop.f32.mrf.mxu2 }
 0x134   :  { %9170 = vmatpush.bf16.msra.mxu1 %v13962_v52  ;;  %v13654_v52 = vor.u32 %v17936_v19, %v13651_v41  ;;  %v8932_v3 = vadd.f32 %v8931_v58, %v8919_v62  ;;  %v8907_v6 = vpop.f32.mrf.mxu0  ;;  %v13598_v19 = vor.u32 %v17922_v16, %v13595_v17  ;;  %v17915_v41 = vld [vmem:[#allocation2 + $0xe04] sm:$0xf]  ;;  %v14631_v16 = vld [vmem:[#allocation2 + $0x166c] sm:$0xf0]  ;;  %v18237_v17 = vld [vmem:[#allocation2 + $0x1814] sm:$0xf] }
 0x135   :  { %9183 = vmatpush.bf16.msra.mxu2 %v14186_v53  ;;  %v14102_v53 = vor.u32 %v18048_v22, %v14099_v49  ;;  %v13791_v22 = vld [vmem:[#allocation2 + $0xfdc] sm:$0xf0]  ;;  %v18027_v49 = vld [vmem:[#allocation2 + $0x1184] sm:$0xf]  ;;  %v13570_v58 = vor.u32 %v17915_v41, %v13567_v45  ;;  %v18174_v45 = vld [vmem:[#allocation2 + $0x161c] sm:$0xf] }
 0x136   :  { %9196 = vmatpush.bf16.msra.mxu3 %v14410_v57  ;;  %v14326_v57 = vor.u32 %v18104_v50, %v14323_v51  ;;  %v14015_v51 = vld [vmem:[#allocation2 + $0x119c] sm:$0xf0] }
 0x137   :  { %9158 = vmatpush.bf16.msra.mxu0 %v13710_v63  ;;  %v8944_v63 = vpop.f32.mrf.mxu3  ;;  %v8920_v10 = vpop.f32.mrf.mxu1 }
 0x138   :  { %9171 = vmatpush.bf16.msra.mxu1 %v13934_v4  ;;  %v18097_v4 = vld [vmem:[#allocation2 + $0x13b4] sm:$0xf]  ;;  %v14886_v10 = vor.u32 %v18244_v56, %v14883_v61  ;;  %v14575_v56 = vld [vmem:[#allocation2 + $0x15fc] sm:$0xf0] }
 0x139   :  { %9184 = vmatpush.bf16.msra.mxu2 %v14158_v5  ;;  %v14295_v5 = vld [vmem:[#allocation2 + $0x13cc] sm:$0xf0]  ;;  %v14799_v61 = vld [vmem:[#allocation2 + $0x17bc] sm:$0xf0] }
 0x13a   :  { %9197 = vmatpush.bf16.msra.mxu3 %v14382_v13  ;;  %v19439_v13 = vadd.f32 %v8944_v63, %v8932_v3  ;;  %v14298_v23 = vor.u32 %v18097_v4, %v14295_v5  ;;  %v13794_v3 = vor.u32 %v17971_v48, %v13791_v22  ;;  %v14018_v63 = vor.u32 %v18027_v49, %v14015_v51  ;;  %v18356_v4 = vld [vmem:[#allocation2 + $0x1bcc] sm:$0xf]  ;;  %v15331_v5 = vld [vmem:[#allocation2 + $0x1be4] sm:$0xf0]  ;;  %v14827_v22 = vld [vmem:[#allocation2 + $0x17f4] sm:$0xf0] }
 0x13b   :  { %9159 = vmatpush.bf16.msra.mxu0 %v13682_v27  ;;  %v18034_v27 = vld [vmem:[#allocation2 + $0x11bc] sm:$0xf] }
 0x13c   :  { %9172 = vmatpush.bf16.msra.mxu1 %v13906_v31  ;;  %v18090_v31 = vld [vmem:[#allocation2 + $0x137c] sm:$0xf]  ;;  %v14046_v62 = vor.u32 %v18034_v27, %v14043_v30  ;;  %v15079_v27 = vld [vmem:[#allocation2 + $0x19ec] sm:$0xf0]  ;;  %v18349_v30 = vld [vmem:[#allocation2 + $0x1b94] sm:$0xf] }
 0x13d   :  { %9185 = vmatpush.bf16.msra.mxu2 %v14130_v37  ;;  %v14267_v37 = vld [vmem:[#allocation2 + $0x1394] sm:$0xf0]  ;;  %v18286_v49 = vld [vmem:[#allocation2 + $0x199c] sm:$0xf] }
 0x13e   :  { %9198 = vmatpush.bf16.msra.mxu3 %v14354_v46  ;;  %v13822_v46 = vor.u32 %v17978_v20, %v13819_v25  ;;  %v14270_v50 = vor.u32 %v18090_v31, %v14267_v37  ;;  %v15334_v20 = vor.u32 %v18356_v4, %v15331_v5  ;;  %v18293_v25 = vld [vmem:[#allocation2 + $0x19d4] sm:$0xf]  ;;  %v15303_v31 = vld [vmem:[#allocation2 + $0x1bac] sm:$0xf0]  ;;  %v18342_v51 = vld [vmem:[#allocation2 + $0x1b5c] sm:$0xf] }
 0x13f   :  { %9160 = vmatpush.bf16.msra.mxu0 %v13654_v52  ;;  %v18083_v52 = vld [vmem:[#allocation2 + $0x1344] sm:$0xf]  ;;  %v15082_v41 = vor.u32 %v18293_v25, %v15079_v27  ;;  %v15306_v48 = vor.u32 %v18349_v30, %v15303_v31  ;;  %v15247_v4 = vld [vmem:[#allocation2 + $0x1b3c] sm:$0xf0]  ;;  %v14771_v25 = vld [vmem:[#allocation2 + $0x1784] sm:$0xf0] }
 0x140   :  { %9173 = vmatpush.bf16.msra.mxu1 %v13878_v11  ;;  %v14239_v11 = vld [vmem:[#allocation2 + $0x135c] sm:$0xf0]  ;;  %v18272_v27 = vld [vmem:[#allocation2 + $0x192c] sm:$0xf]  ;;  %v14995_v30 = vld [vmem:[#allocation2 + $0x1944] sm:$0xf0] }
 0x141   :  { %9186 = vmatpush.bf16.msra.mxu2 %v14102_v53  ;;  %v8933_v53 = vpop.f32.mrf.mxu2  ;;  %v14242_v6 = vor.u32 %v18083_v52, %v14239_v11  ;;  %v15275_v52 = vld [vmem:[#allocation2 + $0x1b74] sm:$0xf0]  ;;  %v18328_v31 = vld [vmem:[#allocation2 + $0x1aec] sm:$0xf] }
 0x142   :  { %9199 = vmatpush.bf16.msra.mxu3 %v14326_v57  ;;  %v8946_v57 = vpop.f32.mrf.mxu3 }
 0x143   :  { %9161 = vmatpush.bf16.msra.mxu0 %v13626_v9  ;;  %v14662_v9 = vor.u32 %v18188_v54, %v14659_v55  ;;  %v18167_v55 = vld [vmem:[#allocation2 + $0x15e4] sm:$0xf] }
 0x144   :  { %9174 = vmatpush.bf16.msra.mxu1 %v13850_v14  ;;  %v15110_v14 = vor.u32 %v18300_v0, %v15107_v1  ;;  %v18223_v57 = vld [vmem:[#allocation2 + $0x17a4] sm:$0xf]  ;;  %v15023_v1 = vld [vmem:[#allocation2 + $0x197c] sm:$0xf0] }
 0x145   :  { %9187 = vmatpush.bf16.msra.mxu2 %v14074_v15  ;;  %v18181_v15 = vld [vmem:[#allocation2 + $0x1654] sm:$0xf]  ;;  %v18279_v0 = vld [vmem:[#allocation2 + $0x1964] sm:$0xf] }
 0x146   :  { %9200 = vmatpush.bf16.msra.mxu3 %v14298_v23  ;;  %v14855_v23 = vld [vmem:[#allocation2 + $0x182c] sm:$0xf0]  ;;  %v14634_v37 = vor.u32 %v18181_v15, %v14631_v16  ;;  %v18160_v15 = vld [vmem:[#allocation2 + $0x15ac] sm:$0xf]  ;;  %v14547_v16 = vld [vmem:[#allocation2 + $0x15c4] sm:$0xf0] }
 0x147   :  { %9162 = vmatpush.bf16.msra.mxu0 %v13598_v19  ;;  %v14858_v19 = vor.u32 %v18237_v17, %v14855_v23  ;;  %v18216_v17 = vld [vmem:[#allocation2 + $0x176c] sm:$0xf] }
 0x148   :  { %9175 = vmatpush.bf16.msra.mxu1 %v13822_v46  ;;  %v14603_v46 = vld [vmem:[#allocation2 + $0x1634] sm:$0xf0] }
 0x149   :  { %9188 = vmatpush.bf16.msra.mxu2 %v14046_v62  ;;  %v18230_v62 = vld [vmem:[#allocation2 + $0x17dc] sm:$0xf]  ;;  %v14606_v11 = vor.u32 %v18174_v45, %v14603_v46  ;;  %v18153_v45 = vld [vmem:[#allocation2 + $0x1574] sm:$0xf]  ;;  %v14519_v46 = vld [vmem:[#allocation2 + $0x158c] sm:$0xf0] }
 0x14a   :  { %9201 = vmatpush.bf16.msra.mxu3 %v14270_v50  ;;  %v15051_v50 = vld [vmem:[#allocation2 + $0x19b4] sm:$0xf0]  ;;  %v14830_v53 = vor.u32 %v18230_v62, %v14827_v22  ;;  %v18209_v62 = vld [vmem:[#allocation2 + $0x1734] sm:$0xf] }
 0x14b   :  { %9163 = vmatpush.bf16.msra.mxu0 %v13570_v58  ;;  %v15054_v54 = vor.u32 %v18286_v49, %v15051_v50  ;;  %v15278_v58 = vor.u32 %v18342_v51, %v15275_v52  ;;  %v14743_v49 = vld [vmem:[#allocation2 + $0x174c] sm:$0xf0]  ;;  %v18265_v50 = vld [vmem:[#allocation2 + $0x18f4] sm:$0xf] }
 0x14c   :  { %9176 = vmatpush.bf16.msra.mxu1 %v13794_v3  ;;  %v8957_v3 = vpop.f32.mrf.mxu0  ;;  %v14967_v51 = vld [vmem:[#allocation2 + $0x190c] sm:$0xf0] }
 0x14d   :  { %9189 = vmatpush.bf16.msra.mxu2 %v14018_v63  ;;  %v18335_v63 = vld [vmem:[#allocation2 + $0x1b24] sm:$0xf]  ;;  %v8958_v5 = vadd.f32 %v8957_v3, %v19439_v13  ;;  %v14774_v13 = vor.u32 %v18216_v17, %v14771_v25  ;;  %v14491_v3 = vld [vmem:[#allocation2 + $0x1554] sm:$0xf0]  ;;  %v14463_v17 = vld [vmem:[#allocation2 + $0x151c] sm:$0xf0] }
 0x14e   :  { %9202 = vmatpush.bf16.msra.mxu3 %v14242_v6  ;;  %9164 = vmatmul.bf16.vlgmr.msra.gmra.mxu0 %v19352_v24  ;;  %v14578_v6 = vor.u32 %v18167_v55, %v14575_v56  ;;  %v14522_v56 = vor.u32 %v18153_v45, %v14519_v46  ;;  %v18195_v25 = vld [vmem:[#allocation2 + $0x16c4] sm:$0xf]  ;;  %v18412_v45 = vld [vmem:[#allocation2 + $0x1d8c] sm:$0xf]  ;;  %v15555_v46 = vld [vmem:[#allocation2 + $0x1da4] sm:$0xf0] }
 0x14f   :  { %9208 = vmatpush.bf16.msrb.mxu0 %v14662_v9  ;;  %9177 = vmatmul.bf16.vlgmr.msra.gmra.mxu1 %v19360_v29  ;;  %v8970_v9 = vpop.f32.mrf.mxu1 }
 0x150   :  { %9221 = vmatpush.bf16.msrb.mxu1 %v14886_v10  ;;  %9190 = vmatmul.bf16.vlgmr.msra.gmra.mxu2 %v19356_v28  ;;  %v14802_v10 = vor.u32 %v18223_v57, %v14799_v61  ;;  %v8971_v23 = vadd.f32 %v8970_v9, %v8958_v5  ;;  %v14746_v61 = vor.u32 %v18209_v62, %v14743_v49  ;;  %v14715_v5 = vld [vmem:[#allocation2 + $0x1714] sm:$0xf0]  ;;  %v18468_v62 = vld [vmem:[#allocation2 + $0x1f4c] sm:$0xf]  ;;  %v15779_v49 = vld [vmem:[#allocation2 + $0x1f64] sm:$0xf0] }
 0x151   :  { %9234 = vmatpush.bf16.msrb.mxu2 %v15110_v14  ;;  %9203 = vmatmul.bf16.vlgmr.msra.gmra.mxu3 %v19364_v18  ;;  %v15026_v14 = vor.u32 %v18279_v0, %v15023_v1  ;;  %v14970_v0 = vor.u32 %v18265_v50, %v14967_v51  ;;  %v18146_v1 = vld [vmem:[#allocation2 + $0x153c] sm:$0xf]  ;;  %v14939_v9 = vld [vmem:[#allocation2 + $0x18d4] sm:$0xf0]  ;;  %v18524_v50 = vld [vmem:[#allocation2 + $0x210c] sm:$0xf] }
 0x152   :  { %9247 = vmatpush.bf16.msrb.mxu3 %v15334_v20  ;;  %v15250_v20 = vor.u32 %v18335_v63, %v15247_v4  ;;  %v18202_v63 = vld [vmem:[#allocation2 + $0x16fc] sm:$0xf]  ;;  %v16003_v51 = vld [vmem:[#allocation2 + $0x2124] sm:$0xf0] }
 0x153   :  { %9209 = vmatpush.bf16.msrb.mxu0 %v14634_v37  ;;  %v15219_v37 = vld [vmem:[#allocation2 + $0x1b04] sm:$0xf0]  ;;  %v8983_v22 = vpop.f32.mrf.mxu2 }
 0x154   :  { %9222 = vmatpush.bf16.msrb.mxu1 %v14858_v19  ;;  %v14550_v19 = vor.u32 %v18160_v15, %v14547_v16  ;;  %v8984_v52 = vadd.f32 %v8983_v22, %v8971_v23  ;;  %v8959_v55 = vpop.f32.mrf.mxu0  ;;  %v14494_v15 = vor.u32 %v18146_v1, %v14491_v3  ;;  %v18139_v16 = vld [vmem:[#allocation2 + $0x1504] sm:$0xf]  ;;  %v15527_v1 = vld [vmem:[#allocation2 + $0x1d6c] sm:$0xf0]  ;;  %v18461_v3 = vld [vmem:[#allocation2 + $0x1f14] sm:$0xf] }
 0x155   :  { %9235 = vmatpush.bf16.msrb.mxu2 %v15082_v41  ;;  %v14998_v41 = vor.u32 %v18272_v27, %v14995_v30  ;;  %v14687_v27 = vld [vmem:[#allocation2 + $0x16dc] sm:$0xf0]  ;;  %v18251_v30 = vld [vmem:[#allocation2 + $0x1884] sm:$0xf]  ;;  %v14466_v22 = vor.u32 %v18139_v16, %v14463_v17  ;;  %v18398_v17 = vld [vmem:[#allocation2 + $0x1d1c] sm:$0xf] }
 0x156   :  { %9248 = vmatpush.bf16.msrb.mxu3 %v15306_v48  ;;  %v15222_v48 = vor.u32 %v18328_v31, %v15219_v37  ;;  %v14911_v37 = vld [vmem:[#allocation2 + $0x189c] sm:$0xf0] }
 0x157   :  { %9210 = vmatpush.bf16.msrb.mxu0 %v14606_v11  ;;  %v8996_v11 = vpop.f32.mrf.mxu3  ;;  %v8972_v57 = vpop.f32.mrf.mxu1 }
 0x158   :  { %9223 = vmatpush.bf16.msrb.mxu1 %v14830_v53  ;;  %v18321_v53 = vld [vmem:[#allocation2 + $0x1ab4] sm:$0xf]  ;;  %v15782_v57 = vor.u32 %v18468_v62, %v15779_v49  ;;  %v15471_v62 = vld [vmem:[#allocation2 + $0x1cfc] sm:$0xf0] }
 0x159   :  { %9236 = vmatpush.bf16.msrb.mxu2 %v15054_v54  ;;  %v15191_v54 = vld [vmem:[#allocation2 + $0x1acc] sm:$0xf0]  ;;  %v15695_v49 = vld [vmem:[#allocation2 + $0x1ebc] sm:$0xf0] }
 0x15a   :  { %9249 = vmatpush.bf16.msrb.mxu3 %v15278_v58  ;;  %v19446_v58 = vadd.f32 %v8996_v11, %v8984_v52  ;;  %v15194_v4 = vor.u32 %v18321_v53, %v15191_v54  ;;  %v14690_v52 = vor.u32 %v18195_v25, %v14687_v27  ;;  %v14914_v11 = vor.u32 %v18251_v30, %v14911_v37  ;;  %v18580_v53 = vld [vmem:[#allocation2 + $0x22cc] sm:$0xf]  ;;  %v16227_v54 = vld [vmem:[#allocation2 + $0x22e4] sm:$0xf0]  ;;  %v15723_v27 = vld [vmem:[#allocation2 + $0x1ef4] sm:$0xf0] }
 0x15b   :  { %9211 = vmatpush.bf16.msrb.mxu0 %v14578_v6  ;;  %v18258_v6 = vld [vmem:[#allocation2 + $0x18bc] sm:$0xf] }
 0x15c   :  { %9224 = vmatpush.bf16.msrb.mxu1 %v14802_v10  ;;  %v18314_v10 = vld [vmem:[#allocation2 + $0x1a7c] sm:$0xf]  ;;  %v14942_v23 = vor.u32 %v18258_v6, %v14939_v9  ;;  %v15975_v6 = vld [vmem:[#allocation2 + $0x20ec] sm:$0xf0]  ;;  %v18573_v9 = vld [vmem:[#allocation2 + $0x2294] sm:$0xf] }
 0x15d   :  { %9237 = vmatpush.bf16.msrb.mxu2 %v15026_v14  ;;  %v15163_v14 = vld [vmem:[#allocation2 + $0x1a94] sm:$0xf0]  ;;  %v18510_v30 = vld [vmem:[#allocation2 + $0x209c] sm:$0xf] }
 0x15e   :  { %9250 = vmatpush.bf16.msrb.mxu3 %v15250_v20  ;;  %v14718_v20 = vor.u32 %v18202_v63, %v14715_v5  ;;  %v15166_v31 = vor.u32 %v18314_v10, %v15163_v14  ;;  %v16230_v63 = vor.u32 %v18580_v53, %v16227_v54  ;;  %v18517_v5 = vld [vmem:[#allocation2 + $0x20d4] sm:$0xf]  ;;  %v16199_v10 = vld [vmem:[#allocation2 + $0x22ac] sm:$0xf0]  ;;  %v18566_v37 = vld [vmem:[#allocation2 + $0x225c] sm:$0xf] }
 0x15f   :  { %9212 = vmatpush.bf16.msrb.mxu0 %v14550_v19  ;;  %v18307_v19 = vld [vmem:[#allocation2 + $0x1a44] sm:$0xf]  ;;  %v15978_v16 = vor.u32 %v18517_v5, %v15975_v6  ;;  %v16202_v25 = vor.u32 %v18573_v9, %v16199_v10  ;;  %v16143_v53 = vld [vmem:[#allocation2 + $0x223c] sm:$0xf0]  ;;  %v15667_v5 = vld [vmem:[#allocation2 + $0x1e84] sm:$0xf0] }
 0x160   :  { %9225 = vmatpush.bf16.msrb.mxu1 %v14774_v13  ;;  %v15135_v13 = vld [vmem:[#allocation2 + $0x1a5c] sm:$0xf0]  ;;  %v18496_v6 = vld [vmem:[#allocation2 + $0x202c] sm:$0xf]  ;;  %v15891_v9 = vld [vmem:[#allocation2 + $0x2044] sm:$0xf0] }
 0x161   :  { %9238 = vmatpush.bf16.msrb.mxu2 %v14998_v41  ;;  %v8985_v41 = vpop.f32.mrf.mxu2  ;;  %v15138_v55 = vor.u32 %v18307_v19, %v15135_v13  ;;  %v16171_v19 = vld [vmem:[#allocation2 + $0x2274] sm:$0xf0]  ;;  %v18552_v10 = vld [vmem:[#allocation2 + $0x21ec] sm:$0xf] }
 0x162   :  { %9251 = vmatpush.bf16.msrb.mxu3 %v15222_v48  ;;  %v8998_v48 = vpop.f32.mrf.mxu3 }
 0x163   :  { %9213 = vmatpush.bf16.msrb.mxu0 %v14522_v56  ;;  %v15558_v56 = vor.u32 %v18412_v45, %v15555_v46  ;;  %v18391_v46 = vld [vmem:[#allocation2 + $0x1ce4] sm:$0xf] }
 0x164   :  { %9226 = vmatpush.bf16.msrb.mxu1 %v14746_v61  ;;  %v16006_v61 = vor.u32 %v18524_v50, %v16003_v51  ;;  %v18447_v48 = vld [vmem:[#allocation2 + $0x1ea4] sm:$0xf]  ;;  %v15919_v51 = vld [vmem:[#allocation2 + $0x207c] sm:$0xf0] }
 0x165   :  { %9239 = vmatpush.bf16.msrb.mxu2 %v14970_v0  ;;  %v18405_v0 = vld [vmem:[#allocation2 + $0x1d54] sm:$0xf]  ;;  %v18503_v50 = vld [vmem:[#allocation2 + $0x2064] sm:$0xf] }
 0x166   :  { %9252 = vmatpush.bf16.msrb.mxu3 %v15194_v4  ;;  %v15751_v4 = vld [vmem:[#allocation2 + $0x1f2c] sm:$0xf0]  ;;  %v15530_v14 = vor.u32 %v18405_v0, %v15527_v1  ;;  %v18384_v0 = vld [vmem:[#allocation2 + $0x1cac] sm:$0xf]  ;;  %v15443_v1 = vld [vmem:[#allocation2 + $0x1cc4] sm:$0xf0] }
 0x167   :  { %9214 = vmatpush.bf16.msrb.mxu0 %v14494_v15  ;;  %v15754_v15 = vor.u32 %v18461_v3, %v15751_v4  ;;  %v18440_v3 = vld [vmem:[#allocation2 + $0x1e6c] sm:$0xf] }
 0x168   :  { %9227 = vmatpush.bf16.msrb.mxu1 %v14718_v20  ;;  %v15499_v20 = vld [vmem:[#allocation2 + $0x1d34] sm:$0xf0] }
 0x169   :  { %9240 = vmatpush.bf16.msrb.mxu2 %v14942_v23  ;;  %v18454_v23 = vld [vmem:[#allocation2 + $0x1edc] sm:$0xf]  ;;  %v15502_v13 = vor.u32 %v18398_v17, %v15499_v20  ;;  %v18377_v17 = vld [vmem:[#allocation2 + $0x1c74] sm:$0xf]  ;;  %v15415_v20 = vld [vmem:[#allocation2 + $0x1c8c] sm:$0xf0] }
 0x16a   :  { %9253 = vmatpush.bf16.msrb.mxu3 %v15166_v31  ;;  %v15947_v31 = vld [vmem:[#allocation2 + $0x20b4] sm:$0xf0]  ;;  %v15726_v41 = vor.u32 %v18454_v23, %v15723_v27  ;;  %v18433_v23 = vld [vmem:[#allocation2 + $0x1e34] sm:$0xf] }
 0x16b   :  { %9215 = vmatpush.bf16.msrb.mxu0 %v14466_v22  ;;  %v15950_v45 = vor.u32 %v18510_v30, %v15947_v31  ;;  %v16174_v22 = vor.u32 %v18566_v37, %v16171_v19  ;;  %v15639_v30 = vld [vmem:[#allocation2 + $0x1e4c] sm:$0xf0]  ;;  %v18489_v31 = vld [vmem:[#allocation2 + $0x1ff4] sm:$0xf] }
 0x16c   :  { %9228 = vmatpush.bf16.msrb.mxu1 %v14690_v52  ;;  %v9009_v52 = vpop.f32.mrf.mxu0  ;;  %v15863_v37 = vld [vmem:[#allocation2 + $0x200c] sm:$0xf0] }
 0x16d   :  { %9241 = vmatpush.bf16.msrb.mxu2 %v14914_v11  ;;  %v18559_v11 = vld [vmem:[#allocation2 + $0x2224] sm:$0xf]  ;;  %v9010_v54 = vadd.f32 %v9009_v52, %v19446_v58  ;;  %v15670_v58 = vor.u32 %v18440_v3, %v15667_v5  ;;  %v15387_v52 = vld [vmem:[#allocation2 + $0x1c54] sm:$0xf0]  ;;  %v15359_v3 = vld [vmem:[#allocation2 + $0x1c1c] sm:$0xf0] }
 0x16e   :  { %9254 = vmatpush.bf16.msrb.mxu3 %v15138_v55  ;;  %9216 = vmatmul.bf16.vlgmr.msrb.gmra.mxu0 %v19383_v26  ;;  %v15474_v55 = vor.u32 %v18391_v46, %v15471_v62  ;;  %v15418_v62 = vor.u32 %v18377_v17, %v15415_v20  ;;  %v18419_v5 = vld [vmem:[#allocation2 + $0x1dc4] sm:$0xf]  ;;  %v18636_v17 = vld [vmem:[#allocation2 + $0x248c] sm:$0xf]  ;;  %v16451_v20 = vld [vmem:[#allocation2 + $0x24a4] sm:$0xf0] }
 0x16f   :  { %9260 = vmatpush.bf16.msra.mxu0 %v15558_v56  ;;  %9229 = vmatmul.bf16.vlgmr.msrb.gmra.mxu1 %v19391_v33  ;;  %v9022_v56 = vpop.f32.mrf.mxu1 }
 0x170   :  { %9273 = vmatpush.bf16.msra.mxu1 %v15782_v57  ;;  %9242 = vmatmul.bf16.vlgmr.msrb.gmra.mxu2 %v19387_v32  ;;  %v15698_v57 = vor.u32 %v18447_v48, %v15695_v49  ;;  %v9023_v4 = vadd.f32 %v9022_v56, %v9010_v54  ;;  %v15642_v49 = vor.u32 %v18433_v23, %v15639_v30  ;;  %v15611_v54 = vld [vmem:[#allocation2 + $0x1e14] sm:$0xf0]  ;;  %v18692_v23 = vld [vmem:[#allocation2 + $0x264c] sm:$0xf]  ;;  %v16675_v30 = vld [vmem:[#allocation2 + $0x2664] sm:$0xf0] }
 0x171   :  { %9286 = vmatpush.bf16.msra.mxu2 %v16006_v61  ;;  %9255 = vmatmul.bf16.vlgmr.msrb.gmra.mxu3 %v19395_v59  ;;  %v15922_v61 = vor.u32 %v18503_v50, %v15919_v51  ;;  %v15866_v50 = vor.u32 %v18489_v31, %v15863_v37  ;;  %v18370_v51 = vld [vmem:[#allocation2 + $0x1c3c] sm:$0xf]  ;;  %v15835_v56 = vld [vmem:[#allocation2 + $0x1fd4] sm:$0xf0]  ;;  %v18748_v31 = vld [vmem:[#allocation2 + $0x280c] sm:$0xf] }
 0x172   :  { %9299 = vmatpush.bf16.msra.mxu3 %v16230_v63  ;;  %v16146_v63 = vor.u32 %v18559_v11, %v16143_v53  ;;  %v18426_v11 = vld [vmem:[#allocation2 + $0x1dfc] sm:$0xf]  ;;  %v16899_v37 = vld [vmem:[#allocation2 + $0x2824] sm:$0xf0] }
 0x173   :  { %9261 = vmatpush.bf16.msra.mxu0 %v15530_v14  ;;  %v16115_v14 = vld [vmem:[#allocation2 + $0x2204] sm:$0xf0]  ;;  %v9035_v27 = vpop.f32.mrf.mxu2 }
 0x174   :  { %9274 = vmatpush.bf16.msra.mxu1 %v15754_v15  ;;  %v15446_v15 = vor.u32 %v18384_v0, %v15443_v1  ;;  %v9036_v19 = vadd.f32 %v9035_v27, %v9023_v4  ;;  %v9011_v46 = vpop.f32.mrf.mxu0  ;;  %v15390_v0 = vor.u32 %v18370_v51, %v15387_v52  ;;  %v18363_v1 = vld [vmem:[#allocation2 + $0x1c04] sm:$0xf]  ;;  %v16423_v51 = vld [vmem:[#allocation2 + $0x246c] sm:$0xf0]  ;;  %v18685_v52 = vld [vmem:[#allocation2 + $0x2614] sm:$0xf] }
 0x175   :  { %9287 = vmatpush.bf16.msra.mxu2 %v15978_v16  ;;  %v15894_v16 = vor.u32 %v18496_v6, %v15891_v9  ;;  %v15583_v6 = vld [vmem:[#allocation2 + $0x1ddc] sm:$0xf0]  ;;  %v18475_v9 = vld [vmem:[#allocation2 + $0x1f84] sm:$0xf]  ;;  %v15362_v27 = vor.u32 %v18363_v1, %v15359_v3  ;;  %v18622_v3 = vld [vmem:[#allocation2 + $0x241c] sm:$0xf] }
 0x176   :  { %9300 = vmatpush.bf16.msra.mxu3 %v16202_v25  ;;  %v16118_v25 = vor.u32 %v18552_v10, %v16115_v14  ;;  %v15807_v14 = vld [vmem:[#allocation2 + $0x1f9c] sm:$0xf0] }
 0x177   :  { %9262 = vmatpush.bf16.msra.mxu0 %v15502_v13  ;;  %v9048_v13 = vpop.f32.mrf.mxu3  ;;  %v9024_v48 = vpop.f32.mrf.mxu1 }
 0x178   :  { %9275 = vmatpush.bf16.msra.mxu1 %v15726_v41  ;;  %v18545_v41 = vld [vmem:[#allocation2 + $0x21b4] sm:$0xf]  ;;  %v16678_v48 = vor.u32 %v18692_v23, %v16675_v30  ;;  %v16367_v23 = vld [vmem:[#allocation2 + $0x23fc] sm:$0xf0] }
 0x179   :  { %9288 = vmatpush.bf16.msra.mxu2 %v15950_v45  ;;  %v16087_v45 = vld [vmem:[#allocation2 + $0x21cc] sm:$0xf0] }
 0x17a   :  { %9301 = vmatpush.bf16.msra.mxu3 %v16174_v22  ;;  %v19453_v22 = vadd.f32 %v9048_v13, %v9036_v19  ;;  %v16090_v53 = vor.u32 %v18545_v41, %v16087_v45  ;;  %v15586_v19 = vor.u32 %v18419_v5, %v15583_v6  ;;  %v15810_v13 = vor.u32 %v18475_v9, %v15807_v14  ;;  %v18804_v41 = vld [vmem:[#allocation2 + $0x29cc] sm:$0xf]  ;;  %v17123_v45 = vld [vmem:[#allocation2 + $0x29e4] sm:$0xf0]  ;;  %v16619_v6 = vld [vmem:[#allocation2 + $0x25f4] sm:$0xf0] }
 0x17b   :  { %9263 = vmatpush.bf16.msra.mxu0 %v15474_v55  ;;  %v18482_v55 = vld [vmem:[#allocation2 + $0x1fbc] sm:$0xf] }
 0x17c   :  { %9276 = vmatpush.bf16.msra.mxu1 %v15698_v57  ;;  %v18538_v57 = vld [vmem:[#allocation2 + $0x217c] sm:$0xf]  ;;  %v15838_v4 = vor.u32 %v18482_v55, %v15835_v56  ;;  %v16871_v55 = vld [vmem:[#allocation2 + $0x27ec] sm:$0xf0]  ;;  %v18797_v56 = vld [vmem:[#allocation2 + $0x2994] sm:$0xf] }
 0x17d   :  { %9289 = vmatpush.bf16.msra.mxu2 %v15922_v61  ;;  %v16059_v61 = vld [vmem:[#allocation2 + $0x2194] sm:$0xf0]  ;;  %v18734_v9 = vld [vmem:[#allocation2 + $0x279c] sm:$0xf] }
 0x17e   :  { %9302 = vmatpush.bf16.msra.mxu3 %v16146_v63  ;;  %v15614_v63 = vor.u32 %v18426_v11, %v15611_v54  ;;  %v16062_v10 = vor.u32 %v18538_v57, %v16059_v61  ;;  %v17126_v11 = vor.u32 %v18804_v41, %v17123_v45  ;;  %v18741_v54 = vld [vmem:[#allocation2 + $0x27d4] sm:$0xf]  ;;  %v17095_v57 = vld [vmem:[#allocation2 + $0x29ac] sm:$0xf0]  ;;  %v18790_v14 = vld [vmem:[#allocation2 + $0x295c] sm:$0xf] }
 0x17f   :  { %9264 = vmatpush.bf16.msra.mxu0 %v15446_v15  ;;  %v18531_v15 = vld [vmem:[#allocation2 + $0x2144] sm:$0xf]  ;;  %v16874_v1 = vor.u32 %v18741_v54, %v16871_v55  ;;  %v17098_v5 = vor.u32 %v18797_v56, %v17095_v57  ;;  %v17039_v45 = vld [vmem:[#allocation2 + $0x293c] sm:$0xf0]  ;;  %v16563_v55 = vld [vmem:[#allocation2 + $0x2584] sm:$0xf0] }
 0x180   :  { %9277 = vmatpush.bf16.msra.mxu1 %v15670_v58  ;;  %v16031_v58 = vld [vmem:[#allocation2 + $0x215c] sm:$0xf0]  ;;  %v18783_v41 = vld [vmem:[#allocation2 + $0x2924] sm:$0xf]  ;;  %v18720_v56 = vld [vmem:[#allocation2 + $0x272c] sm:$0xf] }
 0x181   :  { %9290 = vmatpush.bf16.msra.mxu2 %v15894_v16  ;;  %v9037_v16 = vpop.f32.mrf.mxu2  ;;  %v16034_v46 = vor.u32 %v18531_v15, %v16031_v58  ;;  %v17067_v15 = vld [vmem:[#allocation2 + $0x2974] sm:$0xf0]  ;;  %v17042_v54 = vor.u32 %v18783_v41, %v17039_v45  ;;  %v16787_v57 = vld [vmem:[#allocation2 + $0x2744] sm:$0xf0]  ;;  %v18650_v45 = vld [vmem:[#allocation2 + $0x24fc] sm:$0xf] }
 0x182   :  { %9303 = vmatpush.bf16.msra.mxu3 %v16118_v25  ;;  %v9050_v25 = vpop.f32.mrf.mxu3  ;;  %v18615_v16 = vld [vmem:[#allocation2 + $0x23e4] sm:$0xf]  ;;  %v16283_v41 = vld [vmem:[#allocation2 + $0x2354] sm:$0xf0] }
 0x183   :  { %9265 = vmatpush.bf16.msra.mxu0 %v15418_v62  ;;  %v16454_v62 = vor.u32 %v18636_v17, %v16451_v20  ;;  %v18671_v25 = vld [vmem:[#allocation2 + $0x25a4] sm:$0xf] }
 0x184   :  { %9278 = vmatpush.bf16.msra.mxu1 %v15642_v49  ;;  %v16902_v49 = vor.u32 %v18748_v31, %v16899_v37  ;;  %v17070_v31 = vor.u32 %v18790_v14, %v17067_v15  ;;  %v16591_v37 = vld [vmem:[#allocation2 + $0x25bc] sm:$0xf0]  ;;  %v16535_v15 = vld [vmem:[#allocation2 + $0x254c] sm:$0xf0] }
 0x185   :  { %9291 = vmatpush.bf16.msra.mxu2 %v15866_v50  ;;  %v18629_v50 = vld [vmem:[#allocation2 + $0x2454] sm:$0xf] }
 0x186   :  { %9304 = vmatpush.bf16.msra.mxu3 %v16090_v53  ;;  %v16647_v53 = vld [vmem:[#allocation2 + $0x262c] sm:$0xf0]  ;;  %v16426_v61 = vor.u32 %v18629_v50, %v16423_v51  ;;  %v18608_v50 = vld [vmem:[#allocation2 + $0x23ac] sm:$0xf]  ;;  %v16339_v51 = vld [vmem:[#allocation2 + $0x23c4] sm:$0xf0] }
 0x187   :  { %9266 = vmatpush.bf16.msra.mxu0 %v15390_v0  ;;  %v16650_v0 = vor.u32 %v18685_v52, %v16647_v53  ;;  %v18664_v52 = vld [vmem:[#allocation2 + $0x256c] sm:$0xf] }
 0x188   :  { %9279 = vmatpush.bf16.msra.mxu1 %v15614_v63  ;;  %v16395_v63 = vld [vmem:[#allocation2 + $0x2434] sm:$0xf0] }
 0x189   :  { %9292 = vmatpush.bf16.msra.mxu2 %v15838_v4  ;;  %v18678_v4 = vld [vmem:[#allocation2 + $0x25dc] sm:$0xf]  ;;  %v16398_v58 = vor.u32 %v18622_v3, %v16395_v63  ;;  %v16342_v3 = vor.u32 %v18608_v50, %v16339_v51  ;;  %v16566_v63 = vor.u32 %v18664_v52, %v16563_v55  ;;  %v16731_v50 = vld [vmem:[#allocation2 + $0x26d4] sm:$0xf0] }
 0x18a   :  { %9305 = vmatpush.bf16.msra.mxu3 %v16062_v10  ;;  %v16843_v10 = vld [vmem:[#allocation2 + $0x27b4] sm:$0xf0]  ;;  %v16622_v17 = vor.u32 %v18678_v4, %v16619_v6  ;;  %v16790_v4 = vor.u32 %v18720_v56, %v16787_v57  ;;  %v16311_v6 = vld [vmem:[#allocation2 + $0x238c] sm:$0xf0]  ;;  %v18762_v51 = vld [vmem:[#allocation2 + $0x287c] sm:$0xf] }
 0x18b   :  { %9267 = vmatpush.bf16.msra.mxu0 %v15362_v27  ;;  %v16846_v20 = vor.u32 %v18734_v9, %v16843_v10  ;;  %v18914_v27 = vld [vmem:[#allocation5] sm:$0xff]  ;;  %v18657_v9 = vld [vmem:[#allocation2 + $0x2534] sm:$0xf]  ;;  %v16955_v52 = vld [vmem:[#allocation2 + $0x2894] sm:$0xf0] }
 0x18c   :  { %9280 = vmatpush.bf16.msra.mxu1 %v15586_v19  ;;  %v1815_v30 = vperm.slane %v18914_v27, 1  ;;  %v18727_v19 = vld [vmem:[#allocation2 + $0x2764] sm:$0xf]  ;;  %v9074_v53 = vpop.f32.mrf.mxu1 }
 0x18d   :  { %9293 = vmatpush.bf16.msra.mxu2 %v15810_v13  ;;  %v16815_v13 = vld [vmem:[#allocation2 + $0x277c] sm:$0xf0]  ;;  %v18643_v57 = vld [vmem:[#allocation2 + $0x24c4] sm:$0xf] }
 0x18e   :  { %9306 = vmatpush.bf16.msra.mxu3 %v16034_v46  ;;  %9268 = vmatmul.bf16.vlgmr.msra.gmra.mxu0 %v19401_v38  ;;  %v16370_v46 = vor.u32 %v18615_v16, %v16367_v23  ;;  %v16759_v16 = vld [vmem:[#allocation2 + $0x270c] sm:$0xf0]  ;;  %v18769_v23 = vld [vmem:[#allocation2 + $0x28b4] sm:$0xf] }
 0x18f   :  { %9312 = vmatpush.bf16.msrb.mxu0 %v16454_v62  ;;  %9281 = vmatmul.bf16.vlgmr.msra.gmra.mxu1 %v19405_v60  ;;  %v9061_v62 = vpop.f32.mrf.mxu0 }
 0x190   :  { %9325 = vmatpush.bf16.msrb.mxu1 %v16678_v48  ;;  %9294 = vmatmul.bf16.vlgmr.msra.gmra.mxu2 %v19403_v21  ;;  %v16594_v48 = vor.u32 %v18671_v25, %v16591_v37  ;;  %v16983_v25 = vld [vmem:[#allocation2 + $0x28cc] sm:$0xf0]  ;;  %v16538_v37 = vor.u32 %v18657_v9, %v16535_v15 }
 0x191   :  { %9338 = vmatpush.bf16.msrb.mxu2 %v16902_v49  ;;  %9307 = vmatmul.bf16.vlgmr.msra.gmra.mxu3 %v19407_v47  ;;  %v16818_v49 = vor.u32 %v18727_v19, %v16815_v13  ;;  %v18594_v13 = vld [vmem:[#allocation2 + $0x233c] sm:$0xf]  ;;  %v11977_v9 = vld [vmem:[#allocation2 + $0x190] sm:$0xf] }
 0x192   :  { %9351 = vmatpush.bf16.msrb.mxu3 %v17126_v11  ;;  %v9062_v11 = vadd.f32 %v9061_v62, %v1815_v30  ;;  %v16986_v62 = vor.u32 %v18769_v23, %v16983_v25  ;;  %v12649_v25 = vld [vmem:[#allocation2 + $0x6d0] sm:$0xf] }
 0x193   :  { %9313 = vmatpush.bf16.msrb.mxu0 %v16426_v61  ;;  %v18776_v61 = vld [vmem:[#allocation2 + $0x28ec] sm:$0xf]  ;;  %v9087_v10 = vpop.f32.mrf.mxu2 }
 0x194   :  { %9326 = vmatpush.bf16.msrb.mxu1 %v16650_v0  ;;  %v17011_v0 = vld [vmem:[#allocation2 + $0x2904] sm:$0xf0] }
 0x195   :  { %9339 = vmatpush.bf16.msrb.mxu2 %v16874_v1  ;;  %v9075_v1 = vadd.f32 %v9074_v53, %v9062_v11  ;;  %v17014_v14 = vor.u32 %v18776_v61, %v17011_v0  ;;  %v16286_v11 = vor.u32 %v18594_v13, %v16283_v41  ;;  %v18587_v53 = vld [vmem:[#allocation2 + $0x2304] sm:$0xf]  ;;  %v16479_v61 = vld [vmem:[#allocation2 + $0x24dc] sm:$0xf0]  ;;  %v11949_v41 = vld [vmem:[#allocation2 + $0x158] sm:$0xf] }
 0x196   :  { %9352 = vmatpush.bf16.msrb.mxu3 %v17098_v5  ;;  %v18601_v5 = vld [vmem:[#allocation2 + $0x2374] sm:$0xf]  ;;  %v18699_v0 = vld [vmem:[#allocation2 + $0x2684] sm:$0xf] }
 0x197   :  { %9314 = vmatpush.bf16.msrb.mxu0 %v16398_v58  ;;  %v18713_v58 = vld [vmem:[#allocation2 + $0x26f4] sm:$0xf]  ;;  %v16314_v27 = vor.u32 %v18601_v5, %v16311_v6  ;;  %v16927_v5 = vld [vmem:[#allocation2 + $0x285c] sm:$0xf0] }
 0x198   :  { %9327 = vmatpush.bf16.msrb.mxu1 %v16622_v17  ;;  %v9088_v17 = vadd.f32 %v9087_v10, %v9075_v1  ;;  %v16762_v19 = vor.u32 %v18713_v58, %v16759_v16  ;;  %v17520_v10 = vld [vmem:[#allocation2 + $0x1a8] sm:$0xf0]  ;;  %v12425_v16 = vld [vmem:[#allocation2 + $0x510] sm:$0xf] }
 0x199   :  { %9340 = vmatpush.bf16.msrb.mxu2 %v16846_v20  ;;  %v9100_v20 = vpop.f32.mrf.mxu3  ;;  %v17576_v58 = vld [vmem:[#allocation2 + $0x368] sm:$0xf0] }
 0x19a   :  { %9353 = vmatpush.bf16.msrb.mxu3 %v17070_v31  ;;  %v19459_v30 = vadd.f32 %v9100_v20, %v9088_v17  ;;  %v9063_v31 = vpop.f32.mrf.mxu0  ;;  %v17632_v17 = vld [vmem:[#allocation2 + $0x528] sm:$0xf0]  ;;  %v16482_v20 = vor.u32 %v18643_v57, %v16479_v61  ;;  %v12145_v57 = vld [vmem:[#allocation2 + $0x2e0] sm:$0xf] }
 0x19b   :  { %9315 = vmatpush.bf16.msrb.mxu0 %v16370_v46  ;;  %v9076_v46 = vpop.f32.mrf.mxu1  ;;  %v9089_v1 = vpop.f32.mrf.mxu2  ;;  %v12426_v13 = vor.u32 %v17632_v17, %v12425_v16  ;;  %v17555_v16 = vld [vmem:[#allocation2 + $0x2c0] sm:$0xf0]  ;;  %v12341_v17 = vld [vmem:[#allocation2 + $0x468] sm:$0xf] }
 0x19c   :  { %9328 = vmatpush.bf16.msrb.mxu1 %v16594_v48  ;;  %v16507_v48 = vld [vmem:[#allocation2 + $0x2514] sm:$0xf0]  ;;  %v12369_v1 = vld [vmem:[#allocation2 + $0x4a0] sm:$0xf] }
 0x19d   :  { %9341 = vmatpush.bf16.msrb.mxu2 %v16818_v49  ;;  %v18706_v49 = vld [vmem:[#allocation2 + $0x26bc] sm:$0xf]  ;;  %v16510_v55 = vor.u32 %v18650_v45, %v16507_v48  ;;  %v17513_v45 = vld [vmem:[#allocation2 + $0x170] sm:$0xf0]  ;;  %v12173_v46 = vld [vmem:[#allocation2 + $0x318] sm:$0xf] }
 0x19e   :  { %9354 = vmatpush.bf16.msrb.mxu3 %v17042_v54  ;;  %v16255_v54 = vld [vmem:[#allocation2 + $0x231c] sm:$0xf0]  ;;  %v16734_v56 = vor.u32 %v18706_v49, %v16731_v50  ;;  %v17569_v48 = vld [vmem:[#allocation2 + $0x330] sm:$0xf0]  ;;  %v12397_v49 = vld [vmem:[#allocation2 + $0x4d8] sm:$0xf] }
 0x19f   :  { %9316 = vmatpush.bf16.msrb.mxu0 %v16342_v3  ;;  %v16958_v3 = vor.u32 %v18762_v51, %v16955_v52  ;;  %v16258_v15 = vor.u32 %v18587_v53, %v16255_v54  ;;  %v17625_v50 = vld [vmem:[#allocation2 + $0x4f0] sm:$0xf0]  ;;  %v12621_v51 = vld [vmem:[#allocation2 + $0x698] sm:$0xf]  ;;  %v12174_v53 = vor.u32 %v17569_v48, %v12173_v46 }
 0x1a0   :  { %9329 = vmatpush.bf16.msrb.mxu1 %v16566_v63  ;;  %v16703_v63 = vld [vmem:[#allocation2 + $0x269c] sm:$0xf0]  ;;  %v17681_v52 = vld [vmem:[#allocation2 + $0x6b0] sm:$0xf0]  ;;  %v12398_v54 = vor.u32 %v17625_v50, %v12397_v49  ;;  %v17548_v49 = vld [vmem:[#allocation2 + $0x288] sm:$0xf0] }
 0x1a1   :  { %9342 = vmatpush.bf16.msrb.mxu2 %v16790_v4  ;;  %v18755_v4 = vld [vmem:[#allocation2 + $0x2844] sm:$0xf]  ;;  %v9102_v6 = vpop.f32.mrf.mxu3  ;;  %v16706_v23 = vor.u32 %v18699_v0, %v16703_v63  ;;  %v12622_v61 = vor.u32 %v17681_v52, %v12621_v51  ;;  %v17562_v0 = vld [vmem:[#allocation2 + $0x2f8] sm:$0xf0]  ;;  %v12593_v63 = vld [vmem:[#allocation2 + $0x660] sm:$0xf] }
 0x1a2   :  { %9355 = vmatpush.bf16.msrb.mxu3 %v17014_v14  ;;  %v12201_v14 = vld [vmem:[#allocation2 + $0x350] sm:$0xf]  ;;  %v16930_v31 = vor.u32 %v18755_v4, %v16927_v5  ;;  %v17674_v4 = vld [vmem:[#allocation2 + $0x678] sm:$0xf0]  ;;  %v12146_v6 = vor.u32 %v17562_v0, %v12145_v57  ;;  %v17604_v51 = vld [vmem:[#allocation2 + $0x448] sm:$0xf0] }
 0x1a3   :  { %9317 = vmatpush.bf16.msrb.mxu0 %v16314_v27  ;;  %v17688_v27 = vld [vmem:[#allocation2 + $0x6e8] sm:$0xf0]  ;;  %v12313_v50 = vld [vmem:[#allocation2 + $0x430] sm:$0xf]  ;;  %v11837_v57 = vld [vmem:[#allocation2 + $0x78] sm:$0xf] }
 0x1a4   :  { %9330 = vmatpush.bf16.msrb.mxu1 %v16538_v37  ;;  %v11978_v37 = vor.u32 %v17520_v10, %v11977_v9  ;;  %v11893_v10 = vld [vmem:[#allocation2 + $0xe8] sm:$0xf]  ;;  %v12537_v52 = vld [vmem:[#allocation2 + $0x5f0] sm:$0xf]  ;;  %v12061_v0 = vld [vmem:[#allocation2 + $0x238] sm:$0xf] }
 0x1a5   :  { %9343 = vmatpush.bf16.msrb.mxu2 %v16762_v19  ;;  %v12202_v19 = vor.u32 %v17576_v58, %v12201_v14  ;;  %v17499_v14 = vld [vmem:[#allocation2 + $0x100] sm:$0xf0]  ;;  %v12594_v58 = vor.u32 %v17674_v4, %v12593_v63  ;;  %v12285_v63 = vld [vmem:[#allocation2 + $0x3f8] sm:$0xf]  ;;  %v17597_v4 = vld [vmem:[#allocation2 + $0x410] sm:$0xf0] }
 0x1a6   :  { %9356 = vmatpush.bf16.msrb.mxu3 %v16986_v62  ;;  %v12650_v62 = vor.u32 %v17688_v27, %v12649_v25  ;;  %v17667_v25 = vld [vmem:[#allocation2 + $0x640] sm:$0xf0]  ;;  %v11894_v27 = vor.u32 %v17499_v14, %v11893_v10  ;;  %v17653_v10 = vld [vmem:[#allocation2 + $0x5d0] sm:$0xf0] }
 0x1a7   :  { %9318 = vmatpush.bf16.msrb.mxu0 %v16286_v11  ;;  %v11950_v11 = vor.u32 %v17513_v45, %v11949_v41  ;;  %v17492_v41 = vld [vmem:[#allocation2 + $0xc8] sm:$0xf0]  ;;  %v12089_v45 = vld [vmem:[#allocation2 + $0x270] sm:$0xf] }
 0x1a8   :  { %9331 = vmatpush.bf16.msrb.mxu1 %v16510_v55  ;;  %v11921_v55 = vld [vmem:[#allocation2 + $0x120] sm:$0xf] }
 0x1a9   :  { %9344 = vmatpush.bf16.msrb.mxu2 %v16734_v56  ;;  %v17506_v56 = vld [vmem:[#allocation2 + $0x138] sm:$0xf0] }
 0x1aa   :  { %9357 = vmatpush.bf16.msrb.mxu3 %v16958_v3  ;;  %v17618_v3 = vld [vmem:[#allocation2 + $0x4b8] sm:$0xf0]  ;;  %v11922_v5 = vor.u32 %v17506_v56, %v11921_v55  ;;  %v12090_v55 = vor.u32 %v17548_v49, %v12089_v45  ;;  %v12314_v56 = vor.u32 %v17604_v51, %v12313_v50  ;;  %v12005_v51 = vld [vmem:[#allocation2 + $0x1c8] sm:$0xf] }
 0x1ab   :  { %9319 = vmatpush.bf16.msrb.mxu0 %v16258_v15  ;;  %v12370_v9 = vor.u32 %v17618_v3, %v12369_v1  ;;  %v12117_v15 = vld [vmem:[#allocation2 + $0x2a8] sm:$0xf]  ;;  %v17541_v3 = vld [vmem:[#allocation2 + $0x250] sm:$0xf0]  ;;  %v17646_v45 = vld [vmem:[#allocation2 + $0x598] sm:$0xf0] }
 0x1ac   :  { %9332 = vmatpush.bf16.msrb.mxu1 %v16482_v20  ;;  %v17611_v20 = vld [vmem:[#allocation2 + $0x480] sm:$0xf0] }
 0x1ad   :  { %9345 = vmatpush.bf16.msrb.mxu2 %v16706_v23  ;;  %v12565_v23 = vld [vmem:[#allocation2 + $0x628] sm:$0xf] }
 0x1ae   :  { %9358 = vmatpush.bf16.msrb.mxu3 %v16930_v31  ;;  %9320 = vmatmul.bf16.vlgmr.msrb.gmra.mxu0 %v19413_v2  ;;  %v9113_v31 = vpop.f32.mrf.mxu0  ;;  %v12566_v48 = vor.u32 %v17667_v25, %v12565_v23  ;;  %v17478_v23 = vld [vmem:[#allocation2 + $0x58] sm:$0xf0]  ;;  %v12033_v25 = vld [vmem:[#allocation2 + $0x200] sm:$0xf] }
 0x1af   :  { %9364 = vmatpush.bf16.msra.mxu0 %v11978_v37  ;;  %9333 = vmatmul.bf16.vlgmr.msrb.gmra.mxu1 %v19417_v8  ;;  %v12118_v37 = vor.u32 %v17555_v16, %v12117_v15  ;;  %v9114_v46 = vadd.f32 %v9113_v31, %v19459_v30  ;;  %v12062_v16 = vor.u32 %v17541_v3, %v12061_v0  ;;  %v12873_v0 = vld [vmem:[#allocation2 + $0x890] sm:$0xf] }
 0x1b0   :  { %9377 = vmatpush.bf16.msra.mxu1 %v12202_v19  ;;  %9346 = vmatmul.bf16.vlgmr.msrb.gmra.mxu2 %v19415_v7  ;;  %v12342_v19 = vor.u32 %v17611_v20, %v12341_v17  ;;  %v12286_v17 = vor.u32 %v17597_v4, %v12285_v63  ;;  %v11809_v20 = vld [vmem:[#allocation2 + $0x40] sm:$0xf]  ;;  %v17800_v63 = vld [vmem:[#allocation2 + $0xa68] sm:$0xf0]  ;;  %v13321_v4 = vld [vmem:[#allocation2 + $0xc10] sm:$0xf] }
 0x1b1   :  { %9390 = vmatpush.bf16.msra.mxu2 %v12426_v13  ;;  %9359 = vmatmul.bf16.vlgmr.msrb.gmra.mxu3 %v19419_v12  ;;  %v11865_v13 = vld [vmem:[#allocation2 + $0xb0] sm:$0xf] }
 0x1b2   :  { %9403 = vmatpush.bf16.msra.mxu3 %v12650_v62  ;;  %v9126_v62 = vpop.f32.mrf.mxu1 }
 0x1b3   :  { %9365 = vmatpush.bf16.msra.mxu0 %v11950_v11  ;;  %v17660_v11 = vld [vmem:[#allocation2 + $0x608] sm:$0xf0]  ;;  %v9139_v1 = vpop.f32.mrf.mxu2 }
 0x1b4   :  { %9378 = vmatpush.bf16.msra.mxu1 %v12174_v53  ;;  %v9127_v53 = vadd.f32 %v9126_v62, %v9114_v46  ;;  %v12538_v30 = vor.u32 %v17660_v11, %v12537_v52  ;;  %v11810_v46 = vor.u32 %v17478_v23, %v11809_v20  ;;  %v11781_v62 = vld [vmem:[#allocation2 + $0x8] sm:$0xf]  ;;  %v17527_v52 = vld [vmem:[#allocation2 + $0x1e0] sm:$0xf0]  ;;  %v12845_v23 = vld [vmem:[#allocation2 + $0x858] sm:$0xf] }
 0x1b5   :  { %9391 = vmatpush.bf16.msra.mxu2 %v12398_v54  ;;  %v11866_v54 = vor.u32 %v17492_v41, %v11865_v13  ;;  %v17590_v13 = vld [vmem:[#allocation2 + $0x3d8] sm:$0xf0]  ;;  %v12481_v41 = vld [vmem:[#allocation2 + $0x580] sm:$0xf]  ;;  %v12229_v11 = vld [vmem:[#allocation2 + $0x388] sm:$0xf] }
 0x1b6   :  { %9404 = vmatpush.bf16.msra.mxu3 %v12622_v61  ;;  %v17485_v61 = vld [vmem:[#allocation2 + $0x90] sm:$0xf0] }
 0x1b7   :  { %9366 = vmatpush.bf16.msra.mxu0 %v11922_v5  ;;  %v9140_v5 = vadd.f32 %v9139_v1, %v9127_v53  ;;  %v11838_v14 = vor.u32 %v17485_v61, %v11837_v57  ;;  %v17639_v57 = vld [vmem:[#allocation2 + $0x560] sm:$0xf0]  ;;  %v17744_v1 = vld [vmem:[#allocation2 + $0x8a8] sm:$0xf0] }
 0x1b8   :  { %9379 = vmatpush.bf16.msra.mxu1 %v12146_v6  ;;  %v9152_v6 = vpop.f32.mrf.mxu3 }
 0x1b9   :  { %9392 = vmatpush.bf16.msra.mxu2 %v12370_v9  ;;  %v12509_v9 = vld [vmem:[#allocation2 + $0x5b8] sm:$0xf]  ;;  %v19466_v15 = vadd.f32 %v9152_v6, %v9140_v5  ;;  %v17856_v5 = vld [vmem:[#allocation2 + $0xc28] sm:$0xf0]  ;;  %v12006_v6 = vor.u32 %v17527_v52, %v12005_v51  ;;  %v13041_v51 = vld [vmem:[#allocation2 + $0x9e0] sm:$0xf] }
 0x1ba   :  { %9405 = vmatpush.bf16.msra.mxu3 %v12594_v58  ;;  %v9115_v58 = vpop.f32.mrf.mxu0  ;;  %v12510_v31 = vor.u32 %v17653_v10, %v12509_v9  ;;  %v13545_v10 = vld [vmem:[#allocation2 + $0xdd0] sm:$0xf]  ;;  %v13322_v20 = vor.u32 %v17856_v5, %v13321_v4  ;;  %v17779_v4 = vld [vmem:[#allocation2 + $0x9c0] sm:$0xf0]  ;;  %v13237_v5 = vld [vmem:[#allocation2 + $0xb68] sm:$0xf] }
 0x1bb   :  { %9367 = vmatpush.bf16.msra.mxu0 %v11894_v27  ;;  %v9128_v27 = vpop.f32.mrf.mxu1  ;;  %v9141_v53 = vpop.f32.mrf.mxu2 }
 0x1bc   :  { %9380 = vmatpush.bf16.msra.mxu1 %v12118_v37  ;;  %v17534_v37 = vld [vmem:[#allocation2 + $0x218] sm:$0xf0]  ;;  %v13069_v27 = vld [vmem:[#allocation2 + $0xa18] sm:$0xf]  ;;  %v13265_v53 = vld [vmem:[#allocation2 + $0xba0] sm:$0xf] }
 0x1bd   :  { %9393 = vmatpush.bf16.msra.mxu2 %v12342_v19  ;;  %v12257_v19 = vld [vmem:[#allocation2 + $0x3c0] sm:$0xf]  ;;  %v12034_v49 = vor.u32 %v17534_v37, %v12033_v25  ;;  %v17737_v25 = vld [vmem:[#allocation2 + $0x870] sm:$0xf0] }
 0x1be   :  { %9406 = vmatpush.bf16.msra.mxu3 %v12566_v48  ;;  %v17471_v48 = vld [vmem:[#allocation2 + $0x20] sm:$0xf0]  ;;  %v12258_v50 = vor.u32 %v17590_v13, %v12257_v19  ;;  %v17793_v37 = vld [vmem:[#allocation2 + $0xa30] sm:$0xf0]  ;;  %v13293_v19 = vld [vmem:[#allocation2 + $0xbd8] sm:$0xf] }
 0x1bf   :  { %9368 = vmatpush.bf16.msra.mxu0 %v11866_v54  ;;  %v12482_v54 = vor.u32 %v17646_v45, %v12481_v41  ;;  %v11782_v3 = vor.u32 %v17471_v48, %v11781_v62  ;;  %v17849_v13 = vld [vmem:[#allocation2 + $0xbf0] sm:$0xf0]  ;;  %v13517_v41 = vld [vmem:[#allocation2 + $0xd98] sm:$0xf]  ;;  %v13070_v62 = vor.u32 %v17793_v37, %v13069_v27  ;;  %v17716_v27 = vld [vmem:[#allocation2 + $0x7c8] sm:$0xf0] }
 0x1c0   :  { %9381 = vmatpush.bf16.msra.mxu1 %v12090_v55  ;;  %v17583_v55 = vld [vmem:[#allocation2 + $0x3a0] sm:$0xf0]  ;;  %v9154_v61 = vpop.f32.mrf.mxu3  ;;  %v17905_v45 = vld [vmem:[#allocation2 + $0xdb0] sm:$0xf0]  ;;  %v13294_v48 = vor.u32 %v17849_v13, %v13293_v19  ;;  %v17772_v13 = vld [vmem:[#allocation2 + $0x988] sm:$0xf0] }
 0x1c1   :  { %9394 = vmatpush.bf16.msra.mxu2 %v12314_v56  ;;  %v12453_v56 = vld [vmem:[#allocation2 + $0x548] sm:$0xf]  ;;  %v12230_v9 = vor.u32 %v17583_v55, %v12229_v11  ;;  %v13518_v52 = vor.u32 %v17905_v45, %v13517_v41  ;;  %v17786_v11 = vld [vmem:[#allocation2 + $0x9f8] sm:$0xf0]  ;;  %v13489_v55 = vld [vmem:[#allocation2 + $0xd60] sm:$0xf] }
 0x1c2   :  { %9407 = vmatpush.bf16.msra.mxu3 %v12538_v30  ;;  %v13097_v30 = vld [vmem:[#allocation2 + $0xa50] sm:$0xf]  ;;  %v12454_v58 = vor.u32 %v17639_v57, %v12453_v56  ;;  %v17898_v56 = vld [vmem:[#allocation2 + $0xd78] sm:$0xf0]  ;;  %v13042_v61 = vor.u32 %v17786_v11, %v13041_v51  ;;  %v17828_v45 = vld [vmem:[#allocation2 + $0xb48] sm:$0xf0] }
 0x1c3   :  { %9369 = vmatpush.bf16.msra.mxu0 %v11838_v14  ;;  %v17912_v14 = vld [vmem:[#allocation2 + $0xde8] sm:$0xf0]  ;;  %v13209_v41 = vld [vmem:[#allocation2 + $0xb30] sm:$0xf]  ;;  %v17709_v51 = vld [vmem:[#allocation2 + $0x790] sm:$0xf0] }
 0x1c4   :  { %9382 = vmatpush.bf16.msra.mxu1 %v12062_v16  ;;  %v12874_v16 = vor.u32 %v17744_v1, %v12873_v0  ;;  %v12789_v1 = vld [vmem:[#allocation2 + $0x7e8] sm:$0xf] }
 0x1c5   :  { %9395 = vmatpush.bf16.msra.mxu2 %v12286_v17  ;;  %v13098_v17 = vor.u32 %v17800_v63, %v13097_v30  ;;  %v17723_v30 = vld [vmem:[#allocation2 + $0x800] sm:$0xf0]  ;;  %v13490_v63 = vor.u32 %v17898_v56, %v13489_v55  ;;  %v13181_v55 = vld [vmem:[#allocation2 + $0xaf8] sm:$0xf]  ;;  %v17821_v56 = vld [vmem:[#allocation2 + $0xb10] sm:$0xf0] }
 0x1c6   :  { %9408 = vmatpush.bf16.msra.mxu3 %v12510_v31  ;;  %v13546_v31 = vor.u32 %v17912_v14, %v13545_v10  ;;  %v13461_v10 = vld [vmem:[#allocation2 + $0xd28] sm:$0xf]  ;;  %v17891_v14 = vld [vmem:[#allocation2 + $0xd40] sm:$0xf0] }
 0x1c7   :  { %9370 = vmatpush.bf16.msra.mxu0 %v11810_v46  ;;  %v12846_v46 = vor.u32 %v17737_v25, %v12845_v23  ;;  %v12761_v25 = vld [vmem:[#allocation2 + $0x7b0] sm:$0xf]  ;;  %v13462_v37 = vor.u32 %v17891_v14, %v13461_v10  ;;  %v17702_v10 = vld [vmem:[#allocation2 + $0x758] sm:$0xf0]  ;;  %v12929_v14 = vld [vmem:[#allocation2 + $0x900] sm:$0xf] }
 0x1c8   :  { %9383 = vmatpush.bf16.msra.mxu1 %v12034_v49  ;;  %v12817_v49 = vld [vmem:[#allocation2 + $0x820] sm:$0xf] }
 0x1c9   :  { %9396 = vmatpush.bf16.msra.mxu2 %v12258_v50  ;;  %v17730_v50 = vld [vmem:[#allocation2 + $0x838] sm:$0xf0] }
 0x1ca   :  { %9409 = vmatpush.bf16.msra.mxu3 %v12482_v54  ;;  %v17842_v54 = vld [vmem:[#allocation2 + $0xbb8] sm:$0xf0]  ;;  %v12818_v57 = vor.u32 %v17730_v50, %v12817_v49  ;;  %v13210_v49 = vor.u32 %v17828_v45, %v13209_v41  ;;  %v12733_v50 = vld [vmem:[#allocation2 + $0x778] sm:$0xf]  ;;  %v12901_v41 = vld [vmem:[#allocation2 + $0x8c8] sm:$0xf] }
 0x1cb   :  { %9371 = vmatpush.bf16.msra.mxu0 %v11782_v3  ;;  %v13266_v0 = vor.u32 %v17842_v54, %v13265_v53  ;;  %v13013_v3 = vld [vmem:[#allocation2 + $0x9a8] sm:$0xf]  ;;  %v17765_v54 = vld [vmem:[#allocation2 + $0x950] sm:$0xf0]  ;;  %v17751_v45 = vld [vmem:[#allocation2 + $0x8e0] sm:$0xf0] }
 0x1cc   :  { %9384 = vmatpush.bf16.msra.mxu1 %v12006_v6  ;;  %v17835_v6 = vld [vmem:[#allocation2 + $0xb80] sm:$0xf0] }
 0x1cd   :  { %9397 = vmatpush.bf16.msra.mxu2 %v12230_v9  ;;  %v9165_v9 = vpop.f32.mrf.mxu0  ;;  %v13238_v23 = vor.u32 %v17835_v6, %v13237_v5  ;;  %v13182_v6 = vor.u32 %v17821_v56, %v13181_v55  ;;  %v18024_v55 = vld [vmem:[#allocation2 + $0x1168] sm:$0xf0]  ;;  %v14217_v56 = vld [vmem:[#allocation2 + $0x1310] sm:$0xf] }
 0x1ce   :  { %9410 = vmatpush.bf16.msra.mxu3 %v12454_v58  ;;  %9372 = vmatmul.bf16.vlgmr.msra.gmra.mxu0 %v19311_v36  ;;  %v9166_v58 = vadd.f32 %v9165_v9, %v19466_v15  ;;  %v12705_v9 = vld [vmem:[#allocation2 + $0x740] sm:$0xf] }
 0x1cf   :  { %9416 = vmatpush.bf16.msrb.mxu0 %v12874_v16  ;;  %9385 = vmatmul.bf16.vlgmr.msra.gmra.mxu1 %v19315_v43  ;;  %v12790_v16 = vor.u32 %v17723_v30, %v12789_v1  ;;  %v17877_v1 = vld [vmem:[#allocation2 + $0xcd0] sm:$0xf0] }
 0x1d0   :  { %9429 = vmatpush.bf16.msrb.mxu1 %v13098_v17  ;;  %9398 = vmatmul.bf16.vlgmr.msra.gmra.mxu2 %v19309_v35  ;;  %v9178_v17 = vpop.f32.mrf.mxu1 }
 0x1d1   :  { %9442 = vmatpush.bf16.msrb.mxu2 %v13322_v20  ;;  %9411 = vmatmul.bf16.vlgmr.msra.gmra.mxu3 %v19313_v42  ;;  %v13014_v20 = vor.u32 %v17779_v4, %v13013_v3  ;;  %v9179_v19 = vadd.f32 %v9178_v17, %v9166_v58  ;;  %v12734_v3 = vor.u32 %v17709_v51, %v12733_v50  ;;  %v13153_v17 = vld [vmem:[#allocation2 + $0xac0] sm:$0xf]  ;;  %v13769_v51 = vld [vmem:[#allocation2 + $0xf90] sm:$0xf] }
 0x1d2   :  { %9455 = vmatpush.bf16.msrb.mxu3 %v13546_v31  ;;  %v12985_v31 = vld [vmem:[#allocation2 + $0x970] sm:$0xf] }
 0x1d3   :  { %9417 = vmatpush.bf16.msrb.mxu0 %v12846_v46  ;;  %v13433_v46 = vld [vmem:[#allocation2 + $0xcf0] sm:$0xf]  ;;  %v12986_v15 = vor.u32 %v17772_v13, %v12985_v31  ;;  %v9191_v53 = vpop.f32.mrf.mxu2  ;;  %v12677_v31 = vld [vmem:[#allocation2 + $0x708] sm:$0xf] }
 0x1d4   :  { %9430 = vmatpush.bf16.msrb.mxu1 %v13070_v62  ;;  %v17884_v62 = vld [vmem:[#allocation2 + $0xd08] sm:$0xf0] }
 0x1d5   :  { %9443 = vmatpush.bf16.msrb.mxu2 %v13294_v48  ;;  %v12762_v48 = vor.u32 %v17716_v27, %v12761_v25  ;;  %v13434_v11 = vor.u32 %v17884_v62, %v13433_v46  ;;  %v9167_v30 = vpop.f32.mrf.mxu0  ;;  %v17870_v25 = vld [vmem:[#allocation2 + $0xc98] sm:$0xf0]  ;;  %v12706_v27 = vor.u32 %v17702_v10, %v12705_v9  ;;  %v13125_v46 = vld [vmem:[#allocation2 + $0xa88] sm:$0xf]  ;;  %v13741_v9 = vld [vmem:[#allocation2 + $0xf58] sm:$0xf] }
 0x1d6   :  { %9456 = vmatpush.bf16.msrb.mxu3 %v13518_v52  ;;  %v12957_v52 = vld [vmem:[#allocation2 + $0x938] sm:$0xf]  ;;  %v18136_v30 = vld [vmem:[#allocation2 + $0x14e8] sm:$0xf0]  ;;  %v17961_v10 = vld [vmem:[#allocation2 + $0xf70] sm:$0xf0] }
 0x1d7   :  { %9418 = vmatpush.bf16.msrb.mxu0 %v12818_v57  ;;  %v9192_v57 = vadd.f32 %v9191_v53, %v9179_v19  ;;  %v12958_v5 = vor.u32 %v17765_v54, %v12957_v52  ;;  %v17968_v52 = vld [vmem:[#allocation2 + $0xfa8] sm:$0xf0] }
 0x1d8   :  { %9431 = vmatpush.bf16.msrb.mxu1 %v13042_v61  ;;  %v9204_v61 = vpop.f32.mrf.mxu3 }
 0x1d9   :  { %9444 = vmatpush.bf16.msrb.mxu2 %v13266_v0  ;;  %v13405_v0 = vld [vmem:[#allocation2 + $0xcb8] sm:$0xf]  ;;  %v19473_v4 = vadd.f32 %v9204_v61, %v9192_v57  ;;  %v18080_v57 = vld [vmem:[#allocation2 + $0x1328] sm:$0xf0]  ;;  %v12902_v61 = vor.u32 %v17751_v45, %v12901_v41  ;;  %v13937_v41 = vld [vmem:[#allocation2 + $0x10e0] sm:$0xf] }
 0x1da   :  { %9457 = vmatpush.bf16.msrb.mxu3 %v13490_v63  ;;  %v9180_v63 = vpop.f32.mrf.mxu1  ;;  %v13406_v58 = vor.u32 %v17877_v1, %v13405_v0  ;;  %v14441_v1 = vld [vmem:[#allocation2 + $0x14d0] sm:$0xf] }
 0x1db   :  { %9419 = vmatpush.bf16.msrb.mxu0 %v12790_v16  ;;  %v17758_v16 = vld [vmem:[#allocation2 + $0x918] sm:$0xf0]  ;;  %v9193_v50 = vpop.f32.mrf.mxu2  ;;  %v13770_v63 = vor.u32 %v17968_v52, %v13769_v51 }
 0x1dc   :  { %9432 = vmatpush.bf16.msrb.mxu1 %v13014_v20  ;;  %v17814_v20 = vld [vmem:[#allocation2 + $0xad8] sm:$0xf0]  ;;  %v12930_v19 = vor.u32 %v17758_v16, %v12929_v14  ;;  %v13965_v14 = vld [vmem:[#allocation2 + $0x1118] sm:$0xf]  ;;  %v18017_v16 = vld [vmem:[#allocation2 + $0x1130] sm:$0xf0] }
 0x1dd   :  { %9445 = vmatpush.bf16.msrb.mxu2 %v13238_v23  ;;  %v13377_v23 = vld [vmem:[#allocation2 + $0xc80] sm:$0xf]  ;;  %v13154_v13 = vor.u32 %v17814_v20, %v13153_v17  ;;  %v14189_v17 = vld [vmem:[#allocation2 + $0x12d8] sm:$0xf]  ;;  %v18073_v20 = vld [vmem:[#allocation2 + $0x12f0] sm:$0xf0] }
 0x1de   :  { %9458 = vmatpush.bf16.msrb.mxu3 %v13462_v37  ;;  %v17695_v37 = vld [vmem:[#allocation2 + $0x720] sm:$0xf0]  ;;  %v13378_v62 = vor.u32 %v17870_v25, %v13377_v23  ;;  %v14413_v23 = vld [vmem:[#allocation2 + $0x1498] sm:$0xf]  ;;  %v18129_v25 = vld [vmem:[#allocation2 + $0x14b0] sm:$0xf0] }
 0x1df   :  { %9420 = vmatpush.bf16.msrb.mxu0 %v12762_v48  ;;  %v17807_v48 = vld [vmem:[#allocation2 + $0xaa0] sm:$0xf0]  ;;  %v12678_v54 = vor.u32 %v17695_v37, %v12677_v31  ;;  %v13966_v31 = vor.u32 %v18017_v16, %v13965_v14  ;;  %v14190_v37 = vor.u32 %v18073_v20, %v14189_v17  ;;  %v14414_v45 = vor.u32 %v18129_v25, %v14413_v23  ;;  %v17940_v14 = vld [vmem:[#allocation2 + $0xec8] sm:$0xf0]  ;;  %v14105_v23 = vld [vmem:[#allocation2 + $0x1230] sm:$0xf] }
 0x1e0   :  { %9433 = vmatpush.bf16.msrb.mxu1 %v12986_v15  ;;  %v13349_v15 = vld [vmem:[#allocation2 + $0xc48] sm:$0xf]  ;;  %v9206_v53 = vpop.f32.mrf.mxu3  ;;  %v13126_v0 = vor.u32 %v17807_v48, %v13125_v46  ;;  %v18010_v46 = vld [vmem:[#allocation2 + $0x10f8] sm:$0xf0]  ;;  %v17996_v20 = vld [vmem:[#allocation2 + $0x1088] sm:$0xf0] }
 0x1e1   :  { %9446 = vmatpush.bf16.msrb.mxu2 %v13210_v49  ;;  %v17863_v49 = vld [vmem:[#allocation2 + $0xc60] sm:$0xf0]  ;;  %v18066_v48 = vld [vmem:[#allocation2 + $0x12b8] sm:$0xf0]  ;;  %v13938_v51 = vor.u32 %v18010_v46, %v13937_v41  ;;  %v18052_v25 = vld [vmem:[#allocation2 + $0x1248] sm:$0xf0] }
 0x1e2   :  { %9459 = vmatpush.bf16.msrb.mxu3 %v13434_v11  ;;  %v13993_v11 = vld [vmem:[#allocation2 + $0x1150] sm:$0xf]  ;;  %v17947_v53 = vld [vmem:[#allocation2 + $0xf00] sm:$0xf0]  ;;  %v17933_v41 = vld [vmem:[#allocation2 + $0xe90] sm:$0xf0] }
 0x1e3   :  { %9421 = vmatpush.bf16.msrb.mxu0 %v12734_v3  ;;  %v13350_v3 = vor.u32 %v17863_v49, %v13349_v15  ;;  %v14385_v15 = vld [vmem:[#allocation2 + $0x1460] sm:$0xf]  ;;  %v18122_v49 = vld [vmem:[#allocation2 + $0x1478] sm:$0xf0] }
 0x1e4   :  { %9434 = vmatpush.bf16.msrb.mxu1 %v12958_v5  ;;  %v13994_v5 = vor.u32 %v18024_v55, %v13993_v11  ;;  %v13685_v11 = vld [vmem:[#allocation2 + $0xee8] sm:$0xf]  ;;  %v14386_v55 = vor.u32 %v18122_v49, %v14385_v15  ;;  %v14077_v15 = vld [vmem:[#allocation2 + $0x11f8] sm:$0xf]  ;;  %v18045_v49 = vld [vmem:[#allocation2 + $0x1210] sm:$0xf0] }
 0x1e5   :  { %9447 = vmatpush.bf16.msrb.mxu2 %v13182_v6  ;;  %v14218_v6 = vor.u32 %v18080_v57, %v14217_v56  ;;  %v18003_v56 = vld [vmem:[#allocation2 + $0x10c0] sm:$0xf0]  ;;  %v14133_v57 = vld [vmem:[#allocation2 + $0x1268] sm:$0xf] }
 0x1e6   :  { %9460 = vmatpush.bf16.msrb.mxu3 %v13406_v58  ;;  %v14442_v58 = vor.u32 %v18136_v30, %v14441_v1  ;;  %v14357_v1 = vld [vmem:[#allocation2 + $0x1428] sm:$0xf]  ;;  %v18115_v30 = vld [vmem:[#allocation2 + $0x1440] sm:$0xf0] }
 0x1e7   :  { %9422 = vmatpush.bf16.msrb.mxu0 %v12706_v27  ;;  %v13742_v27 = vor.u32 %v17961_v10, %v13741_v9  ;;  %v13657_v10 = vld [vmem:[#allocation2 + $0xeb0] sm:$0xf]  ;;  %v14358_v16 = vor.u32 %v18115_v30, %v14357_v1  ;;  %v17926_v1 = vld [vmem:[#allocation2 + $0xe58] sm:$0xf0]  ;;  %v13825_v30 = vld [vmem:[#allocation2 + $0x1000] sm:$0xf] }
 0x1e8   :  { %9435 = vmatpush.bf16.msrb.mxu1 %v12930_v19  ;;  %v13713_v19 = vld [vmem:[#allocation2 + $0xf20] sm:$0xf] }
 0x1e9   :  { %9448 = vmatpush.bf16.msrb.mxu2 %v13154_v13  ;;  %v17954_v13 = vld [vmem:[#allocation2 + $0xf38] sm:$0xf0] }
 0x1ea   :  { %9461 = vmatpush.bf16.msrb.mxu3 %v13378_v62  ;;  %v14161_v62 = vld [vmem:[#allocation2 + $0x12a0] sm:$0xf]  ;;  %v13714_v50 = vor.u32 %v17954_v13, %v13713_v19  ;;  %v14106_v19 = vor.u32 %v18052_v25, %v14105_v23  ;;  %v13629_v13 = vld [vmem:[#allocation2 + $0xe78] sm:$0xf]  ;;  %v13797_v23 = vld [vmem:[#allocation2 + $0xfc8] sm:$0xf] }
 0x1eb   :  { %9423 = vmatpush.bf16.msrb.mxu0 %v12678_v54  ;;  %v14162_v52 = vor.u32 %v18066_v48, %v14161_v62  ;;  %v13909_v54 = vld [vmem:[#allocation2 + $0x10a8] sm:$0xf]  ;;  %v17989_v48 = vld [vmem:[#allocation2 + $0x1050] sm:$0xf0]  ;;  %v17975_v25 = vld [vmem:[#allocation2 + $0xfe0] sm:$0xf0] }
 0x1ec   :  { %9436 = vmatpush.bf16.msrb.mxu1 %v12902_v61  ;;  %v18059_v61 = vld [vmem:[#allocation2 + $0x1280] sm:$0xf0] }
 0x1ed   :  { %9449 = vmatpush.bf16.msrb.mxu2 %v13126_v0  ;;  %v9217_v0 = vpop.f32.mrf.mxu0  ;;  %v14134_v9 = vor.u32 %v18059_v61, %v14133_v57  ;;  %v14078_v61 = vor.u32 %v18045_v49, %v14077_v15  ;;  %v18248_v15 = vld [vmem:[#allocation2 + $0x1868] sm:$0xf0]  ;;  %v15113_v49 = vld [vmem:[#allocation2 + $0x1a10] sm:$0xf] }
 0x1ee   :  { %9462 = vmatpush.bf16.msrb.mxu3 %v13350_v3  ;;  %9424 = vmatmul.bf16.vlgmr.msrb.gmra.mxu0 %v19329_v39  ;;  %v9218_v3 = vadd.f32 %v9217_v0, %v19473_v4  ;;  %v13601_v0 = vld [vmem:[#allocation2 + $0xe40] sm:$0xf] }
 0x1ef   :  { %9468 = vmatpush.bf16.msra.mxu0 %v13770_v63  ;;  %9437 = vmatmul.bf16.vlgmr.msrb.gmra.mxu1 %v19333_v44  ;;  %v13686_v63 = vor.u32 %v17947_v53, %v13685_v11  ;;  %v18101_v11 = vld [vmem:[#allocation2 + $0x13d0] sm:$0xf0] }
 0x1f0   :  { %9481 = vmatpush.bf16.msra.mxu1 %v13994_v5  ;;  %9450 = vmatmul.bf16.vlgmr.msrb.gmra.mxu2 %v19327_v34  ;;  %v9230_v5 = vpop.f32.mrf.mxu1 }
 0x1f1   :  { %9494 = vmatpush.bf16.msra.mxu2 %v14218_v6  ;;  %9463 = vmatmul.bf16.vlgmr.msrb.gmra.mxu3 %v19331_v40  ;;  %v13910_v6 = vor.u32 %v18003_v56, %v13909_v54  ;;  %v9231_v17 = vadd.f32 %v9230_v5, %v9218_v3  ;;  %v13630_v54 = vor.u32 %v17933_v41, %v13629_v13  ;;  %v14049_v5 = vld [vmem:[#allocation2 + $0x11c0] sm:$0xf]  ;;  %v14665_v41 = vld [vmem:[#allocation2 + $0x1690] sm:$0xf] }
 0x1f2   :  { %9507 = vmatpush.bf16.msra.mxu3 %v14442_v58  ;;  %v13881_v58 = vld [vmem:[#allocation2 + $0x1070] sm:$0xf] }
 0x1f3   :  { %9469 = vmatpush.bf16.msra.mxu0 %v13742_v27  ;;  %v14329_v27 = vld [vmem:[#allocation2 + $0x13f0] sm:$0xf]  ;;  %v13882_v4 = vor.u32 %v17996_v20, %v13881_v58  ;;  %v9243_v62 = vpop.f32.mrf.mxu2  ;;  %v13573_v58 = vld [vmem:[#allocation2 + $0xe08] sm:$0xf] }
 0x1f4   :  { %9482 = vmatpush.bf16.msra.mxu1 %v13966_v31  ;;  %v18108_v31 = vld [vmem:[#allocation2 + $0x1408] sm:$0xf0] }
 0x1f5   :  { %9495 = vmatpush.bf16.msra.mxu2 %v14190_v37  ;;  %v13658_v37 = vor.u32 %v17940_v14, %v13657_v10  ;;  %v14330_v46 = vor.u32 %v18108_v31, %v14329_v27  ;;  %v9219_v53 = vpop.f32.mrf.mxu0  ;;  %v18094_v10 = vld [vmem:[#allocation2 + $0x1398] sm:$0xf0]  ;;  %v13602_v14 = vor.u32 %v17926_v1, %v13601_v0  ;;  %v14021_v27 = vld [vmem:[#allocation2 + $0x1188] sm:$0xf]  ;;  %v14637_v0 = vld [vmem:[#allocation2 + $0x1658] sm:$0xf] }
 0x1f6   :  { %9508 = vmatpush.bf16.msra.mxu3 %v14414_v45  ;;  %v13853_v45 = vld [vmem:[#allocation2 + $0x1038] sm:$0xf]  ;;  %v18360_v53 = vld [vmem:[#allocation2 + $0x1be8] sm:$0xf0]  ;;  %v18185_v1 = vld [vmem:[#allocation2 + $0x1670] sm:$0xf0] }
 0x1f7   :  { %9470 = vmatpush.bf16.msra.mxu0 %v13714_v50  ;;  %v9244_v50 = vadd.f32 %v9243_v62, %v9231_v17  ;;  %v13854_v57 = vor.u32 %v17989_v48, %v13853_v45  ;;  %v18192_v45 = vld [vmem:[#allocation2 + $0x16a8] sm:$0xf0] }
 0x1f8   :  { %9483 = vmatpush.bf16.msra.mxu1 %v13938_v51  ;;  %v9256_v51 = vpop.f32.mrf.mxu3 }
 0x1f9   :  { %9496 = vmatpush.bf16.msra.mxu2 %v14162_v52  ;;  %v14301_v52 = vld [vmem:[#allocation2 + $0x13b8] sm:$0xf]  ;;  %v19480_v56 = vadd.f32 %v9256_v51, %v9244_v50  ;;  %v18304_v50 = vld [vmem:[#allocation2 + $0x1a28] sm:$0xf0]  ;;  %v13798_v51 = vor.u32 %v17975_v25, %v13797_v23  ;;  %v14833_v23 = vld [vmem:[#allocation2 + $0x17e0] sm:$0xf] }
 0x1fa   :  { %9509 = vmatpush.bf16.msra.mxu3 %v14386_v55  ;;  %v9232_v55 = vpop.f32.mrf.mxu1  ;;  %v14302_v3 = vor.u32 %v18101_v11, %v14301_v52  ;;  %v15337_v11 = vld [vmem:[#allocation2 + $0x1bd0] sm:$0xf] }
 0x1fb   :  { %9471 = vmatpush.bf16.msra.mxu0 %v13686_v63  ;;  %v17982_v63 = vld [vmem:[#allocation2 + $0x1018] sm:$0xf0]  ;;  %v9245_v13 = vpop.f32.mrf.mxu2  ;;  %v14666_v55 = vor.u32 %v18192_v45, %v14665_v41 }
 0x1fc   :  { %9484 = vmatpush.bf16.msra.mxu1 %v13910_v6  ;;  %v18038_v6 = vld [vmem:[#allocation2 + $0x11d8] sm:$0xf0]  ;;  %v13826_v17 = vor.u32 %v17982_v63, %v13825_v30  ;;  %v14861_v30 = vld [vmem:[#allocation2 + $0x1818] sm:$0xf]  ;;  %v18241_v63 = vld [vmem:[#allocation2 + $0x1830] sm:$0xf0] }
 0x1fd   :  { %9497 = vmatpush.bf16.msra.mxu2 %v14134_v9  ;;  %v14273_v9 = vld [vmem:[#allocation2 + $0x1380] sm:$0xf]  ;;  %v14050_v20 = vor.u32 %v18038_v6, %v14049_v5  ;;  %v15085_v5 = vld [vmem:[#allocation2 + $0x19d8] sm:$0xf]  ;;  %v18297_v6 = vld [vmem:[#allocation2 + $0x19f0] sm:$0xf0] }
 0x1fe   :  { %9510 = vmatpush.bf16.msra.mxu3 %v14358_v16  ;;  %v17919_v16 = vld [vmem:[#allocation2 + $0xe20] sm:$0xf0]  ;;  %v14274_v31 = vor.u32 %v18094_v10, %v14273_v9  ;;  %v15309_v9 = vld [vmem:[#allocation2 + $0x1b98] sm:$0xf]  ;;  %v18353_v10 = vld [vmem:[#allocation2 + $0x1bb0] sm:$0xf0] }
 0x1ff   :  { %9472 = vmatpush.bf16.msra.mxu0 %v13658_v37  ;;  %v18031_v37 = vld [vmem:[#allocation2 + $0x11a0] sm:$0xf0]  ;;  %v13574_v48 = vor.u32 %v17919_v16, %v13573_v58  ;;  %v14862_v58 = vor.u32 %v18241_v63, %v14861_v30  ;;  %v15086_v16 = vor.u32 %v18297_v6, %v15085_v5  ;;  %v15310_v25 = vor.u32 %v18353_v10, %v15309_v9  ;;  %v18164_v30 = vld [vmem:[#allocation2 + $0x15c8] sm:$0xf0]  ;;  %v15001_v9 = vld [vmem:[#allocation2 + $0x1930] sm:$0xf] }
 0x200   :  { %9485 = vmatpush.bf16.msra.mxu1 %v13882_v4  ;;  %v14245_v4 = vld [vmem:[#allocation2 + $0x1348] sm:$0xf]  ;;  %v9258_v62 = vpop.f32.mrf.mxu3  ;;  %v14022_v52 = vor.u32 %v18031_v37, %v14021_v27  ;;  %v18234_v27 = vld [vmem:[#allocation2 + $0x17f8] sm:$0xf0]  ;;  %v18220_v6 = vld [vmem:[#allocation2 + $0x1788] sm:$0xf0] }
 0x201   :  { %9498 = vmatpush.bf16.msra.mxu2 %v14106_v19  ;;  %v18087_v19 = vld [vmem:[#allocation2 + $0x1360] sm:$0xf0]  ;;  %v18290_v37 = vld [vmem:[#allocation2 + $0x19b8] sm:$0xf0]  ;;  %v14834_v41 = vor.u32 %v18234_v27, %v14833_v23  ;;  %v18276_v10 = vld [vmem:[#allocation2 + $0x1948] sm:$0xf0] }
 0x202   :  { %9511 = vmatpush.bf16.msra.mxu3 %v14330_v46  ;;  %v14889_v46 = vld [vmem:[#allocation2 + $0x1850] sm:$0xf]  ;;  %v18171_v62 = vld [vmem:[#allocation2 + $0x1600] sm:$0xf0]  ;;  %v18157_v23 = vld [vmem:[#allocation2 + $0x1590] sm:$0xf0] }
 0x203   :  { %9473 = vmatpush.bf16.msra.mxu0 %v13630_v54  ;;  %v14246_v54 = vor.u32 %v18087_v19, %v14245_v4  ;;  %v15281_v4 = vld [vmem:[#allocation2 + $0x1b60] sm:$0xf]  ;;  %v18346_v19 = vld [vmem:[#allocation2 + $0x1b78] sm:$0xf0] }
 0x204   :  { %9486 = vmatpush.bf16.msra.mxu1 %v13854_v57  ;;  %v14890_v57 = vor.u32 %v18248_v15, %v14889_v46  ;;  %v14581_v46 = vld [vmem:[#allocation2 + $0x15e8] sm:$0xf]  ;;  %v15282_v15 = vor.u32 %v18346_v19, %v15281_v4  ;;  %v14973_v4 = vld [vmem:[#allocation2 + $0x18f8] sm:$0xf]  ;;  %v18269_v19 = vld [vmem:[#allocation2 + $0x1910] sm:$0xf0] }
 0x205   :  { %9499 = vmatpush.bf16.msra.mxu2 %v14078_v61  ;;  %v15114_v61 = vor.u32 %v18304_v50, %v15113_v49  ;;  %v18227_v49 = vld [vmem:[#allocation2 + $0x17c0] sm:$0xf0]  ;;  %v15029_v50 = vld [vmem:[#allocation2 + $0x1968] sm:$0xf] }
 0x206   :  { %9512 = vmatpush.bf16.msra.mxu3 %v14302_v3  ;;  %v15338_v3 = vor.u32 %v18360_v53, %v15337_v11  ;;  %v15253_v11 = vld [vmem:[#allocation2 + $0x1b28] sm:$0xf]  ;;  %v18339_v53 = vld [vmem:[#allocation2 + $0x1b40] sm:$0xf0] }
 0x207   :  { %9474 = vmatpush.bf16.msra.mxu0 %v13602_v14  ;;  %v14638_v14 = vor.u32 %v18185_v1, %v14637_v0  ;;  %v14553_v1 = vld [vmem:[#allocation2 + $0x15b0] sm:$0xf]  ;;  %v15254_v63 = vor.u32 %v18339_v53, %v15253_v11  ;;  %v18150_v11 = vld [vmem:[#allocation2 + $0x1558] sm:$0xf0]  ;;  %v14721_v53 = vld [vmem:[#allocation2 + $0x1700] sm:$0xf] }
 0x208   :  { %9487 = vmatpush.bf16.msra.mxu1 %v13826_v17  ;;  %v14609_v17 = vld [vmem:[#allocation2 + $0x1620] sm:$0xf] }
 0x209   :  { %9500 = vmatpush.bf16.msra.mxu2 %v14050_v20  ;;  %v18178_v20 = vld [vmem:[#allocation2 + $0x1638] sm:$0xf0] }
 0x20a   :  { %9513 = vmatpush.bf16.msra.mxu3 %v14274_v31  ;;  %v15057_v31 = vld [vmem:[#allocation2 + $0x19a0] sm:$0xf]  ;;  %v14610_v13 = vor.u32 %v18178_v20, %v14609_v17  ;;  %v15002_v17 = vor.u32 %v18276_v10, %v15001_v9  ;;  %v14525_v20 = vld [vmem:[#allocation2 + $0x1578] sm:$0xf]  ;;  %v14693_v9 = vld [vmem:[#allocation2 + $0x16c8] sm:$0xf] }
 0x20b   :  { %9475 = vmatpush.bf16.msra.mxu0 %v13574_v48  ;;  %v15058_v45 = vor.u32 %v18290_v37, %v15057_v31  ;;  %v14805_v48 = vld [vmem:[#allocation2 + $0x17a8] sm:$0xf]  ;;  %v18213_v37 = vld [vmem:[#allocation2 + $0x1750] sm:$0xf0]  ;;  %v18199_v10 = vld [vmem:[#allocation2 + $0x16e0] sm:$0xf0] }
 0x20c   :  { %9488 = vmatpush.bf16.msra.mxu1 %v13798_v51  ;;  %v18283_v51 = vld [vmem:[#allocation2 + $0x1980] sm:$0xf0] }
 0x20d   :  { %9501 = vmatpush.bf16.msra.mxu2 %v14022_v52  ;;  %v9269_v52 = vpop.f32.mrf.mxu0  ;;  %v15030_v0 = vor.u32 %v18283_v51, %v15029_v50  ;;  %v14974_v51 = vor.u32 %v18269_v19, %v14973_v4  ;;  %v18472_v4 = vld [vmem:[#allocation2 + $0x1f68] sm:$0xf0]  ;;  %v16009_v19 = vld [vmem:[#allocation2 + $0x2110] sm:$0xf] }
 0x20e   :  { %9514 = vmatpush.bf16.msra.mxu3 %v14246_v54  ;;  %9476 = vmatmul.bf16.vlgmr.msra.gmra.mxu0 %v19352_v24  ;;  %v9270_v54 = vadd.f32 %v9269_v52, %v19480_v56  ;;  %v14497_v52 = vld [vmem:[#allocation2 + $0x1540] sm:$0xf] }
 0x20f   :  { %9520 = vmatpush.bf16.msrb.mxu0 %v14666_v55  ;;  %9489 = vmatmul.bf16.vlgmr.msra.gmra.mxu1 %v19360_v29  ;;  %v14582_v55 = vor.u32 %v18171_v62, %v14581_v46  ;;  %v18325_v46 = vld [vmem:[#allocation2 + $0x1ad0] sm:$0xf0] }
 0x210   :  { %9533 = vmatpush.bf16.msrb.mxu1 %v14890_v57  ;;  %9502 = vmatmul.bf16.vlgmr.msra.gmra.mxu2 %v19356_v28  ;;  %v9282_v57 = vpop.f32.mrf.mxu1 }
 0x211   :  { %9546 = vmatpush.bf16.msrb.mxu2 %v15114_v61  ;;  %9515 = vmatmul.bf16.vlgmr.msra.gmra.mxu3 %v19364_v18  ;;  %v14806_v61 = vor.u32 %v18227_v49, %v14805_v48  ;;  %v9283_v5 = vadd.f32 %v9282_v57, %v9270_v54  ;;  %v14526_v48 = vor.u32 %v18157_v23, %v14525_v20  ;;  %v14945_v57 = vld [vmem:[#allocation2 + $0x18c0] sm:$0xf]  ;;  %v15561_v23 = vld [vmem:[#allocation2 + $0x1d90] sm:$0xf] }
 0x212   :  { %9559 = vmatpush.bf16.msrb.mxu3 %v15338_v3  ;;  %v14777_v3 = vld [vmem:[#allocation2 + $0x1770] sm:$0xf] }
 0x213   :  { %9521 = vmatpush.bf16.msrb.mxu0 %v14638_v14  ;;  %v15225_v14 = vld [vmem:[#allocation2 + $0x1af0] sm:$0xf]  ;;  %v14778_v56 = vor.u32 %v18220_v6, %v14777_v3  ;;  %v9295_v31 = vpop.f32.mrf.mxu2  ;;  %v14469_v3 = vld [vmem:[#allocation2 + $0x1508] sm:$0xf] }
 0x214   :  { %9534 = vmatpush.bf16.msrb.mxu1 %v14862_v58  ;;  %v18332_v58 = vld [vmem:[#allocation2 + $0x1b08] sm:$0xf0] }
 0x215   :  { %9547 = vmatpush.bf16.msrb.mxu2 %v15086_v16  ;;  %v14554_v16 = vor.u32 %v18164_v30, %v14553_v1  ;;  %v15226_v27 = vor.u32 %v18332_v58, %v15225_v14  ;;  %v9271_v62 = vpop.f32.mrf.mxu0  ;;  %v18318_v1 = vld [vmem:[#allocation2 + $0x1a98] sm:$0xf0]  ;;  %v14498_v30 = vor.u32 %v18150_v11, %v14497_v52  ;;  %v14917_v14 = vld [vmem:[#allocation2 + $0x1888] sm:$0xf]  ;;  %v15533_v52 = vld [vmem:[#allocation2 + $0x1d58] sm:$0xf] }
 0x216   :  { %9560 = vmatpush.bf16.msrb.mxu3 %v15310_v25  ;;  %v14749_v25 = vld [vmem:[#allocation2 + $0x1738] sm:$0xf]  ;;  %v18584_v62 = vld [vmem:[#allocation2 + $0x22e8] sm:$0xf0]  ;;  %v18409_v11 = vld [vmem:[#allocation2 + $0x1d70] sm:$0xf0] }
 0x217   :  { %9522 = vmatpush.bf16.msrb.mxu0 %v14610_v13  ;;  %v9296_v13 = vadd.f32 %v9295_v31, %v9283_v5  ;;  %v14750_v50 = vor.u32 %v18213_v37, %v14749_v25  ;;  %v18416_v25 = vld [vmem:[#allocation2 + $0x1da8] sm:$0xf0] }
 0x218   :  { %9535 = vmatpush.bf16.msrb.mxu1 %v14834_v41  ;;  %v9308_v41 = vpop.f32.mrf.mxu3 }
 0x219   :  { %9548 = vmatpush.bf16.msrb.mxu2 %v15058_v45  ;;  %v15197_v45 = vld [vmem:[#allocation2 + $0x1ab8] sm:$0xf]  ;;  %v19487_v49 = vadd.f32 %v9308_v41, %v9296_v13  ;;  %v18528_v13 = vld [vmem:[#allocation2 + $0x2128] sm:$0xf0]  ;;  %v14694_v41 = vor.u32 %v18199_v10, %v14693_v9  ;;  %v15729_v9 = vld [vmem:[#allocation2 + $0x1ee0] sm:$0xf] }
 0x21a   :  { %9561 = vmatpush.bf16.msrb.mxu3 %v15282_v15  ;;  %v9284_v15 = vpop.f32.mrf.mxu1  ;;  %v15198_v54 = vor.u32 %v18325_v46, %v15197_v45  ;;  %v16233_v46 = vld [vmem:[#allocation2 + $0x22d0] sm:$0xf] }
 0x21b   :  { %9523 = vmatpush.bf16.msrb.mxu0 %v14582_v55  ;;  %v18206_v55 = vld [vmem:[#allocation2 + $0x1718] sm:$0xf0]  ;;  %v9297_v20 = vpop.f32.mrf.mxu2  ;;  %v15562_v15 = vor.u32 %v18416_v25, %v15561_v23 }
 0x21c   :  { %9536 = vmatpush.bf16.msrb.mxu1 %v14806_v61  ;;  %v18262_v61 = vld [vmem:[#allocation2 + $0x18d8] sm:$0xf0]  ;;  %v14722_v5 = vor.u32 %v18206_v55, %v14721_v53  ;;  %v15757_v53 = vld [vmem:[#allocation2 + $0x1f18] sm:$0xf]  ;;  %v18465_v55 = vld [vmem:[#allocation2 + $0x1f30] sm:$0xf0] }
 0x21d   :  { %9549 = vmatpush.bf16.msrb.mxu2 %v15030_v0  ;;  %v15169_v0 = vld [vmem:[#allocation2 + $0x1a80] sm:$0xf]  ;;  %v14946_v6 = vor.u32 %v18262_v61, %v14945_v57  ;;  %v15981_v57 = vld [vmem:[#allocation2 + $0x20d8] sm:$0xf]  ;;  %v18521_v61 = vld [vmem:[#allocation2 + $0x20f0] sm:$0xf0] }
 0x21e   :  { %9562 = vmatpush.bf16.msrb.mxu3 %v15254_v63  ;;  %v18143_v63 = vld [vmem:[#allocation2 + $0x1520] sm:$0xf0]  ;;  %v15170_v58 = vor.u32 %v18318_v1, %v15169_v0  ;;  %v16205_v0 = vld [vmem:[#allocation2 + $0x2298] sm:$0xf]  ;;  %v18577_v1 = vld [vmem:[#allocation2 + $0x22b0] sm:$0xf0] }
 0x21f   :  { %9524 = vmatpush.bf16.msrb.mxu0 %v14554_v16  ;;  %v18255_v16 = vld [vmem:[#allocation2 + $0x18a0] sm:$0xf0]  ;;  %v14470_v37 = vor.u32 %v18143_v63, %v14469_v3  ;;  %v15758_v3 = vor.u32 %v18465_v55, %v15757_v53  ;;  %v15982_v63 = vor.u32 %v18521_v61, %v15981_v57  ;;  %v16206_v10 = vor.u32 %v18577_v1, %v16205_v0  ;;  %v18388_v53 = vld [vmem:[#allocation2 + $0x1cc8] sm:$0xf0]  ;;  %v15897_v0 = vld [vmem:[#allocation2 + $0x2030] sm:$0xf] }
 0x220   :  { %9537 = vmatpush.bf16.msrb.mxu1 %v14778_v56  ;;  %v15141_v56 = vld [vmem:[#allocation2 + $0x1a48] sm:$0xf]  ;;  %v9310_v31 = vpop.f32.mrf.mxu3  ;;  %v14918_v45 = vor.u32 %v18255_v16, %v14917_v14  ;;  %v18458_v14 = vld [vmem:[#allocation2 + $0x1ef8] sm:$0xf0]  ;;  %v18444_v61 = vld [vmem:[#allocation2 + $0x1e88] sm:$0xf0] }
 0x221   :  { %9550 = vmatpush.bf16.msrb.mxu2 %v15002_v17  ;;  %v18311_v17 = vld [vmem:[#allocation2 + $0x1a60] sm:$0xf0]  ;;  %v18514_v16 = vld [vmem:[#allocation2 + $0x20b8] sm:$0xf0]  ;;  %v15730_v23 = vor.u32 %v18458_v14, %v15729_v9  ;;  %v18500_v1 = vld [vmem:[#allocation2 + $0x2048] sm:$0xf0] }
 0x222   :  { %9563 = vmatpush.bf16.msrb.mxu3 %v15226_v27  ;;  %v15785_v27 = vld [vmem:[#allocation2 + $0x1f50] sm:$0xf]  ;;  %v18395_v31 = vld [vmem:[#allocation2 + $0x1d00] sm:$0xf0]  ;;  %v18381_v9 = vld [vmem:[#allocation2 + $0x1c90] sm:$0xf0] }
 0x223   :  { %9525 = vmatpush.bf16.msrb.mxu0 %v14526_v48  ;;  %v15142_v48 = vor.u32 %v18311_v17, %v15141_v56  ;;  %v16177_v56 = vld [vmem:[#allocation2 + $0x2260] sm:$0xf]  ;;  %v18570_v17 = vld [vmem:[#allocation2 + $0x2278] sm:$0xf0] }
 0x224   :  { %9538 = vmatpush.bf16.msrb.mxu1 %v14750_v50  ;;  %v15786_v50 = vor.u32 %v18472_v4, %v15785_v27  ;;  %v15477_v27 = vld [vmem:[#allocation2 + $0x1ce8] sm:$0xf]  ;;  %v16178_v4 = vor.u32 %v18570_v17, %v16177_v56  ;;  %v15869_v56 = vld [vmem:[#allocation2 + $0x1ff8] sm:$0xf]  ;;  %v18493_v17 = vld [vmem:[#allocation2 + $0x2010] sm:$0xf0] }
 0x225   :  { %9551 = vmatpush.bf16.msrb.mxu2 %v14974_v51  ;;  %v16010_v51 = vor.u32 %v18528_v13, %v16009_v19  ;;  %v18451_v19 = vld [vmem:[#allocation2 + $0x1ec0] sm:$0xf0]  ;;  %v15925_v13 = vld [vmem:[#allocation2 + $0x2068] sm:$0xf] }
 0x226   :  { %9564 = vmatpush.bf16.msrb.mxu3 %v15198_v54  ;;  %v16234_v54 = vor.u32 %v18584_v62, %v16233_v46  ;;  %v16149_v46 = vld [vmem:[#allocation2 + $0x2228] sm:$0xf]  ;;  %v18563_v62 = vld [vmem:[#allocation2 + $0x2240] sm:$0xf0] }
 0x227   :  { %9526 = vmatpush.bf16.msrb.mxu0 %v14498_v30  ;;  %v15534_v30 = vor.u32 %v18409_v11, %v15533_v52  ;;  %v15449_v11 = vld [vmem:[#allocation2 + $0x1cb0] sm:$0xf]  ;;  %v16150_v55 = vor.u32 %v18563_v62, %v16149_v46  ;;  %v18374_v46 = vld [vmem:[#allocation2 + $0x1c58] sm:$0xf0]  ;;  %v15617_v62 = vld [vmem:[#allocation2 + $0x1e00] sm:$0xf] }
 0x228   :  { %9539 = vmatpush.bf16.msrb.mxu1 %v14722_v5  ;;  %v15505_v5 = vld [vmem:[#allocation2 + $0x1d20] sm:$0xf] }
 0x229   :  { %9552 = vmatpush.bf16.msrb.mxu2 %v14946_v6  ;;  %v18402_v6 = vld [vmem:[#allocation2 + $0x1d38] sm:$0xf0] }
 0x22a   :  { %9565 = vmatpush.bf16.msrb.mxu3 %v15170_v58  ;;  %v15953_v58 = vld [vmem:[#allocation2 + $0x20a0] sm:$0xf]  ;;  %v15506_v20 = vor.u32 %v18402_v6, %v15505_v5  ;;  %v15898_v5 = vor.u32 %v18500_v1, %v15897_v0  ;;  %v15421_v6 = vld [vmem:[#allocation2 + $0x1c78] sm:$0xf]  ;;  %v15589_v0 = vld [vmem:[#allocation2 + $0x1dc8] sm:$0xf] }
 0x22b   :  { %9527 = vmatpush.bf16.msrb.mxu0 %v14470_v37  ;;  %v15954_v25 = vor.u32 %v18514_v16, %v15953_v58  ;;  %v15701_v37 = vld [vmem:[#allocation2 + $0x1ea8] sm:$0xf]  ;;  %v18437_v16 = vld [vmem:[#allocation2 + $0x1e50] sm:$0xf0]  ;;  %v18423_v1 = vld [vmem:[#allocation2 + $0x1de0] sm:$0xf0] }
 0x22c   :  { %9540 = vmatpush.bf16.msrb.mxu1 %v14694_v41  ;;  %v18507_v41 = vld [vmem:[#allocation2 + $0x2080] sm:$0xf0] }
 0x22d   :  { %9553 = vmatpush.bf16.msrb.mxu2 %v14918_v45  ;;  %v9321_v45 = vpop.f32.mrf.mxu0  ;;  %v15926_v52 = vor.u32 %v18507_v41, %v15925_v13  ;;  %v15870_v41 = vor.u32 %v18493_v17, %v15869_v56  ;;  %v18696_v56 = vld [vmem:[#allocation2 + $0x2668] sm:$0xf0]  ;;  %v16905_v17 = vld [vmem:[#allocation2 + $0x2810] sm:$0xf] }
 0x22e   :  { %9566 = vmatpush.bf16.msrb.mxu3 %v15142_v48  ;;  %9528 = vmatmul.bf16.vlgmr.msrb.gmra.mxu0 %v19383_v26  ;;  %v9322_v48 = vadd.f32 %v9321_v45, %v19487_v49  ;;  %v15393_v45 = vld [vmem:[#allocation2 + $0x1c40] sm:$0xf] }
 0x22f   :  { %9572 = vmatpush.bf16.msra.mxu0 %v15562_v15  ;;  %9541 = vmatmul.bf16.vlgmr.msrb.gmra.mxu1 %v19391_v33  ;;  %v15478_v15 = vor.u32 %v18395_v31, %v15477_v27  ;;  %v18549_v27 = vld [vmem:[#allocation2 + $0x21d0] sm:$0xf0] }
 0x230   :  { %9585 = vmatpush.bf16.msra.mxu1 %v15786_v50  ;;  %9554 = vmatmul.bf16.vlgmr.msrb.gmra.mxu2 %v19387_v32  ;;  %v9334_v50 = vpop.f32.mrf.mxu1 }
 0x231   :  { %9598 = vmatpush.bf16.msra.mxu2 %v16010_v51  ;;  %9567 = vmatmul.bf16.vlgmr.msrb.gmra.mxu3 %v19395_v59  ;;  %v15702_v51 = vor.u32 %v18451_v19, %v15701_v37  ;;  %v9335_v57 = vadd.f32 %v9334_v50, %v9322_v48  ;;  %v15422_v37 = vor.u32 %v18381_v9, %v15421_v6  ;;  %v15841_v50 = vld [vmem:[#allocation2 + $0x1fc0] sm:$0xf]  ;;  %v16457_v9 = vld [vmem:[#allocation2 + $0x2490] sm:$0xf] }
 0x232   :  { %9611 = vmatpush.bf16.msra.mxu3 %v16234_v54  ;;  %v15673_v54 = vld [vmem:[#allocation2 + $0x1e70] sm:$0xf] }
 0x233   :  { %9573 = vmatpush.bf16.msra.mxu0 %v15534_v30  ;;  %v16121_v30 = vld [vmem:[#allocation2 + $0x21f0] sm:$0xf]  ;;  %v15674_v49 = vor.u32 %v18444_v61, %v15673_v54  ;;  %v9347_v58 = vpop.f32.mrf.mxu2  ;;  %v15365_v54 = vld [vmem:[#allocation2 + $0x1c08] sm:$0xf] }
 0x234   :  { %9586 = vmatpush.bf16.msra.mxu1 %v15758_v3  ;;  %v18556_v3 = vld [vmem:[#allocation2 + $0x2208] sm:$0xf0] }
 0x235   :  { %9599 = vmatpush.bf16.msra.mxu2 %v15982_v63  ;;  %v15450_v63 = vor.u32 %v18388_v53, %v15449_v11  ;;  %v16122_v14 = vor.u32 %v18556_v3, %v16121_v30  ;;  %v9323_v31 = vpop.f32.mrf.mxu0  ;;  %v18542_v11 = vld [vmem:[#allocation2 + $0x2198] sm:$0xf0]  ;;  %v15394_v53 = vor.u32 %v18374_v46, %v15393_v45  ;;  %v15813_v30 = vld [vmem:[#allocation2 + $0x1f88] sm:$0xf]  ;;  %v16429_v45 = vld [vmem:[#allocation2 + $0x2458] sm:$0xf] }
 0x236   :  { %9612 = vmatpush.bf16.msra.mxu3 %v16206_v10  ;;  %v15645_v10 = vld [vmem:[#allocation2 + $0x1e38] sm:$0xf]  ;;  %v18808_v31 = vld [vmem:[#allocation2 + $0x29e8] sm:$0xf0]  ;;  %v18633_v46 = vld [vmem:[#allocation2 + $0x2470] sm:$0xf0] }
 0x237   :  { %9574 = vmatpush.bf16.msra.mxu0 %v15506_v20  ;;  %v9348_v20 = vadd.f32 %v9347_v58, %v9335_v57  ;;  %v15646_v13 = vor.u32 %v18437_v16, %v15645_v10  ;;  %v18640_v10 = vld [vmem:[#allocation2 + $0x24a8] sm:$0xf0] }
 0x238   :  { %9587 = vmatpush.bf16.msra.mxu1 %v15730_v23  ;;  %v9360_v23 = vpop.f32.mrf.mxu3 }
 0x239   :  { %9600 = vmatpush.bf16.msra.mxu2 %v15954_v25  ;;  %v16093_v25 = vld [vmem:[#allocation2 + $0x21b8] sm:$0xf]  ;;  %v19494_v19 = vadd.f32 %v9360_v23, %v9348_v20  ;;  %v18752_v20 = vld [vmem:[#allocation2 + $0x2828] sm:$0xf0]  ;;  %v15590_v23 = vor.u32 %v18423_v1, %v15589_v0  ;;  %v16625_v0 = vld [vmem:[#allocation2 + $0x25e0] sm:$0xf] }
 0x23a   :  { %9613 = vmatpush.bf16.msra.mxu3 %v16178_v4  ;;  %v9336_v4 = vpop.f32.mrf.mxu1  ;;  %v16094_v48 = vor.u32 %v18549_v27, %v16093_v25  ;;  %v17129_v27 = vld [vmem:[#allocation2 + $0x29d0] sm:$0xf] }
 0x23b   :  { %9575 = vmatpush.bf16.msra.mxu0 %v15478_v15  ;;  %v18430_v15 = vld [vmem:[#allocation2 + $0x1e18] sm:$0xf0]  ;;  %v9349_v6 = vpop.f32.mrf.mxu2  ;;  %v16458_v4 = vor.u32 %v18640_v10, %v16457_v9  ;;  %v16373_v9 = vld [vmem:[#allocation2 + $0x23e8] sm:$0xf] }
 0x23c   :  { %9588 = vmatpush.bf16.msra.mxu1 %v15702_v51  ;;  %v18486_v51 = vld [vmem:[#allocation2 + $0x1fd8] sm:$0xf0]  ;;  %v15618_v57 = vor.u32 %v18430_v15, %v15617_v62  ;;  %v16653_v62 = vld [vmem:[#allocation2 + $0x2618] sm:$0xf]  ;;  %v18689_v15 = vld [vmem:[#allocation2 + $0x2630] sm:$0xf0] }
 0x23d   :  { %9601 = vmatpush.bf16.msra.mxu2 %v15926_v52  ;;  %v16065_v52 = vld [vmem:[#allocation2 + $0x2180] sm:$0xf]  ;;  %v15842_v61 = vor.u32 %v18486_v51, %v15841_v50  ;;  %v16877_v50 = vld [vmem:[#allocation2 + $0x27d8] sm:$0xf]  ;;  %v18745_v51 = vld [vmem:[#allocation2 + $0x27f0] sm:$0xf0] }
 0x23e   :  { %9614 = vmatpush.bf16.msra.mxu3 %v16150_v55  ;;  %v18367_v55 = vld [vmem:[#allocation2 + $0x1c20] sm:$0xf0]  ;;  %v16066_v3 = vor.u32 %v18542_v11, %v16065_v52  ;;  %v17101_v52 = vld [vmem:[#allocation2 + $0x2998] sm:$0xf]  ;;  %v18801_v11 = vld [vmem:[#allocation2 + $0x29b0] sm:$0xf0] }
 0x23f   :  { %9576 = vmatpush.bf16.msra.mxu0 %v15450_v63  ;;  %v18479_v63 = vld [vmem:[#allocation2 + $0x1fa0] sm:$0xf0]  ;;  %v15366_v16 = vor.u32 %v18367_v55, %v15365_v54  ;;  %v16654_v54 = vor.u32 %v18689_v15, %v16653_v62  ;;  %v16878_v55 = vor.u32 %v18745_v51, %v16877_v50  ;;  %v17102_v1 = vor.u32 %v18801_v11, %v17101_v52  ;;  %v18612_v62 = vld [vmem:[#allocation2 + $0x23c8] sm:$0xf0]  ;;  %v16793_v11 = vld [vmem:[#allocation2 + $0x2730] sm:$0xf] }
 0x240   :  { %9589 = vmatpush.bf16.msra.mxu1 %v15674_v49  ;;  %v16037_v49 = vld [vmem:[#allocation2 + $0x2148] sm:$0xf]  ;;  %v9362_v58 = vpop.f32.mrf.mxu3  ;;  %v15814_v25 = vor.u32 %v18479_v63, %v15813_v30  ;;  %v18682_v30 = vld [vmem:[#allocation2 + $0x25f8] sm:$0xf0]  ;;  %v18668_v52 = vld [vmem:[#allocation2 + $0x2588] sm:$0xf0] }
 0x241   :  { %9602 = vmatpush.bf16.msra.mxu2 %v15898_v5  ;;  %v18535_v5 = vld [vmem:[#allocation2 + $0x2160] sm:$0xf0]  ;;  %v18738_v63 = vld [vmem:[#allocation2 + $0x27b8] sm:$0xf0]  ;;  %v16626_v10 = vor.u32 %v18682_v30, %v16625_v0  ;;  %v16317_v30 = vld [vmem:[#allocation2 + $0x2378] sm:$0xf] }
 0x242   :  { %9615 = vmatpush.bf16.msra.mxu3 %v16122_v14  ;;  %v16681_v14 = vld [vmem:[#allocation2 + $0x2650] sm:$0xf]  ;;  %v18619_v58 = vld [vmem:[#allocation2 + $0x2400] sm:$0xf0] }
 0x243   :  { %9577 = vmatpush.bf16.msra.mxu0 %v15422_v37  ;;  %v16038_v37 = vor.u32 %v18535_v5, %v16037_v49  ;;  %v17073_v49 = vld [vmem:[#allocation2 + $0x2960] sm:$0xf]  ;;  %v18794_v5 = vld [vmem:[#allocation2 + $0x2978] sm:$0xf0] }
 0x244   :  { %9590 = vmatpush.bf16.msra.mxu1 %v15646_v13  ;;  %v16682_v13 = vor.u32 %v18696_v56, %v16681_v14  ;;  %v18915_v56 = vld [vmem:[#allocation5] sm:$0xff] }
 0x245   :  { %9603 = vmatpush.bf16.msra.mxu2 %v15870_v41  ;;  %v16906_v41 = vor.u32 %v18752_v20, %v16905_v17  ;;  %v1816_v17 = vperm.slane %v18915_v56, 2  ;;  %v17074_v20 = vor.u32 %v18794_v5, %v17073_v49  ;;  %v18773_v56 = vld [vmem:[#allocation2 + $0x28d0] sm:$0xf0] }
 0x246   :  { %9616 = vmatpush.bf16.msra.mxu3 %v16094_v48  ;;  %v17130_v48 = vor.u32 %v18808_v31, %v17129_v27  ;;  %v18731_v27 = vld [vmem:[#allocation2 + $0x2780] sm:$0xf0]  ;;  %v17045_v31 = vld [vmem:[#allocation2 + $0x2928] sm:$0xf] }
 0x247   :  { %9578 = vmatpush.bf16.msra.mxu0 %v15394_v53  ;;  %v16430_v53 = vor.u32 %v18633_v46, %v16429_v45  ;;  %v16345_v46 = vld [vmem:[#allocation2 + $0x23b0] sm:$0xf] }
 0x248   :  { %9591 = vmatpush.bf16.msra.mxu1 %v15618_v57  ;;  %v16401_v57 = vld [vmem:[#allocation2 + $0x2420] sm:$0xf] }
 0x249   :  { %9604 = vmatpush.bf16.msra.mxu2 %v15842_v61  ;;  %v18626_v61 = vld [vmem:[#allocation2 + $0x2438] sm:$0xf0] }
 0x24a   :  { %9617 = vmatpush.bf16.msra.mxu3 %v16066_v3  ;;  %v16849_v3 = vld [vmem:[#allocation2 + $0x27a0] sm:$0xf]  ;;  %v16402_v6 = vor.u32 %v18626_v61, %v16401_v57  ;;  %v16346_v61 = vor.u32 %v18612_v62, %v16345_v46  ;;  %v18710_v62 = vld [vmem:[#allocation2 + $0x26d8] sm:$0xf0] }
 0x24b   :  { %9579 = vmatpush.bf16.msra.mxu0 %v15366_v16  ;;  %v16850_v14 = vor.u32 %v18738_v63, %v16849_v3  ;;  %v16597_v16 = vld [vmem:[#allocation2 + $0x25a8] sm:$0xf]  ;;  %v18605_v3 = vld [vmem:[#allocation2 + $0x2390] sm:$0xf0]  ;;  %v16541_v63 = vld [vmem:[#allocation2 + $0x2538] sm:$0xf] }
 0x24c   :  { %9592 = vmatpush.bf16.msra.mxu1 %v15590_v23  ;;  %v18675_v23 = vld [vmem:[#allocation2 + $0x25c0] sm:$0xf0]  ;;  %v9386_v50 = vpop.f32.mrf.mxu1  ;;  %v16737_v46 = vld [vmem:[#allocation2 + $0x26c0] sm:$0xf] }
 0x24d   :  { %9605 = vmatpush.bf16.msra.mxu2 %v15814_v25  ;;  %v16821_v25 = vld [vmem:[#allocation2 + $0x2768] sm:$0xf] }
 0x24e   :  { %9618 = vmatpush.bf16.msra.mxu3 %v16038_v37  ;;  %9580 = vmatmul.bf16.vlgmr.msra.gmra.mxu0 %v19401_v38  ;;  %v18787_v37 = vld [vmem:[#allocation2 + $0x2940] sm:$0xf0]  ;;  %v16822_v45 = vor.u32 %v18731_v27, %v16821_v25 }
 0x24f   :  { %9624 = vmatpush.bf16.msrb.mxu0 %v16458_v4  ;;  %9593 = vmatmul.bf16.vlgmr.msra.gmra.mxu1 %v19405_v60  ;;  %v16374_v4 = vor.u32 %v18619_v58, %v16373_v9  ;;  %v17046_v51 = vor.u32 %v18787_v37, %v17045_v31  ;;  %v16765_v9 = vld [vmem:[#allocation2 + $0x26f8] sm:$0xf]  ;;  %v16289_v31 = vld [vmem:[#allocation2 + $0x2340] sm:$0xf]  ;;  %v18598_v37 = vld [vmem:[#allocation2 + $0x2358] sm:$0xf0] }
 0x250   :  { %9637 = vmatpush.bf16.msrb.mxu1 %v16682_v13  ;;  %9606 = vmatmul.bf16.vlgmr.msra.gmra.mxu2 %v19403_v21  ;;  %v9373_v13 = vpop.f32.mrf.mxu0 }
 0x251   :  { %9650 = vmatpush.bf16.msrb.mxu2 %v16906_v41  ;;  %9619 = vmatmul.bf16.vlgmr.msra.gmra.mxu3 %v19407_v47  ;;  %v16598_v41 = vor.u32 %v18675_v23, %v16597_v16  ;;  %v9374_v15 = vadd.f32 %v9373_v13, %v1816_v17  ;;  %v16989_v16 = vld [vmem:[#allocation2 + $0x28b8] sm:$0xf]  ;;  %v16318_v17 = vor.u32 %v18605_v3, %v16317_v30  ;;  %v16933_v30 = vld [vmem:[#allocation2 + $0x2848] sm:$0xf]  ;;  %v18759_v3 = vld [vmem:[#allocation2 + $0x2860] sm:$0xf0] }
 0x252   :  { %9663 = vmatpush.bf16.msrb.mxu3 %v17130_v48  ;;  %v16569_v48 = vld [vmem:[#allocation2 + $0x2570] sm:$0xf] }
 0x253   :  { %9625 = vmatpush.bf16.msrb.mxu0 %v16430_v53  ;;  %v18724_v53 = vld [vmem:[#allocation2 + $0x2748] sm:$0xf0]  ;;  %v9387_v57 = vadd.f32 %v9386_v50, %v9374_v15  ;;  %v16570_v0 = vor.u32 %v18668_v52, %v16569_v48  ;;  %v9399_v49 = vpop.f32.mrf.mxu2  ;;  %v16961_v48 = vld [vmem:[#allocation2 + $0x2880] sm:$0xf]  ;;  %v18766_v15 = vld [vmem:[#allocation2 + $0x2898] sm:$0xf0]  ;;  %v16290_v50 = vor.u32 %v18598_v37, %v16289_v31 }
 0x254   :  { %9638 = vmatpush.bf16.msrb.mxu1 %v16654_v54  ;;  %v17017_v54 = vld [vmem:[#allocation2 + $0x28f0] sm:$0xf]  ;;  %v9412_v58 = vpop.f32.mrf.mxu3  ;;  %v9388_v13 = vpop.f32.mrf.mxu1  ;;  %v18591_v52 = vld [vmem:[#allocation2 + $0x2320] sm:$0xf0] }
 0x255   :  { %9651 = vmatpush.bf16.msrb.mxu2 %v16878_v55  ;;  %v18780_v55 = vld [vmem:[#allocation2 + $0x2908] sm:$0xf0]  ;;  %v11951_v13 = vld [vmem:[#allocation2 + $0x174] sm:$0xf0] }
 0x256   :  { %9664 = vmatpush.bf16.msrb.mxu3 %v17102_v1  ;;  %v16794_v1 = vor.u32 %v18724_v53, %v16793_v11  ;;  %v17018_v5 = vor.u32 %v18780_v55, %v17017_v54  ;;  %v16738_v53 = vor.u32 %v18710_v62, %v16737_v46  ;;  %v16485_v54 = vld [vmem:[#allocation2 + $0x24c8] sm:$0xf]  ;;  %v18647_v55 = vld [vmem:[#allocation2 + $0x24e0] sm:$0xf0]  ;;  %v12175_v46 = vld [vmem:[#allocation2 + $0x334] sm:$0xf0] }
 0x257   :  { %9626 = vmatpush.bf16.msrb.mxu0 %v16402_v6  ;;  %v18661_v6 = vld [vmem:[#allocation2 + $0x2550] sm:$0xf0]  ;;  %v17622_v62 = vld [vmem:[#allocation2 + $0x4dc] sm:$0xf] }
 0x258   :  { %9639 = vmatpush.bf16.msrb.mxu1 %v16626_v10  ;;  %v18717_v10 = vld [vmem:[#allocation2 + $0x2710] sm:$0xf0]  ;;  %v9375_v23 = vpop.f32.mrf.mxu0  ;;  %v16542_v25 = vor.u32 %v18661_v6, %v16541_v63 }
 0x259   :  { %9652 = vmatpush.bf16.msrb.mxu2 %v16850_v14  ;;  %v9400_v14 = vadd.f32 %v9399_v49, %v9387_v57  ;;  %v16766_v27 = vor.u32 %v18717_v10, %v16765_v9  ;;  %v16709_v57 = vld [vmem:[#allocation2 + $0x2688] sm:$0xf]  ;;  %v17517_v49 = vld [vmem:[#allocation2 + $0x194] sm:$0xf]  ;;  %v12203_v10 = vld [vmem:[#allocation2 + $0x36c] sm:$0xf0] }
 0x25a   :  { %9665 = vmatpush.bf16.msrb.mxu3 %v17074_v20  ;;  %v17573_v6 = vld [vmem:[#allocation2 + $0x354] sm:$0xf]  ;;  %v12651_v23 = vld [vmem:[#allocation2 + $0x6ec] sm:$0xf0] }
 0x25b   :  { %9627 = vmatpush.bf16.msrb.mxu0 %v16374_v4  ;;  %v19500_v20 = vadd.f32 %v9412_v58, %v9400_v14  ;;  %v16513_v4 = vld [vmem:[#allocation2 + $0x2500] sm:$0xf]  ;;  %v17629_v14 = vld [vmem:[#allocation2 + $0x514] sm:$0xf]  ;;  %v12427_v58 = vld [vmem:[#allocation2 + $0x52c] sm:$0xf0]  ;;  %v12206_v31 = vor.u32 %v17573_v6, %v12203_v10 }
 0x25c   :  { %9640 = vmatpush.bf16.msrb.mxu1 %v16598_v41  ;;  %v16990_v41 = vor.u32 %v18773_v56, %v16989_v16  ;;  %v9414_v63 = vpop.f32.mrf.mxu3  ;;  %v16486_v16 = vor.u32 %v18647_v55, %v16485_v54  ;;  %v12430_v37 = vor.u32 %v17629_v14, %v12427_v58  ;;  %v11923_v54 = vld [vmem:[#allocation2 + $0x13c] sm:$0xf0]  ;;  %v17559_v55 = vld [vmem:[#allocation2 + $0x2e4] sm:$0xf]  ;;  %v17496_v6 = vld [vmem:[#allocation2 + $0xec] sm:$0xf] }
 0x25d   :  { %9653 = vmatpush.bf16.msrb.mxu2 %v16822_v45  ;;  %v18654_v45 = vld [vmem:[#allocation2 + $0x2518] sm:$0xf0]  ;;  %v17552_v10 = vld [vmem:[#allocation2 + $0x2ac] sm:$0xf]  ;;  %v12119_v58 = vld [vmem:[#allocation2 + $0x2c4] sm:$0xf0] }
 0x25e   :  { %9666 = vmatpush.bf16.msrb.mxu3 %v17046_v51  ;;  %v16261_v51 = vld [vmem:[#allocation2 + $0x2308] sm:$0xf]  ;;  %v16514_v11 = vor.u32 %v18654_v45, %v16513_v4  ;;  %v17510_v4 = vld [vmem:[#allocation2 + $0x15c] sm:$0xf] }
 0x25f   :  { %9628 = vmatpush.bf16.msrb.mxu0 %v16346_v61  ;;  %v9401_v61 = vpop.f32.mrf.mxu2  ;;  %v16262_v9 = vor.u32 %v18591_v52, %v16261_v51  ;;  %v11954_v51 = vor.u32 %v17510_v4, %v11951_v13  ;;  %v17489_v4 = vld [vmem:[#allocation2 + $0xb4] sm:$0xf]  ;;  %v11867_v13 = vld [vmem:[#allocation2 + $0xcc] sm:$0xf0] }
 0x260   :  { %9641 = vmatpush.bf16.msrb.mxu1 %v16570_v0  ;;  %v16962_v0 = vor.u32 %v18766_v15, %v16961_v48  ;;  %v12399_v48 = vld [vmem:[#allocation2 + $0x4f4] sm:$0xf0]  ;;  %v17678_v15 = vld [vmem:[#allocation2 + $0x69c] sm:$0xf]  ;;  %v12147_v61 = vld [vmem:[#allocation2 + $0x2fc] sm:$0xf0] }
 0x261   :  { %9654 = vmatpush.bf16.msrb.mxu2 %v16794_v1  ;;  %v18703_v1 = vld [vmem:[#allocation2 + $0x26a0] sm:$0xf0] }
 0x262   :  { %9667 = vmatpush.bf16.msrb.mxu3 %v17018_v5  ;;  %v11979_v5 = vld [vmem:[#allocation2 + $0x1ac] sm:$0xf0]  ;;  %v16710_v56 = vor.u32 %v18703_v1, %v16709_v57  ;;  %v12371_v1 = vld [vmem:[#allocation2 + $0x4bc] sm:$0xf0] }
 0x263   :  { %9629 = vmatpush.bf16.msrb.mxu0 %v16318_v17  ;;  %v17685_v17 = vld [vmem:[#allocation2 + $0x6d4] sm:$0xf] }
 0x264   :  { %9642 = vmatpush.bf16.msrb.mxu1 %v16542_v25  ;;  %v16934_v25 = vor.u32 %v18759_v3, %v16933_v30  ;;  %v12654_v45 = vor.u32 %v17685_v17, %v12651_v23  ;;  %v17671_v30 = vld [vmem:[#allocation2 + $0x664] sm:$0xf]  ;;  %v12595_v3 = vld [vmem:[#allocation2 + $0x67c] sm:$0xf0]  ;;  %v17664_v17 = vld [vmem:[#allocation2 + $0x62c] sm:$0xf] }
 0x265   :  { %9655 = vmatpush.bf16.msrb.mxu2 %v16766_v27  ;;  %v11982_v27 = vor.u32 %v17517_v49, %v11979_v5  ;;  %v12150_v49 = vor.u32 %v17559_v55, %v12147_v61  ;;  %v12598_v14 = vor.u32 %v17671_v30, %v12595_v3  ;;  %v12567_v23 = vld [vmem:[#allocation2 + $0x644] sm:$0xf0]  ;;  %v11839_v61 = vld [vmem:[#allocation2 + $0x94] sm:$0xf0]  ;;  %v17594_v3 = vld [vmem:[#allocation2 + $0x3fc] sm:$0xf] }
 0x266   :  { %9668 = vmatpush.bf16.msrb.mxu3 %v16990_v41  ;;  %v17566_v41 = vld [vmem:[#allocation2 + $0x31c] sm:$0xf]  ;;  %v12063_v30 = vld [vmem:[#allocation2 + $0x254] sm:$0xf0] }
 0x267   :  { %9630 = vmatpush.bf16.msrb.mxu0 %v16290_v50  ;;  %v12623_v50 = vld [vmem:[#allocation2 + $0x6b4] sm:$0xf0]  ;;  %v12178_v52 = vor.u32 %v17566_v41, %v12175_v46  ;;  %v17545_v41 = vld [vmem:[#allocation2 + $0x274] sm:$0xf] }
 0x268   :  { %9643 = vmatpush.bf16.msrb.mxu1 %v16514_v11  ;;  %v12402_v11 = vor.u32 %v17622_v62, %v12399_v48  ;;  %v12626_v57 = vor.u32 %v17678_v15, %v12623_v50  ;;  %v12570_v62 = vor.u32 %v17664_v17, %v12567_v23  ;;  %v12091_v48 = vld [vmem:[#allocation2 + $0x28c] sm:$0xf0]  ;;  %v17601_v15 = vld [vmem:[#allocation2 + $0x434] sm:$0xf]  ;;  %v17475_v17 = vld [vmem:[#allocation2 + $0x44] sm:$0xf] }
 0x269   :  { %9656 = vmatpush.bf16.msrb.mxu2 %v16738_v53  ;;  %v17503_v53 = vld [vmem:[#allocation2 + $0x124] sm:$0xf]  ;;  %v12315_v50 = vld [vmem:[#allocation2 + $0x44c] sm:$0xf0]  ;;  %v11811_v23 = vld [vmem:[#allocation2 + $0x5c] sm:$0xf0] }
 0x26a   :  { %9669 = vmatpush.bf16.msrb.mxu3 %v16962_v0  ;;  %v17615_v0 = vld [vmem:[#allocation2 + $0x4a4] sm:$0xf]  ;;  %v11926_v63 = vor.u32 %v17503_v53, %v11923_v54  ;;  %v11870_v53 = vor.u32 %v17489_v4, %v11867_v13  ;;  %v12094_v54 = vor.u32 %v17545_v41, %v12091_v48  ;;  %v12318_v55 = vor.u32 %v17601_v15, %v12315_v50  ;;  %v12259_v13 = vld [vmem:[#allocation2 + $0x3dc] sm:$0xf0]  ;;  %v11783_v48 = vld [vmem:[#allocation2 + $0x24] sm:$0xf0] }
 0x26b   :  { %9631 = vmatpush.bf16.msrb.mxu0 %v16262_v9  ;;  %v12374_v5 = vor.u32 %v17615_v0, %v12371_v1  ;;  %v11895_v9 = vld [vmem:[#allocation2 + $0x104] sm:$0xf0]  ;;  %v17538_v0 = vld [vmem:[#allocation2 + $0x23c] sm:$0xf]  ;;  %v17587_v4 = vld [vmem:[#allocation2 + $0x3c4] sm:$0xf] }
 0x26c   :  { %9644 = vmatpush.bf16.msrb.mxu1 %v16486_v16  ;;  %v17608_v16 = vld [vmem:[#allocation2 + $0x46c] sm:$0xf]  ;;  %v9438_v46 = vpop.f32.mrf.mxu1  ;;  %v17643_v41 = vld [vmem:[#allocation2 + $0x584] sm:$0xf]  ;;  %v12262_v50 = vor.u32 %v17587_v4, %v12259_v13  ;;  %v13071_v4 = vld [vmem:[#allocation2 + $0xa34] sm:$0xf0] }
 0x26d   :  { %9657 = vmatpush.bf16.msrb.mxu2 %v16710_v56  ;;  %v12343_v56 = vld [vmem:[#allocation2 + $0x484] sm:$0xf0]  ;;  %v17846_v13 = vld [vmem:[#allocation2 + $0xbdc] sm:$0xf] }
 0x26e   :  { %9670 = vmatpush.bf16.msrb.mxu3 %v16934_v25  ;;  %9632 = vmatmul.bf16.vlgmr.msrb.gmra.mxu0 %v19413_v2  ;;  %v11898_v25 = vor.u32 %v17496_v6, %v11895_v9  ;;  %v17650_v6 = vld [vmem:[#allocation2 + $0x5bc] sm:$0xf]  ;;  %v12511_v9 = vld [vmem:[#allocation2 + $0x5d4] sm:$0xf0] }
 0x26f   :  { %9676 = vmatpush.bf16.msra.mxu0 %v11982_v27  ;;  %9645 = vmatmul.bf16.vlgmr.msrb.gmra.mxu1 %v19417_v8  ;;  %v9425_v27 = vpop.f32.mrf.mxu0 }
 0x270   :  { %9689 = vmatpush.bf16.msra.mxu1 %v12206_v31  ;;  %9658 = vmatmul.bf16.vlgmr.msrb.gmra.mxu2 %v19415_v7  ;;  %v12122_v31 = vor.u32 %v17552_v10, %v12119_v58 }
 0x271   :  { %9702 = vmatpush.bf16.msra.mxu2 %v12430_v37  ;;  %9671 = vmatmul.bf16.vlgmr.msrb.gmra.mxu3 %v19419_v12  ;;  %v12346_v37 = vor.u32 %v17608_v16, %v12343_v56  ;;  %v12066_v16 = vor.u32 %v17538_v0, %v12063_v30  ;;  %v17797_v30 = vld [vmem:[#allocation2 + $0xa54] sm:$0xf] }
 0x272   :  { %9715 = vmatpush.bf16.msra.mxu3 %v12654_v45  ;;  %v9426_v45 = vadd.f32 %v9425_v27, %v19500_v20 }
 0x273   :  { %9677 = vmatpush.bf16.msra.mxu0 %v11954_v51  ;;  %v17657_v51 = vld [vmem:[#allocation2 + $0x5f4] sm:$0xf]  ;;  %v9451_v1 = vpop.f32.mrf.mxu2 }
 0x274   :  { %9690 = vmatpush.bf16.msra.mxu1 %v12178_v52  ;;  %v12539_v52 = vld [vmem:[#allocation2 + $0x60c] sm:$0xf0]  ;;  %v9440_v27 = vpop.f32.mrf.mxu1 }
 0x275   :  { %9703 = vmatpush.bf16.msra.mxu2 %v12402_v11  ;;  %v9439_v11 = vadd.f32 %v9438_v46, %v9426_v45  ;;  %v12542_v20 = vor.u32 %v17657_v51, %v12539_v52  ;;  %v12483_v45 = vld [vmem:[#allocation2 + $0x59c] sm:$0xf0]  ;;  %v11814_v46 = vor.u32 %v17475_v17, %v11811_v23  ;;  %v17524_v51 = vld [vmem:[#allocation2 + $0x1cc] sm:$0xf]  ;;  %v12007_v52 = vld [vmem:[#allocation2 + $0x1e4] sm:$0xf0] }
 0x276   :  { %9716 = vmatpush.bf16.msra.mxu3 %v12626_v57  ;;  %v17482_v57 = vld [vmem:[#allocation2 + $0x7c] sm:$0xf]  ;;  %v12847_v27 = vld [vmem:[#allocation2 + $0x874] sm:$0xf0] }
 0x277   :  { %9678 = vmatpush.bf16.msra.mxu0 %v11926_v63  ;;  %v12287_v63 = vld [vmem:[#allocation2 + $0x414] sm:$0xf0]  ;;  %v11842_v10 = vor.u32 %v17482_v57, %v11839_v61  ;;  %v9427_v58 = vpop.f32.mrf.mxu0  ;;  %v17636_v57 = vld [vmem:[#allocation2 + $0x54c] sm:$0xf]  ;;  %v12455_v61 = vld [vmem:[#allocation2 + $0x564] sm:$0xf0] }
 0x278   :  { %9691 = vmatpush.bf16.msra.mxu1 %v12150_v49  ;;  %v9452_v49 = vadd.f32 %v9451_v1, %v9439_v11  ;;  %v12290_v56 = vor.u32 %v17594_v3, %v12287_v63  ;;  %v17580_v11 = vld [vmem:[#allocation2 + $0x38c] sm:$0xf]  ;;  %v17741_v1 = vld [vmem:[#allocation2 + $0x894] sm:$0xf]  ;;  %v13099_v63 = vld [vmem:[#allocation2 + $0xa6c] sm:$0xf0] }
 0x279   :  { %9704 = vmatpush.bf16.msra.mxu2 %v12374_v5  ;;  %v9464_v5 = vpop.f32.mrf.mxu3  ;;  %v13547_v58 = vld [vmem:[#allocation2 + $0xdec] sm:$0xf0]  ;;  %v13102_v17 = vor.u32 %v17797_v30, %v13099_v63  ;;  %v17720_v30 = vld [vmem:[#allocation2 + $0x7ec] sm:$0xf] }
 0x27a   :  { %9717 = vmatpush.bf16.msra.mxu3 %v12598_v14  ;;  %v19507_v14 = vadd.f32 %v9464_v5, %v9452_v49  ;;  %v17853_v49 = vld [vmem:[#allocation2 + $0xc14] sm:$0xf]  ;;  %v13323_v5 = vld [vmem:[#allocation2 + $0xc2c] sm:$0xf0]  ;;  %v17776_v63 = vld [vmem:[#allocation2 + $0x9ac] sm:$0xf] }
 0x27b   :  { %9679 = vmatpush.bf16.msra.mxu0 %v11898_v25  ;;  %v17531_v25 = vld [vmem:[#allocation2 + $0x204] sm:$0xf]  ;;  %v13326_v23 = vor.u32 %v17853_v49, %v13323_v5  ;;  %v13015_v5 = vld [vmem:[#allocation2 + $0x9c4] sm:$0xf0] }
 0x27c   :  { %9692 = vmatpush.bf16.msra.mxu1 %v12122_v31  ;;  %v12514_v31 = vor.u32 %v17650_v6, %v12511_v9  ;;  %v12010_v6 = vor.u32 %v17524_v51, %v12007_v52  ;;  %v12819_v51 = vld [vmem:[#allocation2 + $0x83c] sm:$0xf0]  ;;  %v17783_v52 = vld [vmem:[#allocation2 + $0x9e4] sm:$0xf] }
 0x27d   :  { %9705 = vmatpush.bf16.msra.mxu2 %v12346_v37  ;;  %v12035_v37 = vld [vmem:[#allocation2 + $0x21c] sm:$0xf0] }
 0x27e   :  { %9718 = vmatpush.bf16.msra.mxu3 %v12570_v62  ;;  %v17468_v62 = vld [vmem:[#allocation2 + $0xc] sm:$0xf]  ;;  %v12038_v15 = vor.u32 %v17531_v25, %v12035_v37  ;;  %v17734_v25 = vld [vmem:[#allocation2 + $0x85c] sm:$0xf] }
 0x27f   :  { %9680 = vmatpush.bf16.msra.mxu0 %v11870_v53  ;;  %v9453_v53 = vpop.f32.mrf.mxu2  ;;  %v11786_v3 = vor.u32 %v17468_v62, %v11783_v48  ;;  %v12850_v62 = vor.u32 %v17734_v25, %v12847_v27  ;;  %v13018_v25 = vor.u32 %v17776_v63, %v13015_v5 }
 0x280   :  { %9693 = vmatpush.bf16.msra.mxu1 %v12094_v54  ;;  %v12486_v54 = vor.u32 %v17643_v41, %v12483_v45  ;;  %v13295_v41 = vld [vmem:[#allocation2 + $0xbf4] sm:$0xf0]  ;;  %v17902_v45 = vld [vmem:[#allocation2 + $0xd9c] sm:$0xf]  ;;  %v13043_v53 = vld [vmem:[#allocation2 + $0x9fc] sm:$0xf0] }
 0x281   :  { %9706 = vmatpush.bf16.msra.mxu2 %v12318_v55  ;;  %v12231_v55 = vld [vmem:[#allocation2 + $0x3a4] sm:$0xf0]  ;;  %v9466_v0 = vpop.f32.mrf.mxu3 }
 0x282   :  { %9719 = vmatpush.bf16.msra.mxu3 %v12542_v20  ;;  %v12875_v20 = vld [vmem:[#allocation2 + $0x8ac] sm:$0xf0]  ;;  %v12234_v9 = vor.u32 %v17580_v11, %v12231_v55  ;;  %v13267_v55 = vld [vmem:[#allocation2 + $0xbbc] sm:$0xf0] }
 0x283   :  { %9681 = vmatpush.bf16.msra.mxu0 %v11842_v10  ;;  %v17909_v10 = vld [vmem:[#allocation2 + $0xdd4] sm:$0xf] }
 0x284   :  { %9694 = vmatpush.bf16.msra.mxu1 %v12066_v16  ;;  %v12458_v16 = vor.u32 %v17636_v57, %v12455_v61  ;;  %v13550_v37 = vor.u32 %v17909_v10, %v13547_v58  ;;  %v17895_v57 = vld [vmem:[#allocation2 + $0xd64] sm:$0xf]  ;;  %v13491_v61 = vld [vmem:[#allocation2 + $0xd7c] sm:$0xf0]  ;;  %v17888_v58 = vld [vmem:[#allocation2 + $0xd2c] sm:$0xf] }
 0x285   :  { %9707 = vmatpush.bf16.msra.mxu2 %v12290_v56  ;;  %v12878_v56 = vor.u32 %v17741_v1, %v12875_v20  ;;  %v13046_v1 = vor.u32 %v17783_v52, %v13043_v53  ;;  %v13494_v49 = vor.u32 %v17895_v57, %v13491_v61  ;;  %v17706_v52 = vld [vmem:[#allocation2 + $0x77c] sm:$0xf]  ;;  %v12959_v57 = vld [vmem:[#allocation2 + $0x954] sm:$0xf0] }
 0x286   :  { %9720 = vmatpush.bf16.msra.mxu3 %v12514_v31  ;;  %v17790_v31 = vld [vmem:[#allocation2 + $0xa1c] sm:$0xf] }
 0x287   :  { %9682 = vmatpush.bf16.msra.mxu0 %v11814_v46  ;;  %v13519_v46 = vld [vmem:[#allocation2 + $0xdb4] sm:$0xf0]  ;;  %v13074_v48 = vor.u32 %v17790_v31, %v13071_v4  ;;  %v17713_v31 = vld [vmem:[#allocation2 + $0x7b4] sm:$0xf]  ;;  %v17762_v53 = vld [vmem:[#allocation2 + $0x93c] sm:$0xf] }
 0x288   :  { %9695 = vmatpush.bf16.msra.mxu1 %v12038_v15  ;;  %v13298_v15 = vor.u32 %v17846_v13, %v13295_v41  ;;  %v13522_v11 = vor.u32 %v17902_v45, %v13519_v46  ;;  %v17769_v4 = vld [vmem:[#allocation2 + $0x974] sm:$0xf]  ;;  %v12987_v45 = vld [vmem:[#allocation2 + $0x98c] sm:$0xf0]  ;;  %v17818_v61 = vld [vmem:[#allocation2 + $0xafc] sm:$0xf] }
 0x289   :  { %9708 = vmatpush.bf16.msra.mxu2 %v12262_v50  ;;  %v17727_v50 = vld [vmem:[#allocation2 + $0x824] sm:$0xf]  ;;  %v17825_v46 = vld [vmem:[#allocation2 + $0xb34] sm:$0xf] }
 0x28a   :  { %9721 = vmatpush.bf16.msra.mxu3 %v12486_v54  ;;  %v17839_v54 = vld [vmem:[#allocation2 + $0xba4] sm:$0xf]  ;;  %v12822_v0 = vor.u32 %v17727_v50, %v12819_v51 }
 0x28b   :  { %9683 = vmatpush.bf16.msra.mxu0 %v11786_v3  ;;  %v13270_v20 = vor.u32 %v17839_v54, %v13267_v55  ;;  %v12791_v3 = vld [vmem:[#allocation2 + $0x804] sm:$0xf0]  ;;  %v9477_v10 = vpop.f32.mrf.mxu0 }
 0x28c   :  { %9696 = vmatpush.bf16.msra.mxu1 %v12010_v6  ;;  %v17832_v6 = vld [vmem:[#allocation2 + $0xb6c] sm:$0xf] }
 0x28d   :  { %9709 = vmatpush.bf16.msra.mxu2 %v12234_v9  ;;  %v13239_v9 = vld [vmem:[#allocation2 + $0xb84] sm:$0xf0] }
 0x28e   :  { %9722 = vmatpush.bf16.msra.mxu3 %v12458_v16  ;;  %9684 = vmatmul.bf16.vlgmr.msra.gmra.mxu0 %v19311_v36  ;;  %v13463_v16 = vld [vmem:[#allocation2 + $0xd44] sm:$0xf0]  ;;  %v13242_v27 = vor.u32 %v17832_v6, %v13239_v9  ;;  %v12962_v9 = vor.u32 %v17762_v53, %v12959_v57  ;;  %v17965_v53 = vld [vmem:[#allocation2 + $0xf94] sm:$0xf] }
 0x28f   :  { %9728 = vmatpush.bf16.msrb.mxu0 %v12878_v56  ;;  %9697 = vmatmul.bf16.vlgmr.msra.gmra.mxu1 %v19315_v43  ;;  %v9478_v56 = vadd.f32 %v9477_v10, %v19507_v14  ;;  %v13466_v13 = vor.u32 %v17888_v58, %v13463_v16  ;;  %v12990_v14 = vor.u32 %v17769_v4, %v12987_v45  ;;  %v17699_v58 = vld [vmem:[#allocation2 + $0x744] sm:$0xf]  ;;  %v12707_v16 = vld [vmem:[#allocation2 + $0x75c] sm:$0xf0] }
 0x290   :  { %9741 = vmatpush.bf16.msrb.mxu1 %v13102_v17  ;;  %9710 = vmatmul.bf16.vlgmr.msra.gmra.mxu2 %v19309_v35  ;;  %v12794_v17 = vor.u32 %v17720_v30, %v12791_v3  ;;  %v17874_v30 = vld [vmem:[#allocation2 + $0xcbc] sm:$0xf]  ;;  %v13407_v3 = vld [vmem:[#allocation2 + $0xcd4] sm:$0xf0]  ;;  %v12710_v4 = vor.u32 %v17699_v58, %v12707_v16 }
 0x291   :  { %9754 = vmatpush.bf16.msrb.mxu2 %v13326_v23  ;;  %9723 = vmatmul.bf16.vlgmr.msra.gmra.mxu3 %v19313_v42  ;;  %v9490_v23 = vpop.f32.mrf.mxu1  ;;  %v17958_v16 = vld [vmem:[#allocation2 + $0xf5c] sm:$0xf] }
 0x292   :  { %9767 = vmatpush.bf16.msrb.mxu3 %v13550_v37  ;;  %v12763_v37 = vld [vmem:[#allocation2 + $0x7cc] sm:$0xf0]  ;;  %v9491_v41 = vadd.f32 %v9490_v23, %v9478_v56  ;;  %v17755_v56 = vld [vmem:[#allocation2 + $0x904] sm:$0xf]  ;;  %v12931_v23 = vld [vmem:[#allocation2 + $0x91c] sm:$0xf0] }
 0x293   :  { %9729 = vmatpush.bf16.msrb.mxu0 %v12850_v62  ;;  %v13211_v62 = vld [vmem:[#allocation2 + $0xb4c] sm:$0xf0]  ;;  %v12766_v50 = vor.u32 %v17713_v31, %v12763_v37  ;;  %v9503_v55 = vpop.f32.mrf.mxu2  ;;  %v9479_v63 = vpop.f32.mrf.mxu0  ;;  %v17867_v31 = vld [vmem:[#allocation2 + $0xc84] sm:$0xf]  ;;  %v13379_v37 = vld [vmem:[#allocation2 + $0xc9c] sm:$0xf0]  ;;  %v12934_v45 = vor.u32 %v17755_v56, %v12931_v23 }
 0x294   :  { %9742 = vmatpush.bf16.msrb.mxu1 %v13074_v48  ;;  %v17881_v48 = vld [vmem:[#allocation2 + $0xcf4] sm:$0xf]  ;;  %v13214_v51 = vor.u32 %v17825_v46, %v13211_v62  ;;  %v17748_v62 = vld [vmem:[#allocation2 + $0x8cc] sm:$0xf]  ;;  %v13743_v56 = vld [vmem:[#allocation2 + $0xf74] sm:$0xf0] }
 0x295   :  { %9755 = vmatpush.bf16.msrb.mxu2 %v13298_v15  ;;  %v13435_v15 = vld [vmem:[#allocation2 + $0xd0c] sm:$0xf0]  ;;  %v18133_v63 = vld [vmem:[#allocation2 + $0x14d4] sm:$0xf] }
 0x296   :  { %9768 = vmatpush.bf16.msrb.mxu3 %v13522_v11  ;;  %v12735_v11 = vld [vmem:[#allocation2 + $0x794] sm:$0xf0]  ;;  %v13438_v54 = vor.u32 %v17881_v48, %v13435_v15  ;;  %v12903_v48 = vld [vmem:[#allocation2 + $0x8e4] sm:$0xf0]  ;;  %v17804_v15 = vld [vmem:[#allocation2 + $0xa8c] sm:$0xf] }
 0x297   :  { %9730 = vmatpush.bf16.msrb.mxu0 %v12822_v0  ;;  %v13183_v0 = vld [vmem:[#allocation2 + $0xb14] sm:$0xf0] }
 0x298   :  { %9743 = vmatpush.bf16.msrb.mxu1 %v13046_v1  ;;  %v9504_v1 = vadd.f32 %v9503_v55, %v9491_v41  ;;  %v13186_v10 = vor.u32 %v17818_v61, %v13183_v0  ;;  %v12679_v41 = vld [vmem:[#allocation2 + $0x724] sm:$0xf0]  ;;  %v18021_v55 = vld [vmem:[#allocation2 + $0x1154] sm:$0xf]  ;;  %v13995_v0 = vld [vmem:[#allocation2 + $0x116c] sm:$0xf0] }
 0x299   :  { %9756 = vmatpush.bf16.msrb.mxu2 %v13270_v20  ;;  %v9516_v20 = vpop.f32.mrf.mxu3  ;;  %v9492_v5 = vpop.f32.mrf.mxu1 }
 0x29a   :  { %9769 = vmatpush.bf16.msrb.mxu3 %v13494_v49  ;;  %v12738_v49 = vor.u32 %v17706_v52, %v12735_v11  ;;  %v19514_v6 = vadd.f32 %v9516_v20, %v9504_v1  ;;  %v13351_v52 = vld [vmem:[#allocation2 + $0xc64] sm:$0xf0]  ;;  %v18077_v1 = vld [vmem:[#allocation2 + $0x1314] sm:$0xf]  ;;  %v14219_v20 = vld [vmem:[#allocation2 + $0x132c] sm:$0xf0] }
 0x29b   :  { %9731 = vmatpush.bf16.msrb.mxu0 %v12794_v17  ;;  %v13410_v17 = vor.u32 %v17874_v30, %v13407_v3  ;;  %v9505_v11 = vpop.f32.mrf.mxu2  ;;  %v12906_v30 = vor.u32 %v17748_v62, %v12903_v48  ;;  %v14222_v58 = vor.u32 %v18077_v1, %v14219_v20  ;;  %v13715_v62 = vld [vmem:[#allocation2 + $0xf3c] sm:$0xf0]  ;;  %v18007_v48 = vld [vmem:[#allocation2 + $0x10e4] sm:$0xf]  ;;  %v13911_v20 = vld [vmem:[#allocation2 + $0x10c4] sm:$0xf0] }
 0x29c   :  { %9744 = vmatpush.bf16.msrb.mxu1 %v13018_v25  ;;  %v17811_v25 = vld [vmem:[#allocation2 + $0xac4] sm:$0xf]  ;;  %v14387_v11 = vld [vmem:[#allocation2 + $0x147c] sm:$0xf0] }
 0x29d   :  { %9757 = vmatpush.bf16.msrb.mxu2 %v13242_v27  ;;  %v13155_v27 = vld [vmem:[#allocation2 + $0xadc] sm:$0xf0] }
 0x29e   :  { %9770 = vmatpush.bf16.msrb.mxu3 %v13466_v13  ;;  %v17692_v13 = vld [vmem:[#allocation2 + $0x70c] sm:$0xf]  ;;  %v13158_v46 = vor.u32 %v17811_v25, %v13155_v27  ;;  %v13967_v25 = vld [vmem:[#allocation2 + $0x1134] sm:$0xf0]  ;;  %v18070_v27 = vld [vmem:[#allocation2 + $0x12dc] sm:$0xf] }
 0x29f   :  { %9732 = vmatpush.bf16.msrb.mxu0 %v12766_v50  ;;  %v13382_v50 = vor.u32 %v17867_v31, %v13379_v37  ;;  %v12682_v61 = vor.u32 %v17692_v13, %v12679_v41  ;;  %v14191_v31 = vld [vmem:[#allocation2 + $0x12f4] sm:$0xf0]  ;;  %v18126_v37 = vld [vmem:[#allocation2 + $0x149c] sm:$0xf]  ;;  %v13746_v13 = vor.u32 %v17958_v16, %v13743_v56 }
 0x2a0   :  { %9745 = vmatpush.bf16.msrb.mxu1 %v12990_v14  ;;  %v13127_v14 = vld [vmem:[#allocation2 + $0xaa4] sm:$0xf0] }
 0x2a1   :  { %9758 = vmatpush.bf16.msrb.mxu2 %v13214_v51  ;;  %v17860_v51 = vld [vmem:[#allocation2 + $0xc4c] sm:$0xf]  ;;  %v9518_v57 = vpop.f32.mrf.mxu3  ;;  %v13130_v3 = vor.u32 %v17804_v15, %v13127_v14  ;;  %v18063_v14 = vld [vmem:[#allocation2 + $0x12a4] sm:$0xf] }
 0x2a2   :  { %9771 = vmatpush.bf16.msrb.mxu3 %v13438_v54  ;;  %v13771_v54 = vld [vmem:[#allocation2 + $0xfac] sm:$0xf0]  ;;  %v13354_v5 = vor.u32 %v17860_v51, %v13351_v52  ;;  %v14163_v51 = vld [vmem:[#allocation2 + $0x12bc] sm:$0xf0]  ;;  %v18119_v52 = vld [vmem:[#allocation2 + $0x1464] sm:$0xf] }
 0x2a3   :  { %9733 = vmatpush.bf16.msrb.mxu0 %v12738_v49  ;;  %v14443_v49 = vld [vmem:[#allocation2 + $0x14ec] sm:$0xf0]  ;;  %v17944_v57 = vld [vmem:[#allocation2 + $0xeec] sm:$0xf]  ;;  %v14390_v1 = vor.u32 %v18119_v52, %v14387_v11  ;;  %v13855_v52 = vld [vmem:[#allocation2 + $0x1054] sm:$0xf0] }
 0x2a4   :  { %9746 = vmatpush.bf16.msrb.mxu1 %v12962_v9  ;;  %v13774_v9 = vor.u32 %v17965_v53, %v13771_v54  ;;  %v14446_v23 = vor.u32 %v18133_v63, %v14443_v49  ;;  %v18112_v49 = vld [vmem:[#allocation2 + $0x142c] sm:$0xf]  ;;  %v18042_v11 = vld [vmem:[#allocation2 + $0x11fc] sm:$0xf] }
 0x2a5   :  { %9759 = vmatpush.bf16.msrb.mxu2 %v13186_v10  ;;  %v13998_v10 = vor.u32 %v18021_v55, %v13995_v0  ;;  %v14166_v55 = vor.u32 %v18063_v14, %v14163_v51  ;;  %v18000_v0 = vld [vmem:[#allocation2 + $0x10ac] sm:$0xf] }
 0x2a6   :  { %9772 = vmatpush.bf16.msrb.mxu3 %v13410_v17  ;;  %v18014_v17 = vld [vmem:[#allocation2 + $0x111c] sm:$0xf]  ;;  %v13914_v16 = vor.u32 %v18000_v0, %v13911_v20 }
 0x2a7   :  { %9734 = vmatpush.bf16.msrb.mxu0 %v12710_v4  ;;  %v14415_v4 = vld [vmem:[#allocation2 + $0x14b4] sm:$0xf0]  ;;  %v13970_v41 = vor.u32 %v18014_v17, %v13967_v25  ;;  %v17937_v17 = vld [vmem:[#allocation2 + $0xeb4] sm:$0xf] }
 0x2a8   :  { %9747 = vmatpush.bf16.msrb.mxu1 %v12934_v45  ;;  %v14194_v45 = vor.u32 %v18070_v27, %v14191_v31  ;;  %v14418_v15 = vor.u32 %v18126_v37, %v14415_v4  ;;  %v17993_v25 = vld [vmem:[#allocation2 + $0x1074] sm:$0xf]  ;;  %v13883_v37 = vld [vmem:[#allocation2 + $0x108c] sm:$0xf0] }
 0x2a9   :  { %9760 = vmatpush.bf16.msrb.mxu2 %v13158_v46  ;;  %v17951_v46 = vld [vmem:[#allocation2 + $0xf24] sm:$0xf]  ;;  %v18049_v4 = vld [vmem:[#allocation2 + $0x1234] sm:$0xf] }
 0x2aa   :  { %9773 = vmatpush.bf16.msrb.mxu3 %v13382_v50  ;;  %v13939_v50 = vld [vmem:[#allocation2 + $0x10fc] sm:$0xf0]  ;;  %v13718_v53 = vor.u32 %v17951_v46, %v13715_v62 }
 0x2ab   :  { %9735 = vmatpush.bf16.msrb.mxu0 %v12682_v61  ;;  %v13942_v54 = vor.u32 %v18007_v48, %v13939_v50  ;;  %v13687_v61 = vld [vmem:[#allocation2 + $0xf04] sm:$0xf0]  ;;  %v9529_v63 = vpop.f32.mrf.mxu0  ;;  %v17930_v48 = vld [vmem:[#allocation2 + $0xe7c] sm:$0xf] }
 0x2ac   :  { %9748 = vmatpush.bf16.msrb.mxu1 %v12906_v30  ;;  %v18056_v30 = vld [vmem:[#allocation2 + $0x126c] sm:$0xf]  ;;  %v17986_v50 = vld [vmem:[#allocation2 + $0x103c] sm:$0xf] }
 0x2ad   :  { %9761 = vmatpush.bf16.msrb.mxu2 %v13130_v3  ;;  %v14135_v3 = vld [vmem:[#allocation2 + $0x1284] sm:$0xf0] }
 0x2ae   :  { %9774 = vmatpush.bf16.msrb.mxu3 %v13354_v5  ;;  %9736 = vmatmul.bf16.vlgmr.msrb.gmra.mxu0 %v19329_v39  ;;  %v14359_v5 = vld [vmem:[#allocation2 + $0x1444] sm:$0xf0]  ;;  %v14138_v56 = vor.u32 %v18056_v30, %v14135_v3  ;;  %v13858_v3 = vor.u32 %v17986_v50, %v13855_v52  ;;  %v18189_v50 = vld [vmem:[#allocation2 + $0x1694] sm:$0xf] }
 0x2af   :  { %9780 = vmatpush.bf16.msra.mxu0 %v13774_v9  ;;  %9749 = vmatmul.bf16.vlgmr.msrb.gmra.mxu1 %v19333_v44  ;;  %v9530_v9 = vadd.f32 %v9529_v63, %v19514_v6  ;;  %v14362_v27 = vor.u32 %v18112_v49, %v14359_v5  ;;  %v13886_v6 = vor.u32 %v17993_v25, %v13883_v37  ;;  %v17923_v49 = vld [vmem:[#allocation2 + $0xe44] sm:$0xf]  ;;  %v13603_v5 = vld [vmem:[#allocation2 + $0xe5c] sm:$0xf0] }
 0x2b0   :  { %9793 = vmatpush.bf16.msra.mxu1 %v13998_v10  ;;  %9762 = vmatmul.bf16.vlgmr.msrb.gmra.mxu2 %v19327_v34  ;;  %v13690_v10 = vor.u32 %v17944_v57, %v13687_v61  ;;  %v18098_v57 = vld [vmem:[#allocation2 + $0x13bc] sm:$0xf]  ;;  %v14303_v61 = vld [vmem:[#allocation2 + $0x13d4] sm:$0xf0]  ;;  %v13606_v25 = vor.u32 %v17923_v49, %v13603_v5 }
 0x2b1   :  { %9806 = vmatpush.bf16.msra.mxu2 %v14222_v58  ;;  %9775 = vmatmul.bf16.vlgmr.msrb.gmra.mxu3 %v19331_v40  ;;  %v9542_v58 = vpop.f32.mrf.mxu1  ;;  %v18182_v5 = vld [vmem:[#allocation2 + $0x165c] sm:$0xf] }
 0x2b2   :  { %9819 = vmatpush.bf16.msra.mxu3 %v14446_v23  ;;  %v13659_v23 = vld [vmem:[#allocation2 + $0xecc] sm:$0xf0]  ;;  %v9543_v31 = vadd.f32 %v9542_v58, %v9530_v9  ;;  %v17979_v9 = vld [vmem:[#allocation2 + $0x1004] sm:$0xf]  ;;  %v13827_v58 = vld [vmem:[#allocation2 + $0x101c] sm:$0xf0] }
 0x2b3   :  { %9781 = vmatpush.bf16.msra.mxu0 %v13746_v13  ;;  %v14107_v13 = vld [vmem:[#allocation2 + $0x124c] sm:$0xf0]  ;;  %v13662_v46 = vor.u32 %v17937_v17, %v13659_v23  ;;  %v9555_v51 = vpop.f32.mrf.mxu2  ;;  %v9531_v0 = vpop.f32.mrf.mxu0  ;;  %v18091_v17 = vld [vmem:[#allocation2 + $0x1384] sm:$0xf]  ;;  %v14275_v23 = vld [vmem:[#allocation2 + $0x139c] sm:$0xf0]  ;;  %v13830_v37 = vor.u32 %v17979_v9, %v13827_v58 }
 0x2b4   :  { %9794 = vmatpush.bf16.msra.mxu1 %v13970_v41  ;;  %v18105_v41 = vld [vmem:[#allocation2 + $0x13f4] sm:$0xf]  ;;  %v14110_v62 = vor.u32 %v18049_v4, %v14107_v13  ;;  %v17972_v13 = vld [vmem:[#allocation2 + $0xfcc] sm:$0xf]  ;;  %v14639_v9 = vld [vmem:[#allocation2 + $0x1674] sm:$0xf0] }
 0x2b5   :  { %9807 = vmatpush.bf16.msra.mxu2 %v14194_v45  ;;  %v14331_v45 = vld [vmem:[#allocation2 + $0x140c] sm:$0xf0]  ;;  %v18357_v0 = vld [vmem:[#allocation2 + $0x1bd4] sm:$0xf] }
 0x2b6   :  { %9820 = vmatpush.bf16.msra.mxu3 %v14418_v15  ;;  %v13631_v15 = vld [vmem:[#allocation2 + $0xe94] sm:$0xf0]  ;;  %v14334_v14 = vor.u32 %v18105_v41, %v14331_v45  ;;  %v13799_v41 = vld [vmem:[#allocation2 + $0xfe4] sm:$0xf0]  ;;  %v18028_v45 = vld [vmem:[#allocation2 + $0x118c] sm:$0xf] }
 0x2b7   :  { %9782 = vmatpush.bf16.msra.mxu0 %v13718_v53  ;;  %v14079_v53 = vld [vmem:[#allocation2 + $0x1214] sm:$0xf0] }
 0x2b8   :  { %9795 = vmatpush.bf16.msra.mxu1 %v13942_v54  ;;  %v9556_v54 = vadd.f32 %v9555_v51, %v9543_v31  ;;  %v14082_v63 = vor.u32 %v18042_v11, %v14079_v53  ;;  %v13575_v31 = vld [vmem:[#allocation2 + $0xe24] sm:$0xf0]  ;;  %v18245_v51 = vld [vmem:[#allocation2 + $0x1854] sm:$0xf]  ;;  %v14891_v53 = vld [vmem:[#allocation2 + $0x186c] sm:$0xf0] }
 0x2b9   :  { %9808 = vmatpush.bf16.msra.mxu2 %v14166_v55  ;;  %v9568_v55 = vpop.f32.mrf.mxu3  ;;  %v9544_v20 = vpop.f32.mrf.mxu1 }
 0x2ba   :  { %9821 = vmatpush.bf16.msra.mxu3 %v14390_v1  ;;  %v13634_v1 = vor.u32 %v17930_v48, %v13631_v15  ;;  %v19521_v30 = vadd.f32 %v9568_v55, %v9556_v54  ;;  %v14247_v48 = vld [vmem:[#allocation2 + $0x1364] sm:$0xf0]  ;;  %v18301_v54 = vld [vmem:[#allocation2 + $0x1a14] sm:$0xf]  ;;  %v15115_v55 = vld [vmem:[#allocation2 + $0x1a2c] sm:$0xf0] }
 0x2bb   :  { %9783 = vmatpush.bf16.msra.mxu0 %v13690_v10  ;;  %v14306_v10 = vor.u32 %v18098_v57, %v14303_v61  ;;  %v9557_v15 = vpop.f32.mrf.mxu2  ;;  %v13802_v57 = vor.u32 %v17972_v13, %v13799_v41  ;;  %v15118_v49 = vor.u32 %v18301_v54, %v15115_v55  ;;  %v14611_v13 = vld [vmem:[#allocation2 + $0x163c] sm:$0xf0]  ;;  %v18231_v41 = vld [vmem:[#allocation2 + $0x17e4] sm:$0xf]  ;;  %v14807_v55 = vld [vmem:[#allocation2 + $0x17c4] sm:$0xf0] }
 0x2bc   :  { %9796 = vmatpush.bf16.msra.mxu1 %v13914_v16  ;;  %v18035_v16 = vld [vmem:[#allocation2 + $0x11c4] sm:$0xf]  ;;  %v15283_v15 = vld [vmem:[#allocation2 + $0x1b7c] sm:$0xf0] }
 0x2bd   :  { %9809 = vmatpush.bf16.msra.mxu2 %v14138_v56  ;;  %v14051_v56 = vld [vmem:[#allocation2 + $0x11dc] sm:$0xf0] }
 0x2be   :  { %9822 = vmatpush.bf16.msra.mxu3 %v14362_v27  ;;  %v17916_v27 = vld [vmem:[#allocation2 + $0xe0c] sm:$0xf]  ;;  %v14054_v4 = vor.u32 %v18035_v16, %v14051_v56  ;;  %v14863_v16 = vld [vmem:[#allocation2 + $0x1834] sm:$0xf0]  ;;  %v18294_v56 = vld [vmem:[#allocation2 + $0x19dc] sm:$0xf] }
 0x2bf   :  { %9784 = vmatpush.bf16.msra.mxu0 %v13662_v46  ;;  %v14278_v46 = vor.u32 %v18091_v17, %v14275_v23  ;;  %v13578_v11 = vor.u32 %v17916_v27, %v13575_v31  ;;  %v15087_v17 = vld [vmem:[#allocation2 + $0x19f4] sm:$0xf0]  ;;  %v18350_v23 = vld [vmem:[#allocation2 + $0x1b9c] sm:$0xf]  ;;  %v14642_v27 = vor.u32 %v18182_v5, %v14639_v9 }
 0x2c0   :  { %9797 = vmatpush.bf16.msra.mxu1 %v13886_v6  ;;  %v14023_v6 = vld [vmem:[#allocation2 + $0x11a4] sm:$0xf0] }
 0x2c1   :  { %9810 = vmatpush.bf16.msra.mxu2 %v14110_v62  ;;  %v18084_v62 = vld [vmem:[#allocation2 + $0x134c] sm:$0xf]  ;;  %v9570_v52 = vpop.f32.mrf.mxu3  ;;  %v14026_v61 = vor.u32 %v18028_v45, %v14023_v6  ;;  %v18287_v6 = vld [vmem:[#allocation2 + $0x19a4] sm:$0xf] }
 0x2c2   :  { %9823 = vmatpush.bf16.msra.mxu3 %v14334_v14  ;;  %v14667_v14 = vld [vmem:[#allocation2 + $0x16ac] sm:$0xf0]  ;;  %v14250_v20 = vor.u32 %v18084_v62, %v14247_v48  ;;  %v15059_v62 = vld [vmem:[#allocation2 + $0x19bc] sm:$0xf0]  ;;  %v18343_v48 = vld [vmem:[#allocation2 + $0x1b64] sm:$0xf] }
 0x2c3   :  { %9785 = vmatpush.bf16.msra.mxu0 %v13634_v1  ;;  %v15339_v1 = vld [vmem:[#allocation2 + $0x1bec] sm:$0xf0]  ;;  %v18168_v52 = vld [vmem:[#allocation2 + $0x15ec] sm:$0xf]  ;;  %v15286_v54 = vor.u32 %v18343_v48, %v15283_v15  ;;  %v14751_v48 = vld [vmem:[#allocation2 + $0x1754] sm:$0xf0] }
 0x2c4   :  { %9798 = vmatpush.bf16.msra.mxu1 %v13858_v3  ;;  %v14670_v3 = vor.u32 %v18189_v50, %v14667_v14  ;;  %v15342_v58 = vor.u32 %v18357_v0, %v15339_v1  ;;  %v18336_v1 = vld [vmem:[#allocation2 + $0x1b2c] sm:$0xf]  ;;  %v18266_v15 = vld [vmem:[#allocation2 + $0x18fc] sm:$0xf] }
 0x2c5   :  { %9811 = vmatpush.bf16.msra.mxu2 %v14082_v63  ;;  %v14894_v63 = vor.u32 %v18245_v51, %v14891_v53  ;;  %v15062_v51 = vor.u32 %v18287_v6, %v15059_v62  ;;  %v18224_v53 = vld [vmem:[#allocation2 + $0x17ac] sm:$0xf] }
 0x2c6   :  { %9824 = vmatpush.bf16.msra.mxu3 %v14306_v10  ;;  %v18238_v10 = vld [vmem:[#allocation2 + $0x181c] sm:$0xf]  ;;  %v14810_v5 = vor.u32 %v18224_v53, %v14807_v55 }
 0x2c7   :  { %9786 = vmatpush.bf16.msra.mxu0 %v13606_v25  ;;  %v15311_v25 = vld [vmem:[#allocation2 + $0x1bb4] sm:$0xf0]  ;;  %v14866_v31 = vor.u32 %v18238_v10, %v14863_v16  ;;  %v18161_v10 = vld [vmem:[#allocation2 + $0x15b4] sm:$0xf] }
 0x2c8   :  { %9799 = vmatpush.bf16.msra.mxu1 %v13830_v37  ;;  %v15090_v37 = vor.u32 %v18294_v56, %v15087_v17  ;;  %v15314_v45 = vor.u32 %v18350_v23, %v15311_v25  ;;  %v18217_v16 = vld [vmem:[#allocation2 + $0x1774] sm:$0xf]  ;;  %v14779_v23 = vld [vmem:[#allocation2 + $0x178c] sm:$0xf0] }
 0x2c9   :  { %9812 = vmatpush.bf16.msra.mxu2 %v14054_v4  ;;  %v18175_v4 = vld [vmem:[#allocation2 + $0x1624] sm:$0xf]  ;;  %v18273_v25 = vld [vmem:[#allocation2 + $0x1934] sm:$0xf] }
 0x2ca   :  { %9825 = vmatpush.bf16.msra.mxu3 %v14278_v46  ;;  %v14835_v46 = vld [vmem:[#allocation2 + $0x17fc] sm:$0xf0]  ;;  %v14614_v50 = vor.u32 %v18175_v4, %v14611_v13 }
 0x2cb   :  { %9787 = vmatpush.bf16.msra.mxu0 %v13578_v11  ;;  %v14838_v14 = vor.u32 %v18231_v41, %v14835_v46  ;;  %v14583_v11 = vld [vmem:[#allocation2 + $0x1604] sm:$0xf0]  ;;  %v9581_v0 = vpop.f32.mrf.mxu0  ;;  %v18154_v41 = vld [vmem:[#allocation2 + $0x157c] sm:$0xf] }
 0x2cc   :  { %9800 = vmatpush.bf16.msra.mxu1 %v13802_v57  ;;  %v18280_v57 = vld [vmem:[#allocation2 + $0x196c] sm:$0xf]  ;;  %v18210_v46 = vld [vmem:[#allocation2 + $0x173c] sm:$0xf] }
 0x2cd   :  { %9813 = vmatpush.bf16.msra.mxu2 %v14026_v61  ;;  %v15031_v61 = vld [vmem:[#allocation2 + $0x1984] sm:$0xf0] }
 0x2ce   :  { %9826 = vmatpush.bf16.msra.mxu3 %v14250_v20  ;;  %9788 = vmatmul.bf16.vlgmr.msra.gmra.mxu0 %v19352_v24  ;;  %v15255_v20 = vld [vmem:[#allocation2 + $0x1b44] sm:$0xf0]  ;;  %v15034_v9 = vor.u32 %v18280_v57, %v15031_v61  ;;  %v14754_v61 = vor.u32 %v18210_v46, %v14751_v48  ;;  %v18413_v46 = vld [vmem:[#allocation2 + $0x1d94] sm:$0xf] }
 0x2cf   :  { %9832 = vmatpush.bf16.msrb.mxu0 %v14670_v3  ;;  %9801 = vmatmul.bf16.vlgmr.msra.gmra.mxu1 %v19360_v29  ;;  %v9582_v3 = vadd.f32 %v9581_v0, %v19521_v30  ;;  %v15258_v56 = vor.u32 %v18336_v1, %v15255_v20  ;;  %v14782_v30 = vor.u32 %v18217_v16, %v14779_v23  ;;  %v18147_v1 = vld [vmem:[#allocation2 + $0x1544] sm:$0xf]  ;;  %v14499_v20 = vld [vmem:[#allocation2 + $0x155c] sm:$0xf0] }
 0x2d0   :  { %9845 = vmatpush.bf16.msrb.mxu1 %v14894_v63  ;;  %9814 = vmatmul.bf16.vlgmr.msra.gmra.mxu2 %v19356_v28  ;;  %v14586_v63 = vor.u32 %v18168_v52, %v14583_v11  ;;  %v18322_v52 = vld [vmem:[#allocation2 + $0x1abc] sm:$0xf]  ;;  %v15199_v11 = vld [vmem:[#allocation2 + $0x1ad4] sm:$0xf0]  ;;  %v14502_v16 = vor.u32 %v18147_v1, %v14499_v20 }
 0x2d1   :  { %9858 = vmatpush.bf16.msrb.mxu2 %v15118_v49  ;;  %9827 = vmatmul.bf16.vlgmr.msra.gmra.mxu3 %v19364_v18  ;;  %v9594_v49 = vpop.f32.mrf.mxu1  ;;  %v18406_v20 = vld [vmem:[#allocation2 + $0x1d5c] sm:$0xf] }
 0x2d2   :  { %9871 = vmatpush.bf16.msrb.mxu3 %v15342_v58  ;;  %v14555_v58 = vld [vmem:[#allocation2 + $0x15cc] sm:$0xf0]  ;;  %v9595_v17 = vadd.f32 %v9594_v49, %v9582_v3  ;;  %v18203_v3 = vld [vmem:[#allocation2 + $0x1704] sm:$0xf]  ;;  %v14723_v49 = vld [vmem:[#allocation2 + $0x171c] sm:$0xf0] }
 0x2d3   :  { %9833 = vmatpush.bf16.msrb.mxu0 %v14642_v27  ;;  %v15003_v27 = vld [vmem:[#allocation2 + $0x194c] sm:$0xf0]  ;;  %v14558_v4 = vor.u32 %v18161_v10, %v14555_v58  ;;  %v9607_v62 = vpop.f32.mrf.mxu2  ;;  %v9583_v53 = vpop.f32.mrf.mxu0  ;;  %v18315_v10 = vld [vmem:[#allocation2 + $0x1a84] sm:$0xf]  ;;  %v15171_v58 = vld [vmem:[#allocation2 + $0x1a9c] sm:$0xf0]  ;;  %v14726_v23 = vor.u32 %v18203_v3, %v14723_v49 }
 0x2d4   :  { %9846 = vmatpush.bf16.msrb.mxu1 %v14866_v31  ;;  %v18329_v31 = vld [vmem:[#allocation2 + $0x1af4] sm:$0xf]  ;;  %v15006_v13 = vor.u32 %v18273_v25, %v15003_v27  ;;  %v18196_v27 = vld [vmem:[#allocation2 + $0x16cc] sm:$0xf]  ;;  %v15535_v3 = vld [vmem:[#allocation2 + $0x1d74] sm:$0xf0] }
 0x2d5   :  { %9859 = vmatpush.bf16.msrb.mxu2 %v15090_v37  ;;  %v15227_v37 = vld [vmem:[#allocation2 + $0x1b0c] sm:$0xf0]  ;;  %v18581_v53 = vld [vmem:[#allocation2 + $0x22d4] sm:$0xf] }
 0x2d6   :  { %9872 = vmatpush.bf16.msrb.mxu3 %v15314_v45  ;;  %v14527_v45 = vld [vmem:[#allocation2 + $0x1594] sm:$0xf0]  ;;  %v15230_v6 = vor.u32 %v18329_v31, %v15227_v37  ;;  %v14695_v31 = vld [vmem:[#allocation2 + $0x16e4] sm:$0xf0]  ;;  %v18252_v37 = vld [vmem:[#allocation2 + $0x188c] sm:$0xf] }
 0x2d7   :  { %9834 = vmatpush.bf16.msrb.mxu0 %v14614_v50  ;;  %v14975_v50 = vld [vmem:[#allocation2 + $0x1914] sm:$0xf0] }
 0x2d8   :  { %9847 = vmatpush.bf16.msrb.mxu1 %v14838_v14  ;;  %v9608_v14 = vadd.f32 %v9607_v62, %v9595_v17  ;;  %v14978_v0 = vor.u32 %v18266_v15, %v14975_v50  ;;  %v14471_v17 = vld [vmem:[#allocation2 + $0x1524] sm:$0xf0]  ;;  %v18469_v62 = vld [vmem:[#allocation2 + $0x1f54] sm:$0xf]  ;;  %v15787_v50 = vld [vmem:[#allocation2 + $0x1f6c] sm:$0xf0] }
 0x2d9   :  { %9860 = vmatpush.bf16.msrb.mxu2 %v15062_v51  ;;  %v9620_v51 = vpop.f32.mrf.mxu3  ;;  %v9596_v55 = vpop.f32.mrf.mxu1 }
 0x2da   :  { %9873 = vmatpush.bf16.msrb.mxu3 %v15286_v54  ;;  %v14530_v54 = vor.u32 %v18154_v41, %v14527_v45  ;;  %v19528_v57 = vadd.f32 %v9620_v51, %v9608_v14  ;;  %v15143_v41 = vld [vmem:[#allocation2 + $0x1a64] sm:$0xf0]  ;;  %v18525_v14 = vld [vmem:[#allocation2 + $0x2114] sm:$0xf]  ;;  %v16011_v51 = vld [vmem:[#allocation2 + $0x212c] sm:$0xf0] }
 0x2db   :  { %9835 = vmatpush.bf16.msrb.mxu0 %v14586_v63  ;;  %v15202_v63 = vor.u32 %v18322_v52, %v15199_v11  ;;  %v9609_v45 = vpop.f32.mrf.mxu2  ;;  %v14698_v52 = vor.u32 %v18196_v27, %v14695_v31  ;;  %v16014_v1 = vor.u32 %v18525_v14, %v16011_v51  ;;  %v15507_v27 = vld [vmem:[#allocation2 + $0x1d3c] sm:$0xf0]  ;;  %v18455_v31 = vld [vmem:[#allocation2 + $0x1ee4] sm:$0xf]  ;;  %v15703_v51 = vld [vmem:[#allocation2 + $0x1ec4] sm:$0xf0] }
 0x2dc   :  { %9848 = vmatpush.bf16.msrb.mxu1 %v14810_v5  ;;  %v18259_v5 = vld [vmem:[#allocation2 + $0x18c4] sm:$0xf]  ;;  %v16179_v45 = vld [vmem:[#allocation2 + $0x227c] sm:$0xf0] }
 0x2dd   :  { %9861 = vmatpush.bf16.msrb.mxu2 %v15034_v9  ;;  %v14947_v9 = vld [vmem:[#allocation2 + $0x18dc] sm:$0xf0] }
 0x2de   :  { %9874 = vmatpush.bf16.msrb.mxu3 %v15258_v56  ;;  %v18140_v56 = vld [vmem:[#allocation2 + $0x150c] sm:$0xf]  ;;  %v14950_v25 = vor.u32 %v18259_v5, %v14947_v9  ;;  %v15759_v5 = vld [vmem:[#allocation2 + $0x1f34] sm:$0xf0]  ;;  %v18518_v9 = vld [vmem:[#allocation2 + $0x20dc] sm:$0xf] }
 0x2df   :  { %9836 = vmatpush.bf16.msrb.mxu0 %v14558_v4  ;;  %v15174_v4 = vor.u32 %v18315_v10, %v15171_v58  ;;  %v14474_v15 = vor.u32 %v18140_v56, %v14471_v17  ;;  %v15983_v10 = vld [vmem:[#allocation2 + $0x20f4] sm:$0xf0]  ;;  %v18574_v58 = vld [vmem:[#allocation2 + $0x229c] sm:$0xf]  ;;  %v15538_v56 = vor.u32 %v18406_v20, %v15535_v3 }
 0x2e0   :  { %9849 = vmatpush.bf16.msrb.mxu1 %v14782_v30  ;;  %v14919_v30 = vld [vmem:[#allocation2 + $0x18a4] sm:$0xf0] }
 0x2e1   :  { %9862 = vmatpush.bf16.msrb.mxu2 %v15006_v13  ;;  %v18308_v13 = vld [vmem:[#allocation2 + $0x1a4c] sm:$0xf]  ;;  %v9622_v48 = vpop.f32.mrf.mxu3  ;;  %v14922_v11 = vor.u32 %v18252_v37, %v14919_v30  ;;  %v18511_v30 = vld [vmem:[#allocation2 + $0x20a4] sm:$0xf] }
 0x2e2   :  { %9875 = vmatpush.bf16.msrb.mxu3 %v15230_v6  ;;  %v15563_v6 = vld [vmem:[#allocation2 + $0x1dac] sm:$0xf0]  ;;  %v15146_v55 = vor.u32 %v18308_v13, %v15143_v41  ;;  %v15955_v13 = vld [vmem:[#allocation2 + $0x20bc] sm:$0xf0]  ;;  %v18567_v41 = vld [vmem:[#allocation2 + $0x2264] sm:$0xf] }
 0x2e3   :  { %9837 = vmatpush.bf16.msrb.mxu0 %v14530_v54  ;;  %v16235_v54 = vld [vmem:[#allocation2 + $0x22ec] sm:$0xf0]  ;;  %v18392_v48 = vld [vmem:[#allocation2 + $0x1cec] sm:$0xf]  ;;  %v16182_v14 = vor.u32 %v18567_v41, %v16179_v45  ;;  %v15647_v41 = vld [vmem:[#allocation2 + $0x1e54] sm:$0xf0] }
 0x2e4   :  { %9850 = vmatpush.bf16.msrb.mxu1 %v14754_v61  ;;  %v15566_v61 = vor.u32 %v18413_v46, %v15563_v6  ;;  %v16238_v49 = vor.u32 %v18581_v53, %v16235_v54  ;;  %v18560_v54 = vld [vmem:[#allocation2 + $0x222c] sm:$0xf]  ;;  %v18490_v45 = vld [vmem:[#allocation2 + $0x1ffc] sm:$0xf] }
 0x2e5   :  { %9863 = vmatpush.bf16.msrb.mxu2 %v14978_v0  ;;  %v15790_v0 = vor.u32 %v18469_v62, %v15787_v50  ;;  %v15958_v62 = vor.u32 %v18511_v30, %v15955_v13  ;;  %v18448_v50 = vld [vmem:[#allocation2 + $0x1eac] sm:$0xf] }
 0x2e6   :  { %9876 = vmatpush.bf16.msrb.mxu3 %v15202_v63  ;;  %v18462_v63 = vld [vmem:[#allocation2 + $0x1f1c] sm:$0xf]  ;;  %v15706_v20 = vor.u32 %v18448_v50, %v15703_v51 }
 0x2e7   :  { %9838 = vmatpush.bf16.msrb.mxu0 %v14502_v16  ;;  %v16207_v16 = vld [vmem:[#allocation2 + $0x22b4] sm:$0xf0]  ;;  %v15762_v17 = vor.u32 %v18462_v63, %v15759_v5  ;;  %v18385_v63 = vld [vmem:[#allocation2 + $0x1cb4] sm:$0xf] }
 0x2e8   :  { %9851 = vmatpush.bf16.msrb.mxu1 %v14726_v23  ;;  %v15986_v23 = vor.u32 %v18518_v9, %v15983_v10  ;;  %v16210_v37 = vor.u32 %v18574_v58, %v16207_v16  ;;  %v18441_v5 = vld [vmem:[#allocation2 + $0x1e74] sm:$0xf]  ;;  %v15675_v58 = vld [vmem:[#allocation2 + $0x1e8c] sm:$0xf0] }
 0x2e9   :  { %9864 = vmatpush.bf16.msrb.mxu2 %v14950_v25  ;;  %v18399_v25 = vld [vmem:[#allocation2 + $0x1d24] sm:$0xf]  ;;  %v18497_v16 = vld [vmem:[#allocation2 + $0x2034] sm:$0xf] }
 0x2ea   :  { %9877 = vmatpush.bf16.msrb.mxu3 %v15174_v4  ;;  %v15731_v4 = vld [vmem:[#allocation2 + $0x1efc] sm:$0xf0]  ;;  %v15510_v46 = vor.u32 %v18399_v25, %v15507_v27 }
 0x2eb   :  { %9839 = vmatpush.bf16.msrb.mxu0 %v14474_v15  ;;  %v15734_v6 = vor.u32 %v18455_v31, %v15731_v4  ;;  %v15479_v15 = vld [vmem:[#allocation2 + $0x1d04] sm:$0xf0]  ;;  %v9633_v53 = vpop.f32.mrf.mxu0  ;;  %v18378_v31 = vld [vmem:[#allocation2 + $0x1c7c] sm:$0xf] }
 0x2ec   :  { %9852 = vmatpush.bf16.msrb.mxu1 %v14698_v52  ;;  %v18504_v52 = vld [vmem:[#allocation2 + $0x206c] sm:$0xf]  ;;  %v18434_v4 = vld [vmem:[#allocation2 + $0x1e3c] sm:$0xf] }
 0x2ed   :  { %9865 = vmatpush.bf16.msrb.mxu2 %v14922_v11  ;;  %v15927_v11 = vld [vmem:[#allocation2 + $0x2084] sm:$0xf0] }
 0x2ee   :  { %9878 = vmatpush.bf16.msrb.mxu3 %v15146_v55  ;;  %9840 = vmatmul.bf16.vlgmr.msrb.gmra.mxu0 %v19383_v26  ;;  %v16151_v55 = vld [vmem:[#allocation2 + $0x2244] sm:$0xf0]  ;;  %v15930_v3 = vor.u32 %v18504_v52, %v15927_v11  ;;  %v15650_v11 = vor.u32 %v18434_v4, %v15647_v41  ;;  %v18637_v4 = vld [vmem:[#allocation2 + $0x2494] sm:$0xf] }
 0x2ef   :  { %9884 = vmatpush.bf16.msra.mxu0 %v15566_v61  ;;  %9853 = vmatmul.bf16.vlgmr.msrb.gmra.mxu1 %v19391_v33  ;;  %v9634_v61 = vadd.f32 %v9633_v53, %v19528_v57  ;;  %v16154_v9 = vor.u32 %v18560_v54, %v16151_v55  ;;  %v15678_v57 = vor.u32 %v18441_v5, %v15675_v58  ;;  %v18371_v54 = vld [vmem:[#allocation2 + $0x1c44] sm:$0xf]  ;;  %v15395_v55 = vld [vmem:[#allocation2 + $0x1c5c] sm:$0xf0] }
 0x2f0   :  { %9897 = vmatpush.bf16.msra.mxu1 %v15790_v0  ;;  %9866 = vmatmul.bf16.vlgmr.msrb.gmra.mxu2 %v19387_v32  ;;  %v15482_v0 = vor.u32 %v18392_v48, %v15479_v15  ;;  %v18546_v48 = vld [vmem:[#allocation2 + $0x21bc] sm:$0xf]  ;;  %v16095_v15 = vld [vmem:[#allocation2 + $0x21d4] sm:$0xf0]  ;;  %v15398_v5 = vor.u32 %v18371_v54, %v15395_v55 }
 0x2f1   :  { %9910 = vmatpush.bf16.msra.mxu2 %v16014_v1  ;;  %9879 = vmatmul.bf16.vlgmr.msrb.gmra.mxu3 %v19395_v59  ;;  %v9646_v1 = vpop.f32.mrf.mxu1  ;;  %v18630_v55 = vld [vmem:[#allocation2 + $0x245c] sm:$0xf] }
 0x2f2   :  { %9923 = vmatpush.bf16.msra.mxu3 %v16238_v49  ;;  %v15451_v49 = vld [vmem:[#allocation2 + $0x1ccc] sm:$0xf0]  ;;  %v9647_v10 = vadd.f32 %v9646_v1, %v9634_v61  ;;  %v18427_v61 = vld [vmem:[#allocation2 + $0x1e04] sm:$0xf]  ;;  %v15619_v1 = vld [vmem:[#allocation2 + $0x1e1c] sm:$0xf0] }
 0x2f3   :  { %9885 = vmatpush.bf16.msra.mxu0 %v15538_v56  ;;  %v15899_v56 = vld [vmem:[#allocation2 + $0x204c] sm:$0xf0]  ;;  %v15454_v25 = vor.u32 %v18385_v63, %v15451_v49  ;;  %v9659_v13 = vpop.f32.mrf.mxu2  ;;  %v9635_v50 = vpop.f32.mrf.mxu0  ;;  %v18539_v63 = vld [vmem:[#allocation2 + $0x2184] sm:$0xf]  ;;  %v16067_v49 = vld [vmem:[#allocation2 + $0x219c] sm:$0xf0]  ;;  %v15622_v58 = vor.u32 %v18427_v61, %v15619_v1 }
 0x2f4   :  { %9898 = vmatpush.bf16.msra.mxu1 %v15762_v17  ;;  %v18553_v17 = vld [vmem:[#allocation2 + $0x21f4] sm:$0xf]  ;;  %v15902_v27 = vor.u32 %v18497_v16, %v15899_v56  ;;  %v18420_v56 = vld [vmem:[#allocation2 + $0x1dcc] sm:$0xf]  ;;  %v16431_v61 = vld [vmem:[#allocation2 + $0x2474] sm:$0xf0] }
 0x2f5   :  { %9911 = vmatpush.bf16.msra.mxu2 %v15986_v23  ;;  %v16123_v23 = vld [vmem:[#allocation2 + $0x220c] sm:$0xf0]  ;;  %v18805_v50 = vld [vmem:[#allocation2 + $0x29d4] sm:$0xf] }
 0x2f6   :  { %9924 = vmatpush.bf16.msra.mxu3 %v16210_v37  ;;  %v15423_v37 = vld [vmem:[#allocation2 + $0x1c94] sm:$0xf0]  ;;  %v16126_v30 = vor.u32 %v18553_v17, %v16123_v23  ;;  %v15591_v17 = vld [vmem:[#allocation2 + $0x1de4] sm:$0xf0]  ;;  %v18476_v23 = vld [vmem:[#allocation2 + $0x1f8c] sm:$0xf] }
 0x2f7   :  { %9886 = vmatpush.bf16.msra.mxu0 %v15510_v46  ;;  %v15871_v46 = vld [vmem:[#allocation2 + $0x2014] sm:$0xf0] }
 0x2f8   :  { %9899 = vmatpush.bf16.msra.mxu1 %v15734_v6  ;;  %v9660_v6 = vadd.f32 %v9659_v13, %v9647_v10  ;;  %v15874_v53 = vor.u32 %v18490_v45, %v15871_v46  ;;  %v15367_v10 = vld [vmem:[#allocation2 + $0x1c24] sm:$0xf0]  ;;  %v18693_v13 = vld [vmem:[#allocation2 + $0x2654] sm:$0xf]  ;;  %v16683_v46 = vld [vmem:[#allocation2 + $0x266c] sm:$0xf0] }
 0x2f9   :  { %9912 = vmatpush.bf16.msra.mxu2 %v15958_v62  ;;  %v9672_v62 = vpop.f32.mrf.mxu3  ;;  %v9648_v51 = vpop.f32.mrf.mxu1 }
 0x2fa   :  { %9925 = vmatpush.bf16.msra.mxu3 %v16182_v14  ;;  %v15426_v14 = vor.u32 %v18378_v31, %v15423_v37  ;;  %v19535_v52 = vadd.f32 %v9672_v62, %v9660_v6  ;;  %v16039_v31 = vld [vmem:[#allocation2 + $0x2164] sm:$0xf0]  ;;  %v18749_v6 = vld [vmem:[#allocation2 + $0x2814] sm:$0xf]  ;;  %v16907_v62 = vld [vmem:[#allocation2 + $0x282c] sm:$0xf0] }
 0x2fb   :  { %9887 = vmatpush.bf16.msra.mxu0 %v15482_v0  ;;  %v16098_v0 = vor.u32 %v18546_v48, %v16095_v15  ;;  %v9661_v37 = vpop.f32.mrf.mxu2  ;;  %v15594_v48 = vor.u32 %v18420_v56, %v15591_v17  ;;  %v16910_v54 = vor.u32 %v18749_v6, %v16907_v62  ;;  %v16403_v56 = vld [vmem:[#allocation2 + $0x243c] sm:$0xf0]  ;;  %v18679_v17 = vld [vmem:[#allocation2 + $0x25e4] sm:$0xf] }
 0x2fc   :  { %9900 = vmatpush.bf16.msra.mxu1 %v15706_v20  ;;  %v18483_v20 = vld [vmem:[#allocation2 + $0x1fc4] sm:$0xf]  ;;  %v17075_v37 = vld [vmem:[#allocation2 + $0x297c] sm:$0xf0] }
 0x2fd   :  { %9913 = vmatpush.bf16.msra.mxu2 %v15930_v3  ;;  %v15843_v3 = vld [vmem:[#allocation2 + $0x1fdc] sm:$0xf0] }
 0x2fe   :  { %9926 = vmatpush.bf16.msra.mxu3 %v16154_v9  ;;  %v18364_v9 = vld [vmem:[#allocation2 + $0x1c0c] sm:$0xf]  ;;  %v15846_v16 = vor.u32 %v18483_v20, %v15843_v3  ;;  %v16655_v20 = vld [vmem:[#allocation2 + $0x2634] sm:$0xf0]  ;;  %v18742_v3 = vld [vmem:[#allocation2 + $0x27dc] sm:$0xf] }
 0x2ff   :  { %9888 = vmatpush.bf16.msra.mxu0 %v15454_v25  ;;  %v16070_v25 = vor.u32 %v18539_v63, %v16067_v49  ;;  %v15370_v45 = vor.u32 %v18364_v9, %v15367_v10  ;;  %v16879_v63 = vld [vmem:[#allocation2 + $0x27f4] sm:$0xf0]  ;;  %v18798_v49 = vld [vmem:[#allocation2 + $0x299c] sm:$0xf]  ;;  %v16434_v9 = vor.u32 %v18630_v55, %v16431_v61  ;;  %v18916_v6 = vld [vmem:[#allocation5] sm:$0xff] }
 0x300   :  { %9901 = vmatpush.bf16.msra.mxu1 %v15678_v57  ;;  %v15815_v57 = vld [vmem:[#allocation2 + $0x1fa4] sm:$0xf0]  ;;  %v1817_v62 = vperm.slane %v18916_v6, 3  ;;  %v18770_v6 = vld [vmem:[#allocation2 + $0x28bc] sm:$0xf] }
 0x301   :  { %9914 = vmatpush.bf16.msra.mxu2 %v15902_v27  ;;  %v18532_v27 = vld [vmem:[#allocation2 + $0x214c] sm:$0xf]  ;;  %v9674_v41 = vpop.f32.mrf.mxu3  ;;  %v15818_v15 = vor.u32 %v18476_v23, %v15815_v57  ;;  %v18735_v57 = vld [vmem:[#allocation2 + $0x27a4] sm:$0xf] }
 0x302   :  { %9927 = vmatpush.bf16.msra.mxu3 %v16126_v30  ;;  %v16459_v30 = vld [vmem:[#allocation2 + $0x24ac] sm:$0xf0]  ;;  %v16042_v51 = vor.u32 %v18532_v27, %v16039_v31  ;;  %v16851_v27 = vld [vmem:[#allocation2 + $0x27bc] sm:$0xf0]  ;;  %v18791_v31 = vld [vmem:[#allocation2 + $0x2964] sm:$0xf] }
 0x303   :  { %9889 = vmatpush.bf16.msra.mxu0 %v15426_v14  ;;  %v17131_v14 = vld [vmem:[#allocation2 + $0x29ec] sm:$0xf0]  ;;  %v16854_v41 = vor.u32 %v18735_v57, %v16851_v27  ;;  %v18602_v57 = vld [vmem:[#allocation2 + $0x237c] sm:$0xf]  ;;  %v16319_v27 = vld [vmem:[#allocation2 + $0x2394] sm:$0xf0] }
 0x304   :  { %9902 = vmatpush.bf16.msra.mxu1 %v15650_v11  ;;  %v16462_v11 = vor.u32 %v18637_v4, %v16459_v30  ;;  %v17134_v1 = vor.u32 %v18805_v50, %v17131_v14  ;;  %v18616_v30 = vld [vmem:[#allocation2 + $0x23ec] sm:$0xf]  ;;  %v16823_v14 = vld [vmem:[#allocation2 + $0x2784] sm:$0xf0] }
 0x305   :  { %9915 = vmatpush.bf16.msra.mxu2 %v15874_v53  ;;  %v16686_v53 = vor.u32 %v18693_v13, %v16683_v46  ;;  %v18672_v46 = vld [vmem:[#allocation2 + $0x25ac] sm:$0xf] }
 0x306   :  { %9928 = vmatpush.bf16.msra.mxu3 %v16098_v0  ;;  %v18686_v0 = vld [vmem:[#allocation2 + $0x261c] sm:$0xf]  ;;  %v18728_v50 = vld [vmem:[#allocation2 + $0x276c] sm:$0xf] }
 0x307   :  { %9890 = vmatpush.bf16.msra.mxu0 %v15398_v5  ;;  %v17103_v5 = vld [vmem:[#allocation2 + $0x29b4] sm:$0xf0]  ;;  %v16658_v10 = vor.u32 %v18686_v0, %v16655_v20  ;;  %v16826_v61 = vor.u32 %v18728_v50, %v16823_v14  ;;  %v18609_v0 = vld [vmem:[#allocation2 + $0x23b4] sm:$0xf] }
 0x308   :  { %9903 = vmatpush.bf16.msra.mxu1 %v15622_v58  ;;  %v16882_v58 = vor.u32 %v18742_v3, %v16879_v63  ;;  %v17106_v23 = vor.u32 %v18798_v49, %v17103_v5  ;;  %v18665_v20 = vld [vmem:[#allocation2 + $0x2574] sm:$0xf]  ;;  %v16571_v5 = vld [vmem:[#allocation2 + $0x258c] sm:$0xf0] }
 0x309   :  { %9916 = vmatpush.bf16.msra.mxu2 %v15846_v16  ;;  %v18623_v16 = vld [vmem:[#allocation2 + $0x2424] sm:$0xf] }
 0x30a   :  { %9929 = vmatpush.bf16.msra.mxu3 %v16070_v25  ;;  %v16627_v25 = vld [vmem:[#allocation2 + $0x25fc] sm:$0xf0]  ;;  %v16406_v4 = vor.u32 %v18623_v16, %v16403_v56  ;;  %v17019_v16 = vld [vmem:[#allocation2 + $0x290c] sm:$0xf0] }
 0x30b   :  { %9891 = vmatpush.bf16.msra.mxu0 %v15370_v45  ;;  %v16630_v13 = vor.u32 %v18679_v17, %v16627_v25  ;;  %v16375_v45 = vld [vmem:[#allocation2 + $0x2404] sm:$0xf0] }
 0x30c   :  { %9904 = vmatpush.bf16.msra.mxu1 %v15594_v48  ;;  %v17078_v48 = vor.u32 %v18791_v31, %v17075_v37  ;;  %v9698_v63 = vpop.f32.mrf.mxu1  ;;  %v18658_v31 = vld [vmem:[#allocation2 + $0x253c] sm:$0xf] }
 0x30d   :  { %9917 = vmatpush.bf16.msra.mxu2 %v15818_v15  ;;  %v16599_v15 = vld [vmem:[#allocation2 + $0x25c4] sm:$0xf0] }
 0x30e   :  { %9930 = vmatpush.bf16.msra.mxu3 %v16042_v51  ;;  %9892 = vmatmul.bf16.vlgmr.msra.gmra.mxu0 %v19401_v38  ;;  %v18784_v51 = vld [vmem:[#allocation2 + $0x292c] sm:$0xf]  ;;  %v16602_v55 = vor.u32 %v18672_v46, %v16599_v15 }
 0x30f   :  { %9936 = vmatpush.bf16.msrb.mxu0 %v16462_v11  ;;  %9905 = vmatmul.bf16.vlgmr.msra.gmra.mxu1 %v19405_v60  ;;  %v17047_v11 = vld [vmem:[#allocation2 + $0x2944] sm:$0xf0] }
 0x310   :  { %9949 = vmatpush.bf16.msrb.mxu1 %v16686_v53  ;;  %9918 = vmatmul.bf16.vlgmr.msra.gmra.mxu2 %v19403_v21  ;;  %v16378_v53 = vor.u32 %v18616_v30, %v16375_v45  ;;  %v17050_v49 = vor.u32 %v18784_v51, %v17047_v11  ;;  %v16543_v30 = vld [vmem:[#allocation2 + $0x2554] sm:$0xf0]  ;;  %v18595_v11 = vld [vmem:[#allocation2 + $0x2344] sm:$0xf] }
 0x311   :  { %9962 = vmatpush.bf16.msrb.mxu2 %v16910_v54  ;;  %9931 = vmatmul.bf16.vlgmr.msra.gmra.mxu3 %v19407_v47  ;;  %v9685_v54 = vpop.f32.mrf.mxu0  ;;  %v16546_v14 = vor.u32 %v18658_v31, %v16543_v30  ;;  %v16935_v31 = vld [vmem:[#allocation2 + $0x2864] sm:$0xf0]  ;;  %v17521_v30 = vld [vmem:[#allocation2 + $0x1b0] sm:$0xf0] }
 0x312   :  { %9975 = vmatpush.bf16.msrb.mxu3 %v17134_v1  ;;  %v16347_v1 = vld [vmem:[#allocation2 + $0x23cc] sm:$0xf0]  ;;  %v9686_v3 = vadd.f32 %v9685_v54, %v1817_v62  ;;  %v16991_v62 = vld [vmem:[#allocation2 + $0x28d4] sm:$0xf0]  ;;  %v18651_v54 = vld [vmem:[#allocation2 + $0x2504] sm:$0xf] }
 0x313   :  { %9937 = vmatpush.bf16.msrb.mxu0 %v16434_v9  ;;  %v18721_v9 = vld [vmem:[#allocation2 + $0x2734] sm:$0xf]  ;;  %v16350_v17 = vor.u32 %v18609_v0, %v16347_v1  ;;  %v9711_v37 = vpop.f32.mrf.mxu2  ;;  %v16515_v0 = vld [vmem:[#allocation2 + $0x251c] sm:$0xf0]  ;;  %v18707_v1 = vld [vmem:[#allocation2 + $0x26c4] sm:$0xf] }
 0x314   :  { %9950 = vmatpush.bf16.msrb.mxu1 %v16658_v10  ;;  %v16795_v10 = vld [vmem:[#allocation2 + $0x274c] sm:$0xf0]  ;;  %v9699_v56 = vadd.f32 %v9698_v63, %v9686_v3  ;;  %v9724_v46 = vpop.f32.mrf.mxu3  ;;  %v18763_v3 = vld [vmem:[#allocation2 + $0x2884] sm:$0xf]  ;;  %v16963_v63 = vld [vmem:[#allocation2 + $0x289c] sm:$0xf0] }
 0x315   :  { %9963 = vmatpush.bf16.msrb.mxu2 %v16882_v58  ;;  %v18777_v58 = vld [vmem:[#allocation2 + $0x28f4] sm:$0xf]  ;;  %v16798_v25 = vor.u32 %v18721_v9, %v16795_v10  ;;  %v16263_v9 = vld [vmem:[#allocation2 + $0x2324] sm:$0xf0]  ;;  %v16518_v10 = vor.u32 %v18651_v54, %v16515_v0  ;;  %v12181_v0 = vld [vmem:[#allocation2 + $0x320] sm:$0xf] }
 0x316   :  { %9976 = vmatpush.bf16.msrb.mxu3 %v17106_v23  ;;  %v16574_v23 = vor.u32 %v18665_v20, %v16571_v5  ;;  %v9712_v45 = vadd.f32 %v9711_v37, %v9699_v56  ;;  %v16739_v20 = vld [vmem:[#allocation2 + $0x26dc] sm:$0xf0]  ;;  %v18588_v5 = vld [vmem:[#allocation2 + $0x230c] sm:$0xf]  ;;  %v16487_v56 = vld [vmem:[#allocation2 + $0x24e4] sm:$0xf0] }
 0x317   :  { %9938 = vmatpush.bf16.msrb.mxu0 %v16406_v4  ;;  %v17022_v4 = vor.u32 %v18777_v58, %v17019_v16  ;;  %v16742_v58 = vor.u32 %v18707_v1, %v16739_v20  ;;  %v18644_v16 = vld [vmem:[#allocation2 + $0x24cc] sm:$0xf]  ;;  %v17570_v20 = vld [vmem:[#allocation2 + $0x338] sm:$0xf0] }
 0x318   :  { %9951 = vmatpush.bf16.msrb.mxu1 %v16630_v13  ;;  %v18714_v13 = vld [vmem:[#allocation2 + $0x26fc] sm:$0xf]  ;;  %v19541_v15 = vadd.f32 %v9724_v46, %v9712_v45  ;;  %v17577_v45 = vld [vmem:[#allocation2 + $0x370] sm:$0xf0]  ;;  %v12433_v46 = vld [vmem:[#allocation2 + $0x518] sm:$0xf] }
 0x319   :  { %9964 = vmatpush.bf16.msrb.mxu2 %v16854_v41  ;;  %v16767_v41 = vld [vmem:[#allocation2 + $0x2714] sm:$0xf0]  ;;  %v9687_v50 = vpop.f32.mrf.mxu0 }
 0x31a   :  { %9977 = vmatpush.bf16.msrb.mxu3 %v17078_v48  ;;  %v16322_v48 = vor.u32 %v18602_v57, %v16319_v27  ;;  %v16770_v51 = vor.u32 %v18714_v13, %v16767_v41  ;;  %v16711_v57 = vld [vmem:[#allocation2 + $0x26a4] sm:$0xf0]  ;;  %v18756_v27 = vld [vmem:[#allocation2 + $0x284c] sm:$0xf]  ;;  %v12209_v13 = vld [vmem:[#allocation2 + $0x358] sm:$0xf]  ;;  %v16266_v41 = vor.u32 %v18588_v5, %v16263_v9 }
 0x31b   :  { %9939 = vmatpush.bf16.msrb.mxu0 %v16378_v53  ;;  %v16291_v53 = vld [vmem:[#allocation2 + $0x235c] sm:$0xf0]  ;;  %v12657_v50 = vld [vmem:[#allocation2 + $0x6d8] sm:$0xf]  ;;  %v17682_v5 = vld [vmem:[#allocation2 + $0x6b8] sm:$0xf0] }
 0x31c   :  { %9952 = vmatpush.bf16.msrb.mxu1 %v16602_v55  ;;  %v9700_v55 = vpop.f32.mrf.mxu1  ;;  %v9726_v37 = vpop.f32.mrf.mxu3 }
 0x31d   :  { %9965 = vmatpush.bf16.msrb.mxu2 %v16826_v61  ;;  %v16994_v61 = vor.u32 %v18770_v6, %v16991_v62  ;;  %v17633_v6 = vld [vmem:[#allocation2 + $0x530] sm:$0xf0]  ;;  %v16490_v62 = vor.u32 %v18644_v16, %v16487_v56  ;;  %v11957_v55 = vld [vmem:[#allocation2 + $0x160] sm:$0xf]  ;;  %v11929_v16 = vld [vmem:[#allocation2 + $0x128] sm:$0xf] }
 0x31e   :  { %9978 = vmatpush.bf16.msrb.mxu3 %v17050_v49  ;;  %v16294_v49 = vor.u32 %v18595_v11, %v16291_v53  ;;  %v12210_v53 = vor.u32 %v17577_v45, %v12209_v13  ;;  %v12434_v54 = vor.u32 %v17633_v6, %v12433_v46  ;;  %v17507_v56 = vld [vmem:[#allocation2 + $0x140] sm:$0xf0]  ;;  %v17500_v45 = vld [vmem:[#allocation2 + $0x108] sm:$0xf0]  ;;  %v12125_v46 = vld [vmem:[#allocation2 + $0x2b0] sm:$0xf] }
 0x31f   :  { %9940 = vmatpush.bf16.msrb.mxu0 %v16350_v17  ;;  %v18700_v17 = vld [vmem:[#allocation2 + $0x268c] sm:$0xf]  ;;  %v17675_v37 = vld [vmem:[#allocation2 + $0x680] sm:$0xf0] }
 0x320   :  { %9953 = vmatpush.bf16.msrb.mxu1 %v16574_v23  ;;  %v9713_v23 = vpop.f32.mrf.mxu2 }
 0x321   :  { %9966 = vmatpush.bf16.msrb.mxu2 %v16798_v25  ;;  %v16966_v25 = vor.u32 %v18763_v3, %v16963_v63  ;;  %v12405_v3 = vld [vmem:[#allocation2 + $0x4e0] sm:$0xf]  ;;  %v17626_v63 = vld [vmem:[#allocation2 + $0x4f8] sm:$0xf0] }
 0x322   :  { %9979 = vmatpush.bf16.msrb.mxu3 %v17022_v4  ;;  %v11985_v4 = vld [vmem:[#allocation2 + $0x198] sm:$0xf] }
 0x323   :  { %9941 = vmatpush.bf16.msrb.mxu0 %v16322_v48  ;;  %v16714_v48 = vor.u32 %v18700_v17, %v16711_v57  ;;  %v11986_v11 = vor.u32 %v17521_v30, %v11985_v4  ;;  %v12153_v17 = vld [vmem:[#allocation2 + $0x2e8] sm:$0xf]  ;;  %v11930_v4 = vor.u32 %v17507_v56, %v11929_v16 }
 0x324   :  { %9954 = vmatpush.bf16.msrb.mxu1 %v16546_v14  ;;  %v17689_v14 = vld [vmem:[#allocation2 + $0x6f0] sm:$0xf0]  ;;  %v12377_v57 = vld [vmem:[#allocation2 + $0x4a8] sm:$0xf] }
 0x325   :  { %9967 = vmatpush.bf16.msrb.mxu2 %v16770_v51  ;;  %v16938_v51 = vor.u32 %v18756_v27, %v16935_v31  ;;  %v12658_v1 = vor.u32 %v17689_v14, %v12657_v50  ;;  %v17619_v27 = vld [vmem:[#allocation2 + $0x4c0] sm:$0xf0]  ;;  %v12601_v31 = vld [vmem:[#allocation2 + $0x668] sm:$0xf]  ;;  %v17612_v50 = vld [vmem:[#allocation2 + $0x488] sm:$0xf0] }
 0x326   :  { %9980 = vmatpush.bf16.msrb.mxu3 %v16994_v61  ;;  %v17514_v61 = vld [vmem:[#allocation2 + $0x178] sm:$0xf0]  ;;  %v12378_v13 = vor.u32 %v17619_v27, %v12377_v57  ;;  %v12602_v6 = vor.u32 %v17675_v37, %v12601_v31  ;;  %v12573_v14 = vld [vmem:[#allocation2 + $0x630] sm:$0xf]  ;;  %v12069_v27 = vld [vmem:[#allocation2 + $0x240] sm:$0xf] }
 0x327   :  { %9942 = vmatpush.bf16.msrb.mxu0 %v16294_v49  ;;  %v12629_v49 = vld [vmem:[#allocation2 + $0x6a0] sm:$0xf]  ;;  %v11958_v9 = vor.u32 %v17514_v61, %v11957_v55  ;;  %v11873_v61 = vld [vmem:[#allocation2 + $0xb8] sm:$0xf]  ;;  %v17486_v57 = vld [vmem:[#allocation2 + $0x98] sm:$0xf0] }
 0x328   :  { %9955 = vmatpush.bf16.msrb.mxu1 %v16518_v10  ;;  %v12182_v10 = vor.u32 %v17570_v20, %v12181_v0  ;;  %v12630_v23 = vor.u32 %v17682_v5, %v12629_v49  ;;  %v17493_v0 = vld [vmem:[#allocation2 + $0xd0] sm:$0xf0]  ;;  %v12321_v5 = vld [vmem:[#allocation2 + $0x438] sm:$0xf]  ;;  %v17542_v37 = vld [vmem:[#allocation2 + $0x258] sm:$0xf0] }
 0x329   :  { %9968 = vmatpush.bf16.msrb.mxu2 %v16742_v58  ;;  %v12406_v58 = vor.u32 %v17626_v63, %v12405_v3  ;;  %v17549_v49 = vld [vmem:[#allocation2 + $0x290] sm:$0xf0]  ;;  %v11874_v56 = vor.u32 %v17493_v0, %v11873_v61  ;;  %v17535_v61 = vld [vmem:[#allocation2 + $0x220] sm:$0xf0]  ;;  %v12265_v0 = vld [vmem:[#allocation2 + $0x3c8] sm:$0xf] }
 0x32a   :  { %9981 = vmatpush.bf16.msrb.mxu3 %v16966_v25  ;;  %v17563_v25 = vld [vmem:[#allocation2 + $0x300] sm:$0xf0] }
 0x32b   :  { %9943 = vmatpush.bf16.msrb.mxu0 %v16266_v41  ;;  %v12154_v30 = vor.u32 %v17563_v25, %v12153_v17  ;;  %v11901_v41 = vld [vmem:[#allocation2 + $0xf0] sm:$0xf]  ;;  %v11845_v25 = vld [vmem:[#allocation2 + $0x80] sm:$0xf] }
 0x32c   :  { %9956 = vmatpush.bf16.msrb.mxu1 %v16490_v62  ;;  %v17556_v62 = vld [vmem:[#allocation2 + $0x2c8] sm:$0xf0]  ;;  %v9750_v3 = vpop.f32.mrf.mxu1 }
 0x32d   :  { %9969 = vmatpush.bf16.msrb.mxu2 %v16714_v48  ;;  %v12349_v48 = vld [vmem:[#allocation2 + $0x470] sm:$0xf] }
 0x32e   :  { %9982 = vmatpush.bf16.msrb.mxu3 %v16938_v51  ;;  %9944 = vmatmul.bf16.vlgmr.msrb.gmra.mxu0 %v19413_v2  ;;  %v17668_v51 = vld [vmem:[#allocation2 + $0x648] sm:$0xf0]  ;;  %v12350_v55 = vor.u32 %v17612_v50, %v12349_v48  ;;  %v12070_v50 = vor.u32 %v17542_v37, %v12069_v27  ;;  %v17745_v37 = vld [vmem:[#allocation2 + $0x8b0] sm:$0xf0] }
 0x32f   :  { %9988 = vmatpush.bf16.msra.mxu0 %v11986_v11  ;;  %9957 = vmatmul.bf16.vlgmr.msrb.gmra.mxu1 %v19417_v8  ;;  %v11902_v11 = vor.u32 %v17500_v45, %v11901_v41  ;;  %v12574_v63 = vor.u32 %v17668_v51, %v12573_v14  ;;  %v12517_v45 = vld [vmem:[#allocation2 + $0x5c0] sm:$0xf]  ;;  %v11817_v51 = vld [vmem:[#allocation2 + $0x48] sm:$0xf]  ;;  %v17640_v27 = vld [vmem:[#allocation2 + $0x568] sm:$0xf0] }
 0x330   :  { %10001 = vmatpush.bf16.msra.mxu1 %v12210_v53  ;;  %9970 = vmatmul.bf16.vlgmr.msrb.gmra.mxu2 %v19415_v7  ;;  %v9737_v53 = vpop.f32.mrf.mxu0 }
 0x331   :  { %10014 = vmatpush.bf16.msra.mxu2 %v12434_v54  ;;  %9983 = vmatmul.bf16.vlgmr.msrb.gmra.mxu3 %v19419_v12  ;;  %v12126_v54 = vor.u32 %v17556_v62, %v12125_v46  ;;  %v9738_v20 = vadd.f32 %v9737_v53, %v19541_v15  ;;  %v17654_v46 = vld [vmem:[#allocation2 + $0x5d8] sm:$0xf0]  ;;  %v12041_v53 = vld [vmem:[#allocation2 + $0x208] sm:$0xf] }
 0x332   :  { %10027 = vmatpush.bf16.msra.mxu3 %v12658_v1  ;;  %v12097_v1 = vld [vmem:[#allocation2 + $0x278] sm:$0xf] }
 0x333   :  { %9989 = vmatpush.bf16.msra.mxu0 %v11958_v9  ;;  %v17605_v9 = vld [vmem:[#allocation2 + $0x450] sm:$0xf0]  ;;  %v9751_v16 = vadd.f32 %v9750_v3, %v9738_v20  ;;  %v12098_v17 = vor.u32 %v17549_v49, %v12097_v1  ;;  %v9763_v31 = vpop.f32.mrf.mxu2  ;;  %v17591_v1 = vld [vmem:[#allocation2 + $0x3e0] sm:$0xf0]  ;;  %v12489_v20 = vld [vmem:[#allocation2 + $0x588] sm:$0xf] }
 0x334   :  { %10002 = vmatpush.bf16.msra.mxu1 %v12182_v10  ;;  %v12545_v10 = vld [vmem:[#allocation2 + $0x5f8] sm:$0xf]  ;;  %v9776_v41 = vpop.f32.mrf.mxu3  ;;  %v17647_v3 = vld [vmem:[#allocation2 + $0x5a0] sm:$0xf0]  ;;  %v11789_v49 = vld [vmem:[#allocation2 + $0x10] sm:$0xf] }
 0x335   :  { %10015 = vmatpush.bf16.msra.mxu2 %v12406_v58  ;;  %v17661_v58 = vld [vmem:[#allocation2 + $0x610] sm:$0xf0] }
 0x336   :  { %10028 = vmatpush.bf16.msra.mxu3 %v12630_v23  ;;  %v12322_v23 = vor.u32 %v17605_v9, %v12321_v5  ;;  %v12546_v15 = vor.u32 %v17661_v58, %v12545_v10  ;;  %v17472_v5 = vld [vmem:[#allocation2 + $0x28] sm:$0xf0]  ;;  %v12042_v9 = vor.u32 %v17535_v61, %v12041_v53  ;;  %v12266_v10 = vor.u32 %v17591_v1, %v12265_v0  ;;  %v12013_v58 = vld [vmem:[#allocation2 + $0x1d0] sm:$0xf]  ;;  %v13077_v61 = vld [vmem:[#allocation2 + $0xa20] sm:$0xf] }
 0x337   :  { %9990 = vmatpush.bf16.msra.mxu0 %v11930_v4  ;;  %v12293_v4 = vld [vmem:[#allocation2 + $0x400] sm:$0xf]  ;;  %v17794_v1 = vld [vmem:[#allocation2 + $0xa38] sm:$0xf0] }
 0x338   :  { %10003 = vmatpush.bf16.msra.mxu1 %v12154_v30  ;;  %v17598_v30 = vld [vmem:[#allocation2 + $0x418] sm:$0xf0]  ;;  %v9739_v48 = vpop.f32.mrf.mxu0 }
 0x339   :  { %10016 = vmatpush.bf16.msra.mxu2 %v12378_v13  ;;  %v9764_v13 = vadd.f32 %v9763_v31, %v9751_v16  ;;  %v12294_v14 = vor.u32 %v17598_v30, %v12293_v4  ;;  %v17528_v16 = vld [vmem:[#allocation2 + $0x1e8] sm:$0xf0]  ;;  %v13105_v4 = vld [vmem:[#allocation2 + $0xa58] sm:$0xf]  ;;  %v11790_v30 = vor.u32 %v17472_v5, %v11789_v49  ;;  %v17906_v49 = vld [vmem:[#allocation2 + $0xdb8] sm:$0xf0] }
 0x33a   :  { %10029 = vmatpush.bf16.msra.mxu3 %v12602_v6  ;;  %v11846_v6 = vor.u32 %v17486_v57, %v11845_v25  ;;  %v17584_v25 = vld [vmem:[#allocation2 + $0x3a8] sm:$0xf0]  ;;  %v12461_v57 = vld [vmem:[#allocation2 + $0x550] sm:$0xf]  ;;  %v13553_v48 = vld [vmem:[#allocation2 + $0xdd8] sm:$0xf] }
 0x33b   :  { %9991 = vmatpush.bf16.msra.mxu0 %v11902_v11  ;;  %v19548_v62 = vadd.f32 %v9776_v41, %v9764_v13  ;;  %v17479_v11 = vld [vmem:[#allocation2 + $0x60] sm:$0xf0]  ;;  %v17801_v13 = vld [vmem:[#allocation2 + $0xa70] sm:$0xf0]  ;;  %v13329_v41 = vld [vmem:[#allocation2 + $0xc18] sm:$0xf] }
 0x33c   :  { %10004 = vmatpush.bf16.msra.mxu1 %v12126_v54  ;;  %v9752_v54 = vpop.f32.mrf.mxu1  ;;  %v9778_v31 = vpop.f32.mrf.mxu3 }
 0x33d   :  { %10017 = vmatpush.bf16.msra.mxu2 %v12350_v55  ;;  %v12518_v55 = vor.u32 %v17654_v46, %v12517_v45  ;;  %v17857_v45 = vld [vmem:[#allocation2 + $0xc30] sm:$0xf0]  ;;  %v12014_v46 = vor.u32 %v17528_v16, %v12013_v58  ;;  %v12853_v54 = vld [vmem:[#allocation2 + $0x860] sm:$0xf]  ;;  %v12825_v58 = vld [vmem:[#allocation2 + $0x828] sm:$0xf] }
 0x33e   :  { %10030 = vmatpush.bf16.msra.mxu3 %v12574_v63  ;;  %v11818_v63 = vor.u32 %v17479_v11, %v11817_v51  ;;  %v13106_v11 = vor.u32 %v17801_v13, %v13105_v4  ;;  %v13330_v53 = vor.u32 %v17857_v45, %v13329_v41  ;;  %v17731_v16 = vld [vmem:[#allocation2 + $0x840] sm:$0xf0]  ;;  %v17724_v13 = vld [vmem:[#allocation2 + $0x808] sm:$0xf0]  ;;  %v13021_v41 = vld [vmem:[#allocation2 + $0x9b0] sm:$0xf] }
 0x33f   :  { %9992 = vmatpush.bf16.msra.mxu0 %v11874_v56  ;;  %v12237_v56 = vld [vmem:[#allocation2 + $0x390] sm:$0xf]  ;;  %v17899_v31 = vld [vmem:[#allocation2 + $0xd80] sm:$0xf0] }
 0x340   :  { %10005 = vmatpush.bf16.msra.mxu1 %v12098_v17  ;;  %v9765_v17 = vpop.f32.mrf.mxu2 }
 0x341   :  { %10018 = vmatpush.bf16.msra.mxu2 %v12322_v23  ;;  %v12490_v23 = vor.u32 %v17647_v3, %v12489_v20  ;;  %v13301_v20 = vld [vmem:[#allocation2 + $0xbe0] sm:$0xf]  ;;  %v17850_v3 = vld [vmem:[#allocation2 + $0xbf8] sm:$0xf0] }
 0x342   :  { %10031 = vmatpush.bf16.msra.mxu3 %v12546_v15  ;;  %v12881_v15 = vld [vmem:[#allocation2 + $0x898] sm:$0xf] }
 0x343   :  { %9993 = vmatpush.bf16.msra.mxu0 %v11846_v6  ;;  %v12238_v6 = vor.u32 %v17584_v25, %v12237_v56  ;;  %v12882_v51 = vor.u32 %v17745_v37, %v12881_v15  ;;  %v13049_v56 = vld [vmem:[#allocation2 + $0x9e8] sm:$0xf]  ;;  %v12826_v15 = vor.u32 %v17731_v16, %v12825_v58  ;;  %v17885_v58 = vld [vmem:[#allocation2 + $0xd10] sm:$0xf0] }
 0x344   :  { %10006 = vmatpush.bf16.msra.mxu1 %v12070_v50  ;;  %v17913_v50 = vld [vmem:[#allocation2 + $0xdf0] sm:$0xf0]  ;;  %v13273_v25 = vld [vmem:[#allocation2 + $0xba8] sm:$0xf] }
 0x345   :  { %10019 = vmatpush.bf16.msra.mxu2 %v12294_v14  ;;  %v12462_v14 = vor.u32 %v17640_v27, %v12461_v57  ;;  %v13554_v0 = vor.u32 %v17913_v50, %v13553_v48  ;;  %v17843_v57 = vld [vmem:[#allocation2 + $0xbc0] sm:$0xf0]  ;;  %v13497_v27 = vld [vmem:[#allocation2 + $0xd68] sm:$0xf]  ;;  %v17836_v48 = vld [vmem:[#allocation2 + $0xb88] sm:$0xf0] }
 0x346   :  { %10032 = vmatpush.bf16.msra.mxu3 %v12518_v55  ;;  %v17738_v55 = vld [vmem:[#allocation2 + $0x878] sm:$0xf0]  ;;  %v13274_v4 = vor.u32 %v17843_v57, %v13273_v25  ;;  %v13498_v45 = vor.u32 %v17899_v31, %v13497_v27  ;;  %v12965_v25 = vld [vmem:[#allocation2 + $0x940] sm:$0xf] }
 0x347   :  { %9994 = vmatpush.bf16.msra.mxu0 %v11818_v63  ;;  %v13525_v63 = vld [vmem:[#allocation2 + $0xda0] sm:$0xf]  ;;  %v12854_v5 = vor.u32 %v17738_v55, %v12853_v54  ;;  %v17766_v31 = vld [vmem:[#allocation2 + $0x958] sm:$0xf0] }
 0x348   :  { %10007 = vmatpush.bf16.msra.mxu1 %v12042_v9  ;;  %v13078_v9 = vor.u32 %v17794_v1, %v13077_v61  ;;  %v13526_v17 = vor.u32 %v17906_v49, %v13525_v63  ;;  %v17717_v1 = vld [vmem:[#allocation2 + $0x7d0] sm:$0xf0] }
 0x349   :  { %10020 = vmatpush.bf16.msra.mxu2 %v12266_v10  ;;  %v13302_v10 = vor.u32 %v17850_v3, %v13301_v20  ;;  %v12993_v20 = vld [vmem:[#allocation2 + $0x978] sm:$0xf]  ;;  %v17773_v49 = vld [vmem:[#allocation2 + $0x990] sm:$0xf0] }
 0x34a   :  { %10033 = vmatpush.bf16.msra.mxu3 %v12490_v23  ;;  %v17787_v23 = vld [vmem:[#allocation2 + $0xa00] sm:$0xf0] }
 0x34b   :  { %9995 = vmatpush.bf16.msra.mxu0 %v11790_v30  ;;  %v13050_v37 = vor.u32 %v17787_v23, %v13049_v56  ;;  %v12797_v30 = vld [vmem:[#allocation2 + $0x7f0] sm:$0xf]  ;;  %v9789_v50 = vpop.f32.mrf.mxu0  ;;  %v17710_v23 = vld [vmem:[#allocation2 + $0x798] sm:$0xf0] }
 0x34c   :  { %10008 = vmatpush.bf16.msra.mxu1 %v12014_v46  ;;  %v17780_v46 = vld [vmem:[#allocation2 + $0x9c8] sm:$0xf0]  ;;  %v9802_v54 = vpop.f32.mrf.mxu1 }
 0x34d   :  { %10021 = vmatpush.bf16.msra.mxu2 %v12238_v6  ;;  %v13245_v6 = vld [vmem:[#allocation2 + $0xb70] sm:$0xf]  ;;  %v13022_v55 = vor.u32 %v17780_v46, %v13021_v41  ;;  %v17878_v41 = vld [vmem:[#allocation2 + $0xcd8] sm:$0xf0] }
 0x34e   :  { %10034 = vmatpush.bf16.msra.mxu3 %v12462_v14  ;;  %9996 = vmatmul.bf16.vlgmr.msra.gmra.mxu0 %v19311_v36  ;;  %v13469_v14 = vld [vmem:[#allocation2 + $0xd30] sm:$0xf]  ;;  %v13246_v61 = vor.u32 %v17836_v48, %v13245_v6 }
 0x34f   :  { %10040 = vmatpush.bf16.msrb.mxu0 %v12882_v51  ;;  %10009 = vmatmul.bf16.vlgmr.msra.gmra.mxu1 %v19315_v43  ;;  %v17892_v51 = vld [vmem:[#allocation2 + $0xd48] sm:$0xf0] }
 0x350   :  { %10053 = vmatpush.bf16.msrb.mxu1 %v13106_v11  ;;  %10022 = vmatmul.bf16.vlgmr.msra.gmra.mxu2 %v19309_v35  ;;  %v9790_v11 = vadd.f32 %v9789_v50, %v19548_v62  ;;  %v13470_v3 = vor.u32 %v17892_v51, %v13469_v14  ;;  %v12994_v62 = vor.u32 %v17773_v49, %v12993_v20  ;;  %v12713_v51 = vld [vmem:[#allocation2 + $0x748] sm:$0xf]  ;;  %v17871_v20 = vld [vmem:[#allocation2 + $0xca0] sm:$0xf0]  ;;  %v17696_v49 = vld [vmem:[#allocation2 + $0x728] sm:$0xf0] }
 0x351   :  { %10066 = vmatpush.bf16.msrb.mxu2 %v13330_v53  ;;  %10035 = vmatmul.bf16.vlgmr.msra.gmra.mxu3 %v19313_v42  ;;  %v12798_v53 = vor.u32 %v17724_v13, %v12797_v30  ;;  %v13413_v13 = vld [vmem:[#allocation2 + $0xcc0] sm:$0xf]  ;;  %v12966_v50 = vor.u32 %v17766_v31, %v12965_v25  ;;  %v14001_v31 = vld [vmem:[#allocation2 + $0x1158] sm:$0xf] }
 0x352   :  { %10079 = vmatpush.bf16.msrb.mxu3 %v13554_v0  ;;  %v12769_v0 = vld [vmem:[#allocation2 + $0x7b8] sm:$0xf]  ;;  %v9803_v63 = vadd.f32 %v9802_v54, %v9790_v11  ;;  %v17703_v11 = vld [vmem:[#allocation2 + $0x760] sm:$0xf0]  ;;  %v13414_v54 = vor.u32 %v17878_v41, %v13413_v13  ;;  %v18081_v13 = vld [vmem:[#allocation2 + $0x1330] sm:$0xf0] }
 0x353   :  { %10041 = vmatpush.bf16.msrb.mxu0 %v12854_v5  ;;  %v13217_v5 = vld [vmem:[#allocation2 + $0xb38] sm:$0xf]  ;;  %v12770_v16 = vor.u32 %v17717_v1, %v12769_v0  ;;  %v9815_v27 = vpop.f32.mrf.mxu2  ;;  %v17815_v0 = vld [vmem:[#allocation2 + $0xae0] sm:$0xf0]  ;;  %v13385_v1 = vld [vmem:[#allocation2 + $0xc88] sm:$0xf] }
 0x354   :  { %10054 = vmatpush.bf16.msrb.mxu1 %v13078_v9  ;;  %v17829_v9 = vld [vmem:[#allocation2 + $0xb50] sm:$0xf0]  ;;  %v9828_v30 = vpop.f32.mrf.mxu3  ;;  %v9804_v6 = vpop.f32.mrf.mxu1 }
 0x355   :  { %10067 = vmatpush.bf16.msrb.mxu2 %v13302_v10  ;;  %v13441_v10 = vld [vmem:[#allocation2 + $0xcf8] sm:$0xf]  ;;  %v13218_v56 = vor.u32 %v17829_v9, %v13217_v5  ;;  %v18137_v6 = vld [vmem:[#allocation2 + $0x14f0] sm:$0xf0] }
 0x356   :  { %10080 = vmatpush.bf16.msrb.mxu3 %v13526_v17  ;;  %v12741_v17 = vld [vmem:[#allocation2 + $0x780] sm:$0xf]  ;;  %v13442_v57 = vor.u32 %v17885_v58, %v13441_v10  ;;  %v12909_v10 = vld [vmem:[#allocation2 + $0x8d0] sm:$0xf]  ;;  %v17752_v58 = vld [vmem:[#allocation2 + $0x8e8] sm:$0xf0] }
 0x357   :  { %10042 = vmatpush.bf16.msrb.mxu0 %v12826_v15  ;;  %v13189_v15 = vld [vmem:[#allocation2 + $0xb00] sm:$0xf]  ;;  %v12742_v46 = vor.u32 %v17710_v23, %v12741_v17  ;;  %v13357_v17 = vld [vmem:[#allocation2 + $0xc50] sm:$0xf]  ;;  %v17864_v23 = vld [vmem:[#allocation2 + $0xc68] sm:$0xf0]  ;;  %v12910_v41 = vor.u32 %v17752_v58, %v12909_v10 }
 0x358   :  { %10055 = vmatpush.bf16.msrb.mxu1 %v13050_v37  ;;  %v17822_v37 = vld [vmem:[#allocation2 + $0xb18] sm:$0xf0]  ;;  %v13721_v10 = vld [vmem:[#allocation2 + $0xf28] sm:$0xf]  ;;  %v17955_v58 = vld [vmem:[#allocation2 + $0xf40] sm:$0xf0] }
 0x359   :  { %10068 = vmatpush.bf16.msrb.mxu2 %v13274_v4  ;;  %v9816_v4 = vadd.f32 %v9815_v27, %v9803_v63  ;;  %v13190_v14 = vor.u32 %v17822_v37, %v13189_v15  ;;  %v12685_v63 = vld [vmem:[#allocation2 + $0x710] sm:$0xf]  ;;  %v17969_v27 = vld [vmem:[#allocation2 + $0xfb0] sm:$0xf0] }
 0x35a   :  { %10081 = vmatpush.bf16.msrb.mxu3 %v13498_v45  ;;  %v9791_v45 = vpop.f32.mrf.mxu0  ;;  %v12686_v37 = vor.u32 %v17696_v49, %v12685_v63  ;;  %v18130_v63 = vld [vmem:[#allocation2 + $0x14b8] sm:$0xf0] }
 0x35b   :  { %10043 = vmatpush.bf16.msrb.mxu0 %v12798_v53  ;;  %v19555_v48 = vadd.f32 %v9828_v30, %v9816_v4  ;;  %v12937_v53 = vld [vmem:[#allocation2 + $0x908] sm:$0xf]  ;;  %v9817_v25 = vpop.f32.mrf.mxu2  ;;  %v18025_v4 = vld [vmem:[#allocation2 + $0x1170] sm:$0xf0]  ;;  %v14225_v30 = vld [vmem:[#allocation2 + $0x1318] sm:$0xf] }
 0x35c   :  { %10056 = vmatpush.bf16.msrb.mxu1 %v13022_v55  ;;  %v17759_v55 = vld [vmem:[#allocation2 + $0x920] sm:$0xf0]  ;;  %v9830_v15 = vpop.f32.mrf.mxu3  ;;  %v14393_v25 = vld [vmem:[#allocation2 + $0x1468] sm:$0xf] }
 0x35d   :  { %10069 = vmatpush.bf16.msrb.mxu2 %v13246_v61  ;;  %v13161_v61 = vld [vmem:[#allocation2 + $0xac8] sm:$0xf]  ;;  %v12938_v5 = vor.u32 %v17759_v55, %v12937_v53  ;;  %v13749_v53 = vld [vmem:[#allocation2 + $0xf60] sm:$0xf] }
 0x35e   :  { %10082 = vmatpush.bf16.msrb.mxu3 %v13470_v3  ;;  %v12714_v3 = vor.u32 %v17703_v11, %v12713_v51  ;;  %v13162_v9 = vor.u32 %v17815_v0, %v13161_v61  ;;  %v14002_v51 = vor.u32 %v18025_v4, %v14001_v31  ;;  %v14226_v11 = vor.u32 %v18081_v13, %v14225_v30  ;;  %v13973_v55 = vld [vmem:[#allocation2 + $0x1120] sm:$0xf]  ;;  %v18018_v0 = vld [vmem:[#allocation2 + $0x1138] sm:$0xf0]  ;;  %v17948_v4 = vld [vmem:[#allocation2 + $0xf08] sm:$0xf0] }
 0x35f   :  { %10044 = vmatpush.bf16.msrb.mxu0 %v12770_v16  ;;  %v13133_v16 = vld [vmem:[#allocation2 + $0xa90] sm:$0xf] }
 0x360   :  { %10057 = vmatpush.bf16.msrb.mxu1 %v12994_v62  ;;  %v13386_v62 = vor.u32 %v17871_v20, %v13385_v1  ;;  %v14197_v1 = vld [vmem:[#allocation2 + $0x12e0] sm:$0xf]  ;;  %v18074_v20 = vld [vmem:[#allocation2 + $0x12f8] sm:$0xf0]  ;;  %v13917_v30 = vld [vmem:[#allocation2 + $0x10b0] sm:$0xf] }
 0x361   :  { %10070 = vmatpush.bf16.msrb.mxu2 %v13218_v56  ;;  %v17808_v56 = vld [vmem:[#allocation2 + $0xaa8] sm:$0xf0] }
 0x362   :  { %10083 = vmatpush.bf16.msrb.mxu3 %v13442_v57  ;;  %v13777_v57 = vld [vmem:[#allocation2 + $0xf98] sm:$0xf]  ;;  %v13134_v45 = vor.u32 %v17808_v56, %v13133_v16  ;;  %v13945_v16 = vld [vmem:[#allocation2 + $0x10e8] sm:$0xf]  ;;  %v18011_v56 = vld [vmem:[#allocation2 + $0x1100] sm:$0xf0] }
 0x363   :  { %10045 = vmatpush.bf16.msrb.mxu0 %v12742_v46  ;;  %v14449_v46 = vld [vmem:[#allocation2 + $0x14d8] sm:$0xf]  ;;  %v13946_v31 = vor.u32 %v18011_v56, %v13945_v16  ;;  %v17934_v56 = vld [vmem:[#allocation2 + $0xe98] sm:$0xf0] }
 0x364   :  { %10058 = vmatpush.bf16.msrb.mxu1 %v12966_v50  ;;  %v13358_v50 = vor.u32 %v17864_v23, %v13357_v17  ;;  %v14450_v61 = vor.u32 %v18137_v6, %v14449_v46  ;;  %v14169_v17 = vld [vmem:[#allocation2 + $0x12a8] sm:$0xf]  ;;  %v18067_v23 = vld [vmem:[#allocation2 + $0x12c0] sm:$0xf0]  ;;  %v18060_v46 = vld [vmem:[#allocation2 + $0x1288] sm:$0xf0] }
 0x365   :  { %10071 = vmatpush.bf16.msrb.mxu2 %v13190_v14  ;;  %v13778_v14 = vor.u32 %v17969_v27, %v13777_v57  ;;  %v18123_v57 = vld [vmem:[#allocation2 + $0x1480] sm:$0xf0]  ;;  %v13722_v27 = vor.u32 %v17955_v58, %v13721_v10  ;;  %v14170_v15 = vor.u32 %v18067_v23, %v14169_v17  ;;  %v18109_v10 = vld [vmem:[#allocation2 + $0x1410] sm:$0xf0]  ;;  %v13861_v17 = vld [vmem:[#allocation2 + $0x1040] sm:$0xf] }
 0x366   :  { %10084 = vmatpush.bf16.msrb.mxu3 %v13414_v54  ;;  %v17962_v54 = vld [vmem:[#allocation2 + $0xf78] sm:$0xf0]  ;;  %v14394_v13 = vor.u32 %v18123_v57, %v14393_v25 }
 0x367   :  { %10046 = vmatpush.bf16.msrb.mxu0 %v12714_v3  ;;  %v14421_v3 = vld [vmem:[#allocation2 + $0x14a0] sm:$0xf]  ;;  %v13750_v49 = vor.u32 %v17962_v54, %v13749_v53  ;;  %v17990_v57 = vld [vmem:[#allocation2 + $0x1058] sm:$0xf0] }
 0x368   :  { %10059 = vmatpush.bf16.msrb.mxu1 %v12938_v5  ;;  %v13974_v5 = vor.u32 %v18018_v0, %v13973_v55  ;;  %v17941_v0 = vld [vmem:[#allocation2 + $0xed0] sm:$0xf0] }
 0x369   :  { %10072 = vmatpush.bf16.msrb.mxu2 %v13162_v9  ;;  %v14198_v9 = vor.u32 %v18074_v20, %v14197_v1  ;;  %v13889_v1 = vld [vmem:[#allocation2 + $0x1078] sm:$0xf] }
 0x36a   :  { %10085 = vmatpush.bf16.msrb.mxu3 %v13386_v62  ;;  %v14422_v62 = vor.u32 %v18130_v63, %v14421_v3  ;;  %v17997_v63 = vld [vmem:[#allocation2 + $0x1090] sm:$0xf0] }
 0x36b   :  { %10047 = vmatpush.bf16.msrb.mxu0 %v12686_v37  ;;  %v13693_v37 = vld [vmem:[#allocation2 + $0xef0] sm:$0xf]  ;;  %v9841_v6 = vpop.f32.mrf.mxu0 }
 0x36c   :  { %10060 = vmatpush.bf16.msrb.mxu1 %v12910_v41  ;;  %v18004_v41 = vld [vmem:[#allocation2 + $0x10c8] sm:$0xf0]  ;;  %v9854_v53 = vpop.f32.mrf.mxu1 }
 0x36d   :  { %10073 = vmatpush.bf16.msrb.mxu2 %v13134_v45  ;;  %v14141_v45 = vld [vmem:[#allocation2 + $0x1270] sm:$0xf]  ;;  %v13918_v54 = vor.u32 %v18004_v41, %v13917_v30  ;;  %v18102_v30 = vld [vmem:[#allocation2 + $0x13d8] sm:$0xf0] }
 0x36e   :  { %10086 = vmatpush.bf16.msrb.mxu3 %v13358_v50  ;;  %10048 = vmatmul.bf16.vlgmr.msrb.gmra.mxu0 %v19329_v39  ;;  %v14365_v50 = vld [vmem:[#allocation2 + $0x1430] sm:$0xf]  ;;  %v14142_v55 = vor.u32 %v18060_v46, %v14141_v45 }
 0x36f   :  { %10092 = vmatpush.bf16.msra.mxu0 %v13778_v14  ;;  %10061 = vmatmul.bf16.vlgmr.msrb.gmra.mxu1 %v19333_v44  ;;  %v18116_v14 = vld [vmem:[#allocation2 + $0x1448] sm:$0xf0] }
 0x370   :  { %10105 = vmatpush.bf16.msra.mxu1 %v14002_v51  ;;  %10074 = vmatmul.bf16.vlgmr.msrb.gmra.mxu2 %v19327_v34  ;;  %v9842_v51 = vadd.f32 %v9841_v6, %v19555_v48  ;;  %v14366_v20 = vor.u32 %v18116_v14, %v14365_v50  ;;  %v13890_v48 = vor.u32 %v17997_v63, %v13889_v1  ;;  %v13609_v14 = vld [vmem:[#allocation2 + $0xe48] sm:$0xf]  ;;  %v18095_v1 = vld [vmem:[#allocation2 + $0x13a0] sm:$0xf0]  ;;  %v17920_v63 = vld [vmem:[#allocation2 + $0xe28] sm:$0xf0] }
 0x371   :  { %10118 = vmatpush.bf16.msra.mxu2 %v14226_v11  ;;  %10087 = vmatmul.bf16.vlgmr.msrb.gmra.mxu3 %v19331_v40  ;;  %v13694_v11 = vor.u32 %v17948_v4, %v13693_v37  ;;  %v14309_v4 = vld [vmem:[#allocation2 + $0x13c0] sm:$0xf]  ;;  %v13862_v6 = vor.u32 %v17990_v57, %v13861_v17  ;;  %v14897_v57 = vld [vmem:[#allocation2 + $0x1858] sm:$0xf] }
 0x372   :  { %10131 = vmatpush.bf16.msra.mxu3 %v14450_v61  ;;  %v13665_v61 = vld [vmem:[#allocation2 + $0xeb8] sm:$0xf]  ;;  %v9855_v3 = vadd.f32 %v9854_v53, %v9842_v51  ;;  %v17927_v51 = vld [vmem:[#allocation2 + $0xe60] sm:$0xf0]  ;;  %v14310_v53 = vor.u32 %v18102_v30, %v14309_v4  ;;  %v18305_v4 = vld [vmem:[#allocation2 + $0x1a30] sm:$0xf0] }
 0x373   :  { %10093 = vmatpush.bf16.msra.mxu0 %v13750_v49  ;;  %v14113_v49 = vld [vmem:[#allocation2 + $0x1238] sm:$0xf]  ;;  %v13666_v58 = vor.u32 %v17941_v0, %v13665_v61  ;;  %v9867_v25 = vpop.f32.mrf.mxu2  ;;  %v18039_v61 = vld [vmem:[#allocation2 + $0x11e0] sm:$0xf0]  ;;  %v14281_v0 = vld [vmem:[#allocation2 + $0x1388] sm:$0xf] }
 0x374   :  { %10106 = vmatpush.bf16.msra.mxu1 %v13974_v5  ;;  %v18053_v5 = vld [vmem:[#allocation2 + $0x1250] sm:$0xf0]  ;;  %v9880_v37 = vpop.f32.mrf.mxu3  ;;  %v9856_v45 = vpop.f32.mrf.mxu1 }
 0x375   :  { %10119 = vmatpush.bf16.msra.mxu2 %v14198_v9  ;;  %v14337_v9 = vld [vmem:[#allocation2 + $0x13f8] sm:$0xf]  ;;  %v14114_v16 = vor.u32 %v18053_v5, %v14113_v49  ;;  %v18361_v45 = vld [vmem:[#allocation2 + $0x1bf0] sm:$0xf0] }
 0x376   :  { %10132 = vmatpush.bf16.msra.mxu3 %v14422_v62  ;;  %v13637_v62 = vld [vmem:[#allocation2 + $0xe80] sm:$0xf]  ;;  %v14338_v23 = vor.u32 %v18109_v10, %v14337_v9  ;;  %v13805_v9 = vld [vmem:[#allocation2 + $0xfd0] sm:$0xf]  ;;  %v17976_v10 = vld [vmem:[#allocation2 + $0xfe8] sm:$0xf0] }
 0x377   :  { %10094 = vmatpush.bf16.msra.mxu0 %v13722_v27  ;;  %v14085_v27 = vld [vmem:[#allocation2 + $0x1200] sm:$0xf]  ;;  %v13638_v41 = vor.u32 %v17934_v56, %v13637_v62  ;;  %v14253_v62 = vld [vmem:[#allocation2 + $0x1350] sm:$0xf]  ;;  %v18088_v56 = vld [vmem:[#allocation2 + $0x1368] sm:$0xf0]  ;;  %v13806_v30 = vor.u32 %v17976_v10, %v13805_v9 }
 0x378   :  { %10107 = vmatpush.bf16.msra.mxu1 %v13946_v31  ;;  %v18046_v31 = vld [vmem:[#allocation2 + $0x1218] sm:$0xf0]  ;;  %v14617_v9 = vld [vmem:[#allocation2 + $0x1628] sm:$0xf]  ;;  %v18179_v10 = vld [vmem:[#allocation2 + $0x1640] sm:$0xf0] }
 0x379   :  { %10120 = vmatpush.bf16.msra.mxu2 %v14170_v15  ;;  %v9868_v15 = vadd.f32 %v9867_v25, %v9855_v3  ;;  %v14086_v50 = vor.u32 %v18046_v31, %v14085_v27  ;;  %v13581_v3 = vld [vmem:[#allocation2 + $0xe10] sm:$0xf]  ;;  %v18193_v25 = vld [vmem:[#allocation2 + $0x16b0] sm:$0xf0] }
 0x37a   :  { %10133 = vmatpush.bf16.msra.mxu3 %v14394_v13  ;;  %v9843_v13 = vpop.f32.mrf.mxu0  ;;  %v13582_v31 = vor.u32 %v17920_v63, %v13581_v3  ;;  %v18354_v3 = vld [vmem:[#allocation2 + $0x1bb8] sm:$0xf0] }
 0x37b   :  { %10095 = vmatpush.bf16.msra.mxu0 %v13694_v11  ;;  %v19562_v46 = vadd.f32 %v9880_v37, %v9868_v15  ;;  %v13833_v11 = vld [vmem:[#allocation2 + $0x1008] sm:$0xf]  ;;  %v9869_v17 = vpop.f32.mrf.mxu2  ;;  %v18249_v15 = vld [vmem:[#allocation2 + $0x1870] sm:$0xf0]  ;;  %v15121_v37 = vld [vmem:[#allocation2 + $0x1a18] sm:$0xf] }
 0x37c   :  { %10108 = vmatpush.bf16.msra.mxu1 %v13918_v54  ;;  %v17983_v54 = vld [vmem:[#allocation2 + $0x1020] sm:$0xf0]  ;;  %v9882_v27 = vpop.f32.mrf.mxu3  ;;  %v15289_v17 = vld [vmem:[#allocation2 + $0x1b68] sm:$0xf] }
 0x37d   :  { %10121 = vmatpush.bf16.msra.mxu2 %v14142_v55  ;;  %v14057_v55 = vld [vmem:[#allocation2 + $0x11c8] sm:$0xf]  ;;  %v13834_v49 = vor.u32 %v17983_v54, %v13833_v11  ;;  %v14645_v11 = vld [vmem:[#allocation2 + $0x1660] sm:$0xf] }
 0x37e   :  { %10134 = vmatpush.bf16.msra.mxu3 %v14366_v20  ;;  %v13610_v20 = vor.u32 %v17927_v51, %v13609_v14  ;;  %v14058_v5 = vor.u32 %v18039_v61, %v14057_v55  ;;  %v14898_v14 = vor.u32 %v18249_v15, %v14897_v57  ;;  %v15122_v51 = vor.u32 %v18305_v4, %v15121_v37  ;;  %v14869_v54 = vld [vmem:[#allocation2 + $0x1820] sm:$0xf]  ;;  %v18242_v61 = vld [vmem:[#allocation2 + $0x1838] sm:$0xf0]  ;;  %v18172_v15 = vld [vmem:[#allocation2 + $0x1608] sm:$0xf0] }
 0x37f   :  { %10096 = vmatpush.bf16.msra.mxu0 %v13666_v58  ;;  %v14029_v58 = vld [vmem:[#allocation2 + $0x1190] sm:$0xf] }
 0x380   :  { %10109 = vmatpush.bf16.msra.mxu1 %v13890_v48  ;;  %v14282_v48 = vor.u32 %v18095_v1, %v14281_v0  ;;  %v15093_v0 = vld [vmem:[#allocation2 + $0x19e0] sm:$0xf]  ;;  %v18298_v1 = vld [vmem:[#allocation2 + $0x19f8] sm:$0xf0]  ;;  %v14813_v37 = vld [vmem:[#allocation2 + $0x17b0] sm:$0xf] }
 0x381   :  { %10122 = vmatpush.bf16.msra.mxu2 %v14114_v16  ;;  %v18032_v16 = vld [vmem:[#allocation2 + $0x11a8] sm:$0xf0] }
 0x382   :  { %10135 = vmatpush.bf16.msra.mxu3 %v14338_v23  ;;  %v14673_v23 = vld [vmem:[#allocation2 + $0x1698] sm:$0xf]  ;;  %v14030_v13 = vor.u32 %v18032_v16, %v14029_v58  ;;  %v14841_v58 = vld [vmem:[#allocation2 + $0x17e8] sm:$0xf]  ;;  %v18235_v16 = vld [vmem:[#allocation2 + $0x1800] sm:$0xf0] }
 0x383   :  { %10097 = vmatpush.bf16.msra.mxu0 %v13638_v41  ;;  %v15345_v41 = vld [vmem:[#allocation2 + $0x1bd8] sm:$0xf]  ;;  %v14842_v57 = vor.u32 %v18235_v16, %v14841_v58  ;;  %v18158_v16 = vld [vmem:[#allocation2 + $0x1598] sm:$0xf0] }
 0x384   :  { %10110 = vmatpush.bf16.msra.mxu1 %v13862_v6  ;;  %v14254_v6 = vor.u32 %v18088_v56, %v14253_v62  ;;  %v15346_v55 = vor.u32 %v18361_v45, %v15345_v41  ;;  %v15065_v62 = vld [vmem:[#allocation2 + $0x19a8] sm:$0xf]  ;;  %v18291_v56 = vld [vmem:[#allocation2 + $0x19c0] sm:$0xf0]  ;;  %v18284_v41 = vld [vmem:[#allocation2 + $0x1988] sm:$0xf0] }
 0x385   :  { %10123 = vmatpush.bf16.msra.mxu2 %v14086_v50  ;;  %v14674_v50 = vor.u32 %v18193_v25, %v14673_v23  ;;  %v18347_v23 = vld [vmem:[#allocation2 + $0x1b80] sm:$0xf0]  ;;  %v14618_v25 = vor.u32 %v18179_v10, %v14617_v9  ;;  %v15066_v27 = vor.u32 %v18291_v56, %v15065_v62  ;;  %v18333_v9 = vld [vmem:[#allocation2 + $0x1b10] sm:$0xf0]  ;;  %v14757_v62 = vld [vmem:[#allocation2 + $0x1740] sm:$0xf] }
 0x386   :  { %10136 = vmatpush.bf16.msra.mxu3 %v14310_v53  ;;  %v18186_v53 = vld [vmem:[#allocation2 + $0x1678] sm:$0xf0]  ;;  %v15290_v4 = vor.u32 %v18347_v23, %v15289_v17 }
 0x387   :  { %10098 = vmatpush.bf16.msra.mxu0 %v13610_v20  ;;  %v15317_v20 = vld [vmem:[#allocation2 + $0x1ba0] sm:$0xf]  ;;  %v14646_v63 = vor.u32 %v18186_v53, %v14645_v11  ;;  %v18214_v23 = vld [vmem:[#allocation2 + $0x1758] sm:$0xf0] }
 0x388   :  { %10111 = vmatpush.bf16.msra.mxu1 %v13834_v49  ;;  %v14870_v49 = vor.u32 %v18242_v61, %v14869_v54  ;;  %v18165_v61 = vld [vmem:[#allocation2 + $0x15d0] sm:$0xf0] }
 0x389   :  { %10124 = vmatpush.bf16.msra.mxu2 %v14058_v5  ;;  %v15094_v5 = vor.u32 %v18298_v1, %v15093_v0  ;;  %v14785_v0 = vld [vmem:[#allocation2 + $0x1778] sm:$0xf] }
 0x38a   :  { %10137 = vmatpush.bf16.msra.mxu3 %v14282_v48  ;;  %v15318_v48 = vor.u32 %v18354_v3, %v15317_v20  ;;  %v18221_v3 = vld [vmem:[#allocation2 + $0x1790] sm:$0xf0] }
 0x38b   :  { %10099 = vmatpush.bf16.msra.mxu0 %v13582_v31  ;;  %v14589_v31 = vld [vmem:[#allocation2 + $0x15f0] sm:$0xf]  ;;  %v9893_v45 = vpop.f32.mrf.mxu0 }
 0x38c   :  { %10112 = vmatpush.bf16.msra.mxu1 %v13806_v30  ;;  %v18228_v30 = vld [vmem:[#allocation2 + $0x17c8] sm:$0xf0]  ;;  %v9906_v11 = vpop.f32.mrf.mxu1 }
 0x38d   :  { %10125 = vmatpush.bf16.msra.mxu2 %v14030_v13  ;;  %v15037_v13 = vld [vmem:[#allocation2 + $0x1970] sm:$0xf]  ;;  %v14814_v53 = vor.u32 %v18228_v30, %v14813_v37  ;;  %v18326_v37 = vld [vmem:[#allocation2 + $0x1ad8] sm:$0xf0] }
 0x38e   :  { %10138 = vmatpush.bf16.msra.mxu3 %v14254_v6  ;;  %10100 = vmatmul.bf16.vlgmr.msra.gmra.mxu0 %v19352_v24  ;;  %v15261_v6 = vld [vmem:[#allocation2 + $0x1b30] sm:$0xf]  ;;  %v15038_v54 = vor.u32 %v18284_v41, %v15037_v13 }
 0x38f   :  { %10144 = vmatpush.bf16.msrb.mxu0 %v14674_v50  ;;  %10113 = vmatmul.bf16.vlgmr.msra.gmra.mxu1 %v19360_v29  ;;  %v18340_v50 = vld [vmem:[#allocation2 + $0x1b48] sm:$0xf0] }
 0x390   :  { %10157 = vmatpush.bf16.msrb.mxu1 %v14898_v14  ;;  %10126 = vmatmul.bf16.vlgmr.msra.gmra.mxu2 %v19356_v28  ;;  %v9894_v14 = vadd.f32 %v9893_v45, %v19562_v46  ;;  %v15262_v1 = vor.u32 %v18340_v50, %v15261_v6  ;;  %v14786_v46 = vor.u32 %v18221_v3, %v14785_v0  ;;  %v14505_v50 = vld [vmem:[#allocation2 + $0x1548] sm:$0xf]  ;;  %v18319_v0 = vld [vmem:[#allocation2 + $0x1aa0] sm:$0xf0]  ;;  %v18144_v3 = vld [vmem:[#allocation2 + $0x1528] sm:$0xf0] }
 0x391   :  { %10170 = vmatpush.bf16.msrb.mxu2 %v15122_v51  ;;  %10139 = vmatmul.bf16.vlgmr.msra.gmra.mxu3 %v19364_v18  ;;  %v14590_v51 = vor.u32 %v18172_v15, %v14589_v31  ;;  %v15205_v15 = vld [vmem:[#allocation2 + $0x1ac0] sm:$0xf]  ;;  %v14758_v45 = vor.u32 %v18214_v23, %v14757_v62  ;;  %v15793_v23 = vld [vmem:[#allocation2 + $0x1f58] sm:$0xf] }
 0x392   :  { %10183 = vmatpush.bf16.msrb.mxu3 %v15346_v55  ;;  %v14561_v55 = vld [vmem:[#allocation2 + $0x15b8] sm:$0xf]  ;;  %v9907_v20 = vadd.f32 %v9906_v11, %v9894_v14  ;;  %v18151_v14 = vld [vmem:[#allocation2 + $0x1560] sm:$0xf0]  ;;  %v15206_v11 = vor.u32 %v18326_v37, %v15205_v15  ;;  %v18529_v15 = vld [vmem:[#allocation2 + $0x2130] sm:$0xf0] }
 0x393   :  { %10145 = vmatpush.bf16.msrb.mxu0 %v14646_v63  ;;  %v15009_v63 = vld [vmem:[#allocation2 + $0x1938] sm:$0xf]  ;;  %v14562_v10 = vor.u32 %v18165_v61, %v14561_v55  ;;  %v9919_v17 = vpop.f32.mrf.mxu2  ;;  %v18263_v55 = vld [vmem:[#allocation2 + $0x18e0] sm:$0xf0]  ;;  %v15177_v61 = vld [vmem:[#allocation2 + $0x1a88] sm:$0xf] }
 0x394   :  { %10158 = vmatpush.bf16.msrb.mxu1 %v14870_v49  ;;  %v18277_v49 = vld [vmem:[#allocation2 + $0x1950] sm:$0xf0]  ;;  %v9932_v31 = vpop.f32.mrf.mxu3  ;;  %v9908_v13 = vpop.f32.mrf.mxu1 }
 0x395   :  { %10171 = vmatpush.bf16.msrb.mxu2 %v15094_v5  ;;  %v15233_v5 = vld [vmem:[#allocation2 + $0x1af8] sm:$0xf]  ;;  %v15010_v58 = vor.u32 %v18277_v49, %v15009_v63  ;;  %v18585_v13 = vld [vmem:[#allocation2 + $0x22f0] sm:$0xf0] }
 0x396   :  { %10184 = vmatpush.bf16.msrb.mxu3 %v15318_v48  ;;  %v14533_v48 = vld [vmem:[#allocation2 + $0x1580] sm:$0xf]  ;;  %v15234_v56 = vor.u32 %v18333_v9, %v15233_v5  ;;  %v14701_v5 = vld [vmem:[#allocation2 + $0x16d0] sm:$0xf]  ;;  %v18200_v9 = vld [vmem:[#allocation2 + $0x16e8] sm:$0xf0] }
 0x397   :  { %10146 = vmatpush.bf16.msrb.mxu0 %v14618_v25  ;;  %v14981_v25 = vld [vmem:[#allocation2 + $0x1900] sm:$0xf]  ;;  %v14534_v30 = vor.u32 %v18158_v16, %v14533_v48  ;;  %v15149_v48 = vld [vmem:[#allocation2 + $0x1a50] sm:$0xf]  ;;  %v18312_v16 = vld [vmem:[#allocation2 + $0x1a68] sm:$0xf0]  ;;  %v14702_v37 = vor.u32 %v18200_v9, %v14701_v5 }
 0x398   :  { %10159 = vmatpush.bf16.msrb.mxu1 %v14842_v57  ;;  %v18270_v57 = vld [vmem:[#allocation2 + $0x1918] sm:$0xf0]  ;;  %v15513_v5 = vld [vmem:[#allocation2 + $0x1d28] sm:$0xf]  ;;  %v18403_v9 = vld [vmem:[#allocation2 + $0x1d40] sm:$0xf0] }
 0x399   :  { %10172 = vmatpush.bf16.msrb.mxu2 %v15066_v27  ;;  %v9920_v27 = vadd.f32 %v9919_v17, %v9907_v20  ;;  %v14982_v6 = vor.u32 %v18270_v57, %v14981_v25  ;;  %v14477_v20 = vld [vmem:[#allocation2 + $0x1510] sm:$0xf]  ;;  %v18417_v17 = vld [vmem:[#allocation2 + $0x1db0] sm:$0xf0] }
 0x39a   :  { %10185 = vmatpush.bf16.msrb.mxu3 %v15290_v4  ;;  %v9895_v4 = vpop.f32.mrf.mxu0  ;;  %v14478_v57 = vor.u32 %v18144_v3, %v14477_v20  ;;  %v18578_v20 = vld [vmem:[#allocation2 + $0x22b8] sm:$0xf0] }
 0x39b   :  { %10147 = vmatpush.bf16.msrb.mxu0 %v14590_v51  ;;  %v19569_v41 = vadd.f32 %v9932_v31, %v9920_v27  ;;  %v14729_v51 = vld [vmem:[#allocation2 + $0x1708] sm:$0xf]  ;;  %v9921_v62 = vpop.f32.mrf.mxu2  ;;  %v18473_v27 = vld [vmem:[#allocation2 + $0x1f70] sm:$0xf0]  ;;  %v16017_v31 = vld [vmem:[#allocation2 + $0x2118] sm:$0xf] }
 0x39c   :  { %10160 = vmatpush.bf16.msrb.mxu1 %v14814_v53  ;;  %v18207_v53 = vld [vmem:[#allocation2 + $0x1720] sm:$0xf0]  ;;  %v9934_v25 = vpop.f32.mrf.mxu3  ;;  %v16185_v62 = vld [vmem:[#allocation2 + $0x2268] sm:$0xf] }
 0x39d   :  { %10173 = vmatpush.bf16.msrb.mxu2 %v15038_v54  ;;  %v14953_v54 = vld [vmem:[#allocation2 + $0x18c8] sm:$0xf]  ;;  %v14730_v63 = vor.u32 %v18207_v53, %v14729_v51  ;;  %v15541_v51 = vld [vmem:[#allocation2 + $0x1d60] sm:$0xf] }
 0x39e   :  { %10186 = vmatpush.bf16.msrb.mxu3 %v15262_v1  ;;  %v14506_v1 = vor.u32 %v18151_v14, %v14505_v50  ;;  %v14954_v49 = vor.u32 %v18263_v55, %v14953_v54  ;;  %v15794_v50 = vor.u32 %v18473_v27, %v15793_v23  ;;  %v16018_v14 = vor.u32 %v18529_v15, %v16017_v31  ;;  %v15765_v53 = vld [vmem:[#allocation2 + $0x1f20] sm:$0xf]  ;;  %v18466_v55 = vld [vmem:[#allocation2 + $0x1f38] sm:$0xf0]  ;;  %v18396_v27 = vld [vmem:[#allocation2 + $0x1d08] sm:$0xf0] }
 0x39f   :  { %10148 = vmatpush.bf16.msrb.mxu0 %v14562_v10  ;;  %v14925_v10 = vld [vmem:[#allocation2 + $0x1890] sm:$0xf] }
 0x3a0   :  { %10161 = vmatpush.bf16.msrb.mxu1 %v14786_v46  ;;  %v15178_v46 = vor.u32 %v18319_v0, %v15177_v61  ;;  %v15989_v61 = vld [vmem:[#allocation2 + $0x20e0] sm:$0xf]  ;;  %v18522_v0 = vld [vmem:[#allocation2 + $0x20f8] sm:$0xf0]  ;;  %v15709_v31 = vld [vmem:[#allocation2 + $0x1eb0] sm:$0xf] }
 0x3a1   :  { %10174 = vmatpush.bf16.msrb.mxu2 %v15010_v58  ;;  %v18256_v58 = vld [vmem:[#allocation2 + $0x18a8] sm:$0xf0] }
 0x3a2   :  { %10187 = vmatpush.bf16.msrb.mxu3 %v15234_v56  ;;  %v15569_v56 = vld [vmem:[#allocation2 + $0x1d98] sm:$0xf]  ;;  %v14926_v4 = vor.u32 %v18256_v58, %v14925_v10  ;;  %v15737_v10 = vld [vmem:[#allocation2 + $0x1ee8] sm:$0xf]  ;;  %v18459_v58 = vld [vmem:[#allocation2 + $0x1f00] sm:$0xf0] }
 0x3a3   :  { %10149 = vmatpush.bf16.msrb.mxu0 %v14534_v30  ;;  %v16241_v30 = vld [vmem:[#allocation2 + $0x22d8] sm:$0xf]  ;;  %v15738_v23 = vor.u32 %v18459_v58, %v15737_v10  ;;  %v18382_v58 = vld [vmem:[#allocation2 + $0x1c98] sm:$0xf0] }
 0x3a4   :  { %10162 = vmatpush.bf16.msrb.mxu1 %v14758_v45  ;;  %v15150_v45 = vor.u32 %v18312_v16, %v15149_v48  ;;  %v16242_v54 = vor.u32 %v18585_v13, %v16241_v30  ;;  %v15961_v48 = vld [vmem:[#allocation2 + $0x20a8] sm:$0xf]  ;;  %v18515_v16 = vld [vmem:[#allocation2 + $0x20c0] sm:$0xf0]  ;;  %v18508_v30 = vld [vmem:[#allocation2 + $0x2088] sm:$0xf0] }
 0x3a5   :  { %10175 = vmatpush.bf16.msrb.mxu2 %v14982_v6  ;;  %v15570_v6 = vor.u32 %v18417_v17, %v15569_v56  ;;  %v18571_v56 = vld [vmem:[#allocation2 + $0x2280] sm:$0xf0]  ;;  %v15514_v17 = vor.u32 %v18403_v9, %v15513_v5  ;;  %v15962_v25 = vor.u32 %v18515_v16, %v15961_v48  ;;  %v18557_v5 = vld [vmem:[#allocation2 + $0x2210] sm:$0xf0]  ;;  %v15653_v48 = vld [vmem:[#allocation2 + $0x1e40] sm:$0xf] }
 0x3a6   :  { %10188 = vmatpush.bf16.msrb.mxu3 %v15206_v11  ;;  %v18410_v11 = vld [vmem:[#allocation2 + $0x1d78] sm:$0xf0]  ;;  %v16186_v15 = vor.u32 %v18571_v56, %v16185_v62 }
 0x3a7   :  { %10150 = vmatpush.bf16.msrb.mxu0 %v14506_v1  ;;  %v16213_v1 = vld [vmem:[#allocation2 + $0x22a0] sm:$0xf]  ;;  %v15542_v3 = vor.u32 %v18410_v11, %v15541_v51  ;;  %v18438_v56 = vld [vmem:[#allocation2 + $0x1e58] sm:$0xf0] }
 0x3a8   :  { %10163 = vmatpush.bf16.msrb.mxu1 %v14730_v63  ;;  %v15766_v63 = vor.u32 %v18466_v55, %v15765_v53  ;;  %v18389_v55 = vld [vmem:[#allocation2 + $0x1cd0] sm:$0xf0] }
 0x3a9   :  { %10176 = vmatpush.bf16.msrb.mxu2 %v14954_v49  ;;  %v15990_v49 = vor.u32 %v18522_v0, %v15989_v61  ;;  %v15681_v61 = vld [vmem:[#allocation2 + $0x1e78] sm:$0xf] }
 0x3aa   :  { %10189 = vmatpush.bf16.msrb.mxu3 %v15178_v46  ;;  %v16214_v46 = vor.u32 %v18578_v20, %v16213_v1  ;;  %v18445_v20 = vld [vmem:[#allocation2 + $0x1e90] sm:$0xf0] }
 0x3ab   :  { %10151 = vmatpush.bf16.msrb.mxu0 %v14478_v57  ;;  %v15485_v57 = vld [vmem:[#allocation2 + $0x1cf0] sm:$0xf]  ;;  %v9945_v13 = vpop.f32.mrf.mxu0 }
 0x3ac   :  { %10164 = vmatpush.bf16.msrb.mxu1 %v14702_v37  ;;  %v18452_v37 = vld [vmem:[#allocation2 + $0x1ec8] sm:$0xf0]  ;;  %v9958_v51 = vpop.f32.mrf.mxu1 }
 0x3ad   :  { %10177 = vmatpush.bf16.msrb.mxu2 %v14926_v4  ;;  %v15933_v4 = vld [vmem:[#allocation2 + $0x2070] sm:$0xf]  ;;  %v15710_v11 = vor.u32 %v18452_v37, %v15709_v31  ;;  %v18550_v31 = vld [vmem:[#allocation2 + $0x21d8] sm:$0xf0] }
 0x3ae   :  { %10190 = vmatpush.bf16.msrb.mxu3 %v15150_v45  ;;  %10152 = vmatmul.bf16.vlgmr.msrb.gmra.mxu0 %v19383_v26  ;;  %v16157_v45 = vld [vmem:[#allocation2 + $0x2230] sm:$0xf]  ;;  %v15934_v53 = vor.u32 %v18508_v30, %v15933_v4 }
 0x3af   :  { %10196 = vmatpush.bf16.msra.mxu0 %v15570_v6  ;;  %10165 = vmatmul.bf16.vlgmr.msrb.gmra.mxu1 %v19391_v33  ;;  %v18564_v6 = vld [vmem:[#allocation2 + $0x2248] sm:$0xf0] }
 0x3b0   :  { %10209 = vmatpush.bf16.msra.mxu1 %v15794_v50  ;;  %10178 = vmatmul.bf16.vlgmr.msrb.gmra.mxu2 %v19387_v32  ;;  %v9946_v50 = vadd.f32 %v9945_v13, %v19569_v41  ;;  %v16158_v0 = vor.u32 %v18564_v6, %v16157_v45  ;;  %v15682_v41 = vor.u32 %v18445_v20, %v15681_v61  ;;  %v15401_v6 = vld [vmem:[#allocation2 + $0x1c48] sm:$0xf]  ;;  %v18543_v61 = vld [vmem:[#allocation2 + $0x21a0] sm:$0xf0]  ;;  %v18368_v20 = vld [vmem:[#allocation2 + $0x1c28] sm:$0xf0] }
 0x3b1   :  { %10222 = vmatpush.bf16.msra.mxu2 %v16018_v14  ;;  %10191 = vmatmul.bf16.vlgmr.msrb.gmra.mxu3 %v19395_v59  ;;  %v15486_v14 = vor.u32 %v18396_v27, %v15485_v57  ;;  %v16101_v27 = vld [vmem:[#allocation2 + $0x21c0] sm:$0xf]  ;;  %v15654_v13 = vor.u32 %v18438_v56, %v15653_v48  ;;  %v16689_v56 = vld [vmem:[#allocation2 + $0x2658] sm:$0xf] }
 0x3b2   :  { %10235 = vmatpush.bf16.msra.mxu3 %v16242_v54  ;;  %v15457_v54 = vld [vmem:[#allocation2 + $0x1cb8] sm:$0xf]  ;;  %v9959_v1 = vadd.f32 %v9958_v51, %v9946_v50  ;;  %v18375_v50 = vld [vmem:[#allocation2 + $0x1c60] sm:$0xf0]  ;;  %v16102_v51 = vor.u32 %v18550_v31, %v16101_v27  ;;  %v18753_v27 = vld [vmem:[#allocation2 + $0x2830] sm:$0xf0] }
 0x3b3   :  { %10197 = vmatpush.bf16.msra.mxu0 %v15542_v3  ;;  %v15905_v3 = vld [vmem:[#allocation2 + $0x2038] sm:$0xf]  ;;  %v15458_v9 = vor.u32 %v18389_v55, %v15457_v54  ;;  %v9971_v62 = vpop.f32.mrf.mxu2  ;;  %v18487_v54 = vld [vmem:[#allocation2 + $0x1fe0] sm:$0xf0]  ;;  %v16073_v55 = vld [vmem:[#allocation2 + $0x2188] sm:$0xf] }
 0x3b4   :  { %10210 = vmatpush.bf16.msra.mxu1 %v15766_v63  ;;  %v18501_v63 = vld [vmem:[#allocation2 + $0x2050] sm:$0xf0]  ;;  %v9984_v57 = vpop.f32.mrf.mxu3  ;;  %v9960_v4 = vpop.f32.mrf.mxu1 }
 0x3b5   :  { %10223 = vmatpush.bf16.msra.mxu2 %v15990_v49  ;;  %v16129_v49 = vld [vmem:[#allocation2 + $0x21f8] sm:$0xf]  ;;  %v15906_v10 = vor.u32 %v18501_v63, %v15905_v3  ;;  %v18809_v4 = vld [vmem:[#allocation2 + $0x29f0] sm:$0xf0] }
 0x3b6   :  { %10236 = vmatpush.bf16.msra.mxu3 %v16214_v46  ;;  %v15429_v46 = vld [vmem:[#allocation2 + $0x1c80] sm:$0xf]  ;;  %v16130_v16 = vor.u32 %v18557_v5, %v16129_v49  ;;  %v15597_v49 = vld [vmem:[#allocation2 + $0x1dd0] sm:$0xf]  ;;  %v18424_v5 = vld [vmem:[#allocation2 + $0x1de8] sm:$0xf0] }
 0x3b7   :  { %10198 = vmatpush.bf16.msra.mxu0 %v15514_v17  ;;  %v15877_v17 = vld [vmem:[#allocation2 + $0x2000] sm:$0xf]  ;;  %v15430_v37 = vor.u32 %v18382_v58, %v15429_v46  ;;  %v16045_v46 = vld [vmem:[#allocation2 + $0x2150] sm:$0xf]  ;;  %v18536_v58 = vld [vmem:[#allocation2 + $0x2168] sm:$0xf0]  ;;  %v15598_v31 = vor.u32 %v18424_v5, %v15597_v49 }
 0x3b8   :  { %10211 = vmatpush.bf16.msra.mxu1 %v15738_v23  ;;  %v18494_v23 = vld [vmem:[#allocation2 + $0x2018] sm:$0xf0]  ;;  %v16409_v49 = vld [vmem:[#allocation2 + $0x2428] sm:$0xf]  ;;  %v18627_v5 = vld [vmem:[#allocation2 + $0x2440] sm:$0xf0] }
 0x3b9   :  { %10224 = vmatpush.bf16.msra.mxu2 %v15962_v25  ;;  %v9972_v25 = vadd.f32 %v9971_v62, %v9959_v1  ;;  %v15878_v45 = vor.u32 %v18494_v23, %v15877_v17  ;;  %v15373_v1 = vld [vmem:[#allocation2 + $0x1c10] sm:$0xf]  ;;  %v18641_v62 = vld [vmem:[#allocation2 + $0x24b0] sm:$0xf0] }
 0x3ba   :  { %10237 = vmatpush.bf16.msra.mxu3 %v16186_v15  ;;  %v9947_v15 = vpop.f32.mrf.mxu0  ;;  %v15374_v23 = vor.u32 %v18368_v20, %v15373_v1  ;;  %v18802_v1 = vld [vmem:[#allocation2 + $0x29b8] sm:$0xf0] }
 0x3bb   :  { %10199 = vmatpush.bf16.msra.mxu0 %v15486_v14  ;;  %v19576_v30 = vadd.f32 %v9984_v57, %v9972_v25  ;;  %v15625_v14 = vld [vmem:[#allocation2 + $0x1e08] sm:$0xf]  ;;  %v9973_v48 = vpop.f32.mrf.mxu2  ;;  %v18697_v25 = vld [vmem:[#allocation2 + $0x2670] sm:$0xf0]  ;;  %v16913_v57 = vld [vmem:[#allocation2 + $0x2818] sm:$0xf] }
 0x3bc   :  { %10212 = vmatpush.bf16.msra.mxu1 %v15710_v11  ;;  %v18431_v11 = vld [vmem:[#allocation2 + $0x1e20] sm:$0xf0]  ;;  %v9986_v17 = vpop.f32.mrf.mxu3  ;;  %v17081_v48 = vld [vmem:[#allocation2 + $0x2968] sm:$0xf] }
 0x3bd   :  { %10225 = vmatpush.bf16.msra.mxu2 %v15934_v53  ;;  %v15849_v53 = vld [vmem:[#allocation2 + $0x1fc8] sm:$0xf]  ;;  %v15626_v3 = vor.u32 %v18431_v11, %v15625_v14  ;;  %v16437_v14 = vld [vmem:[#allocation2 + $0x2460] sm:$0xf] }
 0x3be   :  { %10238 = vmatpush.bf16.msra.mxu3 %v16158_v0  ;;  %v15402_v0 = vor.u32 %v18375_v50, %v15401_v6  ;;  %v15850_v63 = vor.u32 %v18487_v54, %v15849_v53  ;;  %v16690_v6 = vor.u32 %v18697_v25, %v16689_v56  ;;  %v16914_v50 = vor.u32 %v18753_v27, %v16913_v57  ;;  %v16661_v11 = vld [vmem:[#allocation2 + $0x2620] sm:$0xf]  ;;  %v18690_v54 = vld [vmem:[#allocation2 + $0x2638] sm:$0xf0]  ;;  %v16381_v56 = vld [vmem:[#allocation2 + $0x23f0] sm:$0xf] }
 0x3bf   :  { %10200 = vmatpush.bf16.msra.mxu0 %v15458_v9  ;;  %v15821_v9 = vld [vmem:[#allocation2 + $0x1f90] sm:$0xf]  ;;  %v18620_v25 = vld [vmem:[#allocation2 + $0x2408] sm:$0xf0]  ;;  %v18917_v27 = vld [vmem:[#allocation5] sm:$0xff] }
 0x3c0   :  { %10213 = vmatpush.bf16.msra.mxu1 %v15682_v41  ;;  %v16074_v41 = vor.u32 %v18543_v61, %v16073_v55  ;;  %v16885_v55 = vld [vmem:[#allocation2 + $0x27e0] sm:$0xf]  ;;  %v18746_v61 = vld [vmem:[#allocation2 + $0x27f8] sm:$0xf0]  ;;  %v16605_v57 = vld [vmem:[#allocation2 + $0x25b0] sm:$0xf] }
 0x3c1   :  { %10226 = vmatpush.bf16.msra.mxu2 %v15906_v10  ;;  %v18480_v10 = vld [vmem:[#allocation2 + $0x1fa8] sm:$0xf0] }
 0x3c2   :  { %10239 = vmatpush.bf16.msra.mxu3 %v16130_v16  ;;  %v16465_v16 = vld [vmem:[#allocation2 + $0x2498] sm:$0xf]  ;;  %v15822_v15 = vor.u32 %v18480_v10, %v15821_v9  ;;  %v16633_v9 = vld [vmem:[#allocation2 + $0x25e8] sm:$0xf]  ;;  %v18683_v10 = vld [vmem:[#allocation2 + $0x2600] sm:$0xf0] }
 0x3c3   :  { %10201 = vmatpush.bf16.msra.mxu0 %v15430_v37  ;;  %v17137_v37 = vld [vmem:[#allocation2 + $0x29d8] sm:$0xf]  ;;  %v16634_v17 = vor.u32 %v18683_v10, %v16633_v9 }
 0x3c4   :  { %10214 = vmatpush.bf16.msra.mxu1 %v15654_v13  ;;  %v16046_v13 = vor.u32 %v18536_v58, %v16045_v46  ;;  %v17138_v53 = vor.u32 %v18809_v4, %v17137_v37  ;;  %v16857_v46 = vld [vmem:[#allocation2 + $0x27a8] sm:$0xf]  ;;  %v18739_v58 = vld [vmem:[#allocation2 + $0x27c0] sm:$0xf0]  ;;  %v18676_v37 = vld [vmem:[#allocation2 + $0x25c8] sm:$0xf0] }
 0x3c5   :  { %10227 = vmatpush.bf16.msra.mxu2 %v15878_v45  ;;  %v16466_v45 = vor.u32 %v18641_v62, %v16465_v16  ;;  %v18795_v16 = vld [vmem:[#allocation2 + $0x2980] sm:$0xf0]  ;;  %v16410_v62 = vor.u32 %v18627_v5, %v16409_v49  ;;  %v16829_v4 = vld [vmem:[#allocation2 + $0x2770] sm:$0xf]  ;;  %v17025_v49 = vld [vmem:[#allocation2 + $0x28f8] sm:$0xf] }
 0x3c6   :  { %10240 = vmatpush.bf16.msra.mxu3 %v16102_v51  ;;  %v18634_v51 = vld [vmem:[#allocation2 + $0x2478] sm:$0xf0]  ;;  %v18781_v5 = vld [vmem:[#allocation2 + $0x2910] sm:$0xf0] }
 0x3c7   :  { %10202 = vmatpush.bf16.msra.mxu0 %v15402_v0  ;;  %v17109_v0 = vld [vmem:[#allocation2 + $0x29a0] sm:$0xf]  ;;  %v16438_v20 = vor.u32 %v18634_v51, %v16437_v14  ;;  %v16606_v51 = vor.u32 %v18676_v37, %v16605_v57 }
 0x3c8   :  { %10215 = vmatpush.bf16.msra.mxu1 %v15626_v3  ;;  %v16662_v3 = vor.u32 %v18690_v54, %v16661_v11  ;;  %v18613_v54 = vld [vmem:[#allocation2 + $0x23d0] sm:$0xf0] }
 0x3c9   :  { %10228 = vmatpush.bf16.msra.mxu2 %v15850_v63  ;;  %v16886_v63 = vor.u32 %v18746_v61, %v16885_v55  ;;  %v16577_v55 = vld [vmem:[#allocation2 + $0x2578] sm:$0xf] }
 0x3ca   :  { %10241 = vmatpush.bf16.msra.mxu3 %v16074_v41  ;;  %v17110_v41 = vor.u32 %v18802_v1, %v17109_v0 }
 0x3cb   :  { %10203 = vmatpush.bf16.msra.mxu0 %v15374_v23  ;;  %v16858_v23 = vor.u32 %v18739_v58, %v16857_v46  ;;  %v9997_v14 = vpop.f32.mrf.mxu0  ;;  %v16325_v58 = vld [vmem:[#allocation2 + $0x2380] sm:$0xf] }
 0x3cc   :  { %10216 = vmatpush.bf16.msra.mxu1 %v15598_v31  ;;  %v1818_v31 = vperm.slane %v18917_v27, 4  ;;  %v10010_v0 = vpop.f32.mrf.mxu1 }
 0x3cd   :  { %10229 = vmatpush.bf16.msra.mxu2 %v15822_v15  ;;  %v17082_v15 = vor.u32 %v18795_v16, %v17081_v48  ;;  %v18606_v48 = vld [vmem:[#allocation2 + $0x2398] sm:$0xf0]  ;;  %v16549_v16 = vld [vmem:[#allocation2 + $0x2540] sm:$0xf] }
 0x3ce   :  { %10242 = vmatpush.bf16.msra.mxu3 %v16046_v13  ;;  %10204 = vmatmul.bf16.vlgmr.msra.gmra.mxu0 %v19401_v38  ;;  %v18732_v13 = vld [vmem:[#allocation2 + $0x2788] sm:$0xf0]  ;;  %v9998_v61 = vadd.f32 %v9997_v14, %v1818_v31  ;;  %v16997_v31 = vld [vmem:[#allocation2 + $0x28c0] sm:$0xf]  ;;  %v16326_v37 = vor.u32 %v18606_v48, %v16325_v58  ;;  %v18599_v14 = vld [vmem:[#allocation2 + $0x2360] sm:$0xf0] }
 0x3cf   :  { %10248 = vmatpush.bf16.msrb.mxu0 %v16466_v45  ;;  %10217 = vmatmul.bf16.vlgmr.msra.gmra.mxu1 %v19405_v60  ;;  %v17053_v45 = vld [vmem:[#allocation2 + $0x2930] sm:$0xf]  ;;  %v16830_v11 = vor.u32 %v18732_v13, %v16829_v4  ;;  %v18704_v48 = vld [vmem:[#allocation2 + $0x26a8] sm:$0xf0] }
 0x3d0   :  { %10261 = vmatpush.bf16.msrb.mxu1 %v16690_v6  ;;  %10230 = vmatmul.bf16.vlgmr.msra.gmra.mxu2 %v19403_v21  ;;  %v18788_v6 = vld [vmem:[#allocation2 + $0x2948] sm:$0xf0]  ;;  %v10011_v9 = vadd.f32 %v10010_v0, %v9998_v61  ;;  %v18711_v61 = vld [vmem:[#allocation2 + $0x26e0] sm:$0xf0]  ;;  %v16969_v0 = vld [vmem:[#allocation2 + $0x2888] sm:$0xf] }
 0x3d1   :  { %10274 = vmatpush.bf16.msrb.mxu2 %v16914_v50  ;;  %10243 = vmatmul.bf16.vlgmr.msra.gmra.mxu3 %v19407_v47  ;;  %v16382_v50 = vor.u32 %v18620_v25, %v16381_v56  ;;  %v17054_v1 = vor.u32 %v18788_v6, %v17053_v45  ;;  %v17026_v56 = vor.u32 %v18781_v5, %v17025_v49  ;;  %v18718_v25 = vld [vmem:[#allocation2 + $0x2718] sm:$0xf0] }
 0x3d2   :  { %10287 = vmatpush.bf16.msrb.mxu3 %v17138_v53  ;;  %v16353_v53 = vld [vmem:[#allocation2 + $0x23b8] sm:$0xf] }
 0x3d3   :  { %10249 = vmatpush.bf16.msrb.mxu0 %v16438_v20  ;;  %v18669_v20 = vld [vmem:[#allocation2 + $0x2590] sm:$0xf0]  ;;  %v9999_v13 = vpop.f32.mrf.mxu0 }
 0x3d4   :  { %10262 = vmatpush.bf16.msrb.mxu1 %v16662_v3  ;;  %v16801_v3 = vld [vmem:[#allocation2 + $0x2738] sm:$0xf]  ;;  %v16578_v10 = vor.u32 %v18669_v20, %v16577_v55  ;;  %v10036_v27 = vpop.f32.mrf.mxu3  ;;  %v16745_v55 = vld [vmem:[#allocation2 + $0x26c8] sm:$0xf] }
 0x3d5   :  { %10275 = vmatpush.bf16.msrb.mxu2 %v16886_v63  ;;  %v18725_v63 = vld [vmem:[#allocation2 + $0x2750] sm:$0xf0]  ;;  %v16746_v5 = vor.u32 %v18711_v61, %v16745_v55  ;;  %v17567_v55 = vld [vmem:[#allocation2 + $0x324] sm:$0xf] }
 0x3d6   :  { %10288 = vmatpush.bf16.msrb.mxu3 %v17110_v41  ;;  %v16354_v41 = vor.u32 %v18613_v54, %v16353_v53  ;;  %v16802_v46 = vor.u32 %v18725_v63, %v16801_v3  ;;  %v18655_v54 = vld [vmem:[#allocation2 + $0x2520] sm:$0xf0]  ;;  %v16269_v3 = vld [vmem:[#allocation2 + $0x2310] sm:$0xf]  ;;  %v18592_v63 = vld [vmem:[#allocation2 + $0x2328] sm:$0xf0] }
 0x3d7   :  { %10250 = vmatpush.bf16.msrb.mxu0 %v16410_v62  ;;  %v10023_v62 = vpop.f32.mrf.mxu2 }
 0x3d8   :  { %10263 = vmatpush.bf16.msrb.mxu1 %v16634_v17  ;;  %v18662_v17 = vld [vmem:[#allocation2 + $0x2558] sm:$0xf0]  ;;  %v10024_v57 = vadd.f32 %v10023_v62, %v10011_v9  ;;  %v16493_v9 = vld [vmem:[#allocation2 + $0x24d0] sm:$0xf]  ;;  %v18760_v62 = vld [vmem:[#allocation2 + $0x2868] sm:$0xf0] }
 0x3d9   :  { %10276 = vmatpush.bf16.msrb.mxu2 %v16858_v23  ;;  %v16773_v23 = vld [vmem:[#allocation2 + $0x2700] sm:$0xf]  ;;  %v16550_v45 = vor.u32 %v18662_v17, %v16549_v16  ;;  %v16941_v16 = vld [vmem:[#allocation2 + $0x2850] sm:$0xf]  ;;  %v17518_v17 = vld [vmem:[#allocation2 + $0x19c] sm:$0xf] }
 0x3da   :  { %10289 = vmatpush.bf16.msrb.mxu3 %v17082_v15  ;;  %v18774_v15 = vld [vmem:[#allocation2 + $0x28d8] sm:$0xf0]  ;;  %v19582_v4 = vadd.f32 %v10036_v27, %v10024_v57  ;;  %v16774_v6 = vor.u32 %v18718_v25, %v16773_v23  ;;  %v11987_v23 = vld [vmem:[#allocation2 + $0x1b4] sm:$0xf0]  ;;  %v16270_v57 = vor.u32 %v18592_v63, %v16269_v3  ;;  %v17679_v3 = vld [vmem:[#allocation2 + $0x6a4] sm:$0xf] }
 0x3db   :  { %10251 = vmatpush.bf16.msrb.mxu0 %v16382_v50  ;;  %v16297_v50 = vld [vmem:[#allocation2 + $0x2348] sm:$0xf]  ;;  %v16998_v53 = vor.u32 %v18774_v15, %v16997_v31  ;;  %v17574_v25 = vld [vmem:[#allocation2 + $0x35c] sm:$0xf]  ;;  %v12211_v27 = vld [vmem:[#allocation2 + $0x374] sm:$0xf0] }
 0x3dc   :  { %10264 = vmatpush.bf16.msrb.mxu1 %v16606_v51  ;;  %v16521_v51 = vld [vmem:[#allocation2 + $0x2508] sm:$0xf]  ;;  %v16298_v20 = vor.u32 %v18599_v14, %v16297_v50  ;;  %v17630_v31 = vld [vmem:[#allocation2 + $0x51c] sm:$0xf]  ;;  %v12435_v15 = vld [vmem:[#allocation2 + $0x534] sm:$0xf0]  ;;  %v16942_v50 = vor.u32 %v18760_v62, %v16941_v16  ;;  %v11990_v14 = vor.u32 %v17518_v17, %v11987_v23 }
 0x3dd   :  { %10277 = vmatpush.bf16.msrb.mxu2 %v16830_v11  ;;  %v10012_v11 = vpop.f32.mrf.mxu1  ;;  %v16522_v49 = vor.u32 %v18655_v54, %v16521_v51  ;;  %v12214_v51 = vor.u32 %v17574_v25, %v12211_v27  ;;  %v11959_v54 = vld [vmem:[#allocation2 + $0x17c] sm:$0xf0]  ;;  %v17616_v16 = vld [vmem:[#allocation2 + $0x4ac] sm:$0xf]  ;;  %v12379_v62 = vld [vmem:[#allocation2 + $0x4c4] sm:$0xf0] }
 0x3de   :  { %10290 = vmatpush.bf16.msrb.mxu3 %v17054_v1  ;;  %v18767_v1 = vld [vmem:[#allocation2 + $0x28a0] sm:$0xf0]  ;;  %v12438_v11 = vor.u32 %v17630_v31, %v12435_v15  ;;  %v12631_v63 = vld [vmem:[#allocation2 + $0x6bc] sm:$0xf0]  ;;  %v12603_v17 = vld [vmem:[#allocation2 + $0x684] sm:$0xf0] }
 0x3df   :  { %10252 = vmatpush.bf16.msrb.mxu0 %v16354_v41  ;;  %v18648_v41 = vld [vmem:[#allocation2 + $0x24e8] sm:$0xf0]  ;;  %v16970_v58 = vor.u32 %v18767_v1, %v16969_v0  ;;  %v12183_v0 = vld [vmem:[#allocation2 + $0x33c] sm:$0xf0]  ;;  %v17623_v1 = vld [vmem:[#allocation2 + $0x4e4] sm:$0xf] }
 0x3e0   :  { %10265 = vmatpush.bf16.msrb.mxu1 %v16578_v10  ;;  %v16717_v10 = vld [vmem:[#allocation2 + $0x2690] sm:$0xf]  ;;  %v17497_v27 = vld [vmem:[#allocation2 + $0xf4] sm:$0xf] }
 0x3e1   :  { %10278 = vmatpush.bf16.msrb.mxu2 %v16802_v46  ;;  %v10025_v46 = vpop.f32.mrf.mxu2  ;;  %v16718_v13 = vor.u32 %v18704_v48, %v16717_v10  ;;  %v11931_v10 = vld [vmem:[#allocation2 + $0x144] sm:$0xf0]  ;;  %v11903_v31 = vld [vmem:[#allocation2 + $0x10c] sm:$0xf0]  ;;  %v17553_v15 = vld [vmem:[#allocation2 + $0x2b4] sm:$0xf] }
 0x3e2   :  { %10291 = vmatpush.bf16.msrb.mxu3 %v17026_v56  ;;  %v10038_v56 = vpop.f32.mrf.mxu3  ;;  %v17560_v46 = vld [vmem:[#allocation2 + $0x2ec] sm:$0xf]  ;;  %v12155_v48 = vld [vmem:[#allocation2 + $0x304] sm:$0xf0] }
 0x3e3   :  { %10253 = vmatpush.bf16.msrb.mxu0 %v16326_v37  ;;  %v16494_v37 = vor.u32 %v18648_v41, %v16493_v9  ;;  %v17504_v41 = vld [vmem:[#allocation2 + $0x12c] sm:$0xf]  ;;  %v12158_v25 = vor.u32 %v17560_v46, %v12155_v48 }
 0x3e4   :  { %10266 = vmatpush.bf16.msrb.mxu1 %v16550_v45  ;;  %v17686_v45 = vld [vmem:[#allocation2 + $0x6dc] sm:$0xf]  ;;  %v17672_v56 = vld [vmem:[#allocation2 + $0x66c] sm:$0xf]  ;;  %v11934_v23 = vor.u32 %v17504_v41, %v11931_v10  ;;  %v12547_v41 = vld [vmem:[#allocation2 + $0x614] sm:$0xf0] }
 0x3e5   :  { %10279 = vmatpush.bf16.msrb.mxu2 %v16774_v6  ;;  %v12659_v6 = vld [vmem:[#allocation2 + $0x6f4] sm:$0xf0] }
 0x3e6   :  { %10292 = vmatpush.bf16.msrb.mxu3 %v16998_v53  ;;  %v17511_v53 = vld [vmem:[#allocation2 + $0x164] sm:$0xf]  ;;  %v12662_v61 = vor.u32 %v17686_v45, %v12659_v6  ;;  %v17609_v45 = vld [vmem:[#allocation2 + $0x474] sm:$0xf]  ;;  %v12351_v6 = vld [vmem:[#allocation2 + $0x48c] sm:$0xf0] }
 0x3e7   :  { %10254 = vmatpush.bf16.msrb.mxu0 %v16298_v20  ;;  %v12407_v20 = vld [vmem:[#allocation2 + $0x4fc] sm:$0xf0] }
 0x3e8   :  { %10267 = vmatpush.bf16.msrb.mxu1 %v16522_v49  ;;  %v11962_v49 = vor.u32 %v17511_v53, %v11959_v54  ;;  %v12410_v9 = vor.u32 %v17623_v1, %v12407_v20  ;;  %v12354_v54 = vor.u32 %v17609_v45, %v12351_v6 }
 0x3e9   :  { %10280 = vmatpush.bf16.msrb.mxu2 %v16746_v5  ;;  %v12186_v5 = vor.u32 %v17567_v55, %v12183_v0  ;;  %v17490_v55 = vld [vmem:[#allocation2 + $0xbc] sm:$0xf] }
 0x3ea   :  { %10293 = vmatpush.bf16.msrb.mxu3 %v16970_v58  ;;  %v12634_v58 = vor.u32 %v17679_v3, %v12631_v63  ;;  %v17546_v0 = vld [vmem:[#allocation2 + $0x27c] sm:$0xf]  ;;  %v12099_v63 = vld [vmem:[#allocation2 + $0x294] sm:$0xf0] }
 0x3eb   :  { %10255 = vmatpush.bf16.msrb.mxu0 %v16270_v57  ;;  %v12382_v57 = vor.u32 %v17616_v16, %v12379_v62  ;;  %v17483_v16 = vld [vmem:[#allocation2 + $0x84] sm:$0xf]  ;;  %v11847_v62 = vld [vmem:[#allocation2 + $0x9c] sm:$0xf0] }
 0x3ec   :  { %10268 = vmatpush.bf16.msrb.mxu1 %v16494_v37  ;;  %v12606_v37 = vor.u32 %v17672_v56, %v12603_v17  ;;  %v10062_v20 = vpop.f32.mrf.mxu1  ;;  %v17539_v56 = vld [vmem:[#allocation2 + $0x244] sm:$0xf] }
 0x3ed   :  { %10281 = vmatpush.bf16.msrb.mxu2 %v16718_v13  ;;  %v12127_v13 = vld [vmem:[#allocation2 + $0x2cc] sm:$0xf0] }
 0x3ee   :  { %10294 = vmatpush.bf16.msrb.mxu3 %v16942_v50  ;;  %10256 = vmatmul.bf16.vlgmr.msrb.gmra.mxu0 %v19413_v2  ;;  %v17665_v50 = vld [vmem:[#allocation2 + $0x634] sm:$0xf]  ;;  %v12130_v53 = vor.u32 %v17553_v15, %v12127_v13  ;;  %v17651_v15 = vld [vmem:[#allocation2 + $0x5c4] sm:$0xf]  ;;  %v11850_v13 = vor.u32 %v17483_v16, %v11847_v62  ;;  %v12239_v62 = vld [vmem:[#allocation2 + $0x3ac] sm:$0xf0] }
 0x3ef   :  { %10300 = vmatpush.bf16.msra.mxu0 %v11990_v14  ;;  %10269 = vmatmul.bf16.vlgmr.msrb.gmra.mxu1 %v19417_v8  ;;  %v12575_v14 = vld [vmem:[#allocation2 + $0x64c] sm:$0xf0] }
 0x3f0   :  { %10313 = vmatpush.bf16.msra.mxu1 %v12214_v51  ;;  %10282 = vmatmul.bf16.vlgmr.msrb.gmra.mxu2 %v19415_v7  ;;  %v11906_v51 = vor.u32 %v17497_v27, %v11903_v31  ;;  %v12578_v3 = vor.u32 %v17665_v50, %v12575_v14 }
 0x3f1   :  { %10326 = vmatpush.bf16.msra.mxu2 %v12438_v11  ;;  %10295 = vmatmul.bf16.vlgmr.msrb.gmra.mxu3 %v19419_v12  ;;  %v10049_v11 = vpop.f32.mrf.mxu0 }
 0x3f2   :  { %10339 = vmatpush.bf16.msra.mxu3 %v12662_v61  ;;  %v11875_v61 = vld [vmem:[#allocation2 + $0xd4] sm:$0xf0]  ;;  %v10050_v1 = vadd.f32 %v10049_v11, %v19582_v4  ;;  %v11819_v11 = vld [vmem:[#allocation2 + $0x64] sm:$0xf0] }
 0x3f3   :  { %10301 = vmatpush.bf16.msra.mxu0 %v11962_v49  ;;  %v17602_v49 = vld [vmem:[#allocation2 + $0x43c] sm:$0xf]  ;;  %v11878_v46 = vor.u32 %v17490_v55, %v11875_v61  ;;  %v10075_v17 = vpop.f32.mrf.mxu2  ;;  %v12043_v61 = vld [vmem:[#allocation2 + $0x224] sm:$0xf0] }
 0x3f4   :  { %10314 = vmatpush.bf16.msra.mxu1 %v12186_v5  ;;  %v12323_v5 = vld [vmem:[#allocation2 + $0x454] sm:$0xf0]  ;;  %v10063_v10 = vadd.f32 %v10062_v20, %v10050_v1  ;;  %v10088_v31 = vpop.f32.mrf.mxu3  ;;  %v12267_v1 = vld [vmem:[#allocation2 + $0x3e4] sm:$0xf0]  ;;  %v17644_v20 = vld [vmem:[#allocation2 + $0x58c] sm:$0xf] }
 0x3f5   :  { %10327 = vmatpush.bf16.msra.mxu2 %v12410_v9  ;;  %v17658_v9 = vld [vmem:[#allocation2 + $0x5fc] sm:$0xf]  ;;  %v12326_v48 = vor.u32 %v17602_v49, %v12323_v5  ;;  %v17469_v49 = vld [vmem:[#allocation2 + $0x14] sm:$0xf]  ;;  %v11791_v5 = vld [vmem:[#allocation2 + $0x2c] sm:$0xf0] }
 0x3f6   :  { %10340 = vmatpush.bf16.msra.mxu3 %v12634_v58  ;;  %v12102_v58 = vor.u32 %v17546_v0, %v12099_v63  ;;  %v12550_v4 = vor.u32 %v17658_v9, %v12547_v41  ;;  %v10076_v27 = vadd.f32 %v10075_v17, %v10063_v10  ;;  %v17588_v0 = vld [vmem:[#allocation2 + $0x3cc] sm:$0xf]  ;;  %v17525_v10 = vld [vmem:[#allocation2 + $0x1d4] sm:$0xf]  ;;  %v12463_v17 = vld [vmem:[#allocation2 + $0x56c] sm:$0xf0] }
 0x3f7   :  { %10302 = vmatpush.bf16.msra.mxu0 %v11934_v23  ;;  %v12071_v23 = vld [vmem:[#allocation2 + $0x25c] sm:$0xf0]  ;;  %v12270_v41 = vor.u32 %v17588_v0, %v12267_v1  ;;  %v17791_v0 = vld [vmem:[#allocation2 + $0xa24] sm:$0xf] }
 0x3f8   :  { %10315 = vmatpush.bf16.msra.mxu1 %v12158_v25  ;;  %v17595_v25 = vld [vmem:[#allocation2 + $0x404] sm:$0xf]  ;;  %v19589_v45 = vadd.f32 %v10088_v31, %v10076_v27  ;;  %v12074_v50 = vor.u32 %v17539_v56, %v12071_v23  ;;  %v17637_v56 = vld [vmem:[#allocation2 + $0x554] sm:$0xf]  ;;  %v17742_v23 = vld [vmem:[#allocation2 + $0x89c] sm:$0xf]  ;;  %v11794_v27 = vor.u32 %v17469_v49, %v11791_v5 }
 0x3f9   :  { %10328 = vmatpush.bf16.msra.mxu2 %v12382_v57  ;;  %v12295_v57 = vld [vmem:[#allocation2 + $0x41c] sm:$0xf0]  ;;  %v10051_v6 = vpop.f32.mrf.mxu0  ;;  %v13107_v31 = vld [vmem:[#allocation2 + $0xa74] sm:$0xf0]  ;;  %v17903_v49 = vld [vmem:[#allocation2 + $0xda4] sm:$0xf] }
 0x3fa   :  { %10341 = vmatpush.bf16.msra.mxu3 %v12606_v37  ;;  %v12519_v37 = vld [vmem:[#allocation2 + $0x5dc] sm:$0xf0]  ;;  %v12298_v14 = vor.u32 %v17595_v25, %v12295_v57  ;;  %v12883_v25 = vld [vmem:[#allocation2 + $0x8b4] sm:$0xf0]  ;;  %v17798_v57 = vld [vmem:[#allocation2 + $0xa5c] sm:$0xf] }
 0x3fb   :  { %10303 = vmatpush.bf16.msra.mxu0 %v11906_v51  ;;  %v17476_v51 = vld [vmem:[#allocation2 + $0x4c] sm:$0xf]  ;;  %v12522_v55 = vor.u32 %v17651_v15, %v12519_v37  ;;  %v17854_v15 = vld [vmem:[#allocation2 + $0xc1c] sm:$0xf]  ;;  %v13331_v37 = vld [vmem:[#allocation2 + $0xc34] sm:$0xf0] }
 0x3fc   :  { %10316 = vmatpush.bf16.msra.mxu1 %v12130_v53  ;;  %v17532_v53 = vld [vmem:[#allocation2 + $0x20c] sm:$0xf]  ;;  %v11822_v63 = vor.u32 %v17476_v51, %v11819_v11  ;;  %v12466_v51 = vor.u32 %v17637_v56, %v12463_v17  ;;  %v12886_v11 = vor.u32 %v17742_v23, %v12883_v25  ;;  %v13527_v5 = vld [vmem:[#allocation2 + $0xdbc] sm:$0xf0]  ;;  %v13275_v17 = vld [vmem:[#allocation2 + $0xbc4] sm:$0xf0] }
 0x3fd   :  { %10329 = vmatpush.bf16.msra.mxu2 %v12354_v54  ;;  %v10064_v54 = vpop.f32.mrf.mxu1  ;;  %v12046_v9 = vor.u32 %v17532_v53, %v12043_v61  ;;  %v13110_v53 = vor.u32 %v17798_v57, %v13107_v31  ;;  %v12855_v61 = vld [vmem:[#allocation2 + $0x87c] sm:$0xf0]  ;;  %v17840_v56 = vld [vmem:[#allocation2 + $0xbac] sm:$0xf]  ;;  %v13499_v23 = vld [vmem:[#allocation2 + $0xd84] sm:$0xf0] }
 0x3fe   :  { %10342 = vmatpush.bf16.msra.mxu3 %v12578_v3  ;;  %v12491_v3 = vld [vmem:[#allocation2 + $0x5a4] sm:$0xf0]  ;;  %v13334_v54 = vor.u32 %v17854_v15, %v13331_v37  ;;  %v17721_v31 = vld [vmem:[#allocation2 + $0x7f4] sm:$0xf]  ;;  %v12799_v15 = vld [vmem:[#allocation2 + $0x80c] sm:$0xf0] }
 0x3ff   :  { %10304 = vmatpush.bf16.msra.mxu0 %v11878_v46  ;;  %v12015_v46 = vld [vmem:[#allocation2 + $0x1ec] sm:$0xf0]  ;;  %v12494_v16 = vor.u32 %v17644_v20, %v12491_v3  ;;  %v13079_v20 = vld [vmem:[#allocation2 + $0xa3c] sm:$0xf0]  ;;  %v17847_v3 = vld [vmem:[#allocation2 + $0xbe4] sm:$0xf] }
 0x400   :  { %10317 = vmatpush.bf16.msra.mxu1 %v12102_v58  ;;  %v17581_v58 = vld [vmem:[#allocation2 + $0x394] sm:$0xf] }
 0x401   :  { %10330 = vmatpush.bf16.msra.mxu2 %v12326_v48  ;;  %v10077_v48 = vpop.f32.mrf.mxu2  ;;  %v12242_v6 = vor.u32 %v17581_v58, %v12239_v62  ;;  %v12827_v58 = vld [vmem:[#allocation2 + $0x844] sm:$0xf0]  ;;  %v17777_v37 = vld [vmem:[#allocation2 + $0x9b4] sm:$0xf] }
 0x402   :  { %10343 = vmatpush.bf16.msra.mxu3 %v12550_v4  ;;  %v10090_v4 = vpop.f32.mrf.mxu3  ;;  %v17784_v48 = vld [vmem:[#allocation2 + $0x9ec] sm:$0xf]  ;;  %v13051_v62 = vld [vmem:[#allocation2 + $0xa04] sm:$0xf0] }
 0x403   :  { %10305 = vmatpush.bf16.msra.mxu0 %v11850_v13  ;;  %v12018_v13 = vor.u32 %v17525_v10, %v12015_v46  ;;  %v17728_v46 = vld [vmem:[#allocation2 + $0x82c] sm:$0xf]  ;;  %v13054_v57 = vor.u32 %v17784_v48, %v13051_v62  ;;  %v17707_v62 = vld [vmem:[#allocation2 + $0x784] sm:$0xf] }
 0x404   :  { %10318 = vmatpush.bf16.msra.mxu1 %v12074_v50  ;;  %v17910_v50 = vld [vmem:[#allocation2 + $0xddc] sm:$0xf]  ;;  %v17896_v4 = vld [vmem:[#allocation2 + $0xd6c] sm:$0xf]  ;;  %v12830_v25 = vor.u32 %v17728_v46, %v12827_v58  ;;  %v13443_v58 = vld [vmem:[#allocation2 + $0xd14] sm:$0xf0] }
 0x405   :  { %10331 = vmatpush.bf16.msra.mxu2 %v12298_v14  ;;  %v13555_v14 = vld [vmem:[#allocation2 + $0xdf4] sm:$0xf0]  ;;  %v17882_v46 = vld [vmem:[#allocation2 + $0xcfc] sm:$0xf] }
 0x406   :  { %10344 = vmatpush.bf16.msra.mxu3 %v12522_v55  ;;  %v17735_v55 = vld [vmem:[#allocation2 + $0x864] sm:$0xf]  ;;  %v13558_v1 = vor.u32 %v17910_v50, %v13555_v14  ;;  %v17833_v50 = vld [vmem:[#allocation2 + $0xb74] sm:$0xf]  ;;  %v13247_v14 = vld [vmem:[#allocation2 + $0xb8c] sm:$0xf0] }
 0x407   :  { %10306 = vmatpush.bf16.msra.mxu0 %v11822_v63  ;;  %v13303_v63 = vld [vmem:[#allocation2 + $0xbfc] sm:$0xf0] }
 0x408   :  { %10319 = vmatpush.bf16.msra.mxu1 %v12046_v9  ;;  %v12858_v9 = vor.u32 %v17735_v55, %v12855_v61  ;;  %v13306_v10 = vor.u32 %v17847_v3, %v13303_v63  ;;  %v12802_v55 = vor.u32 %v17721_v31, %v12799_v15  ;;  %v12771_v3 = vld [vmem:[#allocation2 + $0x7d4] sm:$0xf0]  ;;  %v17770_v63 = vld [vmem:[#allocation2 + $0x97c] sm:$0xf] }
 0x409   :  { %10332 = vmatpush.bf16.msra.mxu2 %v12270_v41  ;;  %v13082_v41 = vor.u32 %v17791_v0, %v13079_v20  ;;  %v17714_v20 = vld [vmem:[#allocation2 + $0x7bc] sm:$0xf] }
 0x40a   :  { %10345 = vmatpush.bf16.msra.mxu3 %v12494_v16  ;;  %v13530_v16 = vor.u32 %v17903_v49, %v13527_v5  ;;  %v12774_v48 = vor.u32 %v17714_v20, %v12771_v3  ;;  %v17812_v20 = vld [vmem:[#allocation2 + $0xacc] sm:$0xf]  ;;  %v13163_v3 = vld [vmem:[#allocation2 + $0xae4] sm:$0xf0] }
 0x40b   :  { %10307 = vmatpush.bf16.msra.mxu0 %v11794_v27  ;;  %v13278_v27 = vor.u32 %v17840_v56, %v13275_v17  ;;  %v12743_v56 = vld [vmem:[#allocation2 + $0x79c] sm:$0xf0]  ;;  %v17763_v17 = vld [vmem:[#allocation2 + $0x944] sm:$0xf] }
 0x40c   :  { %10320 = vmatpush.bf16.msra.mxu1 %v12018_v13  ;;  %v13502_v13 = vor.u32 %v17896_v4, %v13499_v23  ;;  %v10114_v61 = vpop.f32.mrf.mxu1  ;;  %v13446_v4 = vor.u32 %v17882_v46, %v13443_v58  ;;  %v13166_v46 = vor.u32 %v17812_v20, %v13163_v3  ;;  %v17749_v58 = vld [vmem:[#allocation2 + $0x8d4] sm:$0xf]  ;;  %v18015_v20 = vld [vmem:[#allocation2 + $0x1124] sm:$0xf] }
 0x40d   :  { %10333 = vmatpush.bf16.msra.mxu2 %v12242_v6  ;;  %v13023_v6 = vld [vmem:[#allocation2 + $0x9cc] sm:$0xf0] }
 0x40e   :  { %10346 = vmatpush.bf16.msra.mxu3 %v12466_v51  ;;  %10308 = vmatmul.bf16.vlgmr.msra.gmra.mxu0 %v19311_v36  ;;  %v10101_v51 = vpop.f32.mrf.mxu0  ;;  %v13026_v0 = vor.u32 %v17777_v37, %v13023_v6  ;;  %v17875_v37 = vld [vmem:[#allocation2 + $0xcc4] sm:$0xf] }
 0x40f   :  { %10352 = vmatpush.bf16.msrb.mxu0 %v12886_v11  ;;  %10321 = vmatmul.bf16.vlgmr.msra.gmra.mxu1 %v19315_v43  ;;  %v17889_v11 = vld [vmem:[#allocation2 + $0xd34] sm:$0xf] }
 0x410   :  { %10365 = vmatpush.bf16.msrb.mxu1 %v13110_v53  ;;  %10334 = vmatmul.bf16.vlgmr.msra.gmra.mxu2 %v19309_v35  ;;  %v13471_v53 = vld [vmem:[#allocation2 + $0xd4c] sm:$0xf0] }
 0x411   :  { %10378 = vmatpush.bf16.msrb.mxu2 %v13334_v54  ;;  %10347 = vmatmul.bf16.vlgmr.msra.gmra.mxu3 %v19313_v42  ;;  %v10102_v54 = vadd.f32 %v10101_v51, %v19589_v45  ;;  %v13474_v49 = vor.u32 %v17889_v11, %v13471_v53 }
 0x412   :  { %10391 = vmatpush.bf16.msrb.mxu3 %v13558_v1  ;;  %v13250_v1 = vor.u32 %v17833_v50, %v13247_v14  ;;  %v12746_v50 = vor.u32 %v17707_v62, %v12743_v56  ;;  %v13135_v62 = vld [vmem:[#allocation2 + $0xaac] sm:$0xf0]  ;;  %v17861_v56 = vld [vmem:[#allocation2 + $0xc54] sm:$0xf] }
 0x413   :  { %10353 = vmatpush.bf16.msrb.mxu0 %v12858_v9  ;;  %v10115_v5 = vadd.f32 %v10114_v61, %v10102_v54  ;;  %v12995_v9 = vld [vmem:[#allocation2 + $0x994] sm:$0xf0]  ;;  %v10127_v23 = vpop.f32.mrf.mxu2  ;;  %v17700_v54 = vld [vmem:[#allocation2 + $0x74c] sm:$0xf] }
 0x414   :  { %10366 = vmatpush.bf16.msrb.mxu1 %v13082_v41  ;;  %v17826_v41 = vld [vmem:[#allocation2 + $0xb3c] sm:$0xf]  ;;  %v12998_v45 = vor.u32 %v17770_v63, %v12995_v9  ;;  %v10140_v15 = vpop.f32.mrf.mxu3  ;;  %v10116_v14 = vpop.f32.mrf.mxu1  ;;  %v17756_v61 = vld [vmem:[#allocation2 + $0x90c] sm:$0xf]  ;;  %v17693_v9 = vld [vmem:[#allocation2 + $0x714] sm:$0xf] }
 0x415   :  { %10379 = vmatpush.bf16.msrb.mxu2 %v13306_v10  ;;  %v13219_v10 = vld [vmem:[#allocation2 + $0xb54] sm:$0xf0]  ;;  %v10128_v31 = vadd.f32 %v10127_v23, %v10115_v5  ;;  %v17868_v63 = vld [vmem:[#allocation2 + $0xc8c] sm:$0xf]  ;;  %v17966_v23 = vld [vmem:[#allocation2 + $0xf9c] sm:$0xf] }
 0x416   :  { %10392 = vmatpush.bf16.msrb.mxu3 %v13530_v16  ;;  %v13222_v16 = vor.u32 %v17826_v41, %v13219_v10  ;;  %v10103_v6 = vpop.f32.mrf.mxu0  ;;  %v12687_v41 = vld [vmem:[#allocation2 + $0x72c] sm:$0xf0]  ;;  %v18134_v14 = vld [vmem:[#allocation2 + $0x14dc] sm:$0xf] }
 0x417   :  { %10354 = vmatpush.bf16.msrb.mxu0 %v12830_v25  ;;  %v12967_v25 = vld [vmem:[#allocation2 + $0x95c] sm:$0xf0]  ;;  %v19596_v51 = vadd.f32 %v10140_v15, %v10128_v31  ;;  %v12690_v31 = vor.u32 %v17693_v9, %v12687_v41  ;;  %v14003_v15 = vld [vmem:[#allocation2 + $0x1174] sm:$0xf0]  ;;  %v18127_v9 = vld [vmem:[#allocation2 + $0x14a4] sm:$0xf] }
 0x418   :  { %10367 = vmatpush.bf16.msrb.mxu1 %v13054_v57  ;;  %v17819_v57 = vld [vmem:[#allocation2 + $0xb04] sm:$0xf]  ;;  %v12970_v11 = vor.u32 %v17763_v17, %v12967_v25  ;;  %v13359_v17 = vld [vmem:[#allocation2 + $0xc6c] sm:$0xf0]  ;;  %v13779_v25 = vld [vmem:[#allocation2 + $0xfb4] sm:$0xf0] }
 0x419   :  { %10380 = vmatpush.bf16.msrb.mxu2 %v13278_v27  ;;  %v13191_v27 = vld [vmem:[#allocation2 + $0xb1c] sm:$0xf0] }
 0x41a   :  { %10393 = vmatpush.bf16.msrb.mxu3 %v13502_v13  ;;  %v13415_v13 = vld [vmem:[#allocation2 + $0xcdc] sm:$0xf0]  ;;  %v13194_v53 = vor.u32 %v17819_v57, %v13191_v27  ;;  %v18022_v57 = vld [vmem:[#allocation2 + $0x115c] sm:$0xf] }
 0x41b   :  { %10355 = vmatpush.bf16.msrb.mxu0 %v12802_v55  ;;  %v12715_v55 = vld [vmem:[#allocation2 + $0x764] sm:$0xf0]  ;;  %v14423_v41 = vld [vmem:[#allocation2 + $0x14bc] sm:$0xf0] }
 0x41c   :  { %10368 = vmatpush.bf16.msrb.mxu1 %v13026_v0  ;;  %v13418_v0 = vor.u32 %v17875_v37, %v13415_v13  ;;  %v12718_v5 = vor.u32 %v17700_v54, %v12715_v55  ;;  %v10142_v27 = vpop.f32.mrf.mxu3  ;;  %v18078_v37 = vld [vmem:[#allocation2 + $0x131c] sm:$0xf]  ;;  %v14227_v13 = vld [vmem:[#allocation2 + $0x1334] sm:$0xf0]  ;;  %v13782_v54 = vor.u32 %v17966_v23, %v13779_v25  ;;  %v14006_v55 = vor.u32 %v18022_v57, %v14003_v15  ;;  %v18120_v23 = vld [vmem:[#allocation2 + $0x146c] sm:$0xf] }
 0x41d   :  { %10381 = vmatpush.bf16.msrb.mxu2 %v13250_v1  ;;  %v12939_v1 = vld [vmem:[#allocation2 + $0x924] sm:$0xf0]  ;;  %v17945_v15 = vld [vmem:[#allocation2 + $0xef4] sm:$0xf] }
 0x41e   :  { %10394 = vmatpush.bf16.msrb.mxu3 %v13474_v49  ;;  %v13387_v49 = vld [vmem:[#allocation2 + $0xca4] sm:$0xf0]  ;;  %v12942_v10 = vor.u32 %v17756_v61, %v12939_v1  ;;  %v14230_v61 = vor.u32 %v18078_v37, %v14227_v13  ;;  %v13751_v1 = vld [vmem:[#allocation2 + $0xf7c] sm:$0xf0]  ;;  %v13695_v37 = vld [vmem:[#allocation2 + $0xf0c] sm:$0xf0] }
 0x41f   :  { %10356 = vmatpush.bf16.msrb.mxu0 %v12774_v48  ;;  %v12911_v48 = vld [vmem:[#allocation2 + $0x8ec] sm:$0xf0]  ;;  %v14395_v25 = vld [vmem:[#allocation2 + $0x1484] sm:$0xf0]  ;;  %v18001_v13 = vld [vmem:[#allocation2 + $0x10b4] sm:$0xf] }
 0x420   :  { %10369 = vmatpush.bf16.msrb.mxu1 %v12998_v45  ;;  %v17805_v45 = vld [vmem:[#allocation2 + $0xa94] sm:$0xf]  ;;  %v12914_v6 = vor.u32 %v17749_v58, %v12911_v48  ;;  %v17952_v48 = vld [vmem:[#allocation2 + $0xf2c] sm:$0xf] }
 0x421   :  { %10382 = vmatpush.bf16.msrb.mxu2 %v13222_v16  ;;  %v13390_v16 = vor.u32 %v17868_v63, %v13387_v49  ;;  %v13975_v63 = vld [vmem:[#allocation2 + $0x113c] sm:$0xf0]  ;;  %v18071_v49 = vld [vmem:[#allocation2 + $0x12e4] sm:$0xf] }
 0x422   :  { %10395 = vmatpush.bf16.msrb.mxu3 %v13446_v4  ;;  %v10129_v4 = vpop.f32.mrf.mxu2 }
 0x423   :  { %10357 = vmatpush.bf16.msrb.mxu0 %v12746_v50  ;;  %v13138_v50 = vor.u32 %v17805_v45, %v13135_v62  ;;  %v13723_v45 = vld [vmem:[#allocation2 + $0xf44] sm:$0xf0]  ;;  %v14426_v62 = vor.u32 %v18127_v9, %v14423_v41 }
 0x424   :  { %10370 = vmatpush.bf16.msrb.mxu1 %v12970_v11  ;;  %v14451_v11 = vld [vmem:[#allocation2 + $0x14f4] sm:$0xf0]  ;;  %v14171_v4 = vld [vmem:[#allocation2 + $0x12c4] sm:$0xf0]  ;;  %v13726_v57 = vor.u32 %v17952_v48, %v13723_v45  ;;  %v18106_v48 = vld [vmem:[#allocation2 + $0x13fc] sm:$0xf] }
 0x425   :  { %10383 = vmatpush.bf16.msrb.mxu2 %v13194_v53  ;;  %v13362_v53 = vor.u32 %v17861_v56, %v13359_v17  ;;  %v14454_v3 = vor.u32 %v18134_v14, %v14451_v11  ;;  %v13947_v56 = vld [vmem:[#allocation2 + $0x1104] sm:$0xf0]  ;;  %v18064_v17 = vld [vmem:[#allocation2 + $0x12ac] sm:$0xf]  ;;  %v18057_v14 = vld [vmem:[#allocation2 + $0x1274] sm:$0xf] }
 0x426   :  { %10396 = vmatpush.bf16.msrb.mxu3 %v13418_v0  ;;  %v17959_v0 = vld [vmem:[#allocation2 + $0xf64] sm:$0xf]  ;;  %v14143_v11 = vld [vmem:[#allocation2 + $0x128c] sm:$0xf0]  ;;  %v14339_v45 = vld [vmem:[#allocation2 + $0x1414] sm:$0xf0] }
 0x427   :  { %10358 = vmatpush.bf16.msrb.mxu0 %v12718_v5  ;;  %v14199_v5 = vld [vmem:[#allocation2 + $0x12fc] sm:$0xf0] }
 0x428   :  { %10371 = vmatpush.bf16.msrb.mxu1 %v12942_v10  ;;  %v13754_v10 = vor.u32 %v17959_v0, %v13751_v1  ;;  %v14202_v58 = vor.u32 %v18071_v49, %v14199_v5  ;;  %v13698_v0 = vor.u32 %v17945_v15, %v13695_v37  ;;  %v13667_v49 = vld [vmem:[#allocation2 + $0xed4] sm:$0xf0]  ;;  %v17994_v5 = vld [vmem:[#allocation2 + $0x107c] sm:$0xf] }
 0x429   :  { %10384 = vmatpush.bf16.msrb.mxu2 %v13166_v46  ;;  %v13978_v46 = vor.u32 %v18015_v20, %v13975_v63  ;;  %v17938_v63 = vld [vmem:[#allocation2 + $0xebc] sm:$0xf] }
 0x42a   :  { %10397 = vmatpush.bf16.msrb.mxu3 %v13390_v16  ;;  %v18008_v16 = vld [vmem:[#allocation2 + $0x10ec] sm:$0xf] }
 0x42b   :  { %10359 = vmatpush.bf16.msrb.mxu0 %v12690_v31  ;;  %v13950_v27 = vor.u32 %v18008_v16, %v13947_v56  ;;  %v14174_v31 = vor.u32 %v18064_v17, %v14171_v4  ;;  %v13670_v16 = vor.u32 %v17938_v63, %v13667_v49  ;;  %v17931_v56 = vld [vmem:[#allocation2 + $0xe84] sm:$0xf]  ;;  %v13639_v17 = vld [vmem:[#allocation2 + $0xe9c] sm:$0xf0]  ;;  %v18036_v63 = vld [vmem:[#allocation2 + $0x11cc] sm:$0xf] }
 0x42c   :  { %10372 = vmatpush.bf16.msrb.mxu1 %v12914_v6  ;;  %v14398_v6 = vor.u32 %v18120_v23, %v14395_v25  ;;  %v10166_v1 = vpop.f32.mrf.mxu1  ;;  %v17987_v4 = vld [vmem:[#allocation2 + $0x1044] sm:$0xf]  ;;  %v14342_v23 = vor.u32 %v18106_v48, %v14339_v45  ;;  %v14059_v49 = vld [vmem:[#allocation2 + $0x11e4] sm:$0xf0]  ;;  %v17973_v45 = vld [vmem:[#allocation2 + $0xfd4] sm:$0xf] }
 0x42d   :  { %10385 = vmatpush.bf16.msrb.mxu2 %v13138_v50  ;;  %v13919_v50 = vld [vmem:[#allocation2 + $0x10cc] sm:$0xf0]  ;;  %v14062_v48 = vor.u32 %v18036_v63, %v14059_v49  ;;  %v18239_v63 = vld [vmem:[#allocation2 + $0x1824] sm:$0xf] }
 0x42e   :  { %10398 = vmatpush.bf16.msrb.mxu3 %v13362_v53  ;;  %10360 = vmatmul.bf16.vlgmr.msrb.gmra.mxu0 %v19329_v39  ;;  %v10153_v53 = vpop.f32.mrf.mxu0  ;;  %v13922_v20 = vor.u32 %v18001_v13, %v13919_v50  ;;  %v18099_v13 = vld [vmem:[#allocation2 + $0x13c4] sm:$0xf] }
 0x42f   :  { %10404 = vmatpush.bf16.msra.mxu0 %v13782_v54  ;;  %10373 = vmatmul.bf16.vlgmr.msrb.gmra.mxu1 %v19333_v44  ;;  %v18113_v54 = vld [vmem:[#allocation2 + $0x1434] sm:$0xf] }
 0x430   :  { %10417 = vmatpush.bf16.msra.mxu1 %v14006_v55  ;;  %10386 = vmatmul.bf16.vlgmr.msrb.gmra.mxu2 %v19327_v34  ;;  %v14367_v55 = vld [vmem:[#allocation2 + $0x144c] sm:$0xf0] }
 0x431   :  { %10430 = vmatpush.bf16.msra.mxu2 %v14230_v61  ;;  %10399 = vmatmul.bf16.vlgmr.msrb.gmra.mxu3 %v19331_v40  ;;  %v10154_v61 = vadd.f32 %v10153_v53, %v19596_v51  ;;  %v14370_v9 = vor.u32 %v18113_v54, %v14367_v55 }
 0x432   :  { %10443 = vmatpush.bf16.msra.mxu3 %v14454_v3  ;;  %v14146_v3 = vor.u32 %v18057_v14, %v14143_v11  ;;  %v13642_v14 = vor.u32 %v17931_v56, %v13639_v17  ;;  %v14031_v56 = vld [vmem:[#allocation2 + $0x11ac] sm:$0xf0]  ;;  %v18085_v17 = vld [vmem:[#allocation2 + $0x1354] sm:$0xf] }
 0x433   :  { %10405 = vmatpush.bf16.msra.mxu0 %v13754_v10  ;;  %v10167_v41 = vadd.f32 %v10166_v1, %v10154_v61  ;;  %v13891_v10 = vld [vmem:[#allocation2 + $0x1094] sm:$0xf0]  ;;  %v10179_v25 = vpop.f32.mrf.mxu2  ;;  %v17924_v61 = vld [vmem:[#allocation2 + $0xe4c] sm:$0xf] }
 0x434   :  { %10418 = vmatpush.bf16.msra.mxu1 %v13978_v46  ;;  %v18050_v46 = vld [vmem:[#allocation2 + $0x123c] sm:$0xf]  ;;  %v13894_v51 = vor.u32 %v17994_v5, %v13891_v10  ;;  %v10192_v37 = vpop.f32.mrf.mxu3  ;;  %v10168_v11 = vpop.f32.mrf.mxu1  ;;  %v17980_v1 = vld [vmem:[#allocation2 + $0x100c] sm:$0xf]  ;;  %v17917_v10 = vld [vmem:[#allocation2 + $0xe14] sm:$0xf] }
 0x435   :  { %10431 = vmatpush.bf16.msra.mxu2 %v14202_v58  ;;  %v14115_v58 = vld [vmem:[#allocation2 + $0x1254] sm:$0xf0]  ;;  %v10180_v15 = vadd.f32 %v10179_v25, %v10167_v41  ;;  %v18092_v5 = vld [vmem:[#allocation2 + $0x138c] sm:$0xf]  ;;  %v18190_v25 = vld [vmem:[#allocation2 + $0x169c] sm:$0xf] }
 0x436   :  { %10444 = vmatpush.bf16.msra.mxu3 %v14426_v62  ;;  %v14118_v62 = vor.u32 %v18050_v46, %v14115_v58  ;;  %v10155_v50 = vpop.f32.mrf.mxu0  ;;  %v13583_v46 = vld [vmem:[#allocation2 + $0xe2c] sm:$0xf0]  ;;  %v18358_v11 = vld [vmem:[#allocation2 + $0x1bdc] sm:$0xf] }
 0x437   :  { %10406 = vmatpush.bf16.msra.mxu0 %v13726_v57  ;;  %v13863_v57 = vld [vmem:[#allocation2 + $0x105c] sm:$0xf0]  ;;  %v19603_v53 = vadd.f32 %v10192_v37, %v10180_v15  ;;  %v13586_v15 = vor.u32 %v17917_v10, %v13583_v46  ;;  %v14899_v37 = vld [vmem:[#allocation2 + $0x1874] sm:$0xf0]  ;;  %v18351_v10 = vld [vmem:[#allocation2 + $0x1ba4] sm:$0xf] }
 0x438   :  { %10419 = vmatpush.bf16.msra.mxu1 %v13950_v27  ;;  %v18043_v27 = vld [vmem:[#allocation2 + $0x1204] sm:$0xf]  ;;  %v13866_v54 = vor.u32 %v17987_v4, %v13863_v57  ;;  %v14255_v4 = vld [vmem:[#allocation2 + $0x136c] sm:$0xf0]  ;;  %v14675_v57 = vld [vmem:[#allocation2 + $0x16b4] sm:$0xf0] }
 0x439   :  { %10432 = vmatpush.bf16.msra.mxu2 %v14174_v31  ;;  %v14087_v31 = vld [vmem:[#allocation2 + $0x121c] sm:$0xf0] }
 0x43a   :  { %10445 = vmatpush.bf16.msra.mxu3 %v14398_v6  ;;  %v14311_v6 = vld [vmem:[#allocation2 + $0x13dc] sm:$0xf0]  ;;  %v14090_v55 = vor.u32 %v18043_v27, %v14087_v31  ;;  %v18246_v27 = vld [vmem:[#allocation2 + $0x185c] sm:$0xf] }
 0x43b   :  { %10407 = vmatpush.bf16.msra.mxu0 %v13698_v0  ;;  %v13611_v0 = vld [vmem:[#allocation2 + $0xe64] sm:$0xf0]  ;;  %v15319_v46 = vld [vmem:[#allocation2 + $0x1bbc] sm:$0xf0] }
 0x43c   :  { %10420 = vmatpush.bf16.msra.mxu1 %v13922_v20  ;;  %v14314_v20 = vor.u32 %v18099_v13, %v14311_v6  ;;  %v13614_v41 = vor.u32 %v17924_v61, %v13611_v0  ;;  %v10194_v31 = vpop.f32.mrf.mxu3  ;;  %v18302_v13 = vld [vmem:[#allocation2 + $0x1a1c] sm:$0xf]  ;;  %v15123_v6 = vld [vmem:[#allocation2 + $0x1a34] sm:$0xf0]  ;;  %v14678_v61 = vor.u32 %v18190_v25, %v14675_v57  ;;  %v14902_v0 = vor.u32 %v18246_v27, %v14899_v37  ;;  %v18344_v25 = vld [vmem:[#allocation2 + $0x1b6c] sm:$0xf] }
 0x43d   :  { %10433 = vmatpush.bf16.msra.mxu2 %v14146_v3  ;;  %v13835_v3 = vld [vmem:[#allocation2 + $0x1024] sm:$0xf0]  ;;  %v18169_v37 = vld [vmem:[#allocation2 + $0x15f4] sm:$0xf] }
 0x43e   :  { %10446 = vmatpush.bf16.msra.mxu3 %v14370_v9  ;;  %v14283_v9 = vld [vmem:[#allocation2 + $0x13a4] sm:$0xf0]  ;;  %v13838_v58 = vor.u32 %v17980_v1, %v13835_v3  ;;  %v15126_v1 = vor.u32 %v18302_v13, %v15123_v6  ;;  %v14647_v3 = vld [vmem:[#allocation2 + $0x167c] sm:$0xf0]  ;;  %v14591_v13 = vld [vmem:[#allocation2 + $0x160c] sm:$0xf0] }
 0x43f   :  { %10408 = vmatpush.bf16.msra.mxu0 %v13670_v16  ;;  %v13807_v16 = vld [vmem:[#allocation2 + $0xfec] sm:$0xf0]  ;;  %v15291_v57 = vld [vmem:[#allocation2 + $0x1b84] sm:$0xf0]  ;;  %v18225_v6 = vld [vmem:[#allocation2 + $0x17b4] sm:$0xf] }
 0x440   :  { %10421 = vmatpush.bf16.msra.mxu1 %v13894_v51  ;;  %v18029_v51 = vld [vmem:[#allocation2 + $0x1194] sm:$0xf]  ;;  %v13810_v50 = vor.u32 %v17973_v45, %v13807_v16  ;;  %v18176_v16 = vld [vmem:[#allocation2 + $0x162c] sm:$0xf] }
 0x441   :  { %10434 = vmatpush.bf16.msra.mxu2 %v14118_v62  ;;  %v14286_v62 = vor.u32 %v18092_v5, %v14283_v9  ;;  %v14871_v5 = vld [vmem:[#allocation2 + $0x183c] sm:$0xf0]  ;;  %v18295_v9 = vld [vmem:[#allocation2 + $0x19e4] sm:$0xf] }
 0x442   :  { %10447 = vmatpush.bf16.msra.mxu3 %v14342_v23  ;;  %v10181_v23 = vpop.f32.mrf.mxu2 }
 0x443   :  { %10409 = vmatpush.bf16.msra.mxu0 %v13642_v14  ;;  %v14034_v14 = vor.u32 %v18029_v51, %v14031_v56  ;;  %v14619_v51 = vld [vmem:[#allocation2 + $0x1644] sm:$0xf0]  ;;  %v15322_v56 = vor.u32 %v18351_v10, %v15319_v46 }
 0x444   :  { %10422 = vmatpush.bf16.msra.mxu1 %v13866_v54  ;;  %v15347_v54 = vld [vmem:[#allocation2 + $0x1bf4] sm:$0xf0]  ;;  %v15067_v23 = vld [vmem:[#allocation2 + $0x19c4] sm:$0xf0]  ;;  %v14622_v27 = vor.u32 %v18176_v16, %v14619_v51  ;;  %v18330_v16 = vld [vmem:[#allocation2 + $0x1afc] sm:$0xf] }
 0x445   :  { %10435 = vmatpush.bf16.msra.mxu2 %v14090_v55  ;;  %v14258_v55 = vor.u32 %v18085_v17, %v14255_v4  ;;  %v15350_v49 = vor.u32 %v18358_v11, %v15347_v54  ;;  %v14843_v17 = vld [vmem:[#allocation2 + $0x1804] sm:$0xf0]  ;;  %v18288_v4 = vld [vmem:[#allocation2 + $0x19ac] sm:$0xf]  ;;  %v18281_v11 = vld [vmem:[#allocation2 + $0x1974] sm:$0xf] }
 0x446   :  { %10448 = vmatpush.bf16.msra.mxu3 %v14314_v20  ;;  %v18183_v20 = vld [vmem:[#allocation2 + $0x1664] sm:$0xf]  ;;  %v15039_v54 = vld [vmem:[#allocation2 + $0x198c] sm:$0xf0]  ;;  %v15235_v51 = vld [vmem:[#allocation2 + $0x1b14] sm:$0xf0] }
 0x447   :  { %10410 = vmatpush.bf16.msra.mxu0 %v13614_v41  ;;  %v15095_v41 = vld [vmem:[#allocation2 + $0x19fc] sm:$0xf0] }
 0x448   :  { %10423 = vmatpush.bf16.msra.mxu1 %v13838_v58  ;;  %v14650_v58 = vor.u32 %v18183_v20, %v14647_v3  ;;  %v15098_v45 = vor.u32 %v18295_v9, %v15095_v41  ;;  %v14594_v20 = vor.u32 %v18169_v37, %v14591_v13  ;;  %v14563_v9 = vld [vmem:[#allocation2 + $0x15d4] sm:$0xf0]  ;;  %v18218_v41 = vld [vmem:[#allocation2 + $0x177c] sm:$0xf] }
 0x449   :  { %10436 = vmatpush.bf16.msra.mxu2 %v14062_v48  ;;  %v14874_v48 = vor.u32 %v18239_v63, %v14871_v5  ;;  %v18162_v5 = vld [vmem:[#allocation2 + $0x15bc] sm:$0xf] }
 0x44a   :  { %10449 = vmatpush.bf16.msra.mxu3 %v14286_v62  ;;  %v18232_v62 = vld [vmem:[#allocation2 + $0x17ec] sm:$0xf] }
 0x44b   :  { %10411 = vmatpush.bf16.msra.mxu0 %v13586_v15  ;;  %v14846_v31 = vor.u32 %v18232_v62, %v14843_v17  ;;  %v15070_v15 = vor.u32 %v18288_v4, %v15067_v23  ;;  %v14566_v62 = vor.u32 %v18162_v5, %v14563_v9  ;;  %v18155_v17 = vld [vmem:[#allocation2 + $0x1584] sm:$0xf]  ;;  %v14535_v4 = vld [vmem:[#allocation2 + $0x159c] sm:$0xf0]  ;;  %v18260_v5 = vld [vmem:[#allocation2 + $0x18cc] sm:$0xf] }
 0x44c   :  { %10424 = vmatpush.bf16.msra.mxu1 %v13810_v50  ;;  %v15294_v50 = vor.u32 %v18344_v25, %v15291_v57  ;;  %v10218_v3 = vpop.f32.mrf.mxu1  ;;  %v18211_v23 = vld [vmem:[#allocation2 + $0x1744] sm:$0xf]  ;;  %v15238_v25 = vor.u32 %v18330_v16, %v15235_v51  ;;  %v14955_v9 = vld [vmem:[#allocation2 + $0x18e4] sm:$0xf0]  ;;  %v18197_v51 = vld [vmem:[#allocation2 + $0x16d4] sm:$0xf] }
 0x44d   :  { %10437 = vmatpush.bf16.msra.mxu2 %v14034_v14  ;;  %v14815_v14 = vld [vmem:[#allocation2 + $0x17cc] sm:$0xf0]  ;;  %v14958_v16 = vor.u32 %v18260_v5, %v14955_v9  ;;  %v18463_v5 = vld [vmem:[#allocation2 + $0x1f24] sm:$0xf] }
 0x44e   :  { %10450 = vmatpush.bf16.msra.mxu3 %v14258_v55  ;;  %10412 = vmatmul.bf16.vlgmr.msra.gmra.mxu0 %v19352_v24  ;;  %v10205_v55 = vpop.f32.mrf.mxu0  ;;  %v14818_v63 = vor.u32 %v18225_v6, %v14815_v14  ;;  %v18323_v6 = vld [vmem:[#allocation2 + $0x1ac4] sm:$0xf] }
 0x44f   :  { %10456 = vmatpush.bf16.msrb.mxu0 %v14678_v61  ;;  %10425 = vmatmul.bf16.vlgmr.msra.gmra.mxu1 %v19360_v29  ;;  %v18337_v61 = vld [vmem:[#allocation2 + $0x1b34] sm:$0xf] }
 0x450   :  { %10469 = vmatpush.bf16.msrb.mxu1 %v14902_v0  ;;  %10438 = vmatmul.bf16.vlgmr.msra.gmra.mxu2 %v19356_v28  ;;  %v15263_v0 = vld [vmem:[#allocation2 + $0x1b4c] sm:$0xf0] }
 0x451   :  { %10482 = vmatpush.bf16.msrb.mxu2 %v15126_v1  ;;  %10451 = vmatmul.bf16.vlgmr.msra.gmra.mxu3 %v19364_v18  ;;  %v10206_v1 = vadd.f32 %v10205_v55, %v19603_v53  ;;  %v15266_v10 = vor.u32 %v18337_v61, %v15263_v0 }
 0x452   :  { %10495 = vmatpush.bf16.msrb.mxu3 %v15350_v49  ;;  %v15042_v49 = vor.u32 %v18281_v11, %v15039_v54  ;;  %v14538_v11 = vor.u32 %v18155_v17, %v14535_v4  ;;  %v14927_v17 = vld [vmem:[#allocation2 + $0x18ac] sm:$0xf0]  ;;  %v18309_v4 = vld [vmem:[#allocation2 + $0x1a54] sm:$0xf] }
 0x453   :  { %10457 = vmatpush.bf16.msrb.mxu0 %v14650_v58  ;;  %v10219_v46 = vadd.f32 %v10218_v3, %v10206_v1  ;;  %v14787_v58 = vld [vmem:[#allocation2 + $0x1794] sm:$0xf0]  ;;  %v10231_v57 = vpop.f32.mrf.mxu2  ;;  %v18148_v1 = vld [vmem:[#allocation2 + $0x154c] sm:$0xf] }
 0x454   :  { %10470 = vmatpush.bf16.msrb.mxu1 %v14874_v48  ;;  %v18274_v48 = vld [vmem:[#allocation2 + $0x193c] sm:$0xf]  ;;  %v14790_v53 = vor.u32 %v18218_v41, %v14787_v58  ;;  %v10244_v13 = vpop.f32.mrf.mxu3  ;;  %v10220_v54 = vpop.f32.mrf.mxu1  ;;  %v18204_v3 = vld [vmem:[#allocation2 + $0x170c] sm:$0xf]  ;;  %v18141_v58 = vld [vmem:[#allocation2 + $0x1514] sm:$0xf] }
 0x455   :  { %10483 = vmatpush.bf16.msrb.mxu2 %v15098_v45  ;;  %v15011_v45 = vld [vmem:[#allocation2 + $0x1954] sm:$0xf0]  ;;  %v10232_v37 = vadd.f32 %v10231_v57, %v10219_v46  ;;  %v18316_v41 = vld [vmem:[#allocation2 + $0x1a8c] sm:$0xf]  ;;  %v18414_v57 = vld [vmem:[#allocation2 + $0x1d9c] sm:$0xf] }
 0x456   :  { %10496 = vmatpush.bf16.msrb.mxu3 %v15322_v56  ;;  %v15014_v56 = vor.u32 %v18274_v48, %v15011_v45  ;;  %v10207_v14 = vpop.f32.mrf.mxu0  ;;  %v14479_v48 = vld [vmem:[#allocation2 + $0x152c] sm:$0xf0]  ;;  %v18582_v54 = vld [vmem:[#allocation2 + $0x22dc] sm:$0xf] }
 0x457   :  { %10458 = vmatpush.bf16.msrb.mxu0 %v14622_v27  ;;  %v14759_v27 = vld [vmem:[#allocation2 + $0x175c] sm:$0xf0]  ;;  %v19610_v55 = vadd.f32 %v10244_v13, %v10232_v37  ;;  %v14482_v37 = vor.u32 %v18141_v58, %v14479_v48  ;;  %v15795_v13 = vld [vmem:[#allocation2 + $0x1f74] sm:$0xf0]  ;;  %v18575_v58 = vld [vmem:[#allocation2 + $0x22a4] sm:$0xf] }
 0x458   :  { %10471 = vmatpush.bf16.msrb.mxu1 %v14846_v31  ;;  %v18267_v31 = vld [vmem:[#allocation2 + $0x1904] sm:$0xf]  ;;  %v14762_v61 = vor.u32 %v18211_v23, %v14759_v27  ;;  %v15151_v23 = vld [vmem:[#allocation2 + $0x1a6c] sm:$0xf0]  ;;  %v15571_v27 = vld [vmem:[#allocation2 + $0x1db4] sm:$0xf0] }
 0x459   :  { %10484 = vmatpush.bf16.msrb.mxu2 %v15070_v15  ;;  %v14983_v15 = vld [vmem:[#allocation2 + $0x191c] sm:$0xf0] }
 0x45a   :  { %10497 = vmatpush.bf16.msrb.mxu3 %v15294_v50  ;;  %v15207_v50 = vld [vmem:[#allocation2 + $0x1adc] sm:$0xf0]  ;;  %v14986_v0 = vor.u32 %v18267_v31, %v14983_v15  ;;  %v18470_v31 = vld [vmem:[#allocation2 + $0x1f5c] sm:$0xf] }
 0x45b   :  { %10459 = vmatpush.bf16.msrb.mxu0 %v14594_v20  ;;  %v14507_v20 = vld [vmem:[#allocation2 + $0x1564] sm:$0xf0]  ;;  %v16215_v48 = vld [vmem:[#allocation2 + $0x22bc] sm:$0xf0] }
 0x45c   :  { %10472 = vmatpush.bf16.msrb.mxu1 %v14818_v63  ;;  %v15210_v63 = vor.u32 %v18323_v6, %v15207_v50  ;;  %v14510_v46 = vor.u32 %v18148_v1, %v14507_v20  ;;  %v10246_v15 = vpop.f32.mrf.mxu3  ;;  %v18526_v6 = vld [vmem:[#allocation2 + $0x211c] sm:$0xf]  ;;  %v16019_v50 = vld [vmem:[#allocation2 + $0x2134] sm:$0xf0]  ;;  %v15574_v1 = vor.u32 %v18414_v57, %v15571_v27  ;;  %v15798_v20 = vor.u32 %v18470_v31, %v15795_v13  ;;  %v18568_v57 = vld [vmem:[#allocation2 + $0x226c] sm:$0xf] }
 0x45d   :  { %10485 = vmatpush.bf16.msrb.mxu2 %v15042_v49  ;;  %v14731_v49 = vld [vmem:[#allocation2 + $0x1724] sm:$0xf0]  ;;  %v18393_v13 = vld [vmem:[#allocation2 + $0x1cf4] sm:$0xf] }
 0x45e   :  { %10498 = vmatpush.bf16.msrb.mxu3 %v15266_v10  ;;  %v15179_v10 = vld [vmem:[#allocation2 + $0x1aa4] sm:$0xf0]  ;;  %v14734_v45 = vor.u32 %v18204_v3, %v14731_v49  ;;  %v16022_v3 = vor.u32 %v18526_v6, %v16019_v50  ;;  %v15543_v49 = vld [vmem:[#allocation2 + $0x1d7c] sm:$0xf0]  ;;  %v15487_v6 = vld [vmem:[#allocation2 + $0x1d0c] sm:$0xf0] }
 0x45f   :  { %10460 = vmatpush.bf16.msrb.mxu0 %v14566_v62  ;;  %v14703_v62 = vld [vmem:[#allocation2 + $0x16ec] sm:$0xf0]  ;;  %v16187_v27 = vld [vmem:[#allocation2 + $0x2284] sm:$0xf0]  ;;  %v18449_v50 = vld [vmem:[#allocation2 + $0x1eb4] sm:$0xf] }
 0x460   :  { %10473 = vmatpush.bf16.msrb.mxu1 %v14790_v53  ;;  %v18253_v53 = vld [vmem:[#allocation2 + $0x1894] sm:$0xf]  ;;  %v14706_v14 = vor.u32 %v18197_v51, %v14703_v62  ;;  %v18400_v62 = vld [vmem:[#allocation2 + $0x1d2c] sm:$0xf] }
 0x461   :  { %10486 = vmatpush.bf16.msrb.mxu2 %v15014_v56  ;;  %v15182_v56 = vor.u32 %v18316_v41, %v15179_v10  ;;  %v15767_v41 = vld [vmem:[#allocation2 + $0x1f3c] sm:$0xf0]  ;;  %v18519_v10 = vld [vmem:[#allocation2 + $0x20e4] sm:$0xf] }
 0x462   :  { %10499 = vmatpush.bf16.msrb.mxu3 %v15238_v25  ;;  %v10233_v25 = vpop.f32.mrf.mxu2 }
 0x463   :  { %10461 = vmatpush.bf16.msrb.mxu0 %v14538_v11  ;;  %v14930_v11 = vor.u32 %v18253_v53, %v14927_v17  ;;  %v15515_v53 = vld [vmem:[#allocation2 + $0x1d44] sm:$0xf0]  ;;  %v16218_v17 = vor.u32 %v18575_v58, %v16215_v48 }
 0x464   :  { %10474 = vmatpush.bf16.msrb.mxu1 %v14762_v61  ;;  %v16243_v61 = vld [vmem:[#allocation2 + $0x22f4] sm:$0xf0]  ;;  %v15963_v25 = vld [vmem:[#allocation2 + $0x20c4] sm:$0xf0]  ;;  %v15518_v31 = vor.u32 %v18400_v62, %v15515_v53  ;;  %v18554_v62 = vld [vmem:[#allocation2 + $0x21fc] sm:$0xf] }
 0x465   :  { %10487 = vmatpush.bf16.msrb.mxu2 %v14986_v0  ;;  %v15154_v0 = vor.u32 %v18309_v4, %v15151_v23  ;;  %v16246_v9 = vor.u32 %v18582_v54, %v16243_v61  ;;  %v15739_v4 = vld [vmem:[#allocation2 + $0x1f04] sm:$0xf0]  ;;  %v18512_v23 = vld [vmem:[#allocation2 + $0x20ac] sm:$0xf]  ;;  %v18505_v54 = vld [vmem:[#allocation2 + $0x2074] sm:$0xf] }
 0x466   :  { %10500 = vmatpush.bf16.msrb.mxu3 %v15210_v63  ;;  %v18407_v63 = vld [vmem:[#allocation2 + $0x1d64] sm:$0xf]  ;;  %v15935_v61 = vld [vmem:[#allocation2 + $0x208c] sm:$0xf0]  ;;  %v16131_v53 = vld [vmem:[#allocation2 + $0x2214] sm:$0xf0] }
 0x467   :  { %10462 = vmatpush.bf16.msrb.mxu0 %v14510_v46  ;;  %v15991_v46 = vld [vmem:[#allocation2 + $0x20fc] sm:$0xf0] }
 0x468   :  { %10475 = vmatpush.bf16.msrb.mxu1 %v14734_v45  ;;  %v15546_v45 = vor.u32 %v18407_v63, %v15543_v49  ;;  %v15994_v51 = vor.u32 %v18519_v10, %v15991_v46  ;;  %v15490_v63 = vor.u32 %v18393_v13, %v15487_v6  ;;  %v15459_v10 = vld [vmem:[#allocation2 + $0x1cd4] sm:$0xf0]  ;;  %v18442_v46 = vld [vmem:[#allocation2 + $0x1e7c] sm:$0xf] }
 0x469   :  { %10488 = vmatpush.bf16.msrb.mxu2 %v14958_v16  ;;  %v15770_v16 = vor.u32 %v18463_v5, %v15767_v41  ;;  %v18386_v41 = vld [vmem:[#allocation2 + $0x1cbc] sm:$0xf] }
 0x46a   :  { %10501 = vmatpush.bf16.msrb.mxu3 %v15182_v56  ;;  %v18456_v56 = vld [vmem:[#allocation2 + $0x1eec] sm:$0xf] }
 0x46b   :  { %10463 = vmatpush.bf16.msrb.mxu0 %v14482_v37  ;;  %v15742_v15 = vor.u32 %v18456_v56, %v15739_v4  ;;  %v15966_v37 = vor.u32 %v18512_v23, %v15963_v25  ;;  %v15462_v56 = vor.u32 %v18386_v41, %v15459_v10  ;;  %v18379_v4 = vld [vmem:[#allocation2 + $0x1c84] sm:$0xf]  ;;  %v15431_v23 = vld [vmem:[#allocation2 + $0x1c9c] sm:$0xf0]  ;;  %v18484_v41 = vld [vmem:[#allocation2 + $0x1fcc] sm:$0xf] }
 0x46c   :  { %10476 = vmatpush.bf16.msrb.mxu1 %v14706_v14  ;;  %v16190_v14 = vor.u32 %v18568_v57, %v16187_v27  ;;  %v10270_v49 = vpop.f32.mrf.mxu1  ;;  %v18435_v25 = vld [vmem:[#allocation2 + $0x1e44] sm:$0xf]  ;;  %v16134_v57 = vor.u32 %v18554_v62, %v16131_v53  ;;  %v15851_v10 = vld [vmem:[#allocation2 + $0x1fe4] sm:$0xf0]  ;;  %v18421_v53 = vld [vmem:[#allocation2 + $0x1dd4] sm:$0xf] }
 0x46d   :  { %10489 = vmatpush.bf16.msrb.mxu2 %v14930_v11  ;;  %v15711_v11 = vld [vmem:[#allocation2 + $0x1ecc] sm:$0xf0]  ;;  %v15854_v62 = vor.u32 %v18484_v41, %v15851_v10  ;;  %v18687_v41 = vld [vmem:[#allocation2 + $0x2624] sm:$0xf] }
 0x46e   :  { %10502 = vmatpush.bf16.msrb.mxu3 %v15154_v0  ;;  %10464 = vmatmul.bf16.vlgmr.msrb.gmra.mxu0 %v19383_v26  ;;  %v10257_v0 = vpop.f32.mrf.mxu0  ;;  %v15714_v5 = vor.u32 %v18449_v50, %v15711_v11  ;;  %v18547_v50 = vld [vmem:[#allocation2 + $0x21c4] sm:$0xf] }
 0x46f   :  { %10508 = vmatpush.bf16.msra.mxu0 %v15574_v1  ;;  %10477 = vmatmul.bf16.vlgmr.msrb.gmra.mxu1 %v19391_v33  ;;  %v18561_v1 = vld [vmem:[#allocation2 + $0x2234] sm:$0xf] }
 0x470   :  { %10521 = vmatpush.bf16.msra.mxu1 %v15798_v20  ;;  %10490 = vmatmul.bf16.vlgmr.msrb.gmra.mxu2 %v19387_v32  ;;  %v16159_v20 = vld [vmem:[#allocation2 + $0x224c] sm:$0xf0] }
 0x471   :  { %10534 = vmatpush.bf16.msra.mxu2 %v16022_v3  ;;  %10503 = vmatmul.bf16.vlgmr.msrb.gmra.mxu3 %v19395_v59  ;;  %v10258_v3 = vadd.f32 %v10257_v0, %v19610_v55  ;;  %v16162_v58 = vor.u32 %v18561_v1, %v16159_v20 }
 0x472   :  { %10547 = vmatpush.bf16.msra.mxu3 %v16246_v9  ;;  %v15938_v9 = vor.u32 %v18505_v54, %v15935_v61  ;;  %v15434_v54 = vor.u32 %v18379_v4, %v15431_v23  ;;  %v15823_v4 = vld [vmem:[#allocation2 + $0x1fac] sm:$0xf0]  ;;  %v18533_v23 = vld [vmem:[#allocation2 + $0x2154] sm:$0xf] }
 0x473   :  { %10509 = vmatpush.bf16.msra.mxu0 %v15546_v45  ;;  %v10271_v48 = vadd.f32 %v10270_v49, %v10258_v3  ;;  %v15683_v45 = vld [vmem:[#allocation2 + $0x1e94] sm:$0xf0]  ;;  %v10283_v27 = vpop.f32.mrf.mxu2  ;;  %v18372_v3 = vld [vmem:[#allocation2 + $0x1c4c] sm:$0xf] }
 0x474   :  { %10522 = vmatpush.bf16.msra.mxu1 %v15770_v16  ;;  %v18498_v16 = vld [vmem:[#allocation2 + $0x203c] sm:$0xf]  ;;  %v15686_v55 = vor.u32 %v18442_v46, %v15683_v45  ;;  %v10296_v6 = vpop.f32.mrf.mxu3  ;;  %v10272_v61 = vpop.f32.mrf.mxu1  ;;  %v18428_v49 = vld [vmem:[#allocation2 + $0x1e0c] sm:$0xf]  ;;  %v18365_v45 = vld [vmem:[#allocation2 + $0x1c14] sm:$0xf] }
 0x475   :  { %10535 = vmatpush.bf16.msra.mxu2 %v15994_v51  ;;  %v15907_v51 = vld [vmem:[#allocation2 + $0x2054] sm:$0xf0]  ;;  %v10284_v13 = vadd.f32 %v10283_v27, %v10271_v48  ;;  %v18540_v46 = vld [vmem:[#allocation2 + $0x218c] sm:$0xf]  ;;  %v18638_v27 = vld [vmem:[#allocation2 + $0x249c] sm:$0xf] }
 0x476   :  { %10548 = vmatpush.bf16.msra.mxu3 %v16218_v17  ;;  %v15910_v17 = vor.u32 %v18498_v16, %v15907_v51  ;;  %v10259_v11 = vpop.f32.mrf.mxu0  ;;  %v15375_v16 = vld [vmem:[#allocation2 + $0x1c2c] sm:$0xf0]  ;;  %v18806_v61 = vld [vmem:[#allocation2 + $0x29dc] sm:$0xf] }
 0x477   :  { %10510 = vmatpush.bf16.msra.mxu0 %v15518_v31  ;;  %v15655_v31 = vld [vmem:[#allocation2 + $0x1e5c] sm:$0xf0]  ;;  %v19617_v0 = vadd.f32 %v10296_v6, %v10284_v13  ;;  %v15378_v13 = vor.u32 %v18365_v45, %v15375_v16  ;;  %v16691_v6 = vld [vmem:[#allocation2 + $0x2674] sm:$0xf0]  ;;  %v18799_v45 = vld [vmem:[#allocation2 + $0x29a4] sm:$0xf] }
 0x478   :  { %10523 = vmatpush.bf16.msra.mxu1 %v15742_v15  ;;  %v18491_v15 = vld [vmem:[#allocation2 + $0x2004] sm:$0xf]  ;;  %v15658_v1 = vor.u32 %v18435_v25, %v15655_v31  ;;  %v16047_v25 = vld [vmem:[#allocation2 + $0x216c] sm:$0xf0]  ;;  %v16467_v31 = vld [vmem:[#allocation2 + $0x24b4] sm:$0xf0] }
 0x479   :  { %10536 = vmatpush.bf16.msra.mxu2 %v15966_v37  ;;  %v15879_v37 = vld [vmem:[#allocation2 + $0x201c] sm:$0xf0] }
 0x47a   :  { %10549 = vmatpush.bf16.msra.mxu3 %v16190_v14  ;;  %v16103_v14 = vld [vmem:[#allocation2 + $0x21dc] sm:$0xf0]  ;;  %v15882_v20 = vor.u32 %v18491_v15, %v15879_v37  ;;  %v18694_v15 = vld [vmem:[#allocation2 + $0x265c] sm:$0xf] }
 0x47b   :  { %10511 = vmatpush.bf16.msra.mxu0 %v15490_v63  ;;  %v15403_v63 = vld [vmem:[#allocation2 + $0x1c64] sm:$0xf0]  ;;  %v17111_v16 = vld [vmem:[#allocation2 + $0x29bc] sm:$0xf0] }
 0x47c   :  { %10524 = vmatpush.bf16.msra.mxu1 %v15714_v5  ;;  %v16106_v5 = vor.u32 %v18547_v50, %v16103_v14  ;;  %v15406_v48 = vor.u32 %v18372_v3, %v15403_v63  ;;  %v10298_v37 = vpop.f32.mrf.mxu3  ;;  %v18750_v50 = vld [vmem:[#allocation2 + $0x281c] sm:$0xf]  ;;  %v16915_v14 = vld [vmem:[#allocation2 + $0x2834] sm:$0xf0]  ;;  %v16470_v3 = vor.u32 %v18638_v27, %v16467_v31  ;;  %v16694_v63 = vor.u32 %v18694_v15, %v16691_v6  ;;  %v18792_v27 = vld [vmem:[#allocation2 + $0x296c] sm:$0xf] }
 0x47d   :  { %10537 = vmatpush.bf16.msra.mxu2 %v15938_v9  ;;  %v15627_v9 = vld [vmem:[#allocation2 + $0x1e24] sm:$0xf0]  ;;  %v18617_v37 = vld [vmem:[#allocation2 + $0x23f4] sm:$0xf] }
 0x47e   :  { %10550 = vmatpush.bf16.msra.mxu3 %v16162_v58  ;;  %v16075_v58 = vld [vmem:[#allocation2 + $0x21a4] sm:$0xf0]  ;;  %v15630_v51 = vor.u32 %v18428_v49, %v15627_v9  ;;  %v16918_v49 = vor.u32 %v18750_v50, %v16915_v14  ;;  %v16439_v9 = vld [vmem:[#allocation2 + $0x247c] sm:$0xf0]  ;;  %v16383_v50 = vld [vmem:[#allocation2 + $0x240c] sm:$0xf0] }
 0x47f   :  { %10512 = vmatpush.bf16.msra.mxu0 %v15462_v56  ;;  %v15599_v56 = vld [vmem:[#allocation2 + $0x1dec] sm:$0xf0]  ;;  %v17083_v31 = vld [vmem:[#allocation2 + $0x2984] sm:$0xf0]  ;;  %v18673_v14 = vld [vmem:[#allocation2 + $0x25b4] sm:$0xf] }
 0x480   :  { %10525 = vmatpush.bf16.msra.mxu1 %v15686_v55  ;;  %v18477_v55 = vld [vmem:[#allocation2 + $0x1f94] sm:$0xf]  ;;  %v15602_v11 = vor.u32 %v18421_v53, %v15599_v56  ;;  %v18624_v56 = vld [vmem:[#allocation2 + $0x242c] sm:$0xf] }
 0x481   :  { %10538 = vmatpush.bf16.msra.mxu2 %v15910_v17  ;;  %v16078_v17 = vor.u32 %v18540_v46, %v16075_v58  ;;  %v16663_v46 = vld [vmem:[#allocation2 + $0x263c] sm:$0xf0]  ;;  %v18743_v58 = vld [vmem:[#allocation2 + $0x27e4] sm:$0xf] }
 0x482   :  { %10551 = vmatpush.bf16.msra.mxu3 %v16134_v57  ;;  %v10285_v57 = vpop.f32.mrf.mxu2 }
 0x483   :  { %10513 = vmatpush.bf16.msra.mxu0 %v15434_v54  ;;  %v15826_v54 = vor.u32 %v18477_v55, %v15823_v4  ;;  %v16411_v55 = vld [vmem:[#allocation2 + $0x2444] sm:$0xf0]  ;;  %v17114_v4 = vor.u32 %v18799_v45, %v17111_v16 }
 0x484   :  { %10526 = vmatpush.bf16.msra.mxu1 %v15658_v1  ;;  %v17139_v1 = vld [vmem:[#allocation2 + $0x29f4] sm:$0xf0]  ;;  %v16859_v57 = vld [vmem:[#allocation2 + $0x27c4] sm:$0xf0]  ;;  %v16414_v15 = vor.u32 %v18624_v56, %v16411_v55  ;;  %v18778_v55 = vld [vmem:[#allocation2 + $0x28fc] sm:$0xf] }
 0x485   :  { %10539 = vmatpush.bf16.msra.mxu2 %v15882_v20  ;;  %v16050_v20 = vor.u32 %v18533_v23, %v16047_v25  ;;  %v17142_v10 = vor.u32 %v18806_v61, %v17139_v1  ;;  %v16635_v23 = vld [vmem:[#allocation2 + $0x2604] sm:$0xf0]  ;;  %v18736_v25 = vld [vmem:[#allocation2 + $0x27ac] sm:$0xf]  ;;  %v17086_v61 = vor.u32 %v18792_v27, %v17083_v31  ;;  %v16607_v1 = vld [vmem:[#allocation2 + $0x25cc] sm:$0xf0] }
 0x486   :  { %10552 = vmatpush.bf16.msra.mxu3 %v16106_v5  ;;  %v18631_v5 = vld [vmem:[#allocation2 + $0x2464] sm:$0xf]  ;;  %v16862_v6 = vor.u32 %v18736_v25, %v16859_v57  ;;  %v16803_v56 = vld [vmem:[#allocation2 + $0x2754] sm:$0xf0]  ;;  %v16327_v31 = vld [vmem:[#allocation2 + $0x239c] sm:$0xf0] }
 0x487   :  { %10514 = vmatpush.bf16.msra.mxu0 %v15406_v48  ;;  %v16887_v48 = vld [vmem:[#allocation2 + $0x27fc] sm:$0xf0]  ;;  %v18603_v27 = vld [vmem:[#allocation2 + $0x2384] sm:$0xf] }
 0x488   :  { %10527 = vmatpush.bf16.msra.mxu1 %v15630_v51  ;;  %v16442_v51 = vor.u32 %v18631_v5, %v16439_v9  ;;  %v16890_v53 = vor.u32 %v18743_v58, %v16887_v48  ;;  %v16386_v5 = vor.u32 %v18617_v37, %v16383_v50  ;;  %v16355_v58 = vld [vmem:[#allocation2 + $0x23d4] sm:$0xf0]  ;;  %v18666_v48 = vld [vmem:[#allocation2 + $0x257c] sm:$0xf]  ;;  %v18715_v50 = vld [vmem:[#allocation2 + $0x2704] sm:$0xf] }
 0x489   :  { %10540 = vmatpush.bf16.msra.mxu2 %v15854_v62  ;;  %v16666_v62 = vor.u32 %v18687_v41, %v16663_v46  ;;  %v16610_v41 = vor.u32 %v18673_v14, %v16607_v1  ;;  %v18610_v46 = vld [vmem:[#allocation2 + $0x23bc] sm:$0xf]  ;;  %v16775_v14 = vld [vmem:[#allocation2 + $0x271c] sm:$0xf0] }
 0x48a   :  { %10553 = vmatpush.bf16.msra.mxu3 %v16078_v17  ;;  %v18680_v17 = vld [vmem:[#allocation2 + $0x25ec] sm:$0xf]  ;;  %v16999_v1 = vld [vmem:[#allocation2 + $0x28dc] sm:$0xf0] }
 0x48b   :  { %10515 = vmatpush.bf16.msra.mxu0 %v15378_v13  ;;  %v16638_v13 = vor.u32 %v18680_v17, %v16635_v23  ;;  %v10309_v9 = vpop.f32.mrf.mxu0  ;;  %v17027_v17 = vld [vmem:[#allocation2 + $0x2914] sm:$0xf0]  ;;  %v16358_v23 = vor.u32 %v18610_v46, %v16355_v58 }
 0x48c   :  { %10528 = vmatpush.bf16.msra.mxu1 %v15602_v11  ;;  %v18918_v11 = vld [vmem:[#allocation5] sm:$0xff]  ;;  %v10322_v16 = vpop.f32.mrf.mxu1 }
 0x48d   :  { %10541 = vmatpush.bf16.msra.mxu2 %v15826_v54  ;;  %v1819_v54 = vperm.slane %v18918_v11, 5 }
 0x48e   :  { %10554 = vmatpush.bf16.msra.mxu3 %v16050_v20  ;;  %10516 = vmatmul.bf16.vlgmr.msra.gmra.mxu0 %v19401_v38  ;;  %v18729_v20 = vld [vmem:[#allocation2 + $0x2774] sm:$0xf] }
 0x48f   :  { %10560 = vmatpush.bf16.msrb.mxu0 %v16470_v3  ;;  %10529 = vmatmul.bf16.vlgmr.msra.gmra.mxu1 %v19405_v60  ;;  %v16831_v3 = vld [vmem:[#allocation2 + $0x278c] sm:$0xf0]  ;;  %v10310_v45 = vadd.f32 %v10309_v9, %v1819_v54  ;;  %v18596_v9 = vld [vmem:[#allocation2 + $0x234c] sm:$0xf] }
 0x490   :  { %10573 = vmatpush.bf16.msrb.mxu1 %v16694_v63  ;;  %10542 = vmatmul.bf16.vlgmr.msra.gmra.mxu2 %v19403_v21  ;;  %v18785_v63 = vld [vmem:[#allocation2 + $0x2934] sm:$0xf] }
 0x491   :  { %10586 = vmatpush.bf16.msrb.mxu2 %v16918_v49  ;;  %10555 = vmatmul.bf16.vlgmr.msra.gmra.mxu3 %v19407_v47  ;;  %v17055_v49 = vld [vmem:[#allocation2 + $0x294c] sm:$0xf0] }
 0x492   :  { %10599 = vmatpush.bf16.msrb.mxu3 %v17142_v10  ;;  %v16834_v10 = vor.u32 %v18729_v20, %v16831_v3  ;;  %v16330_v20 = vor.u32 %v18603_v27, %v16327_v31 }
 0x493   :  { %10561 = vmatpush.bf16.msrb.mxu0 %v16442_v51  ;;  %v17058_v51 = vor.u32 %v18785_v63, %v17055_v49  ;;  %v10335_v37 = vpop.f32.mrf.mxu2  ;;  %v10311_v63 = vpop.f32.mrf.mxu0 }
 0x494   :  { %10574 = vmatpush.bf16.msrb.mxu1 %v16666_v62  ;;  %v16579_v62 = vld [vmem:[#allocation2 + $0x2594] sm:$0xf0]  ;;  %v10348_v54 = vpop.f32.mrf.mxu3  ;;  %v10324_v46 = vpop.f32.mrf.mxu1 }
 0x495   :  { %10587 = vmatpush.bf16.msrb.mxu2 %v16890_v53  ;;  %v18722_v53 = vld [vmem:[#allocation2 + $0x273c] sm:$0xf]  ;;  %v16582_v25 = vor.u32 %v18666_v48, %v16579_v62  ;;  %v16523_v48 = vld [vmem:[#allocation2 + $0x2524] sm:$0xf0] }
 0x496   :  { %10600 = vmatpush.bf16.msrb.mxu3 %v17114_v4  ;;  %v10323_v4 = vadd.f32 %v10322_v16, %v10310_v45  ;;  %v16806_v57 = vor.u32 %v18722_v53, %v16803_v56  ;;  %v18708_v45 = vld [vmem:[#allocation2 + $0x26cc] sm:$0xf]  ;;  %v16747_v16 = vld [vmem:[#allocation2 + $0x26e4] sm:$0xf0]  ;;  %v18589_v56 = vld [vmem:[#allocation2 + $0x2314] sm:$0xf] }
 0x497   :  { %10562 = vmatpush.bf16.msrb.mxu0 %v16414_v15  ;;  %v18659_v15 = vld [vmem:[#allocation2 + $0x2544] sm:$0xf]  ;;  %v16971_v62 = vld [vmem:[#allocation2 + $0x28a4] sm:$0xf0] }
 0x498   :  { %10575 = vmatpush.bf16.msrb.mxu1 %v16638_v13  ;;  %v17030_v13 = vor.u32 %v18778_v55, %v17027_v17  ;;  %v10336_v11 = vadd.f32 %v10335_v37, %v10323_v4  ;;  %v16271_v55 = vld [vmem:[#allocation2 + $0x232c] sm:$0xf0]  ;;  %v16750_v4 = vor.u32 %v18708_v45, %v16747_v16  ;;  %v18757_v37 = vld [vmem:[#allocation2 + $0x2854] sm:$0xf]  ;;  %v17515_v45 = vld [vmem:[#allocation2 + $0x180] sm:$0xf0] }
 0x499   :  { %10588 = vmatpush.bf16.msrb.mxu2 %v16862_v6  ;;  %v16551_v6 = vld [vmem:[#allocation2 + $0x255c] sm:$0xf0]  ;;  %v12189_v16 = vld [vmem:[#allocation2 + $0x328] sm:$0xf] }
 0x49a   :  { %10601 = vmatpush.bf16.msrb.mxu3 %v17086_v61  ;;  %v18771_v61 = vld [vmem:[#allocation2 + $0x28c4] sm:$0xf]  ;;  %v19623_v3 = vadd.f32 %v10348_v54, %v10336_v11  ;;  %v16554_v49 = vor.u32 %v18659_v15, %v16551_v6  ;;  %v16719_v15 = vld [vmem:[#allocation2 + $0x26ac] sm:$0xf0]  ;;  %v12217_v11 = vld [vmem:[#allocation2 + $0x360] sm:$0xf]  ;;  %v16274_v54 = vor.u32 %v18589_v56, %v16271_v55 }
 0x49b   :  { %10563 = vmatpush.bf16.msrb.mxu0 %v16386_v5  ;;  %v16778_v5 = vor.u32 %v18715_v50, %v16775_v14  ;;  %v17002_v58 = vor.u32 %v18771_v61, %v16999_v1  ;;  %v10337_v27 = vpop.f32.mrf.mxu2  ;;  %v11993_v50 = vld [vmem:[#allocation2 + $0x1a0] sm:$0xf]  ;;  %v17522_v14 = vld [vmem:[#allocation2 + $0x1b8] sm:$0xf0]  ;;  %v17627_v56 = vld [vmem:[#allocation2 + $0x500] sm:$0xf0] }
 0x49c   :  { %10576 = vmatpush.bf16.msrb.mxu1 %v16610_v41  ;;  %v16299_v41 = vld [vmem:[#allocation2 + $0x2364] sm:$0xf0]  ;;  %v10350_v6 = vpop.f32.mrf.mxu3  ;;  %v17578_v61 = vld [vmem:[#allocation2 + $0x378] sm:$0xf0]  ;;  %v12441_v1 = vld [vmem:[#allocation2 + $0x520] sm:$0xf] }
 0x49d   :  { %10589 = vmatpush.bf16.msrb.mxu2 %v16834_v10  ;;  %v18652_v10 = vld [vmem:[#allocation2 + $0x250c] sm:$0xf]  ;;  %v16302_v53 = vor.u32 %v18596_v9, %v16299_v41  ;;  %v17690_v9 = vld [vmem:[#allocation2 + $0x6f8] sm:$0xf0]  ;;  %v12218_v46 = vor.u32 %v17578_v61, %v12217_v11  ;;  %v12637_v55 = vld [vmem:[#allocation2 + $0x6a8] sm:$0xf] }
 0x49e   :  { %10602 = vmatpush.bf16.msrb.mxu3 %v17058_v51  ;;  %v18764_v51 = vld [vmem:[#allocation2 + $0x288c] sm:$0xf]  ;;  %v16526_v17 = vor.u32 %v18652_v10, %v16523_v48  ;;  %v11994_v10 = vor.u32 %v17522_v14, %v11993_v50  ;;  %v11965_v48 = vld [vmem:[#allocation2 + $0x168] sm:$0xf]  ;;  %v12609_v50 = vld [vmem:[#allocation2 + $0x670] sm:$0xf] }
 0x49f   :  { %10564 = vmatpush.bf16.msrb.mxu0 %v16358_v23  ;;  %v18645_v23 = vld [vmem:[#allocation2 + $0x24d4] sm:$0xf]  ;;  %v16974_v31 = vor.u32 %v18764_v51, %v16971_v62  ;;  %v17571_v62 = vld [vmem:[#allocation2 + $0x340] sm:$0xf0]  ;;  %v17508_v27 = vld [vmem:[#allocation2 + $0x148] sm:$0xf0] }
 0x4a0   :  { %10577 = vmatpush.bf16.msrb.mxu1 %v16582_v25  ;;  %v16495_v25 = vld [vmem:[#allocation2 + $0x24ec] sm:$0xf0]  ;;  %v17620_v6 = vld [vmem:[#allocation2 + $0x4c8] sm:$0xf0] }
 0x4a1   :  { %10590 = vmatpush.bf16.msrb.mxu2 %v16806_v57  ;;  %v18701_v57 = vld [vmem:[#allocation2 + $0x2694] sm:$0xf]  ;;  %v16498_v63 = vor.u32 %v18645_v23, %v16495_v25  ;;  %v12190_v23 = vor.u32 %v17571_v62, %v12189_v16  ;;  %v17676_v14 = vld [vmem:[#allocation2 + $0x688] sm:$0xf0]  ;;  %v17494_v62 = vld [vmem:[#allocation2 + $0xd8] sm:$0xf0] }
 0x4a2   :  { %10603 = vmatpush.bf16.msrb.mxu3 %v17030_v13  ;;  %v16943_v13 = vld [vmem:[#allocation2 + $0x286c] sm:$0xf0] }
 0x4a3   :  { %10565 = vmatpush.bf16.msrb.mxu0 %v16330_v20  ;;  %v17634_v20 = vld [vmem:[#allocation2 + $0x538] sm:$0xf0]  ;;  %v16946_v41 = vor.u32 %v18757_v37, %v16943_v13  ;;  %v17564_v37 = vld [vmem:[#allocation2 + $0x308] sm:$0xf0]  ;;  %v12385_v13 = vld [vmem:[#allocation2 + $0x4b0] sm:$0xf] }
 0x4a4   :  { %10578 = vmatpush.bf16.msrb.mxu1 %v16554_v49  ;;  %v16722_v49 = vor.u32 %v18701_v57, %v16719_v15  ;;  %v11937_v57 = vld [vmem:[#allocation2 + $0x130] sm:$0xf]  ;;  %v12386_v61 = vor.u32 %v17620_v6, %v12385_v13  ;;  %v11853_v6 = vld [vmem:[#allocation2 + $0x88] sm:$0xf] }
 0x4a5   :  { %10591 = vmatpush.bf16.msrb.mxu2 %v16778_v5  ;;  %v12665_v5 = vld [vmem:[#allocation2 + $0x6e0] sm:$0xf]  ;;  %v11938_v11 = vor.u32 %v17508_v27, %v11937_v57  ;;  %v17662_v27 = vld [vmem:[#allocation2 + $0x618] sm:$0xf0] }
 0x4a6   :  { %10604 = vmatpush.bf16.msrb.mxu3 %v17002_v58  ;;  %v12442_v58 = vor.u32 %v17634_v20, %v12441_v1  ;;  %v12666_v51 = vor.u32 %v17690_v9, %v12665_v5  ;;  %v11909_v1 = vld [vmem:[#allocation2 + $0xf8] sm:$0xf]  ;;  %v17501_v20 = vld [vmem:[#allocation2 + $0x110] sm:$0xf0]  ;;  %v12553_v57 = vld [vmem:[#allocation2 + $0x600] sm:$0xf] }
 0x4a7   :  { %10566 = vmatpush.bf16.msrb.mxu0 %v16302_v53  ;;  %v12413_v53 = vld [vmem:[#allocation2 + $0x4e8] sm:$0xf]  ;;  %v17557_v5 = vld [vmem:[#allocation2 + $0x2d0] sm:$0xf0]  ;;  %v12357_v9 = vld [vmem:[#allocation2 + $0x478] sm:$0xf] }
 0x4a8   :  { %10579 = vmatpush.bf16.msrb.mxu1 %v16526_v17  ;;  %v17683_v17 = vld [vmem:[#allocation2 + $0x6c0] sm:$0xf0]  ;;  %v12414_v25 = vor.u32 %v17627_v56, %v12413_v53  ;;  %v12105_v53 = vld [vmem:[#allocation2 + $0x280] sm:$0xf] }
 0x4a9   :  { %10592 = vmatpush.bf16.msrb.mxu2 %v16750_v4  ;;  %v11966_v4 = vor.u32 %v17515_v45, %v11965_v48  ;;  %v12638_v15 = vor.u32 %v17683_v17, %v12637_v55 }
 0x4aa   :  { %10605 = vmatpush.bf16.msrb.mxu3 %v16974_v31  ;;  %v12161_v31 = vld [vmem:[#allocation2 + $0x2f0] sm:$0xf] }
 0x4ab   :  { %10567 = vmatpush.bf16.msrb.mxu0 %v16274_v54  ;;  %v12162_v54 = vor.u32 %v17564_v37, %v12161_v31  ;;  %v10361_v48 = vpop.f32.mrf.mxu0 }
 0x4ac   :  { %10580 = vmatpush.bf16.msrb.mxu1 %v16498_v63  ;;  %v12133_v63 = vld [vmem:[#allocation2 + $0x2b8] sm:$0xf]  ;;  %v10362_v56 = vadd.f32 %v10361_v48, %v19623_v3  ;;  %v10374_v55 = vpop.f32.mrf.mxu1  ;;  %v12554_v3 = vor.u32 %v17662_v27, %v12553_v57  ;;  %v11825_v48 = vld [vmem:[#allocation2 + $0x50] sm:$0xf]  ;;  %v17473_v57 = vld [vmem:[#allocation2 + $0x30] sm:$0xf0] }
 0x4ad   :  { %10593 = vmatpush.bf16.msrb.mxu2 %v16722_v49  ;;  %v12610_v49 = vor.u32 %v17676_v14, %v12609_v50  ;;  %v12134_v45 = vor.u32 %v17557_v5, %v12133_v63  ;;  %v17487_v50 = vld [vmem:[#allocation2 + $0xa0] sm:$0xf0]  ;;  %v12077_v14 = vld [vmem:[#allocation2 + $0x248] sm:$0xf] }
 0x4ae   :  { %10606 = vmatpush.bf16.msrb.mxu3 %v16946_v41  ;;  %10568 = vmatmul.bf16.vlgmr.msrb.gmra.mxu0 %v19413_v2  ;;  %v17613_v41 = vld [vmem:[#allocation2 + $0x490] sm:$0xf0]  ;;  %v10375_v31 = vadd.f32 %v10374_v55, %v10362_v56  ;;  %v17655_v5 = vld [vmem:[#allocation2 + $0x5e0] sm:$0xf0]  ;;  %v12273_v56 = vld [vmem:[#allocation2 + $0x3d0] sm:$0xf] }
 0x4af   :  { %10612 = vmatpush.bf16.msra.mxu0 %v11994_v10  ;;  %10581 = vmatmul.bf16.vlgmr.msrb.gmra.mxu1 %v19417_v8  ;;  %v12581_v10 = vld [vmem:[#allocation2 + $0x638] sm:$0xf]  ;;  %v12358_v16 = vor.u32 %v17613_v41, %v12357_v9  ;;  %v11854_v9 = vor.u32 %v17487_v50, %v11853_v6  ;;  %v17592_v55 = vld [vmem:[#allocation2 + $0x3e8] sm:$0xf0] }
 0x4b0   :  { %10625 = vmatpush.bf16.msra.mxu1 %v12218_v46  ;;  %10594 = vmatmul.bf16.vlgmr.msrb.gmra.mxu2 %v19415_v7  ;;  %v17669_v46 = vld [vmem:[#allocation2 + $0x650] sm:$0xf0] }
 0x4b1   :  { %10638 = vmatpush.bf16.msra.mxu2 %v12442_v58  ;;  %10607 = vmatmul.bf16.vlgmr.msrb.gmra.mxu3 %v19419_v12  ;;  %v11910_v58 = vor.u32 %v17501_v20, %v11909_v1  ;;  %v12582_v17 = vor.u32 %v17669_v46, %v12581_v10  ;;  %v17599_v1 = vld [vmem:[#allocation2 + $0x420] sm:$0xf0] }
 0x4b2   :  { %10651 = vmatpush.bf16.msra.mxu3 %v12666_v51  ;;  %v11881_v51 = vld [vmem:[#allocation2 + $0xc0] sm:$0xf] }
 0x4b3   :  { %10613 = vmatpush.bf16.msra.mxu0 %v11966_v4  ;;  %v17550_v4 = vld [vmem:[#allocation2 + $0x298] sm:$0xf0]  ;;  %v10363_v10 = vpop.f32.mrf.mxu0 }
 0x4b4   :  { %10626 = vmatpush.bf16.msra.mxu1 %v12190_v23  ;;  %v12329_v23 = vld [vmem:[#allocation2 + $0x440] sm:$0xf]  ;;  %v12106_v37 = vor.u32 %v17550_v4, %v12105_v53  ;;  %v10400_v63 = vpop.f32.mrf.mxu3  ;;  %v17536_v53 = vld [vmem:[#allocation2 + $0x228] sm:$0xf0] }
 0x4b5   :  { %10639 = vmatpush.bf16.msra.mxu2 %v12414_v25  ;;  %v17606_v25 = vld [vmem:[#allocation2 + $0x458] sm:$0xf0]  ;;  %v17648_v4 = vld [vmem:[#allocation2 + $0x5a8] sm:$0xf0] }
 0x4b6   :  { %10652 = vmatpush.bf16.msra.mxu3 %v12638_v15  ;;  %v11882_v15 = vor.u32 %v17494_v62, %v11881_v51  ;;  %v12330_v13 = vor.u32 %v17606_v25, %v12329_v23  ;;  %v10376_v51 = vpop.f32.mrf.mxu1  ;;  %v11797_v25 = vld [vmem:[#allocation2 + $0x18] sm:$0xf] }
 0x4b7   :  { %10614 = vmatpush.bf16.msra.mxu0 %v11938_v11  ;;  %v10387_v11 = vpop.f32.mrf.mxu2 }
 0x4b8   :  { %10627 = vmatpush.bf16.msra.mxu1 %v12162_v54  ;;  %v17543_v54 = vld [vmem:[#allocation2 + $0x260] sm:$0xf0]  ;;  %v10388_v20 = vadd.f32 %v10387_v11, %v10375_v31  ;;  %v12274_v31 = vor.u32 %v17592_v55, %v12273_v56  ;;  %v12469_v11 = vld [vmem:[#allocation2 + $0x558] sm:$0xf]  ;;  %v13085_v55 = vld [vmem:[#allocation2 + $0xa28] sm:$0xf] }
 0x4b9   :  { %10640 = vmatpush.bf16.msra.mxu2 %v12386_v61  ;;  %v12301_v61 = vld [vmem:[#allocation2 + $0x408] sm:$0xf]  ;;  %v12078_v46 = vor.u32 %v17543_v54, %v12077_v14  ;;  %v17585_v14 = vld [vmem:[#allocation2 + $0x3b0] sm:$0xf0]  ;;  %v17739_v56 = vld [vmem:[#allocation2 + $0x880] sm:$0xf0] }
 0x4ba   :  { %10653 = vmatpush.bf16.msra.mxu3 %v12610_v49  ;;  %v12525_v49 = vld [vmem:[#allocation2 + $0x5c8] sm:$0xf]  ;;  %v19630_v41 = vadd.f32 %v10400_v63, %v10388_v20  ;;  %v13113_v20 = vld [vmem:[#allocation2 + $0xa60] sm:$0xf]  ;;  %v11798_v63 = vor.u32 %v17473_v57, %v11797_v25  ;;  %v17851_v25 = vld [vmem:[#allocation2 + $0xc00] sm:$0xf0] }
 0x4bb   :  { %10615 = vmatpush.bf16.msra.mxu0 %v11910_v58  ;;  %v12302_v58 = vor.u32 %v17599_v1, %v12301_v61  ;;  %v12526_v62 = vor.u32 %v17655_v5, %v12525_v49  ;;  %v12889_v61 = vld [vmem:[#allocation2 + $0x8a0] sm:$0xf]  ;;  %v17746_v1 = vld [vmem:[#allocation2 + $0x8b8] sm:$0xf0]  ;;  %v13533_v57 = vld [vmem:[#allocation2 + $0xda8] sm:$0xf] }
 0x4bc   :  { %10628 = vmatpush.bf16.msra.mxu1 %v12134_v45  ;;  %v17480_v45 = vld [vmem:[#allocation2 + $0x68] sm:$0xf0]  ;;  %v10402_v54 = vpop.f32.mrf.mxu3  ;;  %v17802_v49 = vld [vmem:[#allocation2 + $0xa78] sm:$0xf0]  ;;  %v13337_v5 = vld [vmem:[#allocation2 + $0xc20] sm:$0xf] }
 0x4bd   :  { %10641 = vmatpush.bf16.msra.mxu2 %v12358_v16  ;;  %v12049_v16 = vld [vmem:[#allocation2 + $0x210] sm:$0xf]  ;;  %v11826_v23 = vor.u32 %v17480_v45, %v11825_v48  ;;  %v17914_v48 = vld [vmem:[#allocation2 + $0xdf8] sm:$0xf0]  ;;  %v13114_v51 = vor.u32 %v17802_v49, %v13113_v20  ;;  %v17844_v54 = vld [vmem:[#allocation2 + $0xbc8] sm:$0xf0] }
 0x4be   :  { %10654 = vmatpush.bf16.msra.mxu3 %v12582_v17  ;;  %v12497_v17 = vld [vmem:[#allocation2 + $0x590] sm:$0xf]  ;;  %v12050_v27 = vor.u32 %v17536_v53, %v12049_v16  ;;  %v12890_v16 = vor.u32 %v17746_v1, %v12889_v61  ;;  %v12861_v53 = vld [vmem:[#allocation2 + $0x868] sm:$0xf]  ;;  %v17900_v1 = vld [vmem:[#allocation2 + $0xd88] sm:$0xf0] }
 0x4bf   :  { %10616 = vmatpush.bf16.msra.mxu0 %v11882_v15  ;;  %v12021_v15 = vld [vmem:[#allocation2 + $0x1d8] sm:$0xf]  ;;  %v10389_v6 = vpop.f32.mrf.mxu2  ;;  %v12498_v50 = vor.u32 %v17648_v4, %v12497_v17  ;;  %v17795_v4 = vld [vmem:[#allocation2 + $0xa40] sm:$0xf0]  ;;  %v13505_v61 = vld [vmem:[#allocation2 + $0xd70] sm:$0xf] }
 0x4c0   :  { %10629 = vmatpush.bf16.msra.mxu1 %v12106_v37  ;;  %v17529_v37 = vld [vmem:[#allocation2 + $0x1f0] sm:$0xf0]  ;;  %v17732_v6 = vld [vmem:[#allocation2 + $0x848] sm:$0xf0] }
 0x4c1   :  { %10642 = vmatpush.bf16.msra.mxu2 %v12330_v13  ;;  %v12245_v13 = vld [vmem:[#allocation2 + $0x398] sm:$0xf]  ;;  %v12022_v10 = vor.u32 %v17529_v37, %v12021_v15  ;;  %v13086_v15 = vor.u32 %v17795_v4, %v13085_v55  ;;  %v17718_v55 = vld [vmem:[#allocation2 + $0x7d8] sm:$0xf0] }
 0x4c2   :  { %10655 = vmatpush.bf16.msra.mxu3 %v12554_v3  ;;  %v17641_v3 = vld [vmem:[#allocation2 + $0x570] sm:$0xf0] }
 0x4c3   :  { %10617 = vmatpush.bf16.msra.mxu0 %v11854_v9  ;;  %v17858_v9 = vld [vmem:[#allocation2 + $0xc38] sm:$0xf0]  ;;  %v12470_v45 = vor.u32 %v17641_v3, %v12469_v11  ;;  %v17788_v11 = vld [vmem:[#allocation2 + $0xa08] sm:$0xf0]  ;;  %v13281_v3 = vld [vmem:[#allocation2 + $0xbb0] sm:$0xf] }
 0x4c4   :  { %10630 = vmatpush.bf16.msra.mxu1 %v12078_v46  ;;  %v12246_v46 = vor.u32 %v17585_v14, %v12245_v13  ;;  %v12833_v13 = vld [vmem:[#allocation2 + $0x830] sm:$0xf]  ;;  %v13282_v49 = vor.u32 %v17844_v54, %v13281_v3  ;;  %v17767_v54 = vld [vmem:[#allocation2 + $0x960] sm:$0xf0] }
 0x4c5   :  { %10643 = vmatpush.bf16.msra.mxu2 %v12302_v58  ;;  %v13561_v58 = vld [vmem:[#allocation2 + $0xde0] sm:$0xf]  ;;  %v12834_v20 = vor.u32 %v17732_v6, %v12833_v13  ;;  %v12749_v6 = vld [vmem:[#allocation2 + $0x788] sm:$0xf] }
 0x4c6   :  { %10656 = vmatpush.bf16.msra.mxu3 %v12526_v62  ;;  %v13338_v62 = vor.u32 %v17858_v9, %v13337_v5  ;;  %v13562_v17 = vor.u32 %v17914_v48, %v13561_v58  ;;  %v12805_v5 = vld [vmem:[#allocation2 + $0x7f8] sm:$0xf]  ;;  %v17725_v9 = vld [vmem:[#allocation2 + $0x810] sm:$0xf0] }
 0x4c7   :  { %10618 = vmatpush.bf16.msra.mxu0 %v11826_v23  ;;  %v13309_v23 = vld [vmem:[#allocation2 + $0xbe8] sm:$0xf]  ;;  %v13253_v58 = vld [vmem:[#allocation2 + $0xb78] sm:$0xf]  ;;  %v17837_v48 = vld [vmem:[#allocation2 + $0xb90] sm:$0xf0] }
 0x4c8   :  { %10631 = vmatpush.bf16.msra.mxu1 %v12050_v27  ;;  %v17907_v27 = vld [vmem:[#allocation2 + $0xdc0] sm:$0xf0]  ;;  %v13310_v37 = vor.u32 %v17851_v25, %v13309_v23  ;;  %v17774_v25 = vld [vmem:[#allocation2 + $0x998] sm:$0xf0] }
 0x4c9   :  { %10644 = vmatpush.bf16.msra.mxu2 %v12274_v31  ;;  %v12862_v31 = vor.u32 %v17739_v56, %v12861_v53  ;;  %v13534_v14 = vor.u32 %v17907_v27, %v13533_v57  ;;  %v13254_v53 = vor.u32 %v17837_v48, %v13253_v58  ;;  %v12777_v56 = vld [vmem:[#allocation2 + $0x7c0] sm:$0xf]  ;;  %v17830_v27 = vld [vmem:[#allocation2 + $0xb58] sm:$0xf0] }
 0x4ca   :  { %10657 = vmatpush.bf16.msra.mxu3 %v12498_v50  ;;  %v13057_v50 = vld [vmem:[#allocation2 + $0x9f0] sm:$0xf]  ;;  %v13225_v57 = vld [vmem:[#allocation2 + $0xb40] sm:$0xf] }
 0x4cb   :  { %10619 = vmatpush.bf16.msra.mxu0 %v11798_v63  ;;  %v13058_v63 = vor.u32 %v17788_v11, %v13057_v50  ;;  %v13226_v13 = vor.u32 %v17830_v27, %v13225_v57  ;;  %v17711_v50 = vld [vmem:[#allocation2 + $0x7a0] sm:$0xf0]  ;;  %v12917_v57 = vld [vmem:[#allocation2 + $0x8d8] sm:$0xf]  ;;  %v17753_v27 = vld [vmem:[#allocation2 + $0x8f0] sm:$0xf0] }
 0x4cc   :  { %10632 = vmatpush.bf16.msra.mxu1 %v12022_v10  ;;  %v13029_v10 = vld [vmem:[#allocation2 + $0x9b8] sm:$0xf] }
 0x4cd   :  { %10645 = vmatpush.bf16.msra.mxu2 %v12246_v46  ;;  %v13506_v46 = vor.u32 %v17900_v1, %v13505_v61  ;;  %v13197_v61 = vld [vmem:[#allocation2 + $0xb08] sm:$0xf]  ;;  %v17823_v1 = vld [vmem:[#allocation2 + $0xb20] sm:$0xf0] }
 0x4ce   :  { %10658 = vmatpush.bf16.msra.mxu3 %v12470_v45  ;;  %10620 = vmatmul.bf16.vlgmr.msra.gmra.mxu0 %v19311_v36  ;;  %v10413_v45 = vpop.f32.mrf.mxu0  ;;  %v13477_v36 = vld [vmem:[#allocation2 + $0xd38] sm:$0xf]  ;;  %v13198_v48 = vor.u32 %v17823_v1, %v13197_v61  ;;  %v18026_v61 = vld [vmem:[#allocation2 + $0x1178] sm:$0xf0]  ;;  %v14233_v1 = vld [vmem:[#allocation2 + $0x1320] sm:$0xf] }
 0x4cf   :  { %10664 = vmatpush.bf16.msrb.mxu0 %v12890_v16  ;;  %10633 = vmatmul.bf16.vlgmr.msra.gmra.mxu1 %v19315_v43  ;;  %v17893_v16 = vld [vmem:[#allocation2 + $0xd50] sm:$0xf0]  ;;  %v10426_v43 = vpop.f32.mrf.mxu1 }
 0x4d0   :  { %10677 = vmatpush.bf16.msrb.mxu1 %v13114_v51  ;;  %10646 = vmatmul.bf16.vlgmr.msra.gmra.mxu2 %v19309_v35  ;;  %v17781_v35 = vld [vmem:[#allocation2 + $0x9d0] sm:$0xf0]  ;;  %v12806_v51 = vor.u32 %v17725_v9, %v12805_v5  ;;  %v13478_v4 = vor.u32 %v17893_v16, %v13477_v36  ;;  %v17879_v5 = vld [vmem:[#allocation2 + $0xce0] sm:$0xf0]  ;;  %v17704_v36 = vld [vmem:[#allocation2 + $0x768] sm:$0xf0] }
 0x4d1   :  { %10690 = vmatpush.bf16.msrb.mxu2 %v13338_v62  ;;  %10659 = vmatmul.bf16.vlgmr.msra.gmra.mxu3 %v19313_v42  ;;  %v10414_v42 = vadd.f32 %v10413_v45, %v19630_v41  ;;  %v13030_v62 = vor.u32 %v17781_v35, %v13029_v10  ;;  %v12750_v10 = vor.u32 %v17711_v50, %v12749_v6  ;;  %v12721_v45 = vld [vmem:[#allocation2 + $0x750] sm:$0xf]  ;;  %v13785_v50 = vld [vmem:[#allocation2 + $0xfa0] sm:$0xf] }
 0x4d2   :  { %10703 = vmatpush.bf16.msrb.mxu3 %v13562_v17  ;;  %v13001_v17 = vld [vmem:[#allocation2 + $0x980] sm:$0xf]  ;;  %v12945_v16 = vld [vmem:[#allocation2 + $0x910] sm:$0xf] }
 0x4d3   :  { %10665 = vmatpush.bf16.msrb.mxu0 %v12862_v31  ;;  %v10427_v23 = vadd.f32 %v10426_v43, %v10414_v42  ;;  %v13449_v31 = vld [vmem:[#allocation2 + $0xd00] sm:$0xf]  ;;  %v13002_v41 = vor.u32 %v17774_v25, %v13001_v17  ;;  %v10439_v3 = vpop.f32.mrf.mxu2  ;;  %v13169_v43 = vld [vmem:[#allocation2 + $0xad0] sm:$0xf]  ;;  %v12693_v17 = vld [vmem:[#allocation2 + $0x718] sm:$0xf] }
 0x4d4   :  { %10678 = vmatpush.bf16.msrb.mxu1 %v13086_v15  ;;  %v17886_v15 = vld [vmem:[#allocation2 + $0xd18] sm:$0xf0] }
 0x4d5   :  { %10691 = vmatpush.bf16.msrb.mxu2 %v13310_v37  ;;  %v12778_v37 = vor.u32 %v17718_v55, %v12777_v56  ;;  %v13450_v11 = vor.u32 %v17886_v15, %v13449_v31  ;;  %v17872_v56 = vld [vmem:[#allocation2 + $0xca8] sm:$0xf0]  ;;  %v12722_v55 = vor.u32 %v17704_v36, %v12721_v45  ;;  %v13141_v31 = vld [vmem:[#allocation2 + $0xa98] sm:$0xf]  ;;  %v13757_v45 = vld [vmem:[#allocation2 + $0xf68] sm:$0xf] }
 0x4d6   :  { %10704 = vmatpush.bf16.msrb.mxu3 %v13534_v14  ;;  %v12973_v14 = vld [vmem:[#allocation2 + $0x948] sm:$0xf]  ;;  %v10415_v9 = vpop.f32.mrf.mxu0  ;;  %v17963_v36 = vld [vmem:[#allocation2 + $0xf80] sm:$0xf0] }
 0x4d7   :  { %10666 = vmatpush.bf16.msrb.mxu0 %v12834_v20  ;;  %v10440_v20 = vadd.f32 %v10439_v3, %v10427_v23  ;;  %v12974_v58 = vor.u32 %v17767_v54, %v12973_v14  ;;  %v17970_v14 = vld [vmem:[#allocation2 + $0xfb8] sm:$0xf0] }
 0x4d8   :  { %10679 = vmatpush.bf16.msrb.mxu1 %v13058_v63  ;;  %v10452_v63 = vpop.f32.mrf.mxu3  ;;  %v18138_v9 = vld [vmem:[#allocation2 + $0x14f8] sm:$0xf0] }
 0x4d9   :  { %10692 = vmatpush.bf16.msrb.mxu2 %v13282_v49  ;;  %v13421_v49 = vld [vmem:[#allocation2 + $0xcc8] sm:$0xf]  ;;  %v19637_v35 = vadd.f32 %v10452_v63, %v10440_v20  ;;  %v18082_v20 = vld [vmem:[#allocation2 + $0x1338] sm:$0xf0]  ;;  %v12918_v63 = vor.u32 %v17753_v27, %v12917_v57  ;;  %v13953_v57 = vld [vmem:[#allocation2 + $0x10f0] sm:$0xf] }
 0x4da   :  { %10705 = vmatpush.bf16.msrb.mxu3 %v13506_v46  ;;  %v10428_v46 = vpop.f32.mrf.mxu1  ;;  %v13422_v42 = vor.u32 %v17879_v5, %v13421_v49  ;;  %v14457_v5 = vld [vmem:[#allocation2 + $0x14e0] sm:$0xf] }
 0x4db   :  { %10667 = vmatpush.bf16.msrb.mxu0 %v12806_v51  ;;  %v17760_v51 = vld [vmem:[#allocation2 + $0x928] sm:$0xf0]  ;;  %v10441_v6 = vpop.f32.mrf.mxu2  ;;  %v13786_v46 = vor.u32 %v17970_v14, %v13785_v50 }
 0x4dc   :  { %10680 = vmatpush.bf16.msrb.mxu1 %v13030_v62  ;;  %v17816_v62 = vld [vmem:[#allocation2 + $0xae8] sm:$0xf0]  ;;  %v12946_v23 = vor.u32 %v17760_v51, %v12945_v16  ;;  %v13981_v16 = vld [vmem:[#allocation2 + $0x1128] sm:$0xf]  ;;  %v18019_v51 = vld [vmem:[#allocation2 + $0x1140] sm:$0xf0] }
 0x4dd   :  { %10693 = vmatpush.bf16.msrb.mxu2 %v13254_v53  ;;  %v13393_v53 = vld [vmem:[#allocation2 + $0xc90] sm:$0xf]  ;;  %v13170_v25 = vor.u32 %v17816_v62, %v13169_v43  ;;  %v14205_v43 = vld [vmem:[#allocation2 + $0x12e8] sm:$0xf]  ;;  %v18075_v62 = vld [vmem:[#allocation2 + $0x1300] sm:$0xf0] }
 0x4de   :  { %10706 = vmatpush.bf16.msrb.mxu3 %v13478_v4  ;;  %v17697_v4 = vld [vmem:[#allocation2 + $0x730] sm:$0xf0]  ;;  %v13394_v15 = vor.u32 %v17872_v56, %v13393_v53  ;;  %v14429_v53 = vld [vmem:[#allocation2 + $0x14a8] sm:$0xf]  ;;  %v18131_v56 = vld [vmem:[#allocation2 + $0x14c0] sm:$0xf0] }
 0x4df   :  { %10668 = vmatpush.bf16.msrb.mxu0 %v12778_v37  ;;  %v17809_v37 = vld [vmem:[#allocation2 + $0xab0] sm:$0xf0]  ;;  %v12694_v54 = vor.u32 %v17697_v4, %v12693_v17  ;;  %v13982_v17 = vor.u32 %v18019_v51, %v13981_v16  ;;  %v14206_v4 = vor.u32 %v18075_v62, %v14205_v43  ;;  %v14430_v27 = vor.u32 %v18131_v56, %v14429_v53  ;;  %v17998_v16 = vld [vmem:[#allocation2 + $0x1098] sm:$0xf0]  ;;  %v14345_v43 = vld [vmem:[#allocation2 + $0x1400] sm:$0xf] }
 0x4e0   :  { %10681 = vmatpush.bf16.msrb.mxu1 %v13002_v41  ;;  %v13365_v41 = vld [vmem:[#allocation2 + $0xc58] sm:$0xf]  ;;  %v10454_v3 = vpop.f32.mrf.mxu3  ;;  %v13142_v49 = vor.u32 %v17809_v37, %v13141_v31  ;;  %v18012_v31 = vld [vmem:[#allocation2 + $0x1108] sm:$0xf0]  ;;  %v18054_v51 = vld [vmem:[#allocation2 + $0x1258] sm:$0xf0] }
 0x4e1   :  { %10694 = vmatpush.bf16.msrb.mxu2 %v13226_v13  ;;  %v17865_v13 = vld [vmem:[#allocation2 + $0xc70] sm:$0xf0]  ;;  %v18068_v37 = vld [vmem:[#allocation2 + $0x12c8] sm:$0xf0]  ;;  %v13954_v50 = vor.u32 %v18012_v31, %v13953_v57  ;;  %v18110_v62 = vld [vmem:[#allocation2 + $0x1418] sm:$0xf0] }
 0x4e2   :  { %10707 = vmatpush.bf16.msrb.mxu3 %v13450_v11  ;;  %v14009_v11 = vld [vmem:[#allocation2 + $0x1160] sm:$0xf]  ;;  %v17949_v3 = vld [vmem:[#allocation2 + $0xf10] sm:$0xf0]  ;;  %v17991_v57 = vld [vmem:[#allocation2 + $0x1060] sm:$0xf0] }
 0x4e3   :  { %10669 = vmatpush.bf16.msrb.mxu0 %v12750_v10  ;;  %v13366_v10 = vor.u32 %v17865_v13, %v13365_v41  ;;  %v14401_v41 = vld [vmem:[#allocation2 + $0x1470] sm:$0xf]  ;;  %v18124_v13 = vld [vmem:[#allocation2 + $0x1488] sm:$0xf0]  ;;  %v18047_v31 = vld [vmem:[#allocation2 + $0x1220] sm:$0xf0] }
 0x4e4   :  { %10682 = vmatpush.bf16.msrb.mxu1 %v12974_v58  ;;  %v14010_v58 = vor.u32 %v18026_v61, %v14009_v11  ;;  %v13701_v11 = vld [vmem:[#allocation2 + $0xef8] sm:$0xf]  ;;  %v18005_v61 = vld [vmem:[#allocation2 + $0x10d0] sm:$0xf0] }
 0x4e5   :  { %10695 = vmatpush.bf16.msrb.mxu2 %v13198_v48  ;;  %v14234_v48 = vor.u32 %v18082_v20, %v14233_v1  ;;  %v14149_v1 = vld [vmem:[#allocation2 + $0x1278] sm:$0xf]  ;;  %v18061_v20 = vld [vmem:[#allocation2 + $0x1290] sm:$0xf0] }
 0x4e6   :  { %10708 = vmatpush.bf16.msrb.mxu3 %v13422_v42  ;;  %v14458_v42 = vor.u32 %v18138_v9, %v14457_v5  ;;  %v13702_v5 = vor.u32 %v17949_v3, %v13701_v11 }
 0x4e7   :  { %10670 = vmatpush.bf16.msrb.mxu0 %v12722_v55  ;;  %v13758_v55 = vor.u32 %v17963_v36, %v13757_v45 }
 0x4e8   :  { %10683 = vmatpush.bf16.msrb.mxu1 %v12946_v23  ;;  %v13729_v23 = vld [vmem:[#allocation2 + $0xf30] sm:$0xf] }
 0x4e9   :  { %10696 = vmatpush.bf16.msrb.mxu2 %v13170_v25  ;;  %v17956_v25 = vld [vmem:[#allocation2 + $0xf48] sm:$0xf0] }
 0x4ea   :  { %10709 = vmatpush.bf16.msrb.mxu3 %v13394_v15  ;;  %v14177_v15 = vld [vmem:[#allocation2 + $0x12b0] sm:$0xf]  ;;  %v13730_v6 = vor.u32 %v17956_v25, %v13729_v23  ;;  %v14346_v23 = vor.u32 %v18110_v62, %v14345_v43  ;;  %v18089_v43 = vld [vmem:[#allocation2 + $0x1370] sm:$0xf0] }
 0x4eb   :  { %10671 = vmatpush.bf16.msrb.mxu0 %v12694_v54  ;;  %v14178_v14 = vor.u32 %v18068_v37, %v14177_v15  ;;  %v14402_v54 = vor.u32 %v18124_v13, %v14401_v41  ;;  %v14317_v41 = vld [vmem:[#allocation2 + $0x13c8] sm:$0xf]  ;;  %v18103_v13 = vld [vmem:[#allocation2 + $0x13e0] sm:$0xf0] }
 0x4ec   :  { %10684 = vmatpush.bf16.msrb.mxu1 %v12918_v63  ;;  %v10465_v63 = vpop.f32.mrf.mxu0 }
 0x4ed   :  { %10697 = vmatpush.bf16.msrb.mxu2 %v13142_v49  ;;  %v18117_v49 = vld [vmem:[#allocation2 + $0x1450] sm:$0xf0] }
 0x4ee   :  { %10710 = vmatpush.bf16.msrb.mxu3 %v13366_v10  ;;  %10672 = vmatmul.bf16.vlgmr.msrb.gmra.mxu0 %v19329_v39  ;;  %v14373_v39 = vld [vmem:[#allocation2 + $0x1438] sm:$0xf]  ;;  %v14150_v10 = vor.u32 %v18061_v20, %v14149_v1  ;;  %v13841_v1 = vld [vmem:[#allocation2 + $0x1010] sm:$0xf]  ;;  %v14318_v20 = vor.u32 %v18103_v13, %v14317_v41 }
 0x4ef   :  { %10716 = vmatpush.bf16.msra.mxu0 %v13786_v46  ;;  %10685 = vmatmul.bf16.vlgmr.msrb.gmra.mxu1 %v19333_v44  ;;  %v10478_v44 = vpop.f32.mrf.mxu1  ;;  %v13673_v46 = vld [vmem:[#allocation2 + $0xec0] sm:$0xf]  ;;  %v14374_v45 = vor.u32 %v18117_v49, %v14373_v39  ;;  %v14065_v39 = vld [vmem:[#allocation2 + $0x11d0] sm:$0xf]  ;;  %v18040_v49 = vld [vmem:[#allocation2 + $0x11e8] sm:$0xf0] }
 0x4f0   :  { %10729 = vmatpush.bf16.msra.mxu1 %v14010_v58  ;;  %10698 = vmatmul.bf16.vlgmr.msrb.gmra.mxu2 %v19327_v34  ;;  %v13925_v34 = vld [vmem:[#allocation2 + $0x10b8] sm:$0xf]  ;;  %v17942_v58 = vld [vmem:[#allocation2 + $0xed8] sm:$0xf0] }
 0x4f1   :  { %10742 = vmatpush.bf16.msra.mxu2 %v14234_v48  ;;  %10711 = vmatmul.bf16.vlgmr.msrb.gmra.mxu3 %v19331_v40  ;;  %v10466_v40 = vadd.f32 %v10465_v63, %v19637_v35  ;;  %v13926_v9 = vor.u32 %v18005_v61, %v13925_v34  ;;  %v13897_v48 = vld [vmem:[#allocation2 + $0x1080] sm:$0xf]  ;;  %v13674_v53 = vor.u32 %v17942_v58, %v13673_v46  ;;  %v17928_v61 = vld [vmem:[#allocation2 + $0xe68] sm:$0xf0] }
 0x4f2   :  { %10755 = vmatpush.bf16.msra.mxu3 %v14458_v42  ;;  %v14121_v42 = vld [vmem:[#allocation2 + $0x1240] sm:$0xf]  ;;  %v13898_v35 = vor.u32 %v17998_v16, %v13897_v48  ;;  %v17984_v63 = vld [vmem:[#allocation2 + $0x1028] sm:$0xf0]  ;;  %v14066_v58 = vor.u32 %v18040_v49, %v14065_v39  ;;  %v13813_v48 = vld [vmem:[#allocation2 + $0xfd8] sm:$0xf] }
 0x4f3   :  { %10717 = vmatpush.bf16.msra.mxu0 %v13758_v55  ;;  %v10479_v36 = vadd.f32 %v10478_v44, %v10466_v40  ;;  %v14122_v56 = vor.u32 %v18054_v51, %v14121_v42  ;;  %v13645_v55 = vld [vmem:[#allocation2 + $0xe88] sm:$0xf]  ;;  %v10491_v25 = vpop.f32.mrf.mxu2  ;;  %v14289_v40 = vld [vmem:[#allocation2 + $0x1390] sm:$0xf]  ;;  %v13842_v46 = vor.u32 %v17984_v63, %v13841_v1  ;;  %v18033_v42 = vld [vmem:[#allocation2 + $0x11b0] sm:$0xf0] }
 0x4f4   :  { %10730 = vmatpush.bf16.msra.mxu1 %v13982_v17  ;;  %v17935_v17 = vld [vmem:[#allocation2 + $0xea0] sm:$0xf0]  ;;  %v10504_v37 = vpop.f32.mrf.mxu3  ;;  %v14261_v51 = vld [vmem:[#allocation2 + $0x1358] sm:$0xf] }
 0x4f5   :  { %10743 = vmatpush.bf16.msra.mxu2 %v14206_v4  ;;  %v13869_v4 = vld [vmem:[#allocation2 + $0x1048] sm:$0xf]  ;;  %v10492_v15 = vadd.f32 %v10491_v25, %v10479_v36  ;;  %v14037_v36 = vld [vmem:[#allocation2 + $0x1198] sm:$0xf]  ;;  %v18306_v25 = vld [vmem:[#allocation2 + $0x1a38] sm:$0xf0] }
 0x4f6   :  { %10756 = vmatpush.bf16.msra.mxu3 %v14430_v27  ;;  %v14093_v27 = vld [vmem:[#allocation2 + $0x1208] sm:$0xf]  ;;  %v13870_v3 = vor.u32 %v17991_v57, %v13869_v4  ;;  %v18250_v4 = vld [vmem:[#allocation2 + $0x1878] sm:$0xf0]  ;;  %v18299_v1 = vld [vmem:[#allocation2 + $0x1a00] sm:$0xf0] }
 0x4f7   :  { %10718 = vmatpush.bf16.msra.mxu0 %v13730_v6  ;;  %v10467_v6 = vpop.f32.mrf.mxu0  ;;  %v19644_v11 = vadd.f32 %v10504_v37, %v10492_v15  ;;  %v14094_v34 = vor.u32 %v18047_v31, %v14093_v27  ;;  %v14038_v27 = vor.u32 %v18033_v42, %v14037_v36  ;;  %v15353_v31 = vld [vmem:[#allocation2 + $0x1be0] sm:$0xf]  ;;  %v18362_v15 = vld [vmem:[#allocation2 + $0x1bf8] sm:$0xf0]  ;;  %v14262_v37 = vor.u32 %v18089_v43, %v14261_v51  ;;  %v18355_v63 = vld [vmem:[#allocation2 + $0x1bc0] sm:$0xf0] }
 0x4f8   :  { %10731 = vmatpush.bf16.msra.mxu1 %v13954_v50  ;;  %v13646_v50 = vor.u32 %v17935_v17, %v13645_v55  ;;  %v18348_v36 = vld [vmem:[#allocation2 + $0x1b88] sm:$0xf0]  ;;  %v14597_v43 = vld [vmem:[#allocation2 + $0x15f8] sm:$0xf] }
 0x4f9   :  { %10744 = vmatpush.bf16.msra.mxu2 %v14178_v14  ;;  %v10480_v14 = vpop.f32.mrf.mxu1 }
 0x4fa   :  { %10757 = vmatpush.bf16.msra.mxu3 %v14402_v54  ;;  %v13617_v54 = vld [vmem:[#allocation2 + $0xe50] sm:$0xf]  ;;  %v18187_v14 = vld [vmem:[#allocation2 + $0x1680] sm:$0xf0] }
 0x4fb   :  { %10719 = vmatpush.bf16.msra.mxu0 %v13702_v5  ;;  %v18096_v5 = vld [vmem:[#allocation2 + $0x13a8] sm:$0xf0]  ;;  %v13618_v44 = vor.u32 %v17928_v61, %v13617_v54  ;;  %v10493_v62 = vpop.f32.mrf.mxu2  ;;  %v18243_v54 = vld [vmem:[#allocation2 + $0x1840] sm:$0xf0]  ;;  %v15101_v61 = vld [vmem:[#allocation2 + $0x19e8] sm:$0xf] }
 0x4fc   :  { %10732 = vmatpush.bf16.msra.mxu1 %v13926_v9  ;;  %v13589_v9 = vld [vmem:[#allocation2 + $0xe18] sm:$0xf]  ;;  %v14290_v16 = vor.u32 %v18096_v5, %v14289_v40  ;;  %v10506_v55 = vpop.f32.mrf.mxu3  ;;  %v15102_v40 = vor.u32 %v18299_v1, %v15101_v61  ;;  %v14625_v5 = vld [vmem:[#allocation2 + $0x1630] sm:$0xf]  ;;  %v14541_v61 = vld [vmem:[#allocation2 + $0x1588] sm:$0xf] }
 0x4fd   :  { %10745 = vmatpush.bf16.msra.mxu2 %v14150_v10  ;;  %v17921_v10 = vld [vmem:[#allocation2 + $0xe30] sm:$0xf0]  ;;  %v14821_v62 = vld [vmem:[#allocation2 + $0x17b8] sm:$0xf]  ;;  %v18159_v1 = vld [vmem:[#allocation2 + $0x15a0] sm:$0xf0] }
 0x4fe   :  { %10758 = vmatpush.bf16.msra.mxu3 %v14374_v45  ;;  %v17977_v45 = vld [vmem:[#allocation2 + $0xff0] sm:$0xf0]  ;;  %v13590_v17 = vor.u32 %v17921_v10, %v13589_v9  ;;  %v14849_v9 = vld [vmem:[#allocation2 + $0x17f0] sm:$0xf] }
 0x4ff   :  { %10720 = vmatpush.bf16.msra.mxu0 %v13674_v53  ;;  %v14681_v53 = vld [vmem:[#allocation2 + $0x16a0] sm:$0xf]  ;;  %v13814_v57 = vor.u32 %v17977_v45, %v13813_v48  ;;  %v18292_v48 = vld [vmem:[#allocation2 + $0x19c8] sm:$0xf0]  ;;  %v15297_v45 = vld [vmem:[#allocation2 + $0x1b70] sm:$0xf] }
 0x500   :  { %10733 = vmatpush.bf16.msra.mxu1 %v13898_v35  ;;  %v18194_v35 = vld [vmem:[#allocation2 + $0x16b8] sm:$0xf0] }
 0x501   :  { %10746 = vmatpush.bf16.msra.mxu2 %v14122_v56  ;;  %v14905_v56 = vld [vmem:[#allocation2 + $0x1860] sm:$0xf]  ;;  %v14682_v41 = vor.u32 %v18194_v35, %v14681_v53  ;;  %v15298_v53 = vor.u32 %v18348_v36, %v15297_v45  ;;  %v18229_v35 = vld [vmem:[#allocation2 + $0x17d0] sm:$0xf0] }
 0x502   :  { %10759 = vmatpush.bf16.msra.mxu3 %v14346_v23  ;;  %v15129_v23 = vld [vmem:[#allocation2 + $0x1a20] sm:$0xf]  ;;  %v14906_v13 = vor.u32 %v18250_v4, %v14905_v56  ;;  %v15045_v56 = vld [vmem:[#allocation2 + $0x1978] sm:$0xf] }
 0x503   :  { %10721 = vmatpush.bf16.msra.mxu0 %v13646_v50  ;;  %v15130_v6 = vor.u32 %v18306_v25, %v15129_v23  ;;  %v14653_v50 = vld [vmem:[#allocation2 + $0x1668] sm:$0xf]  ;;  %v14822_v25 = vor.u32 %v18229_v35, %v14821_v62  ;;  %v14961_v35 = vld [vmem:[#allocation2 + $0x18d0] sm:$0xf] }
 0x504   :  { %10734 = vmatpush.bf16.msra.mxu1 %v13870_v3  ;;  %v14877_v3 = vld [vmem:[#allocation2 + $0x1828] sm:$0xf]  ;;  %v14654_v39 = vor.u32 %v18187_v14, %v14653_v50  ;;  %v18278_v50 = vld [vmem:[#allocation2 + $0x1958] sm:$0xf0]  ;;  %v15241_v14 = vld [vmem:[#allocation2 + $0x1b00] sm:$0xf] }
 0x505   :  { %10747 = vmatpush.bf16.msra.mxu2 %v14094_v34  ;;  %v15354_v34 = vor.u32 %v18362_v15, %v15353_v31  ;;  %v14878_v49 = vor.u32 %v18243_v54, %v14877_v3  ;;  %v18166_v31 = vld [vmem:[#allocation2 + $0x15d8] sm:$0xf0]  ;;  %v14793_v15 = vld [vmem:[#allocation2 + $0x1780] sm:$0xf] }
 0x506   :  { %10760 = vmatpush.bf16.msra.mxu3 %v14318_v20  ;;  %v15325_v20 = vld [vmem:[#allocation2 + $0x1ba8] sm:$0xf]  ;;  %v18334_v3 = vld [vmem:[#allocation2 + $0x1b18] sm:$0xf0] }
 0x507   :  { %10722 = vmatpush.bf16.msra.mxu0 %v13618_v44  ;;  %v18180_v44 = vld [vmem:[#allocation2 + $0x1648] sm:$0xf0]  ;;  %v15326_v10 = vor.u32 %v18355_v63, %v15325_v20  ;;  %v14765_v20 = vld [vmem:[#allocation2 + $0x1748] sm:$0xf]  ;;  %v15242_v63 = vor.u32 %v18334_v3, %v15241_v14  ;;  %v15801_v14 = vld [vmem:[#allocation2 + $0x1f60] sm:$0xf] }
 0x508   :  { %10735 = vmatpush.bf16.msra.mxu1 %v13842_v46  ;;  %v18236_v46 = vld [vmem:[#allocation2 + $0x1808] sm:$0xf0] }
 0x509   :  { %10748 = vmatpush.bf16.msra.mxu2 %v14066_v58  ;;  %v15073_v58 = vld [vmem:[#allocation2 + $0x19b0] sm:$0xf]  ;;  %v14850_v42 = vor.u32 %v18236_v46, %v14849_v9  ;;  %v18327_v46 = vld [vmem:[#allocation2 + $0x1ae0] sm:$0xf0] }
 0x50a   :  { %10761 = vmatpush.bf16.msra.mxu3 %v14290_v16  ;;  %v14626_v16 = vor.u32 %v18180_v44, %v14625_v5  ;;  %v15074_v51 = vor.u32 %v18292_v48, %v15073_v58  ;;  %v18271_v5 = vld [vmem:[#allocation2 + $0x1920] sm:$0xf0]  ;;  %v14542_v48 = vor.u32 %v18159_v1, %v14541_v61  ;;  %v18530_v61 = vld [vmem:[#allocation2 + $0x2138] sm:$0xf0] }
 0x50b   :  { %10723 = vmatpush.bf16.msra.mxu0 %v13590_v17  ;;  %v10517_v55 = vpop.f32.mrf.mxu0  ;;  %v18341_v17 = vld [vmem:[#allocation2 + $0x1b50] sm:$0xf0] }
 0x50c   :  { %10736 = vmatpush.bf16.msra.mxu1 %v13814_v57  ;;  %v10530_v23 = vpop.f32.mrf.mxu1 }
 0x50d   :  { %10749 = vmatpush.bf16.msra.mxu2 %v14038_v27  ;;  %v14569_v27 = vld [vmem:[#allocation2 + $0x15c0] sm:$0xf] }
 0x50e   :  { %10762 = vmatpush.bf16.msra.mxu3 %v14262_v37  ;;  %10724 = vmatmul.bf16.vlgmr.msra.gmra.mxu0 %v19352_v24  ;;  %v18173_v24 = vld [vmem:[#allocation2 + $0x1610] sm:$0xf0] }
 0x50f   :  { %10768 = vmatpush.bf16.msrb.mxu0 %v14682_v41  ;;  %10737 = vmatmul.bf16.vlgmr.msra.gmra.mxu1 %v19360_v29  ;;  %v15269_v29 = vld [vmem:[#allocation2 + $0x1b38] sm:$0xf]  ;;  %v14598_v4 = vor.u32 %v18173_v24, %v14597_v43  ;;  %v18152_v43 = vld [vmem:[#allocation2 + $0x1568] sm:$0xf0]  ;;  %v14737_v24 = vld [vmem:[#allocation2 + $0x1710] sm:$0xf] }
 0x510   :  { %10781 = vmatpush.bf16.msrb.mxu1 %v14906_v13  ;;  %10750 = vmatmul.bf16.vlgmr.msra.gmra.mxu2 %v19356_v28  ;;  %v18285_v28 = vld [vmem:[#allocation2 + $0x1990] sm:$0xf0]  ;;  %v15270_v37 = vor.u32 %v18341_v17, %v15269_v29  ;;  %v18222_v13 = vld [vmem:[#allocation2 + $0x1798] sm:$0xf0]  ;;  %v14485_v17 = vld [vmem:[#allocation2 + $0x1518] sm:$0xf] }
 0x511   :  { %10794 = vmatpush.bf16.msrb.mxu2 %v15130_v6  ;;  %10763 = vmatmul.bf16.vlgmr.msra.gmra.mxu3 %v19364_v18  ;;  %v10518_v18 = vadd.f32 %v10517_v55, %v19644_v11  ;;  %v15046_v57 = vor.u32 %v18285_v28, %v15045_v56  ;;  %v15017_v6 = vld [vmem:[#allocation2 + $0x1940] sm:$0xf]  ;;  %v14794_v11 = vor.u32 %v18222_v13, %v14793_v15  ;;  %v18264_v56 = vld [vmem:[#allocation2 + $0x18e8] sm:$0xf0]  ;;  %v15185_v28 = vld [vmem:[#allocation2 + $0x1a90] sm:$0xf] }
 0x512   :  { %10807 = vmatpush.bf16.msrb.mxu3 %v15354_v34  ;;  %v14570_v34 = vor.u32 %v18166_v31, %v14569_v27  ;;  %v15018_v54 = vor.u32 %v18278_v50, %v15017_v6  ;;  %v18320_v55 = vld [vmem:[#allocation2 + $0x1aa8] sm:$0xf0]  ;;  %v14933_v27 = vld [vmem:[#allocation2 + $0x1898] sm:$0xf]  ;;  %v18257_v15 = vld [vmem:[#allocation2 + $0x18b0] sm:$0xf0] }
 0x513   :  { %10769 = vmatpush.bf16.msrb.mxu0 %v14654_v39  ;;  %v10531_v41 = vadd.f32 %v10530_v23, %v10518_v18  ;;  %v10543_v39 = vpop.f32.mrf.mxu2  ;;  %v10519_v58 = vpop.f32.mrf.mxu0  ;;  %v18145_v18 = vld [vmem:[#allocation2 + $0x1530] sm:$0xf0]  ;;  %v14962_v23 = vor.u32 %v18264_v56, %v14961_v35  ;;  %v15186_v31 = vor.u32 %v18320_v55, %v15185_v28  ;;  %v15577_v6 = vld [vmem:[#allocation2 + $0x1da0] sm:$0xf]  ;;  %v18418_v50 = vld [vmem:[#allocation2 + $0x1db8] sm:$0xf0] }
 0x514   :  { %10782 = vmatpush.bf16.msrb.mxu1 %v14878_v49  ;;  %v18215_v49 = vld [vmem:[#allocation2 + $0x1760] sm:$0xf0]  ;;  %v10556_v9 = vpop.f32.mrf.mxu3  ;;  %v10532_v45 = vpop.f32.mrf.mxu1  ;;  %v18404_v35 = vld [vmem:[#allocation2 + $0x1d48] sm:$0xf0]  ;;  %v15745_v56 = vld [vmem:[#allocation2 + $0x1ef0] sm:$0xf] }
 0x515   :  { %10795 = vmatpush.bf16.msrb.mxu2 %v15102_v40  ;;  %v14989_v40 = vld [vmem:[#allocation2 + $0x1908] sm:$0xf]  ;;  %v10544_v44 = vadd.f32 %v10543_v39, %v10531_v41  ;;  %v18313_v41 = vld [vmem:[#allocation2 + $0x1a70] sm:$0xf0]  ;;  %v18586_v39 = vld [vmem:[#allocation2 + $0x22f8] sm:$0xf0] }
 0x516   :  { %10808 = vmatpush.bf16.msrb.mxu3 %v15326_v10  ;;  %v15213_v10 = vld [vmem:[#allocation2 + $0x1ac8] sm:$0xf]  ;;  %v18460_v55 = vld [vmem:[#allocation2 + $0x1f08] sm:$0xf0] }
 0x517   :  { %10770 = vmatpush.bf16.msrb.mxu0 %v14626_v16  ;;  %v19651_v36 = vadd.f32 %v10556_v9, %v10544_v44  ;;  %v14766_v16 = vor.u32 %v18215_v49, %v14765_v20  ;;  %v15214_v62 = vor.u32 %v18327_v46, %v15213_v10  ;;  %v14934_v20 = vor.u32 %v18257_v15, %v14933_v27  ;;  %v15549_v9 = vld [vmem:[#allocation2 + $0x1d68] sm:$0xf]  ;;  %v18411_v10 = vld [vmem:[#allocation2 + $0x1d80] sm:$0xf0]  ;;  %v15493_v27 = vld [vmem:[#allocation2 + $0x1cf8] sm:$0xf] }
 0x518   :  { %10783 = vmatpush.bf16.msrb.mxu1 %v14850_v42  ;;  %v14990_v42 = vor.u32 %v18271_v5, %v14989_v40  ;;  %v15578_v40 = vor.u32 %v18418_v50, %v15577_v6  ;;  %v15773_v46 = vld [vmem:[#allocation2 + $0x1f28] sm:$0xf]  ;;  %v18565_v6 = vld [vmem:[#allocation2 + $0x2250] sm:$0xf0] }
 0x519   :  { %10796 = vmatpush.bf16.msrb.mxu2 %v15074_v51  ;;  %v14513_v51 = vld [vmem:[#allocation2 + $0x1550] sm:$0xf]  ;;  %v15997_v45 = vld [vmem:[#allocation2 + $0x20e8] sm:$0xf] }
 0x51a   :  { %10809 = vmatpush.bf16.msrb.mxu3 %v15298_v53  ;;  %v18208_v53 = vld [vmem:[#allocation2 + $0x1728] sm:$0xf0]  ;;  %v14514_v29 = vor.u32 %v18152_v43, %v14513_v51  ;;  %v18579_v51 = vld [vmem:[#allocation2 + $0x22c0] sm:$0xf0]  ;;  %v15550_v43 = vor.u32 %v18411_v10, %v15549_v9  ;;  %v15437_v10 = vld [vmem:[#allocation2 + $0x1c88] sm:$0xf] }
 0x51b   :  { %10771 = vmatpush.bf16.msrb.mxu0 %v14598_v4  ;;  %v14738_v4 = vor.u32 %v18208_v53, %v14737_v24  ;;  %v10545_v13 = vpop.f32.mrf.mxu2  ;;  %v15521_v53 = vld [vmem:[#allocation2 + $0x1d30] sm:$0xf] }
 0x51c   :  { %10784 = vmatpush.bf16.msrb.mxu1 %v14822_v25  ;;  %v14709_v25 = vld [vmem:[#allocation2 + $0x16d8] sm:$0xf]  ;;  %v10558_v3 = vpop.f32.mrf.mxu3 }
 0x51d   :  { %10797 = vmatpush.bf16.msrb.mxu2 %v15046_v57  ;;  %v18201_v57 = vld [vmem:[#allocation2 + $0x16f0] sm:$0xf0] }
 0x51e   :  { %10810 = vmatpush.bf16.msrb.mxu3 %v15270_v37  ;;  %v15157_v37 = vld [vmem:[#allocation2 + $0x1a58] sm:$0xf]  ;;  %v14710_v1 = vor.u32 %v18201_v57, %v14709_v25  ;;  %v15746_v25 = vor.u32 %v18460_v55, %v15745_v56 }
 0x51f   :  { %10772 = vmatpush.bf16.msrb.mxu0 %v14570_v34  ;;  %v14486_v34 = vor.u32 %v18145_v18, %v14485_v17  ;;  %v15158_v49 = vor.u32 %v18313_v41, %v15157_v37  ;;  %v18516_v17 = vld [vmem:[#allocation2 + $0x20c8] sm:$0xf0]  ;;  %v16193_v18 = vld [vmem:[#allocation2 + $0x2270] sm:$0xf]  ;;  %v18453_v37 = vld [vmem:[#allocation2 + $0x1ed0] sm:$0xf0] }
 0x520   :  { %10785 = vmatpush.bf16.msrb.mxu1 %v14794_v11  ;;  %v18474_v11 = vld [vmem:[#allocation2 + $0x1f78] sm:$0xf0]  ;;  %v15941_v41 = vld [vmem:[#allocation2 + $0x2078] sm:$0xf] }
 0x521   :  { %10798 = vmatpush.bf16.msrb.mxu2 %v15018_v54  ;;  %v16025_v54 = vld [vmem:[#allocation2 + $0x2120] sm:$0xf]  ;;  %v15802_v5 = vor.u32 %v18474_v11, %v15801_v14 }
 0x522   :  { %10811 = vmatpush.bf16.msrb.mxu3 %v15242_v63  ;;  %v16249_v63 = vld [vmem:[#allocation2 + $0x22e0] sm:$0xf]  ;;  %v16026_v44 = vor.u32 %v18530_v61, %v16025_v54  ;;  %v18390_v54 = vld [vmem:[#allocation2 + $0x1cd8] sm:$0xf0] }
 0x523   :  { %10773 = vmatpush.bf16.msrb.mxu0 %v14542_v48  ;;  %v16250_v58 = vor.u32 %v18586_v39, %v16249_v63  ;;  %v18467_v48 = vld [vmem:[#allocation2 + $0x1f40] sm:$0xf0]  ;;  %v15465_v11 = vld [vmem:[#allocation2 + $0x1cc0] sm:$0xf]  ;;  %v18446_v63 = vld [vmem:[#allocation2 + $0x1e98] sm:$0xf0] }
 0x524   :  { %10786 = vmatpush.bf16.msrb.mxu1 %v14766_v16  ;;  %v18523_v16 = vld [vmem:[#allocation2 + $0x2100] sm:$0xf0]  ;;  %v15774_v24 = vor.u32 %v18467_v48, %v15773_v46  ;;  %v15689_v61 = vld [vmem:[#allocation2 + $0x1e80] sm:$0xf] }
 0x525   :  { %10799 = vmatpush.bf16.msrb.mxu2 %v14990_v42  ;;  %v16221_v42 = vld [vmem:[#allocation2 + $0x22a8] sm:$0xf]  ;;  %v15913_v39 = vld [vmem:[#allocation2 + $0x2040] sm:$0xf]  ;;  %v18383_v46 = vld [vmem:[#allocation2 + $0x1ca0] sm:$0xf0] }
 0x526   :  { %10812 = vmatpush.bf16.msrb.mxu3 %v15214_v62  ;;  %v15998_v62 = vor.u32 %v18523_v16, %v15997_v45  ;;  %v16222_v28 = vor.u32 %v18579_v51, %v16221_v42  ;;  %v18439_v16 = vld [vmem:[#allocation2 + $0x1e60] sm:$0xf0]  ;;  %v15885_v42 = vld [vmem:[#allocation2 + $0x2008] sm:$0xf]  ;;  %v15438_v56 = vor.u32 %v18383_v46, %v15437_v10  ;;  %v18810_v10 = vld [vmem:[#allocation2 + $0x29f8] sm:$0xf0] }
 0x527   :  { %10774 = vmatpush.bf16.msrb.mxu0 %v14514_v29  ;;  %v15969_v29 = vld [vmem:[#allocation2 + $0x20b0] sm:$0xf]  ;;  %v18495_v51 = vld [vmem:[#allocation2 + $0x2020] sm:$0xf0] }
 0x528   :  { %10787 = vmatpush.bf16.msrb.mxu1 %v14738_v4  ;;  %v18572_v4 = vld [vmem:[#allocation2 + $0x2288] sm:$0xf0]  ;;  %v15970_v57 = vor.u32 %v18516_v17, %v15969_v29  ;;  %v15886_v17 = vor.u32 %v18495_v51, %v15885_v42  ;;  %v18635_v42 = vld [vmem:[#allocation2 + $0x2480] sm:$0xf0]  ;;  %v16669_v51 = vld [vmem:[#allocation2 + $0x2628] sm:$0xf] }
 0x529   :  { %10800 = vmatpush.bf16.msrb.mxu2 %v14962_v23  ;;  %v15522_v23 = vor.u32 %v18404_v35, %v15521_v53  ;;  %v16194_v15 = vor.u32 %v18572_v4, %v16193_v18  ;;  %v18551_v53 = vld [vmem:[#allocation2 + $0x21e0] sm:$0xf0]  ;;  %v15409_v18 = vld [vmem:[#allocation2 + $0x1c50] sm:$0xf]  ;;  %v18376_v4 = vld [vmem:[#allocation2 + $0x1c68] sm:$0xf0] }
 0x52a   :  { %10813 = vmatpush.bf16.msrb.mxu3 %v15186_v31  ;;  %v15717_v31 = vld [vmem:[#allocation2 + $0x1eb8] sm:$0xf] }
 0x52b   :  { %10775 = vmatpush.bf16.msrb.mxu0 %v14486_v34  ;;  %v10569_v13 = vpop.f32.mrf.mxu0  ;;  %v15718_v3 = vor.u32 %v18453_v37, %v15717_v31  ;;  %v16081_v31 = vld [vmem:[#allocation2 + $0x2190] sm:$0xf]  ;;  %v15410_v37 = vor.u32 %v18376_v4, %v15409_v18  ;;  %v18628_v4 = vld [vmem:[#allocation2 + $0x2448] sm:$0xf0] }
 0x52c   :  { %10788 = vmatpush.bf16.msrb.mxu1 %v14710_v1  ;;  %v10582_v14 = vpop.f32.mrf.mxu1  ;;  %v16417_v18 = vld [vmem:[#allocation2 + $0x2430] sm:$0xf] }
 0x52d   :  { %10801 = vmatpush.bf16.msrb.mxu2 %v14934_v20 }
 0x52e   :  { %10814 = vmatpush.bf16.msrb.mxu3 %v15158_v49  ;;  %10776 = vmatmul.bf16.vlgmr.msrb.gmra.mxu0 %v19383_v26  ;;  %v18397_v26 = vld [vmem:[#allocation2 + $0x1d10] sm:$0xf0]  ;;  %v18502_v49 = vld [vmem:[#allocation2 + $0x2058] sm:$0xf0] }
 0x52f   :  { %10820 = vmatpush.bf16.msra.mxu0 %v15578_v40  ;;  %10789 = vmatmul.bf16.vlgmr.msrb.gmra.mxu1 %v19391_v33  ;;  %v16165_v33 = vld [vmem:[#allocation2 + $0x2238] sm:$0xf]  ;;  %v15494_v50 = vor.u32 %v18397_v26, %v15493_v27  ;;  %v16137_v40 = vld [vmem:[#allocation2 + $0x2200] sm:$0xf]  ;;  %v15914_v9 = vor.u32 %v18502_v49, %v15913_v39  ;;  %v15857_v27 = vld [vmem:[#allocation2 + $0x1fd0] sm:$0xf] }
 0x530   :  { %10833 = vmatpush.bf16.msra.mxu1 %v15802_v5  ;;  %10802 = vmatmul.bf16.vlgmr.msrb.gmra.mxu2 %v19387_v32  ;;  %v18509_v32 = vld [vmem:[#allocation2 + $0x2090] sm:$0xf0]  ;;  %v16166_v1 = vor.u32 %v18565_v6, %v16165_v33  ;;  %v18558_v5 = vld [vmem:[#allocation2 + $0x2218] sm:$0xf0]  ;;  %v18488_v26 = vld [vmem:[#allocation2 + $0x1fe8] sm:$0xf0] }
 0x531   :  { %10846 = vmatpush.bf16.msra.mxu2 %v16026_v44  ;;  %10815 = vmatmul.bf16.vlgmr.msrb.gmra.mxu3 %v19395_v59  ;;  %v10570_v59 = vadd.f32 %v10569_v13, %v19651_v36  ;;  %v15942_v34 = vor.u32 %v18509_v32, %v15941_v41  ;;  %v15466_v44 = vor.u32 %v18390_v54, %v15465_v11  ;;  %v15381_v41 = vld [vmem:[#allocation2 + $0x1c18] sm:$0xf]  ;;  %v18369_v32 = vld [vmem:[#allocation2 + $0x1c30] sm:$0xf0]  ;;  %v18698_v49 = vld [vmem:[#allocation2 + $0x2678] sm:$0xf0] }
 0x532   :  { %10859 = vmatpush.bf16.msra.mxu3 %v16250_v58  ;;  %v15690_v36 = vor.u32 %v18446_v63, %v15689_v61  ;;  %v15661_v58 = vld [vmem:[#allocation2 + $0x1e48] sm:$0xf]  ;;  %v16138_v48 = vor.u32 %v18558_v5, %v16137_v40  ;;  %v15858_v33 = vor.u32 %v18488_v26, %v15857_v27  ;;  %v15605_v6 = vld [vmem:[#allocation2 + $0x1dd8] sm:$0xf]  ;;  %v18537_v11 = vld [vmem:[#allocation2 + $0x2170] sm:$0xf0]  ;;  %v15382_v39 = vor.u32 %v18369_v32, %v15381_v41 }
 0x533   :  { %10821 = vmatpush.bf16.msra.mxu0 %v15550_v43  ;;  %v10583_v20 = vadd.f32 %v10582_v14, %v10570_v59  ;;  %v10595_v45 = vpop.f32.mrf.mxu2  ;;  %v10571_v35 = vpop.f32.mrf.mxu0  ;;  %v15662_v29 = vor.u32 %v18439_v16, %v15661_v58  ;;  %v18425_v59 = vld [vmem:[#allocation2 + $0x1df0] sm:$0xf0]  ;;  %v16473_v61 = vld [vmem:[#allocation2 + $0x24a0] sm:$0xf]  ;;  %v18754_v5 = vld [vmem:[#allocation2 + $0x2838] sm:$0xf0] }
 0x534   :  { %10834 = vmatpush.bf16.msra.mxu1 %v15774_v24  ;;  %v10608_v24 = vpop.f32.mrf.mxu3  ;;  %v16921_v40 = vld [vmem:[#allocation2 + $0x2820] sm:$0xf]  ;;  %v16445_v16 = vld [vmem:[#allocation2 + $0x2468] sm:$0xf]  ;;  %v16865_v27 = vld [vmem:[#allocation2 + $0x27b0] sm:$0xf] }
 0x535   :  { %10847 = vmatpush.bf16.msra.mxu2 %v15998_v62  ;;  %v10596_v43 = vadd.f32 %v10595_v45, %v10583_v20  ;;  %v16109_v62 = vld [vmem:[#allocation2 + $0x21c8] sm:$0xf]  ;;  %v16697_v20 = vld [vmem:[#allocation2 + $0x2660] sm:$0xf]  ;;  %v16922_v45 = vor.u32 %v18754_v5, %v16921_v40  ;;  %v18740_v26 = vld [vmem:[#allocation2 + $0x27c8] sm:$0xf0] }
 0x536   :  { %10860 = vmatpush.bf16.msra.mxu3 %v16222_v28  ;;  %v10584_v28 = vpop.f32.mrf.mxu1  ;;  %v17117_v35 = vld [vmem:[#allocation2 + $0x29a8] sm:$0xf]  ;;  %v16389_v41 = vld [vmem:[#allocation2 + $0x23f8] sm:$0xf]  ;;  %v18670_v5 = vld [vmem:[#allocation2 + $0x2598] sm:$0xf0] }
 0x537   :  { %10822 = vmatpush.bf16.msra.mxu0 %v15522_v23  ;;  %v19658_v55 = vadd.f32 %v10608_v24, %v10596_v43  ;;  %v15633_v23 = vld [vmem:[#allocation2 + $0x1e10] sm:$0xf]  ;;  %v18691_v24 = vld [vmem:[#allocation2 + $0x2640] sm:$0xf0]  ;;  %v16446_v28 = vor.u32 %v18635_v42, %v16445_v16  ;;  %v16333_v16 = vld [vmem:[#allocation2 + $0x2388] sm:$0xf] }
 0x538   :  { %10835 = vmatpush.bf16.msra.mxu1 %v15746_v25  ;;  %v16110_v25 = vor.u32 %v18551_v53, %v16109_v62  ;;  %v16893_v62 = vld [vmem:[#allocation2 + $0x27e8] sm:$0xf]  ;;  %v18747_v53 = vld [vmem:[#allocation2 + $0x2800] sm:$0xf0] }
 0x539   :  { %10848 = vmatpush.bf16.msra.mxu2 %v15970_v57  ;;  %v18432_v57 = vld [vmem:[#allocation2 + $0x1e28] sm:$0xf0]  ;;  %v18607_v42 = vld [vmem:[#allocation2 + $0x23a0] sm:$0xf0] }
 0x53a   :  { %10861 = vmatpush.bf16.msra.mxu3 %v16194_v15  ;;  %v18544_v15 = vld [vmem:[#allocation2 + $0x21a8] sm:$0xf0]  ;;  %v15634_v13 = vor.u32 %v18432_v57, %v15633_v23  ;;  %v16641_v23 = vld [vmem:[#allocation2 + $0x25f0] sm:$0xf] }
 0x53b   :  { %10823 = vmatpush.bf16.msra.mxu0 %v15494_v50  ;;  %v15829_v50 = vld [vmem:[#allocation2 + $0x1f98] sm:$0xf]  ;;  %v16082_v14 = vor.u32 %v18544_v15, %v16081_v31  ;;  %v10597_v54 = vpop.f32.mrf.mxu2  ;;  %v18684_v57 = vld [vmem:[#allocation2 + $0x2608] sm:$0xf0]  ;;  %v17089_v31 = vld [vmem:[#allocation2 + $0x2970] sm:$0xf] }
 0x53c   :  { %10836 = vmatpush.bf16.msra.mxu1 %v15718_v3  ;;  %v18481_v3 = vld [vmem:[#allocation2 + $0x1fb0] sm:$0xf0]  ;;  %v10610_v63 = vpop.f32.mrf.mxu3  ;;  %v18796_v15 = vld [vmem:[#allocation2 + $0x2988] sm:$0xf0]  ;;  %v16642_v32 = vor.u32 %v18684_v57, %v16641_v23 }
 0x53d   :  { %10849 = vmatpush.bf16.msra.mxu2 %v15942_v34  ;;  %v16053_v34 = vld [vmem:[#allocation2 + $0x2158] sm:$0xf]  ;;  %v16585_v63 = vld [vmem:[#allocation2 + $0x2580] sm:$0xf] }
 0x53e   :  { %10862 = vmatpush.bf16.msra.mxu3 %v16166_v1  ;;  %v18642_v1 = vld [vmem:[#allocation2 + $0x24b8] sm:$0xf0]  ;;  %v16054_v46 = vor.u32 %v18537_v11, %v16053_v34  ;;  %v18789_v34 = vld [vmem:[#allocation2 + $0x2950] sm:$0xf0] }
 0x53f   :  { %10824 = vmatpush.bf16.msra.mxu0 %v15466_v44  ;;  %v15606_v44 = vor.u32 %v18425_v59, %v15605_v6  ;;  %v16474_v58 = vor.u32 %v18642_v1, %v16473_v61  ;;  %v18919_v6 = vld [vmem:[#allocation5] sm:$0xff] }
 0x540   :  { %10837 = vmatpush.bf16.msra.mxu1 %v15690_v36  ;;  %v15830_v36 = vor.u32 %v18481_v3, %v15829_v50  ;;  %v1820_v59 = vperm.slane %v18919_v6, 6  ;;  %v17090_v50 = vor.u32 %v18796_v15, %v17089_v31  ;;  %v17061_v3 = vld [vmem:[#allocation2 + $0x2938] sm:$0xf]  ;;  %v16361_v1 = vld [vmem:[#allocation2 + $0x23c0] sm:$0xf] }
 0x541   :  { %10850 = vmatpush.bf16.msra.mxu2 %v15914_v9  ;;  %v17145_v9 = vld [vmem:[#allocation2 + $0x29e0] sm:$0xf]  ;;  %v17062_v40 = vor.u32 %v18789_v34, %v17061_v3  ;;  %v16529_v31 = vld [vmem:[#allocation2 + $0x2510] sm:$0xf] }
 0x542   :  { %10863 = vmatpush.bf16.msra.mxu3 %v16138_v48  ;;  %v16698_v48 = vor.u32 %v18698_v49, %v16697_v20  ;;  %v17146_v43 = vor.u32 %v18810_v10, %v17145_v9  ;;  %v18614_v20 = vld [vmem:[#allocation2 + $0x23d8] sm:$0xf0]  ;;  %v17033_v9 = vld [vmem:[#allocation2 + $0x2900] sm:$0xf] }
 0x543   :  { %10825 = vmatpush.bf16.msra.mxu0 %v15438_v56  ;;  %v18803_v56 = vld [vmem:[#allocation2 + $0x29c0] sm:$0xf0]  ;;  %v18782_v10 = vld [vmem:[#allocation2 + $0x2918] sm:$0xf0] }
 0x544   :  { %10838 = vmatpush.bf16.msra.mxu1 %v15662_v29  ;;  %v16670_v29 = vor.u32 %v18691_v24, %v16669_v51  ;;  %v16557_v51 = vld [vmem:[#allocation2 + $0x2548] sm:$0xf]  ;;  %v17034_v24 = vor.u32 %v18782_v10, %v17033_v9  ;;  %v18842_v9 = vld [vmem:[#allocation7 + $0xf8] sm:$0xff]  ;;  %v18817_v10 = vld [vmem:[#allocation7 + $0x30] sm:$0xff] }
 0x545   :  { %10851 = vmatpush.bf16.msra.mxu2 %v15886_v17  ;;  %v16894_v17 = vor.u32 %v18747_v53, %v16893_v62  ;;  %v18663_v62 = vld [vmem:[#allocation2 + $0x2560] sm:$0xf0]  ;;  %v16781_v53 = vld [vmem:[#allocation2 + $0x2708] sm:$0xf] }
 0x546   :  { %10864 = vmatpush.bf16.msra.mxu3 %v16110_v25  ;;  %v17118_v25 = vor.u32 %v18803_v56, %v17117_v35  ;;  %v18719_v35 = vld [vmem:[#allocation2 + $0x2720] sm:$0xf0] }
 0x547   :  { %10826 = vmatpush.bf16.msra.mxu0 %v15410_v37  ;;  %v16418_v37 = vor.u32 %v18628_v4, %v16417_v18  ;;  %v16334_v18 = vor.u32 %v18607_v42, %v16333_v16  ;;  %v16782_v57 = vor.u32 %v18719_v35, %v16781_v53  ;;  %v18824_v16 = vld [vmem:[#allocation7 + $0x68] sm:$0xff]  ;;  %v18814_v35 = vld [vmem:[#allocation7 + $0x18] sm:$0xff] }
 0x548   :  { %10839 = vmatpush.bf16.msra.mxu1 %v15634_v13  ;;  %v16866_v13 = vor.u32 %v18740_v26, %v16865_v27  ;;  %v16305_v27 = vld [vmem:[#allocation2 + $0x2350] sm:$0xf]  ;;  %v18600_v26 = vld [vmem:[#allocation2 + $0x2368] sm:$0xf0] }
 0x549   :  { %10852 = vmatpush.bf16.msra.mxu2 %v15858_v33  ;;  %v16613_v33 = vld [vmem:[#allocation2 + $0x25b8] sm:$0xf]  ;;  %v16306_v6 = vor.u32 %v18600_v26, %v16305_v27  ;;  %v18832_v42 = vld [vmem:[#allocation7 + $0xa8] sm:$0xff] }
 0x54a   :  { %10865 = vmatpush.bf16.msra.mxu3 %v16082_v14  ;;  %v16837_v14 = vld [vmem:[#allocation2 + $0x2778] sm:$0xf] }
 0x54b   :  { %10827 = vmatpush.bf16.msra.mxu0 %v15382_v39  ;;  %v10621_v11 = vpop.f32.mrf.mxu0  ;;  %v18829_v26 = vld [vmem:[#allocation7 + $0x90] sm:$0xff] }
 0x54c   :  { %10840 = vmatpush.bf16.msra.mxu1 %v15606_v44  ;;  %v10622_v39 = vadd.f32 %v10621_v11, %v1820_v59  ;;  %v10634_v49 = vpop.f32.mrf.mxu1  ;;  %v16809_v44 = vld [vmem:[#allocation2 + $0x2740] sm:$0xf]  ;;  %v16725_v11 = vld [vmem:[#allocation2 + $0x2698] sm:$0xf] }
 0x54d   :  { %10853 = vmatpush.bf16.msra.mxu2 %v15830_v36  ;;  %v18726_v36 = vld [vmem:[#allocation2 + $0x2758] sm:$0xf0] }
 0x54e   :  { %10866 = vmatpush.bf16.msra.mxu3 %v16054_v46  ;;  %10828 = vmatmul.bf16.vlgmr.msra.gmra.mxu0 %v19401_v38  ;;  %v18621_v38 = vld [vmem:[#allocation2 + $0x2410] sm:$0xf0]  ;;  %v10635_v46 = vadd.f32 %v10634_v49, %v10622_v39 }
 0x54f   :  { %10872 = vmatpush.bf16.msrb.mxu0 %v16474_v58  ;;  %10841 = vmatmul.bf16.vlgmr.msra.gmra.mxu1 %v19405_v60  ;;  %v18733_v60 = vld [vmem:[#allocation2 + $0x2790] sm:$0xf0]  ;;  %v16362_v58 = vor.u32 %v18614_v20, %v16361_v1  ;;  %v16949_v1 = vld [vmem:[#allocation2 + $0x2858] sm:$0xf] }
 0x550   :  { %10885 = vmatpush.bf16.msrb.mxu1 %v16698_v48  ;;  %10854 = vmatmul.bf16.vlgmr.msra.gmra.mxu2 %v19403_v21  ;;  %v18677_v21 = vld [vmem:[#allocation2 + $0x25d0] sm:$0xf0]  ;;  %v16838_v61 = vor.u32 %v18733_v60, %v16837_v14  ;;  %v16586_v48 = vor.u32 %v18670_v5, %v16585_v63  ;;  %v16501_v60 = vld [vmem:[#allocation2 + $0x24d8] sm:$0xf]  ;;  %v18818_v5 = vld [vmem:[#allocation7 + $0x38] sm:$0xff] }
 0x551   :  { %10898 = vmatpush.bf16.msrb.mxu2 %v16922_v45  ;;  %10867 = vmatmul.bf16.vlgmr.msra.gmra.mxu3 %v19407_v47  ;;  %v16390_v47 = vor.u32 %v18621_v38, %v16389_v41  ;;  %v16614_v54 = vor.u32 %v18677_v21, %v16613_v33  ;;  %v16810_v45 = vor.u32 %v18726_v36, %v16809_v44  ;;  %v18656_v41 = vld [vmem:[#allocation2 + $0x2528] sm:$0xf0]  ;;  %v16977_v38 = vld [vmem:[#allocation2 + $0x2890] sm:$0xf]  ;;  %v16277_v21 = vld [vmem:[#allocation2 + $0x2318] sm:$0xf] }
 0x552   :  { %10911 = vmatpush.bf16.msrb.mxu3 %v17146_v43  ;;  %v18768_v33 = vld [vmem:[#allocation2 + $0x28a8] sm:$0xf0]  ;;  %v16530_v59 = vor.u32 %v18656_v41, %v16529_v31  ;;  %v18593_v14 = vld [vmem:[#allocation2 + $0x2330] sm:$0xf0]  ;;  %v18826_v44 = vld [vmem:[#allocation7 + $0x78] sm:$0xff] }
 0x553   :  { %10873 = vmatpush.bf16.msrb.mxu0 %v16446_v28  ;;  %v10647_v43 = vpop.f32.mrf.mxu2  ;;  %v10623_v23 = vpop.f32.mrf.mxu0  ;;  %v16978_v34 = vor.u32 %v18768_v33, %v16977_v38  ;;  %v18761_v20 = vld [vmem:[#allocation2 + $0x2870] sm:$0xf0]  ;;  %v16278_v63 = vor.u32 %v18593_v14, %v16277_v21  ;;  %v18834_v36 = vld [vmem:[#allocation7 + $0xb8] sm:$0xff]  ;;  %v18827_v21 = vld [vmem:[#allocation7 + $0x80] sm:$0xff]  ;;  %v10925_v14 = vmax.f32 %v19494_v19, 0.0 }
 0x554   :  { %10886 = vmatpush.bf16.msrb.mxu1 %v16670_v29  ;;  %v10648_v56 = vadd.f32 %v10647_v43, %v10635_v46  ;;  %v10660_v28 = vpop.f32.mrf.mxu3  ;;  %v17005_v29 = vld [vmem:[#allocation2 + $0x28c8] sm:$0xf]  ;;  %v10636_v15 = vpop.f32.mrf.mxu1  ;;  %v18825_v46 = vld [vmem:[#allocation7 + $0x70] sm:$0xff]  ;;  %v18820_v41 = vld [vmem:[#allocation7 + $0x48] sm:$0xff] }
 0x555   :  { %10899 = vmatpush.bf16.msrb.mxu2 %v16894_v17  ;;  %v18775_v17 = vld [vmem:[#allocation2 + $0x28e0] sm:$0xf0]  ;;  %v18815_v43 = vld [vmem:[#allocation7 + $0x20] sm:$0xff]  ;;  %v18837_v15 = vld [vmem:[#allocation7 + $0xd0] sm:$0xff] }
 0x556   :  { %10912 = vmatpush.bf16.msrb.mxu3 %v17118_v25  ;;  %v19664_v4 = vadd.f32 %v10660_v28, %v10648_v56  ;;  %v16558_v25 = vor.u32 %v18663_v62, %v16557_v51  ;;  %v18840_v51 = vld [vmem:[#allocation7 + $0xe8] sm:$0xff]  ;;  %v18831_v62 = vld [vmem:[#allocation7 + $0xa0] sm:$0xff]  ;;  %v18822_v56 = vld [vmem:[#allocation7 + $0x58] sm:$0xff] }
 0x557   :  { %10874 = vmatpush.bf16.msrb.mxu0 %v16418_v37  ;;  %v17006_v37 = vor.u32 %v18775_v17, %v17005_v29  ;;  %v18830_v28 = vld [vmem:[#allocation7 + $0x98] sm:$0xff]  ;;  %v18836_v38 = vld [vmem:[#allocation7 + $0xc8] sm:$0xff]  ;;  %v18857_v19 = vld [vmem:[#allocation7 + $0x170] sm:$0xff] }
 0x558   :  { %10887 = vmatpush.bf16.msrb.mxu1 %v16642_v32  ;;  %v16753_v32 = vld [vmem:[#allocation2 + $0x26d0] sm:$0xf]  ;;  %v18838_v17 = vld [vmem:[#allocation7 + $0xd8] sm:$0xff] }
 0x559   :  { %10900 = vmatpush.bf16.msrb.mxu2 %v16866_v13  ;;  %v18712_v13 = vld [vmem:[#allocation2 + $0x26e8] sm:$0xf0] }
 0x55a   :  { %10913 = vmatpush.bf16.msrb.mxu3 %v17090_v50  ;;  %v16754_v50 = vor.u32 %v18712_v13, %v16753_v32  ;;  %v18828_v32 = vld [vmem:[#allocation7 + $0x88] sm:$0xff] }
 0x55b   :  { %10875 = vmatpush.bf16.msrb.mxu0 %v16390_v47  ;;  %v10649_v3 = vpop.f32.mrf.mxu2  ;;  %v18649_v47 = vld [vmem:[#allocation2 + $0x24f0] sm:$0xf0] }
 0x55c   :  { %10888 = vmatpush.bf16.msrb.mxu1 %v16614_v54  ;;  %v18705_v54 = vld [vmem:[#allocation2 + $0x26b0] sm:$0xf0]  ;;  %v16502_v39 = vor.u32 %v18649_v47, %v16501_v60  ;;  %v10926_v60 = vmax.f32 %v19535_v52, 0.0  ;;  %v18835_v3 = vld [vmem:[#allocation7 + $0xc0] sm:$0xff]  ;;  %v10927_v47 = vmax.f32 %v19576_v30, 0.0 }
 0x55d   :  { %10901 = vmatpush.bf16.msrb.mxu2 %v16838_v61  ;;  %v10662_v61 = vpop.f32.mrf.mxu3  ;;  %v16726_v49 = vor.u32 %v18705_v54, %v16725_v11  ;;  %v18858_v11 = vld [vmem:[#allocation7 + $0x178] sm:$0xff]  ;;  %v18848_v52 = vld [vmem:[#allocation7 + $0x128] sm:$0xff] }
 0x55e   :  { %10914 = vmatpush.bf16.msrb.mxu3 %v17062_v40  ;;  %v16950_v40 = vor.u32 %v18761_v20, %v16949_v1  ;;  %v10932_v61 = vpack.c.bf16 %v10925_v14, %v10925_v14  ;;  %v18849_v1 = vld [vmem:[#allocation7 + $0x130] sm:$0xff]  ;;  %v10934_v20 = vpack.c.bf16 %v10927_v47, %v10927_v47  ;;  %v18856_v30 = vld [vmem:[#allocation7 + $0x168] sm:$0xff] }
 0x55f   :  { %10876 = vmatpush.bf16.msrb.mxu0 %v16362_v58  ;;  %v18833_v58 = vld [vmem:[#allocation7 + $0xb0] sm:$0xff] }
 0x560   :  { %10889 = vmatpush.bf16.msrb.mxu1 %v16586_v48  ;;  %v18841_v48 = vld [vmem:[#allocation7 + $0xf0] sm:$0xff] }
 0x561   :  { %10902 = vmatpush.bf16.msrb.mxu2 %v16810_v45  ;;  %v18816_v45 = vld [vmem:[#allocation7 + $0x28] sm:$0xff] }
 0x562   :  { %10915 = vmatpush.bf16.msrb.mxu3 %v17034_v24 }
 0x563   :  { %10877 = vmatpush.bf16.msrb.mxu0 %v16334_v18 }
 0x564   :  { %10890 = vmatpush.bf16.msrb.mxu1 %v16558_v25  ;;  %v18813_v25 = vld [vmem:[#allocation7 + $0x10] sm:$0xff] }
 0x565   :  { %10903 = vmatpush.bf16.msrb.mxu2 %v16782_v57 }
 0x566   :  { %10916 = vmatpush.bf16.msrb.mxu3 %v17006_v37  ;;  %v18812_v37 = vld [vmem:[#allocation7 + $0x8] sm:$0xff] }
 0x567   :  { %10878 = vmatpush.bf16.msrb.mxu0 %v16306_v6  ;;  %v18811_v6 = vld [vmem:[#allocation7] sm:$0xff] }
 0x568   :  { %10891 = vmatpush.bf16.msrb.mxu1 %v16530_v59  ;;  %v10924_v59 = vmax.f32 %v19453_v22, 0.0  ;;  %v10933_v22 = vpack.c.bf16 %v10926_v60, %v10926_v60 }
 0x569   :  { %10904 = vmatpush.bf16.msrb.mxu2 %v16754_v50  ;;  %v18819_v50 = vld [vmem:[#allocation7 + $0x40] sm:$0xff] }
 0x56a   :  { %10917 = vmatpush.bf16.msrb.mxu3 %v16978_v34  ;;  %v18850_v34 = vld [vmem:[#allocation7 + $0x138] sm:$0xff]  ;;  %v10931_v54 = vpack.c.bf16 %v10924_v59, %v10924_v59 }
 0x56b   :  { %10879 = vmatpush.bf16.msrb.mxu0 %v16278_v63  ;;  %v10673_v24 = vpop.f32.mrf.mxu0 }
 0x56c   :  { %10892 = vmatpush.bf16.msrb.mxu1 %v16502_v39 }
 0x56d   :  { %10905 = vmatpush.bf16.msrb.mxu2 %v16726_v49  ;;  %v18847_v49 = vld [vmem:[#allocation7 + $0x120] sm:$0xff] }
 0x56e   :  { %10918 = vmatpush.bf16.msrb.mxu3 %v16950_v40  ;;  %10880 = vmatmul.bf16.vlgmr.msrb.gmra.mxu0 %v19413_v2  ;;  %v18823_v2 = vld [vmem:[#allocation7 + $0x60] sm:$0xff] }
 0x56f   :  { %11390 = vmatpush.bf16.msra.mxu0 %v18818_v5  ;;  %10893 = vmatmul.bf16.vlgmr.msrb.gmra.mxu1 %v19417_v8  ;;  %v10674_v8 = vadd.f32 %v10673_v24, %v19664_v4  ;;  %v18821_v4 = vld [vmem:[#allocation7 + $0x50] sm:$0xff]  ;;  %v18855_v5 = vld [vmem:[#allocation7 + $0x160] sm:$0xff]  ;;  %v18852_v24 = vld [vmem:[#allocation7 + $0x148] sm:$0xff] }
 0x570   :  { %11403 = vmatpush.bf16.msra.mxu1 %v18826_v44  ;;  %10906 = vmatmul.bf16.vlgmr.msrb.gmra.mxu2 %v19415_v7  ;;  %v10686_v7 = vpop.f32.mrf.mxu1 }
 0x571   :  { %11416 = vmatpush.bf16.msra.mxu2 %v18834_v36  ;;  %10919 = vmatmul.bf16.vlgmr.msrb.gmra.mxu3 %v19419_v12  ;;  %v18839_v12 = vld [vmem:[#allocation7 + $0xe0] sm:$0xff]  ;;  %v10687_v53 = vadd.f32 %v10686_v7, %v10674_v8  ;;  %v18846_v36 = vld [vmem:[#allocation7 + $0x118] sm:$0xff]  ;;  %v10928_v7 = vmax.f32 %v19617_v0, 0.0  ;;  %v18864_v0 = vld [vmem:[#allocation7 + $0x1a8] sm:$0xff] }
 0x572   :  { %11429 = vmatpush.bf16.msra.mxu3 %v18842_v9  ;;  %v18854_v9 = vld [vmem:[#allocation7 + $0x158] sm:$0xff]  ;;  %v18843_v8 = vld [vmem:[#allocation7 + $0x100] sm:$0xff] }
 0x573   :  { %11391 = vmatpush.bf16.msra.mxu0 %v18817_v10  ;;  %v10699_v29 = vpop.f32.mrf.mxu2  ;;  %v10675_v27 = vpop.f32.mrf.mxu0 }
 0x574   :  { %11404 = vmatpush.bf16.msra.mxu1 %v18825_v46  ;;  %v10700_v18 = vadd.f32 %v10699_v29, %v10687_v53  ;;  %v10712_v23 = vpop.f32.mrf.mxu3  ;;  %v10929_v53 = vmax.f32 %v19658_v55, 0.0  ;;  %v18865_v27 = vld [vmem:[#allocation7 + $0x1b0] sm:$0xff]  ;;  %v18863_v55 = vld [vmem:[#allocation7 + $0x1a0] sm:$0xff] }
 0x575   :  { %11417 = vmatpush.bf16.msra.mxu2 %v18833_v58 }
 0x576   :  { %11430 = vmatpush.bf16.msra.mxu3 %v18841_v48  ;;  %v10713_v57 = vadd.f32 %v10712_v23, %v10700_v18 }
 0x577   :  { %11392 = vmatpush.bf16.msra.mxu0 %v18816_v45  ;;  %v18845_v45 = vld [vmem:[#allocation7 + $0x110] sm:$0xff] }
 0x578   :  { %11405 = vmatpush.bf16.msra.mxu1 %v18824_v16  ;;  %v10688_v31 = vpop.f32.mrf.mxu1 }
 0x579   :  { %11418 = vmatpush.bf16.msra.mxu2 %v18832_v42  ;;  %v18862_v31 = vld [vmem:[#allocation7 + $0x198] sm:$0xff] }
 0x57a   :  { %11431 = vmatpush.bf16.msra.mxu3 %v18840_v51  ;;  %v18853_v51 = vld [vmem:[#allocation7 + $0x150] sm:$0xff] }
 0x57b   :  { %11393 = vmatpush.bf16.msra.mxu0 %v18815_v43  ;;  %v10701_v13 = vpop.f32.mrf.mxu2  ;;  %v18844_v43 = vld [vmem:[#allocation7 + $0x108] sm:$0xff] }
 0x57c   :  { %11406 = vmatpush.bf16.msra.mxu1 %v18823_v2  ;;  %v10714_v33 = vpop.f32.mrf.mxu3 }
 0x57d   :  { %11419 = vmatpush.bf16.msra.mxu2 %v18831_v62 }
 0x57e   :  { %11432 = vmatpush.bf16.msra.mxu3 %v18839_v12  ;;  %v18851_v12 = vld [vmem:[#allocation7 + $0x140] sm:$0xff] }
 0x57f   :  { %11394 = vmatpush.bf16.msra.mxu0 %v18814_v35  ;;  %v10935_v35 = vpack.c.bf16 %v10928_v7, %v10928_v7  ;;  %v18872_v7 = vld [vmem:[#allocation10 + $0x28] sm:$0xff] }
 0x580   :  { %11407 = vmatpush.bf16.msra.mxu1 %v18822_v56  ;;  %v10936_v56 = vpack.c.bf16 %v10929_v53, %v10929_v53 }
 0x581   :  { %11420 = vmatpush.bf16.msra.mxu2 %v18830_v28 }
 0x582   :  { %11433 = vmatpush.bf16.msra.mxu3 %v18838_v17 }
 0x583   :  { %11395 = vmatpush.bf16.msra.mxu0 %v18813_v25  ;;  %v18866_v25 = vld [vmem:[#allocation7 + $0x1b8] sm:$0xff] }
 0x584   :  { %11408 = vmatpush.bf16.msra.mxu1 %v18821_v4 }
 0x585   :  { %11421 = vmatpush.bf16.msra.mxu2 %v18829_v26 }
 0x586   :  { %11434 = vmatpush.bf16.msra.mxu3 %v18837_v15 }
 0x587   :  { %11396 = vmatpush.bf16.msra.mxu0 %v18812_v37 }
 0x588   :  { %11409 = vmatpush.bf16.msra.mxu1 %v18820_v41  ;;  %v18861_v41 = vld [vmem:[#allocation7 + $0x190] sm:$0xff] }
 0x589   :  { %11422 = vmatpush.bf16.msra.mxu2 %v18828_v32  ;;  %v18860_v32 = vld [vmem:[#allocation7 + $0x188] sm:$0xff] }
 0x58a   :  { %11435 = vmatpush.bf16.msra.mxu3 %v18836_v38 }
 0x58b   :  { %11397 = vmatpush.bf16.msra.mxu0 %v18811_v6  ;;  %v10725_v63 = vpop.f32.mrf.mxu0 }
 0x58c   :  { %11410 = vmatpush.bf16.msra.mxu1 %v18819_v50  ;;  %v10726_v39 = vadd.f32 %v10725_v63, %v10713_v57  ;;  %v10738_v40 = vpop.f32.mrf.mxu1  ;;  %v18859_v50 = vld [vmem:[#allocation7 + $0x180] sm:$0xff] }
 0x58d   :  { %11423 = vmatpush.bf16.msra.mxu2 %v18827_v21 }
 0x58e   :  { %11436 = vmatpush.bf16.msra.mxu3 %v18835_v3  ;;  %11398 = vmatmul.bf16.vlgmr.msra.gmra.mxu0 %v10931_v54  ;;  %v10739_v44 = vadd.f32 %v10738_v40, %v10726_v39 }
 0x58f   :  { %11442 = vmatpush.bf16.msrb.mxu0 %v18850_v34  ;;  %11411 = vmatmul.bf16.vlgmr.msra.gmra.mxu1 %v10932_v61 }
 0x590   :  { %11455 = vmatpush.bf16.msrb.mxu1 %v18858_v11  ;;  %11424 = vmatmul.bf16.vlgmr.msra.gmra.mxu2 %v10933_v22 }
 0x591   :  { %11437 = vmatmul.bf16.vlgmr.msra.gmra.mxu3 %v10934_v20  ;;  %11468 = vmatpush.bf16.msrb.mxu2 %v18866_v25 }
 0x593   :  { %11443 = vmatpush.bf16.msrb.mxu0 %v18849_v1  ;;  %v10751_v10 = vpop.f32.mrf.mxu2  ;;  %v10727_v48 = vpop.f32.mrf.mxu0 }
 0x594   :  { %11456 = vmatpush.bf16.msrb.mxu1 %v18857_v19  ;;  %v10752_v46 = vadd.f32 %v10751_v10, %v10739_v44  ;;  %v10764_v58 = vpop.f32.mrf.mxu3  ;;  %v10740_v16 = vpop.f32.mrf.mxu1  ;;  %v18906_v10 = vld [vmem:[#allocation8] ss:$0 sm:$0xff] }
 0x595   :  { %11469 = vmatpush.bf16.msrb.mxu2 %v18865_v27  ;;  %v18868_v27 = vld [vmem:[#allocation10 + $0x8] sm:$0xff] }
 0x596   :  { %v10765_v42 = vadd.f32 %v10764_v58, %v10752_v46 }
 0x597   :  { %11444 = vmatpush.bf16.msrb.mxu0 %v18848_v52 }
 0x598   :  { %11457 = vmatpush.bf16.msrb.mxu1 %v18856_v30 }
 0x599   :  { %11470 = vmatpush.bf16.msrb.mxu2 %v18864_v0  ;;  %v18867_v0 = vld [vmem:[#allocation10] sm:$0xff] }
 0x59b   :  { %11445 = vmatpush.bf16.msrb.mxu0 %v18847_v49  ;;  %v10753_v2 = vpop.f32.mrf.mxu2 }
 0x59c   :  { %11458 = vmatpush.bf16.msrb.mxu1 %v18855_v5  ;;  %v10766_v62 = vpop.f32.mrf.mxu3 }
 0x59d   :  { %11471 = vmatpush.bf16.msrb.mxu2 %v18863_v55  ;;  %v18873_v62 = vld [vmem:[#allocation10 + $0x30] sm:$0xff] }
 0x59e   :  { %v18880_v55 = vld [vmem:[#allocation13 + $0x28] sm:$0xff] }
 0x59f   :  { %11446 = vmatpush.bf16.msrb.mxu0 %v18846_v36 }
 0x5a0   :  { %11459 = vmatpush.bf16.msrb.mxu1 %v18854_v9 }
 0x5a1   :  { %11472 = vmatpush.bf16.msrb.mxu2 %v18862_v31  ;;  %v18879_v31 = vld [vmem:[#allocation13 + $0x20] sm:$0xff] }
 0x5a3   :  { %11447 = vmatpush.bf16.msrb.mxu0 %v18845_v45 }
 0x5a4   :  { %11460 = vmatpush.bf16.msrb.mxu1 %v18853_v51 }
 0x5a5   :  { %11473 = vmatpush.bf16.msrb.mxu2 %v18861_v41 }
 0x5a7   :  { %11448 = vmatpush.bf16.msrb.mxu0 %v18844_v43 }
 0x5a8   :  { %11461 = vmatpush.bf16.msrb.mxu1 %v18852_v24 }
 0x5a9   :  { %11474 = vmatpush.bf16.msrb.mxu2 %v18860_v32 }
 0x5ab   :  { %11449 = vmatpush.bf16.msrb.mxu0 %v18843_v8  ;;  %v10777_v28 = vpop.f32.mrf.mxu0 }
 0x5ac   :  { %11462 = vmatpush.bf16.msrb.mxu1 %v18851_v12  ;;  %v10790_v29 = vpop.f32.mrf.mxu1  ;;  %v10778_v38 = vadd.f32 %v10777_v28, %v10765_v42  ;;  %v18874_v42 = vld [vmem:[#allocation10 + $0x38] sm:$0xff]  ;;  %v18869_v28 = vld [vmem:[#allocation10 + $0x10] sm:$0xff] }
 0x5ad   :  { %11475 = vmatpush.bf16.msrb.mxu2 %v18859_v50  ;;  %11551 = vmatpush.bf16.msrb.mxu3 %v18874_v42  ;;  %v18890_v50 = vld [vmem:[#allocation16 + $0x38] sm:$0xff] }
 0x5ae   :  { %11450 = vmatmul.bf16.vlgmr.msrb.gmra.mxu0 %v10935_v35  ;;  %v10791_v21 = vadd.f32 %v10790_v29, %v10778_v38  ;;  %v18871_v35 = vld [vmem:[#allocation10 + $0x20] sm:$0xff] }
 0x5af   :  { %11463 = vmatmul.bf16.vlgmr.msrb.gmra.mxu1 %v10936_v56  ;;  %v18870_v56 = vld [vmem:[#allocation10 + $0x18] sm:$0xff] }
 0x5b0   :  { %11717 = vmatpush.bf16.msra.mxu1 %v18890_v50 }
 0x5b1   :  { %11552 = vmatpush.bf16.msrb.mxu3 %v18873_v62 }
 0x5b3   :  { %v10803_v17 = vpop.f32.mrf.mxu2  ;;  %v10779_v23 = vpop.f32.mrf.mxu0 }
 0x5b4   :  { %v10816_v18 = vpop.f32.mrf.mxu3  ;;  %v10792_v57 = vpop.f32.mrf.mxu1  ;;  %v10804_v14 = vadd.f32 %v10803_v17, %v10791_v21  ;;  %v18889_v21 = vld [vmem:[#allocation16 + $0x30] sm:$0xff] }
 0x5b5   :  { %11553 = vmatpush.bf16.msrb.mxu3 %v18872_v7  ;;  %11718 = vmatpush.bf16.msra.mxu1 %v18889_v21 }
 0x5b6   :  { %v10817_v34 = vadd.f32 %v10816_v18, %v10804_v14  ;;  %v18888_v14 = vld [vmem:[#allocation16 + $0x28] sm:$0xff] }
 0x5b9   :  { %11554 = vmatpush.bf16.msrb.mxu3 %v18871_v35  ;;  %11719 = vmatpush.bf16.msra.mxu1 %v18888_v14 }
 0x5bb   :  { %v10805_v4 = vpop.f32.mrf.mxu2 }
 0x5bc   :  { %v10818_v26 = vpop.f32.mrf.mxu3  ;;  %v18882_v4 = vld [vmem:[#allocation13 + $0x38] sm:$0xff] }
 0x5bd   :  { %11555 = vmatpush.bf16.msrb.mxu3 %v18870_v56  ;;  %11634 = vmatpush.bf16.msra.mxu0 %v18882_v4  ;;  %v18881_v26 = vld [vmem:[#allocation13 + $0x30] sm:$0xff] }
 0x5c1   :  { %11556 = vmatpush.bf16.msrb.mxu3 %v18869_v28  ;;  %11635 = vmatpush.bf16.msra.mxu0 %v18881_v26 }
 0x5c5   :  { %11557 = vmatpush.bf16.msrb.mxu3 %v18868_v27  ;;  %11636 = vmatpush.bf16.msra.mxu0 %v18880_v55 }
 0x5c9   :  { %11558 = vmatpush.bf16.msrb.mxu3 %v18867_v0  ;;  %11637 = vmatpush.bf16.msra.mxu0 %v18879_v31 }
 0x5cb   :  { %v10829_v15 = vpop.f32.mrf.mxu0 }
 0x5cc   :  { %v10842_v37 = vpop.f32.mrf.mxu1  ;;  %v10830_v47 = vadd.f32 %v10829_v15, %v10817_v34  ;;  %v18878_v15 = vld [vmem:[#allocation13 + $0x18] sm:$0xff] }
 0x5cd   :  { %11638 = vmatpush.bf16.msra.mxu0 %v18878_v15  ;;  %v18885_v34 = vld [vmem:[#allocation16 + $0x10] sm:$0xff] }
 0x5ce   :  { %v10843_v11 = vadd.f32 %v10842_v37, %v10830_v47  ;;  %v18877_v37 = vld [vmem:[#allocation13 + $0x10] sm:$0xff]  ;;  %v18907_v47 = vld [vmem:[#allocation11] ss:$0 sm:$0xff] }
 0x5d1   :  { %11639 = vmatpush.bf16.msra.mxu0 %v18877_v37 }
 0x5d3   :  { %v10855_v13 = vpop.f32.mrf.mxu2  ;;  %v10831_v6 = vpop.f32.mrf.mxu0 }
 0x5d4   :  { %v10868_v33 = vpop.f32.mrf.mxu3  ;;  %v10844_v59 = vpop.f32.mrf.mxu1  ;;  %v10856_v54 = vadd.f32 %v10855_v13, %v10843_v11  ;;  %v18876_v6 = vld [vmem:[#allocation13 + $0x8] sm:$0xff] }
 0x5d5   :  { %11640 = vmatpush.bf16.msra.mxu0 %v18876_v6  ;;  %v18875_v59 = vld [vmem:[#allocation13] sm:$0xff] }
 0x5d6   :  { %v10869_v61 = vadd.f32 %v10868_v33, %v10856_v54 }
 0x5d9   :  { %11641 = vmatpush.bf16.msra.mxu0 %v18875_v59 }
 0x5db   :  { %v10857_v60 = vpop.f32.mrf.mxu2 }
 0x5dc   :  { %v10870_v3 = vpop.f32.mrf.mxu3  ;;  %v18887_v60 = vld [vmem:[#allocation16 + $0x20] sm:$0xff] }
 0x5dd   :  { %11720 = vmatpush.bf16.msra.mxu1 %v18887_v60  ;;  %v18886_v3 = vld [vmem:[#allocation16 + $0x18] sm:$0xff] }
 0x5e1   :  { %11721 = vmatpush.bf16.msra.mxu1 %v18886_v3 }
 0x5e5   :  { %11722 = vmatpush.bf16.msra.mxu1 %v18885_v34 }
 0x5eb   :  { %v10881_v22 = vpop.f32.mrf.mxu0 }
 0x5ec   :  { %v10894_v1 = vpop.f32.mrf.mxu1  ;;  %v10882_v20 = vadd.f32 %v10881_v22, %v10869_v61 }
 0x5ee   :  { %v10895_v19 = vadd.f32 %v10894_v1, %v10882_v20  ;;  %v18884_v20 = vld [vmem:[#allocation16 + $0x8] sm:$0xff] }
 0x5ef   :  { %11723 = vmatpush.bf16.msra.mxu1 %v18884_v20 }
 0x5f3   :  { %v10907_v52 = vpop.f32.mrf.mxu2  ;;  %v10883_v39 = vpop.f32.mrf.mxu0 }
 0x5f4   :  { %v10908_v30 = vadd.f32 %v10907_v52, %v10895_v19  ;;  %v10920_v63 = vpop.f32.mrf.mxu3  ;;  %v10896_v49 = vpop.f32.mrf.mxu1  ;;  %v18883_v19 = vld [vmem:[#allocation16] sm:$0xff]  ;;  %v18908_v52 = vld [vmem:[#allocation14] ss:$0 sm:$0xff] }
 0x5f5   :  { %11724 = vmatpush.bf16.msra.mxu1 %v18883_v19 }
 0x5f6   :  { %v10921_v40 = vadd.f32 %v10920_v63, %v10908_v30 }
 0x5f8   :  { %v10930_v5 = vmax.f32 %v10921_v40, 0.0 }
 0x5fa   :  { %v10937_v44 = vpack.c.bf16 %v10930_v5, %v10930_v5  ;;  %v11730_v5 = vlaneseq }
 0x5fb   :  { %v10909_v36 = vpop.f32.mrf.mxu2 }
 0x5fc   :  { %v10922_v9 = vpop.f32.mrf.mxu3  ;;  %11476 = vmatmul.bf16.vlgmr.msrb.gmra.mxu2 %v10937_v44  ;;  %v11731_v44 = vand.u32 127, %v11730_v5  ;;  %v18909_v36 = vld [vmem:[#allocation17] ss:$0 sm:$0xff] }
 0x5fe   :  { %vm11732_vm0 = vcmp.lt.s32.totalorder %v11731_v44, 10 }
 0x60b   :  { %v11399_v46 = vpop.f32.mrf.mxu0 }
 0x60c   :  { %v11400_v58 = vadd.f32 %v18906_v10, %v11399_v46  ;;  %v11412_v48 = vpop.f32.mrf.mxu1 }
 0x60e   :  { %v11413_v45 = vadd.f32 %v11412_v48, %v11400_v58 }
 0x613   :  { %v11425_v16 = vpop.f32.mrf.mxu2  ;;  %v11401_v24 = vpop.f32.mrf.mxu0 }
 0x614   :  { %v11426_v51 = vadd.f32 %v11425_v16, %v11413_v45  ;;  %v11438_v43 = vpop.f32.mrf.mxu3  ;;  %v11414_v2 = vpop.f32.mrf.mxu1 }
 0x616   :  { %v11439_v8 = vadd.f32 %v11438_v43, %v11426_v51 }
 0x61b   :  { %v11427_v12 = vpop.f32.mrf.mxu2 }
 0x61c   :  { %v11440_v53 = vpop.f32.mrf.mxu3 }
 0x62b   :  { %v11451_v29 = vpop.f32.mrf.mxu0 }
 0x62c   :  { %v11452_v17 = vadd.f32 %v11451_v29, %v11439_v8  ;;  %v11464_v18 = vpop.f32.mrf.mxu1 }
 0x62e   :  { %v11465_v23 = vadd.f32 %v11464_v18, %v11452_v17 }
 0x633   :  { %v11453_v25 = vpop.f32.mrf.mxu0 }
 0x634   :  { %v11466_v57 = vpop.f32.mrf.mxu1 }
 0x67f   :  { %v11477_v41 = vpop.f32.mrf.mxu2 }
 0x680   :  { %v11478_v32 = vadd.f32 %v11477_v41, %v11465_v23 }
 0x682   :  { %v11481_v13 = vmax.f32 %v11478_v32, 0.0 }
 0x684   :  { %v11482_v38 = vpack.c.bf16 %v11481_v13, %v11481_v13 }
 0x686   :  { %11559 = vmatmul.bf16.vlgmr.msrb.gmra.mxu3 %v11482_v38 }
 0x687   :  { %v11479_v33 = vpop.f32.mrf.mxu2 }
 0x709   :  { %v11560_v11 = vpop.f32.mrf.mxu3 }
 0x70a   :  { %v11561_v54 = vadd.f32 %v18907_v47, %v11560_v11 }
 0x70c   :  { %v11564_v61 = vmax.f32 %v11561_v54, 0.0 }
 0x70e   :  { %v11565_v22 = vpack.c.bf16 %v11564_v61, %v11564_v61 }
 0x710   :  { %11642 = vmatmul.bf16.vlgmr.msra.gmra.mxu0 %v11565_v22 }
 0x711   :  { %v11562_v1 = vpop.f32.mrf.mxu3 }
 0x78d   :  { %v11643_v30 = vpop.f32.mrf.mxu0 }
 0x78e   :  { %v11644_v63 = vadd.f32 %v18908_v52, %v11643_v30 }
 0x790   :  { %v11647_v39 = vmax.f32 %v11644_v63, 0.0 }
 0x792   :  { %v11648_v49 = vpack.c.bf16 %v11647_v39, %v11647_v39 }
 0x794   :  { %11725 = vmatmul.bf16.vlgmr.msra.gmra.mxu1 %v11648_v49 }
 0x795   :  { %v11645_v40 = vpop.f32.mrf.mxu0 }
 0x811   :  { %v11726_v9 = vpop.f32.mrf.mxu1 }
 0x812   :  { %v11727_v10 = vadd.f32 %v18909_v36, %v11726_v9 }
 0x814   :  { %v11733_v46 = vsel %vm11732_vm0, %v11727_v10, -1e+30 }
 0x815   :  { %v11735_v58 = vsel %vm11734_vm1, %v11733_v46, -inf }
 0x816   :  { %11736 = vmax.xlane.f32.xlu0 %v11735_v58 }
 0x819   :  { %v11728_v48 = vpop.f32.mrf.mxu1 }
 0x889   :  { %v11737_v45 = vpop.xlane.xlu0 %11736 }
 0x88a   :  { %v11738_v16 = vsub.f32 %v11733_v46, %v11737_v45 }
 0x88c   :  { %v11739_v42 = vmul.f32 1.442695, %v11738_v16 }
 0x88e   :  { %18910 = vpow2.f32 %v11739_v42 }
 0x894   :  { %v18911_v51 = vpop.eup %18910 }
 0x895   :  { %v11741_v43 = vsel %vm11732_vm0, %v18911_v51, 0.0 }
 0x896   :  { %v11742_v24 = vsel %vm11734_vm1, %v11741_v43, 0.0 }
 0x897   :  { %11743 = vadd.xlane.f32.xlu0 %v11742_v24 }
 0x90a   :  { %v11744_v2 = vpop.xlane.xlu0 %11743 }
 0x90b   :  { %18912 = vlog2.f32 %v11744_v2 }
 0x911   :  { %v18913_v62 = vpop.eup %18912 }
 0x912   :  { %v11746_v8 = vmul.f32 0.6931472, %v18913_v62 }
 0x914   :  { %v11747_v7 = vsub.f32 %v11738_v16, %v11746_v8 }
 0x916   :  { %11748 = vst [vmem:[#allocation19] sm:$0x3] %v11747_v7 }
 0x917   :  { %11759 = dma.vmem_to_hbm [thread:$0]  %s11755_s2, 32, %s11757_s3, [#allocation4]  }
 0x918   :  { %19196 = dma.done.wait [#allocation4], 32  }
 0x919   :  { %19197 = vsyncadd [#allocation4], 4294967264 }
 0x91a   :  { %11764 = vsyncpa [#allocation3], 1 }
 0x91b   :  { %11765 = vsyncpa [#allocation6], 1 }
 0x91c   :  { %11766 = vsyncpa [#allocation9], 1 }
 0x91d   :  { %11767 = vsyncpa [#allocation12], 1 }
 0x91e   :  { %11768 = vsyncpa [#allocation15], 1 }
 0x91f   :  { %11769 = vsyncpa [#allocation18], 1 }
 0x920   :  { %11770 = vsyncpa [#allocation4], 1 }

</bundles_post_ra>
